<compile_context>
chip_gen: v7x
topology: tpu7x:2x2x1
jax: 0.10.0
libtpu: 0.0.40
codegen_flags: <defaults>
</compile_context>

<pallas_src>
import functools

import jax
import jax.numpy as jnp
from jax import lax
from jax.experimental import pallas as pl
from jax.experimental.pallas import tpu as pltpu

DEPTH = 14
N_CHANNELS = 64
IMAGE_CHANNELS = 1
BN_EPS = 1e-4


# ---------------------------------------------------------------------------
# Fused Pallas kernel: all DEPTH layers for one batch element per grid step.
# ---------------------------------------------------------------------------
def _dncnn_fused_kernel(x_ref, w0_ref, b0_ref, wmid_ref, scale_ref, shift_ref,
                        wlast_ref, o_ref, xpad, act_a, act_b,
                        *, H, W, C, n_mid):
    # x_ref:     (1, H, W)        f32   input image (one batch element)
    # w0_ref:    (9, C)           f32   layer-0 taps, row = dy*3+dx
    # b0_ref:    (1, C)           f32   layer-0 bias
    # wmid_ref:  (n_mid*9, C, C)  bf16  middle taps, row = l*9+dy*3+dx, (cin,cout)
    # scale_ref: (n_mid, C)       f32   folded BN scale per middle layer
    # shift_ref: (n_mid, C)       f32   folded BN shift per middle layer
    # wlast_ref: (9, C)           f32   last-layer taps, row = dy*3+dx, (cin,)
    # o_ref:     (1, H, W)        f32   residual output  y - conv_stack(y)
    # xpad:      (H+2, W+2)       f32   zero-padded input scratch
    # act_a/b:   (H+2, W+2, C)    f32   zero-padded ping-pong activation buffers

    # Zero the scratch buffers: establishes the zero border once; interiors are
    # fully overwritten below.  Done every grid step so the kernel does not
    # depend on grid iteration order / core assignment.
    xpad[...] = jnp.zeros_like(xpad)
    act_a[...] = jnp.zeros_like(act_a)
    act_b[...] = jnp.zeros_like(act_b)

    xpad[1:H + 1, 1:W + 1] = x_ref[0]

    # ---- Layer 0: Conv(1 -> C) + bias + ReLU, as a VPU broadcast MAC --------
    acc0 = jnp.zeros((H, W, C), jnp.float32)
    for dy in range(3):
        for dx in range(3):
            k = dy * 3 + dx
            tap = xpad[dy:dy + H, dx:dx + W]                        # (H, W)
            w_row = w0_ref[k:k + 1, :].reshape(1, 1, C)
            acc0 = acc0 + tap[:, :, None] * w_row
    acc0 = jnp.maximum(acc0 + b0_ref[...].reshape(1, 1, C), 0.0)
    act_a[1:H + 1, 1:W + 1, :] = acc0

    # ---- Middle layers: Conv(C -> C, no bias) + folded BN + ReLU ------------
    def mid_layer(l, src, dst):
        # 3x3 conv as 9 tap matmuls on the MXU (bf16 operands, f32 accumulate).
        acc = jnp.zeros((H * W, C), jnp.float32)
        for dy in range(3):
            for dx in range(3):
                patch = src[dy:dy + H, dx:dx + W, :].reshape(H * W, C)
                w = wmid_ref[l * 9 + dy * 3 + dx]                   # (C, C) bf16
                acc = acc + jnp.dot(patch.astype(jnp.bfloat16), w,
                                    preferred_element_type=jnp.float32)
        scale = scale_ref[pl.ds(l, 1), :]                           # (1, C)
        shift = shift_ref[pl.ds(l, 1), :]
        out = jnp.maximum(acc * scale + shift, 0.0)
        dst[1:H + 1, 1:W + 1, :] = out.reshape(H, W, C)

    # Process the middle layers in pairs so the ping-pong roles stay static.
    @pl.loop(0, n_mid // 2)
    def _(i):
        mid_layer(2 * i, act_a, act_b)       # even middle layer: A -> B
        mid_layer(2 * i + 1, act_b, act_a)   # odd  middle layer: B -> A

    # ---- Last layer: Conv(C -> 1, no bias), then residual y - out -----------
    # Cout == 1: accumulate per-tap on the VPU, one cross-lane channel
    # reduction at the end (avoids an N=1 matmul and a lane-dim-1 output).
    accL = jnp.zeros((H, W, C), jnp.float32)
    for dy in range(3):
        for dx in range(3):
            k = dy * 3 + dx
            w_row = wlast_ref[k:k + 1, :].reshape(1, 1, C)
            accL = accL + act_a[dy:dy + H, dx:dx + W, :] * w_row
    conv_out = jnp.sum(accL, axis=-1)                               # (H, W)
    o_ref[0] = x_ref[0] - conv_out


# ---------------------------------------------------------------------------
# Wrapper: one pallas_call for the whole network.
# ---------------------------------------------------------------------------
@jax.jit
def dncnn_forward(x_nchw, packed):
    B, ic, H, W = x_nchw.shape
    assert ic == 1, "DnCNN image_channels must be 1"
    C = packed["w0"].shape[1]
    n_mid = packed["scale_mid"].shape[0]
    assert n_mid % 2 == 0, "kernel processes middle layers in pairs"

    x = x_nchw[:, 0, :, :].astype(jnp.float32)        # (B, H, W), W on lanes

    kernel = functools.partial(_dncnn_fused_kernel, H=H, W=W, C=C, n_mid=n_mid)
    out = pl.pallas_call(
        kernel,
        out_shape=jax.ShapeDtypeStruct((B, H, W), jnp.float32),
        grid_spec=pltpu.PrefetchScalarGridSpec(
            num_scalar_prefetch=0,
            grid=(B,),
            in_specs=[
                pl.BlockSpec((1, H, W), lambda b: (b, 0, 0)),
                pl.BlockSpec((9, C), lambda b: (0, 0)),
                pl.BlockSpec((1, C), lambda b: (0, 0)),
                pl.BlockSpec((n_mid * 9, C, C), lambda b: (0, 0, 0)),
                pl.BlockSpec((n_mid, C), lambda b: (0, 0)),
                pl.BlockSpec((n_mid, C), lambda b: (0, 0)),
                pl.BlockSpec((9, C), lambda b: (0, 0)),
            ],
            out_specs=pl.BlockSpec((1, H, W), lambda b: (b, 0, 0)),
            scratch_shapes=[
                pltpu.VMEM((H + 2, W + 2), jnp.float32),
                pltpu.VMEM((H + 2, W + 2, C), jnp.float32),
                pltpu.VMEM((H + 2, W + 2, C), jnp.float32),
            ],
        ),
        compiler_params=pltpu.CompilerParams(
            dimension_semantics=("parallel",),
        ),
    )(x, packed["w0"], packed["b0"], packed["w_mid"],
      packed["scale_mid"], packed["shift_mid"], packed["w_last"])

    return out[:, None, :, :]                          # back to NCHW (C=1)


# ---------------------------------------------------------------------------
# One-time parameter packing (hoists transpose / cast / stacking out of the
# forward pass; middle-layer weights stored bf16 for the MXU).
# ---------------------------------------------------------------------------
def _oihw_to_taps(w):
    """(cout, cin, 3, 3) OIHW -> (9, cin, cout), tap row index = dy*3 + dx."""
    cout, cin = w.shape[0], w.shape[1]
    return jnp.transpose(w, (2, 3, 1, 0)).reshape(9, cin, cout)


def pack_params(layers):
    n_mid = len(layers) - 2
    C = layers[1]["w"].shape[0]

    # Layer 0: Conv(1 -> C) + bias (its scale, always 1, is folded into w0).
    w0 = _oihw_to_taps(layers[0]["w"])[:, 0, :]                     # (9, C)
    w0 = (w0 * layers[0]["scale"][None, :]).astype(jnp.float32)
    b0 = layers[0]["shift"].reshape(1, C).astype(jnp.float32)

    # Middle layers: stacked tap matrices (bf16) + folded BN scale/shift (f32).
    w_mid = jnp.stack([_oihw_to_taps(layers[i]["w"]) for i in range(1, n_mid + 1)])
    w_mid = w_mid.reshape(n_mid * 9, C, C).astype(jnp.bfloat16)
    scale_mid = jnp.stack([layers[i]["scale"] for i in range(1, n_mid + 1)]).astype(jnp.float32)
    shift_mid = jnp.stack([layers[i]["shift"] for i in range(1, n_mid + 1)]).astype(jnp.float32)

    # Last layer: Conv(C -> 1), bias=False, no BN (scale folded; shift is 0).
    w_last = _oihw_to_taps(layers[-1]["w"])[:, :, 0]                # (9, C)
    w_last = (w_last * layers[-1]["scale"][0]).astype(jnp.float32)

    return dict(w0=w0, b0=b0, w_mid=w_mid, scale_mid=scale_mid,
                shift_mid=shift_mid, w_last=w_last)


# ---------------------------------------------------------------------------
# Parameter initialization (deterministic, mirrors DnCNN._initialize_weights)
# ---------------------------------------------------------------------------
def _orthogonal(key, rows, cols):
    transposed = rows < cols
    a_rows, a_cols = (cols, rows) if transposed else (rows, cols)
    a = jax.random.normal(key, (a_rows, a_cols), dtype=jnp.float32)
    q, r = jnp.linalg.qr(a)
    q = q * jnp.sign(jnp.diagonal(r))
    if transposed:
        q = q.T
    return q


def orthogonal_conv_weight(key, cout, cin, k=3):
    # PyTorch OIHW layout: (cout, cin, k, k)
    return _orthogonal(key, cout, cin * k * k).reshape(cout, cin, k, k)


def init_dncnn_params(key, depth=DEPTH, n_channels=N_CHANNELS,
                      image_channels=IMAGE_CHANNELS):
    keys = jax.random.split(key, depth)
    layers = []

    # Layer 0: Conv(image_channels -> n_channels, bias=0) + ReLU
    layers.append(dict(
        w=orthogonal_conv_weight(keys[0], n_channels, image_channels),
        scale=jnp.ones((n_channels,), jnp.float32),
        shift=jnp.zeros((n_channels,), jnp.float32),
        relu=True))

    # Middle layers: Conv(no bias) + BatchNorm(eps=1e-4) + ReLU
    # BatchNorm in inference mode with init stats (mean=0, var=1, gamma=1,
    # beta=0) folds to scale = 1/sqrt(1+eps), shift = 0.
    # TODO(synk): training-mode BatchNorm (per-batch statistics) not implemented.
    bn_scale = float(1.0 / jnp.sqrt(1.0 + BN_EPS))
    for i in range(1, depth - 1):
        layers.append(dict(
            w=orthogonal_conv_weight(keys[i], n_channels, n_channels),
            scale=jnp.full((n_channels,), bn_scale, jnp.float32),
            shift=jnp.zeros((n_channels,), jnp.float32),
            relu=True))

    # Last layer: Conv(n_channels -> image_channels, no bias), no ReLU
    layers.append(dict(
        w=orthogonal_conv_weight(keys[-1], image_channels, n_channels),
        scale=jnp.ones((image_channels,), jnp.float32),
        shift=jnp.zeros((image_channels,), jnp.float32),
        relu=False))
    return layers


# ---------------------------------------------------------------------------
# Pure-JAX reference (f32, HIGHEST precision)
# ---------------------------------------------------------------------------
def dncnn_reference(x_nchw, layers):
    out = x_nchw.astype(jnp.float32)
    for layer in layers:
        out = lax.conv_general_dilated(
            out, layer["w"], window_strides=(1, 1), padding="SAME",
            dimension_numbers=("NCHW", "OIHW", "NCHW"),
            precision=lax.Precision.HIGHEST)
        out = out * layer["scale"][None, :, None, None] \
                  + layer["shift"][None, :, None, None]
        if layer["relu"]:
            out = jnp.maximum(out, 0.0)
    return x_nchw - out


# ---------------------------------------------------------------------------
if __name__ == "__main__":
    key = jax.random.PRNGKey(0)
    pkey, xkey = jax.random.split(key)

    layers = init_dncnn_params(pkey)
    packed = pack_params(layers)

    x = jax.random.normal(xkey, (2, IMAGE_CHANNELS, 16, 16), dtype=jnp.float32)

    out = jax.block_until_ready(dncnn_forward(x, packed))
    ref = jax.block_until_ready(dncnn_reference(x, layers))

    assert out.shape == x.shape and out.dtype == jnp.float32
    max_err = float(jnp.max(jnp.abs(out - ref)))
    # bf16 matmul operands across 13 stacked 64-channel conv layers: use a
    # looser tolerance than the pure-f32 path (typical error ~1e-2).
    assert max_err < 1e-1, f"mismatch vs reference: max abs err = {max_err}"

    print("KERNEL_OK")
</pallas_src>

<mosaic_0001>
module attributes {stable_mosaic.version = 11 : i64} {
  func.func @_dncnn_fused_kernel(%arg0: i32, %arg1: memref<1x16x16xf32, #tpu.memory_space<vmem>>, %arg2: memref<9x64xf32, #tpu.memory_space<vmem>>, %arg3: memref<1x64xf32, #tpu.memory_space<vmem>>, %arg4: memref<108x64x64xbf16, #tpu.memory_space<vmem>>, %arg5: memref<12x64xf32, #tpu.memory_space<vmem>>, %arg6: memref<12x64xf32, #tpu.memory_space<vmem>>, %arg7: memref<9x64xf32, #tpu.memory_space<vmem>>, %arg8: memref<1x16x16xf32, #tpu.memory_space<vmem>>, %arg9: memref<18x18xf32, #tpu.memory_space<vmem>>, %arg10: memref<18x18x64xf32, #tpu.memory_space<vmem>>, %arg11: memref<18x18x64xf32, #tpu.memory_space<vmem>>) attributes {dimension_semantics = [#tpu.dimension_semantics<parallel>], iteration_bounds = array<i64: 2>, scalar_prefetch = 0 : i64, scratch_operands = 3 : i64, tpu.core_type = #tpu.core_type<tc>, window_params = [{transform_indices = @transform_0, window_bounds = array<i64: 1, 16, 16>}, {pipeline_mode = #tpu.pipeline_mode<synchronous>, transform_indices = @transform_1, window_bounds = array<i64: 9, 64>}, {pipeline_mode = #tpu.pipeline_mode<synchronous>, transform_indices = @transform_2, window_bounds = array<i64: 1, 64>}, {pipeline_mode = #tpu.pipeline_mode<synchronous>, transform_indices = @transform_3, window_bounds = array<i64: 108, 64, 64>}, {pipeline_mode = #tpu.pipeline_mode<synchronous>, transform_indices = @transform_4, window_bounds = array<i64: 12, 64>}, {pipeline_mode = #tpu.pipeline_mode<synchronous>, transform_indices = @transform_5, window_bounds = array<i64: 12, 64>}, {pipeline_mode = #tpu.pipeline_mode<synchronous>, transform_indices = @transform_6, window_bounds = array<i64: 9, 64>}, {transform_indices = @transform_7, window_bounds = array<i64: 1, 16, 16>}]} {
    %cst = arith.constant 0.000000e+00 : f32
    %0 = vector.broadcast %cst : f32 to vector<18x18xf32>
    %c0 = arith.constant 0 : index
    %c0_0 = arith.constant 0 : index
    %1 = vector.load %arg9[%c0, %c0_0] : memref<18x18xf32, #tpu.memory_space<vmem>>, vector<18x18xf32>
    tpu.vector_store %arg9[%c0, %c0_0], %0 {strides = array<i32>} : memref<18x18xf32, #tpu.memory_space<vmem>>, vector<18x18xf32>,
    %cst_1 = arith.constant 0.000000e+00 : f32
    %2 = vector.broadcast %cst_1 : f32 to vector<18x18x64xf32>
    %c0_2 = arith.constant 0 : index
    %c0_3 = arith.constant 0 : index
    %c0_4 = arith.constant 0 : index
    %3 = vector.load %arg10[%c0_2, %c0_3, %c0_4] : memref<18x18x64xf32, #tpu.memory_space<vmem>>, vector<18x18x64xf32>
    tpu.vector_store %arg10[%c0_2, %c0_3, %c0_4], %2 {strides = array<i32>} : memref<18x18x64xf32, #tpu.memory_space<vmem>>, vector<18x18x64xf32>,
    %cst_5 = arith.constant 0.000000e+00 : f32
    %4 = vector.broadcast %cst_5 : f32 to vector<18x18x64xf32>
    %c0_6 = arith.constant 0 : index
    %c0_7 = arith.constant 0 : index
    %c0_8 = arith.constant 0 : index
    %5 = vector.load %arg11[%c0_6, %c0_7, %c0_8] : memref<18x18x64xf32, #tpu.memory_space<vmem>>, vector<18x18x64xf32>
    tpu.vector_store %arg11[%c0_6, %c0_7, %c0_8], %4 {strides = array<i32>} : memref<18x18x64xf32, #tpu.memory_space<vmem>>, vector<18x18x64xf32>,
    %c0_9 = arith.constant 0 : index
    %c0_10 = arith.constant 0 : index
    %c0_11 = arith.constant 0 : index
    %6 = vector.load %arg1[%c0_9, %c0_10, %c0_11] : memref<1x16x16xf32, #tpu.memory_space<vmem>>, vector<1x16x16xf32>
    %7 = vector.shape_cast %6 : vector<1x16x16xf32> to vector<16x16xf32>
    %c1 = arith.constant 1 : index
    %c1_12 = arith.constant 1 : index
    %8 = vector.load %arg9[%c1, %c1_12] : memref<18x18xf32, #tpu.memory_space<vmem>>, vector<16x16xf32>
    tpu.vector_store %arg9[%c1, %c1_12], %7 {strides = array<i32>} : memref<18x18xf32, #tpu.memory_space<vmem>>, vector<16x16xf32>,
    %cst_13 = arith.constant 0.000000e+00 : f32
    %9 = vector.broadcast %cst_13 : f32 to vector<16x16x64xf32>
    %c0_14 = arith.constant 0 : index
    %c0_15 = arith.constant 0 : index
    %10 = vector.load %arg9[%c0_14, %c0_15] : memref<18x18xf32, #tpu.memory_space<vmem>>, vector<16x16xf32>
    %c0_16 = arith.constant 0 : index
    %c0_17 = arith.constant 0 : index
    %11 = vector.load %arg2[%c0_16, %c0_17] : memref<9x64xf32, #tpu.memory_space<vmem>>, vector<1x64xf32>
    %12 = vector.shape_cast %11 : vector<1x64xf32> to vector<1x1x64xf32>
    %13 = vector.shape_cast %10 : vector<16x16xf32> to vector<16x16x1xf32>
    %14 = vector.broadcast %13 : vector<16x16x1xf32> to vector<16x16x64xf32>
    %15 = vector.broadcast %12 : vector<1x1x64xf32> to vector<16x16x64xf32>
    %16 = arith.mulf %14, %15 : vector<16x16x64xf32>
    %17 = arith.addf %9, %16 : vector<16x16x64xf32>
    %c0_18 = arith.constant 0 : index
    %c1_19 = arith.constant 1 : index
    %18 = vector.load %arg9[%c0_18, %c1_19] : memref<18x18xf32, #tpu.memory_space<vmem>>, vector<16x16xf32>
    %c1_20 = arith.constant 1 : index
    %c0_21 = arith.constant 0 : index
    %19 = vector.load %arg2[%c1_20, %c0_21] : memref<9x64xf32, #tpu.memory_space<vmem>>, vector<1x64xf32>
    %20 = vector.shape_cast %19 : vector<1x64xf32> to vector<1x1x64xf32>
    %21 = vector.shape_cast %18 : vector<16x16xf32> to vector<16x16x1xf32>
    %22 = vector.broadcast %21 : vector<16x16x1xf32> to vector<16x16x64xf32>
    %23 = vector.broadcast %20 : vector<1x1x64xf32> to vector<16x16x64xf32>
    %24 = arith.mulf %22, %23 : vector<16x16x64xf32>
    %25 = arith.addf %17, %24 : vector<16x16x64xf32>
    %c0_22 = arith.constant 0 : index
    %c2 = arith.constant 2 : index
    %26 = vector.load %arg9[%c0_22, %c2] : memref<18x18xf32, #tpu.memory_space<vmem>>, vector<16x16xf32>
    %c2_23 = arith.constant 2 : index
    %c0_24 = arith.constant 0 : index
    %27 = vector.load %arg2[%c2_23, %c0_24] : memref<9x64xf32, #tpu.memory_space<vmem>>, vector<1x64xf32>
    %28 = vector.shape_cast %27 : vector<1x64xf32> to vector<1x1x64xf32>
    %29 = vector.shape_cast %26 : vector<16x16xf32> to vector<16x16x1xf32>
    %30 = vector.broadcast %29 : vector<16x16x1xf32> to vector<16x16x64xf32>
    %31 = vector.broadcast %28 : vector<1x1x64xf32> to vector<16x16x64xf32>
    %32 = arith.mulf %30, %31 : vector<16x16x64xf32>
    %33 = arith.addf %25, %32 : vector<16x16x64xf32>
    %c1_25 = arith.constant 1 : index
    %c0_26 = arith.constant 0 : index
    %34 = vector.load %arg9[%c1_25, %c0_26] : memref<18x18xf32, #tpu.memory_space<vmem>>, vector<16x16xf32>
    %c3 = arith.constant 3 : index
    %c0_27 = arith.constant 0 : index
    %35 = vector.load %arg2[%c3, %c0_27] : memref<9x64xf32, #tpu.memory_space<vmem>>, vector<1x64xf32>
    %36 = vector.shape_cast %35 : vector<1x64xf32> to vector<1x1x64xf32>
    %37 = vector.shape_cast %34 : vector<16x16xf32> to vector<16x16x1xf32>
    %38 = vector.broadcast %37 : vector<16x16x1xf32> to vector<16x16x64xf32>
    %39 = vector.broadcast %36 : vector<1x1x64xf32> to vector<16x16x64xf32>
    %40 = arith.mulf %38, %39 : vector<16x16x64xf32>
    %41 = arith.addf %33, %40 : vector<16x16x64xf32>
    %c1_28 = arith.constant 1 : index
    %c1_29 = arith.constant 1 : index
    %42 = vector.load %arg9[%c1_28, %c1_29] : memref<18x18xf32, #tpu.memory_space<vmem>>, vector<16x16xf32>
    %c4 = arith.constant 4 : index
    %c0_30 = arith.constant 0 : index
    %43 = vector.load %arg2[%c4, %c0_30] : memref<9x64xf32, #tpu.memory_space<vmem>>, vector<1x64xf32>
    %44 = vector.shape_cast %43 : vector<1x64xf32> to vector<1x1x64xf32>
    %45 = vector.shape_cast %42 : vector<16x16xf32> to vector<16x16x1xf32>
    %46 = vector.broadcast %45 : vector<16x16x1xf32> to vector<16x16x64xf32>
    %47 = vector.broadcast %44 : vector<1x1x64xf32> to vector<16x16x64xf32>
    %48 = arith.mulf %46, %47 : vector<16x16x64xf32>
    %49 = arith.addf %41, %48 : vector<16x16x64xf32>
    %c1_31 = arith.constant 1 : index
    %c2_32 = arith.constant 2 : index
    %50 = vector.load %arg9[%c1_31, %c2_32] : memref<18x18xf32, #tpu.memory_space<vmem>>, vector<16x16xf32>
    %c5 = arith.constant 5 : index
    %c0_33 = arith.constant 0 : index
    %51 = vector.load %arg2[%c5, %c0_33] : memref<9x64xf32, #tpu.memory_space<vmem>>, vector<1x64xf32>
    %52 = vector.shape_cast %51 : vector<1x64xf32> to vector<1x1x64xf32>
    %53 = vector.shape_cast %50 : vector<16x16xf32> to vector<16x16x1xf32>
    %54 = vector.broadcast %53 : vector<16x16x1xf32> to vector<16x16x64xf32>
    %55 = vector.broadcast %52 : vector<1x1x64xf32> to vector<16x16x64xf32>
    %56 = arith.mulf %54, %55 : vector<16x16x64xf32>
    %57 = arith.addf %49, %56 : vector<16x16x64xf32>
    %c2_34 = arith.constant 2 : index
    %c0_35 = arith.constant 0 : index
    %58 = vector.load %arg9[%c2_34, %c0_35] : memref<18x18xf32, #tpu.memory_space<vmem>>, vector<16x16xf32>
    %c6 = arith.constant 6 : index
    %c0_36 = arith.constant 0 : index
    %59 = vector.load %arg2[%c6, %c0_36] : memref<9x64xf32, #tpu.memory_space<vmem>>, vector<1x64xf32>
    %60 = vector.shape_cast %59 : vector<1x64xf32> to vector<1x1x64xf32>
    %61 = vector.shape_cast %58 : vector<16x16xf32> to vector<16x16x1xf32>
    %62 = vector.broadcast %61 : vector<16x16x1xf32> to vector<16x16x64xf32>
    %63 = vector.broadcast %60 : vector<1x1x64xf32> to vector<16x16x64xf32>
    %64 = arith.mulf %62, %63 : vector<16x16x64xf32>
    %65 = arith.addf %57, %64 : vector<16x16x64xf32>
    %c2_37 = arith.constant 2 : index
    %c1_38 = arith.constant 1 : index
    %66 = vector.load %arg9[%c2_37, %c1_38] : memref<18x18xf32, #tpu.memory_space<vmem>>, vector<16x16xf32>
    %c7 = arith.constant 7 : index
    %c0_39 = arith.constant 0 : index
    %67 = vector.load %arg2[%c7, %c0_39] : memref<9x64xf32, #tpu.memory_space<vmem>>, vector<1x64xf32>
    %68 = vector.shape_cast %67 : vector<1x64xf32> to vector<1x1x64xf32>
    %69 = vector.shape_cast %66 : vector<16x16xf32> to vector<16x16x1xf32>
    %70 = vector.broadcast %69 : vector<16x16x1xf32> to vector<16x16x64xf32>
    %71 = vector.broadcast %68 : vector<1x1x64xf32> to vector<16x16x64xf32>
    %72 = arith.mulf %70, %71 : vector<16x16x64xf32>
    %73 = arith.addf %65, %72 : vector<16x16x64xf32>
    %c2_40 = arith.constant 2 : index
    %c2_41 = arith.constant 2 : index
    %74 = vector.load %arg9[%c2_40, %c2_41] : memref<18x18xf32, #tpu.memory_space<vmem>>, vector<16x16xf32>
    %c8 = arith.constant 8 : index
    %c0_42 = arith.constant 0 : index
    %75 = vector.load %arg2[%c8, %c0_42] : memref<9x64xf32, #tpu.memory_space<vmem>>, vector<1x64xf32>
    %76 = vector.shape_cast %75 : vector<1x64xf32> to vector<1x1x64xf32>
    %77 = vector.shape_cast %74 : vector<16x16xf32> to vector<16x16x1xf32>
    %78 = vector.broadcast %77 : vector<16x16x1xf32> to vector<16x16x64xf32>
    %79 = vector.broadcast %76 : vector<1x1x64xf32> to vector<16x16x64xf32>
    %80 = arith.mulf %78, %79 : vector<16x16x64xf32>
    %81 = arith.addf %73, %80 : vector<16x16x64xf32>
    %c0_43 = arith.constant 0 : index
    %c0_44 = arith.constant 0 : index
    %82 = vector.load %arg3[%c0_43, %c0_44] : memref<1x64xf32, #tpu.memory_space<vmem>>, vector<1x64xf32>
    %83 = vector.shape_cast %82 : vector<1x64xf32> to vector<1x1x64xf32>
    %84 = vector.broadcast %83 : vector<1x1x64xf32> to vector<16x16x64xf32>
    %85 = arith.addf %81, %84 : vector<16x16x64xf32>
    %cst_45 = arith.constant 0.000000e+00 : f32
    %86 = vector.broadcast %cst_45 : f32 to vector<16x16x64xf32>
    %87 = arith.maximumf %85, %86 : vector<16x16x64xf32>
    %c1_46 = arith.constant 1 : index
    %c1_47 = arith.constant 1 : index
    %c0_48 = arith.constant 0 : index
    %88 = vector.load %arg10[%c1_46, %c1_47, %c0_48] : memref<18x18x64xf32, #tpu.memory_space<vmem>>, vector<16x16x64xf32>
    tpu.vector_store %arg10[%c1_46, %c1_47, %c0_48], %87 {strides = array<i32>} : memref<18x18x64xf32, #tpu.memory_space<vmem>>, vector<16x16x64xf32>,
    %c0_i32 = arith.constant 0 : i32
    %c6_i32 = arith.constant 6 : i32
    %89 = arith.addi %c0_i32, %c6_i32 : i32
    %c1_i32 = arith.constant 1 : i32
    scf.for %arg12 = %c0_i32 to %89 step %c1_i32  : i32 {
      %c1_i32_103 = arith.constant 1 : i32
      %152 = arith.muli %arg12, %c1_i32_103 : i32
      %c0_i32_104 = arith.constant 0 : i32
      %153 = arith.addi %c0_i32_104, %152 : i32
      %c2_i32 = arith.constant 2 : i32
      %154 = arith.muli %c2_i32, %153 : i32
      %cst_105 = arith.constant 0.000000e+00 : f32
      %155 = vector.broadcast %cst_105 : f32 to vector<256x64xf32>
      %c0_106 = arith.constant 0 : index
      %c0_107 = arith.constant 0 : index
      %c0_108 = arith.constant 0 : index
      %156 = vector.load %arg10[%c0_106, %c0_107, %c0_108] : memref<18x18x64xf32, #tpu.memory_space<vmem>>, vector<16x16x64xf32>
      %157 = vector.shape_cast %156 : vector<16x16x64xf32> to vector<256x64xf32>
      %c9_i32 = arith.constant 9 : i32
      %158 = arith.muli %154, %c9_i32 : i32
      %c0_i32_109 = arith.constant 0 : i32
      %159 = arith.addi %158, %c0_i32_109 : i32
      %c0_i32_110 = arith.constant 0 : i32
      %160 = arith.addi %159, %c0_i32_110 : i32
      %161 = arith.index_cast %160 : i32 to index
      %c0_111 = arith.constant 0 : index
      %c0_112 = arith.constant 0 : index
      %162 = vector.load %arg4[%161, %c0_111, %c0_112] : memref<108x64x64xbf16, #tpu.memory_space<vmem>>, vector<1x64x64xbf16>
      %163 = vector.shape_cast %162 : vector<1x64x64xbf16> to vector<64x64xbf16>
      %164 = arith.truncf %157 : vector<256x64xf32> to vector<256x64xbf16>
      %cst_113 = arith.constant dense<0.000000e+00> : vector<256x64xf32>
      %165 = tpu.matmul %164, %163, %cst_113 {dimension_numbers = #tpu.dot_dimension_numbers<[1], [0], [0], [1], [0, 0, 1, 1], [], []>} : vector<256x64xbf16>, vector<64x64xbf16>, vector<256x64xf32> -> vector<256x64xf32>
      %166 = arith.addf %155, %165 : vector<256x64xf32>
      %c0_114 = arith.constant 0 : index
      %c1_115 = arith.constant 1 : index
      %c0_116 = arith.constant 0 : index
      %167 = vector.load %arg10[%c0_114, %c1_115, %c0_116] : memref<18x18x64xf32, #tpu.memory_space<vmem>>, vector<16x16x64xf32>
      %168 = vector.shape_cast %167 : vector<16x16x64xf32> to vector<256x64xf32>
      %c9_i32_117 = arith.constant 9 : i32
      %169 = arith.muli %154, %c9_i32_117 : i32
      %c0_i32_118 = arith.constant 0 : i32
      %170 = arith.addi %169, %c0_i32_118 : i32
      %c1_i32_119 = arith.constant 1 : i32
      %171 = arith.addi %170, %c1_i32_119 : i32
      %172 = arith.index_cast %171 : i32 to index
      %c0_120 = arith.constant 0 : index
      %c0_121 = arith.constant 0 : index
      %173 = vector.load %arg4[%172, %c0_120, %c0_121] : memref<108x64x64xbf16, #tpu.memory_space<vmem>>, vector<1x64x64xbf16>
      %174 = vector.shape_cast %173 : vector<1x64x64xbf16> to vector<64x64xbf16>
      %175 = arith.truncf %168 : vector<256x64xf32> to vector<256x64xbf16>
      %cst_122 = arith.constant dense<0.000000e+00> : vector<256x64xf32>
      %176 = tpu.matmul %175, %174, %cst_122 {dimension_numbers = #tpu.dot_dimension_numbers<[1], [0], [0], [1], [0, 0, 1, 1], [], []>} : vector<256x64xbf16>, vector<64x64xbf16>, vector<256x64xf32> -> vector<256x64xf32>
      %177 = arith.addf %166, %176 : vector<256x64xf32>
      %c0_123 = arith.constant 0 : index
      %c2_124 = arith.constant 2 : index
      %c0_125 = arith.constant 0 : index
      %178 = vector.load %arg10[%c0_123, %c2_124, %c0_125] : memref<18x18x64xf32, #tpu.memory_space<vmem>>, vector<16x16x64xf32>
      %179 = vector.shape_cast %178 : vector<16x16x64xf32> to vector<256x64xf32>
      %c9_i32_126 = arith.constant 9 : i32
      %180 = arith.muli %154, %c9_i32_126 : i32
      %c0_i32_127 = arith.constant 0 : i32
      %181 = arith.addi %180, %c0_i32_127 : i32
      %c2_i32_128 = arith.constant 2 : i32
      %182 = arith.addi %181, %c2_i32_128 : i32
      %183 = arith.index_cast %182 : i32 to index
      %c0_129 = arith.constant 0 : index
      %c0_130 = arith.constant 0 : index
      %184 = vector.load %arg4[%183, %c0_129, %c0_130] : memref<108x64x64xbf16, #tpu.memory_space<vmem>>, vector<1x64x64xbf16>
      %185 = vector.shape_cast %184 : vector<1x64x64xbf16> to vector<64x64xbf16>
      %186 = arith.truncf %179 : vector<256x64xf32> to vector<256x64xbf16>
      %cst_131 = arith.constant dense<0.000000e+00> : vector<256x64xf32>
      %187 = tpu.matmul %186, %185, %cst_131 {dimension_numbers = #tpu.dot_dimension_numbers<[1], [0], [0], [1], [0, 0, 1, 1], [], []>} : vector<256x64xbf16>, vector<64x64xbf16>, vector<256x64xf32> -> vector<256x64xf32>
      %188 = arith.addf %177, %187 : vector<256x64xf32>
      %c1_132 = arith.constant 1 : index
      %c0_133 = arith.constant 0 : index
      %c0_134 = arith.constant 0 : index
      %189 = vector.load %arg10[%c1_132, %c0_133, %c0_134] : memref<18x18x64xf32, #tpu.memory_space<vmem>>, vector<16x16x64xf32>
      %190 = vector.shape_cast %189 : vector<16x16x64xf32> to vector<256x64xf32>
      %c9_i32_135 = arith.constant 9 : i32
      %191 = arith.muli %154, %c9_i32_135 : i32
      %c3_i32 = arith.constant 3 : i32
      %192 = arith.addi %191, %c3_i32 : i32
      %c0_i32_136 = arith.constant 0 : i32
      %193 = arith.addi %192, %c0_i32_136 : i32
      %194 = arith.index_cast %193 : i32 to index
      %c0_137 = arith.constant 0 : index
      %c0_138 = arith.constant 0 : index
      %195 = vector.load %arg4[%194, %c0_137, %c0_138] : memref<108x64x64xbf16, #tpu.memory_space<vmem>>, vector<1x64x64xbf16>
      %196 = vector.shape_cast %195 : vector<1x64x64xbf16> to vector<64x64xbf16>
      %197 = arith.truncf %190 : vector<256x64xf32> to vector<256x64xbf16>
      %cst_139 = arith.constant dense<0.000000e+00> : vector<256x64xf32>
      %198 = tpu.matmul %197, %196, %cst_139 {dimension_numbers = #tpu.dot_dimension_numbers<[1], [0], [0], [1], [0, 0, 1, 1], [], []>} : vector<256x64xbf16>, vector<64x64xbf16>, vector<256x64xf32> -> vector<256x64xf32>
      %199 = arith.addf %188, %198 : vector<256x64xf32>
      %c1_140 = arith.constant 1 : index
      %c1_141 = arith.constant 1 : index
      %c0_142 = arith.constant 0 : index
      %200 = vector.load %arg10[%c1_140, %c1_141, %c0_142] : memref<18x18x64xf32, #tpu.memory_space<vmem>>, vector<16x16x64xf32>
      %201 = vector.shape_cast %200 : vector<16x16x64xf32> to vector<256x64xf32>
      %c9_i32_143 = arith.constant 9 : i32
      %202 = arith.muli %154, %c9_i32_143 : i32
      %c3_i32_144 = arith.constant 3 : i32
      %203 = arith.addi %202, %c3_i32_144 : i32
      %c1_i32_145 = arith.constant 1 : i32
      %204 = arith.addi %203, %c1_i32_145 : i32
      %205 = arith.index_cast %204 : i32 to index
      %c0_146 = arith.constant 0 : index
      %c0_147 = arith.constant 0 : index
      %206 = vector.load %arg4[%205, %c0_146, %c0_147] : memref<108x64x64xbf16, #tpu.memory_space<vmem>>, vector<1x64x64xbf16>
      %207 = vector.shape_cast %206 : vector<1x64x64xbf16> to vector<64x64xbf16>
      %208 = arith.truncf %201 : vector<256x64xf32> to vector<256x64xbf16>
      %cst_148 = arith.constant dense<0.000000e+00> : vector<256x64xf32>
      %209 = tpu.matmul %208, %207, %cst_148 {dimension_numbers = #tpu.dot_dimension_numbers<[1], [0], [0], [1], [0, 0, 1, 1], [], []>} : vector<256x64xbf16>, vector<64x64xbf16>, vector<256x64xf32> -> vector<256x64xf32>
      %210 = arith.addf %199, %209 : vector<256x64xf32>
      %c1_149 = arith.constant 1 : index
      %c2_150 = arith.constant 2 : index
      %c0_151 = arith.constant 0 : index
      %211 = vector.load %arg10[%c1_149, %c2_150, %c0_151] : memref<18x18x64xf32, #tpu.memory_space<vmem>>, vector<16x16x64xf32>
      %212 = vector.shape_cast %211 : vector<16x16x64xf32> to vector<256x64xf32>
      %c9_i32_152 = arith.constant 9 : i32
      %213 = arith.muli %154, %c9_i32_152 : i32
      %c3_i32_153 = arith.constant 3 : i32
      %214 = arith.addi %213, %c3_i32_153 : i32
      %c2_i32_154 = arith.constant 2 : i32
      %215 = arith.addi %214, %c2_i32_154 : i32
      %216 = arith.index_cast %215 : i32 to index
      %c0_155 = arith.constant 0 : index
      %c0_156 = arith.constant 0 : index
      %217 = vector.load %arg4[%216, %c0_155, %c0_156] : memref<108x64x64xbf16, #tpu.memory_space<vmem>>, vector<1x64x64xbf16>
      %218 = vector.shape_cast %217 : vector<1x64x64xbf16> to vector<64x64xbf16>
      %219 = arith.truncf %212 : vector<256x64xf32> to vector<256x64xbf16>
      %cst_157 = arith.constant dense<0.000000e+00> : vector<256x64xf32>
      %220 = tpu.matmul %219, %218, %cst_157 {dimension_numbers = #tpu.dot_dimension_numbers<[1], [0], [0], [1], [0, 0, 1, 1], [], []>} : vector<256x64xbf16>, vector<64x64xbf16>, vector<256x64xf32> -> vector<256x64xf32>
      %221 = arith.addf %210, %220 : vector<256x64xf32>
      %c2_158 = arith.constant 2 : index
      %c0_159 = arith.constant 0 : index
      %c0_160 = arith.constant 0 : index
      %222 = vector.load %arg10[%c2_158, %c0_159, %c0_160] : memref<18x18x64xf32, #tpu.memory_space<vmem>>, vector<16x16x64xf32>
      %223 = vector.shape_cast %222 : vector<16x16x64xf32> to vector<256x64xf32>
      %c9_i32_161 = arith.constant 9 : i32
      %224 = arith.muli %154, %c9_i32_161 : i32
      %c6_i32_162 = arith.constant 6 : i32
      %225 = arith.addi %224, %c6_i32_162 : i32
      %c0_i32_163 = arith.constant 0 : i32
      %226 = arith.addi %225, %c0_i32_163 : i32
      %227 = arith.index_cast %226 : i32 to index
      %c0_164 = arith.constant 0 : index
      %c0_165 = arith.constant 0 : index
      %228 = vector.load %arg4[%227, %c0_164, %c0_165] : memref<108x64x64xbf16, #tpu.memory_space<vmem>>, vector<1x64x64xbf16>
      %229 = vector.shape_cast %228 : vector<1x64x64xbf16> to vector<64x64xbf16>
      %230 = arith.truncf %223 : vector<256x64xf32> to vector<256x64xbf16>
      %cst_166 = arith.constant dense<0.000000e+00> : vector<256x64xf32>
      %231 = tpu.matmul %230, %229, %cst_166 {dimension_numbers = #tpu.dot_dimension_numbers<[1], [0], [0], [1], [0, 0, 1, 1], [], []>} : vector<256x64xbf16>, vector<64x64xbf16>, vector<256x64xf32> -> vector<256x64xf32>
      %232 = arith.addf %221, %231 : vector<256x64xf32>
      %c2_167 = arith.constant 2 : index
      %c1_168 = arith.constant 1 : index
      %c0_169 = arith.constant 0 : index
      %233 = vector.load %arg10[%c2_167, %c1_168, %c0_169] : memref<18x18x64xf32, #tpu.memory_space<vmem>>, vector<16x16x64xf32>
      %234 = vector.shape_cast %233 : vector<16x16x64xf32> to vector<256x64xf32>
      %c9_i32_170 = arith.constant 9 : i32
      %235 = arith.muli %154, %c9_i32_170 : i32
      %c6_i32_171 = arith.constant 6 : i32
      %236 = arith.addi %235, %c6_i32_171 : i32
      %c1_i32_172 = arith.constant 1 : i32
      %237 = arith.addi %236, %c1_i32_172 : i32
      %238 = arith.index_cast %237 : i32 to index
      %c0_173 = arith.constant 0 : index
      %c0_174 = arith.constant 0 : index
      %239 = vector.load %arg4[%238, %c0_173, %c0_174] : memref<108x64x64xbf16, #tpu.memory_space<vmem>>, vector<1x64x64xbf16>
      %240 = vector.shape_cast %239 : vector<1x64x64xbf16> to vector<64x64xbf16>
      %241 = arith.truncf %234 : vector<256x64xf32> to vector<256x64xbf16>
      %cst_175 = arith.constant dense<0.000000e+00> : vector<256x64xf32>
      %242 = tpu.matmul %241, %240, %cst_175 {dimension_numbers = #tpu.dot_dimension_numbers<[1], [0], [0], [1], [0, 0, 1, 1], [], []>} : vector<256x64xbf16>, vector<64x64xbf16>, vector<256x64xf32> -> vector<256x64xf32>
      %243 = arith.addf %232, %242 : vector<256x64xf32>
      %c2_176 = arith.constant 2 : index
      %c2_177 = arith.constant 2 : index
      %c0_178 = arith.constant 0 : index
      %244 = vector.load %arg10[%c2_176, %c2_177, %c0_178] : memref<18x18x64xf32, #tpu.memory_space<vmem>>, vector<16x16x64xf32>
      %245 = vector.shape_cast %244 : vector<16x16x64xf32> to vector<256x64xf32>
      %c9_i32_179 = arith.constant 9 : i32
      %246 = arith.muli %154, %c9_i32_179 : i32
      %c6_i32_180 = arith.constant 6 : i32
      %247 = arith.addi %246, %c6_i32_180 : i32
      %c2_i32_181 = arith.constant 2 : i32
      %248 = arith.addi %247, %c2_i32_181 : i32
      %249 = arith.index_cast %248 : i32 to index
      %c0_182 = arith.constant 0 : index
      %c0_183 = arith.constant 0 : index
      %250 = vector.load %arg4[%249, %c0_182, %c0_183] : memref<108x64x64xbf16, #tpu.memory_space<vmem>>, vector<1x64x64xbf16>
      %251 = vector.shape_cast %250 : vector<1x64x64xbf16> to vector<64x64xbf16>
      %252 = arith.truncf %245 : vector<256x64xf32> to vector<256x64xbf16>
      %cst_184 = arith.constant dense<0.000000e+00> : vector<256x64xf32>
      %253 = tpu.matmul %252, %251, %cst_184 {dimension_numbers = #tpu.dot_dimension_numbers<[1], [0], [0], [1], [0, 0, 1, 1], [], []>} : vector<256x64xbf16>, vector<64x64xbf16>, vector<256x64xf32> -> vector<256x64xf32>
      %254 = arith.addf %243, %253 : vector<256x64xf32>
      %255 = arith.index_cast %154 : i32 to index
      %c0_185 = arith.constant 0 : index
      %256 = vector.load %arg5[%255, %c0_185] : memref<12x64xf32, #tpu.memory_space<vmem>>, vector<1x64xf32>
      %257 = arith.index_cast %154 : i32 to index
      %c0_186 = arith.constant 0 : index
      %258 = vector.load %arg6[%257, %c0_186] : memref<12x64xf32, #tpu.memory_space<vmem>>, vector<1x64xf32>
      %259 = vector.broadcast %256 : vector<1x64xf32> to vector<256x64xf32>
      %260 = arith.mulf %254, %259 : vector<256x64xf32>
      %261 = vector.broadcast %258 : vector<1x64xf32> to vector<256x64xf32>
      %262 = arith.addf %260, %261 : vector<256x64xf32>
      %cst_187 = arith.constant 0.000000e+00 : f32
      %263 = vector.broadcast %cst_187 : f32 to vector<256x64xf32>
      %264 = arith.maximumf %262, %263 : vector<256x64xf32>
      %265 = vector.shape_cast %264 : vector<256x64xf32> to vector<16x16x64xf32>
      %c1_188 = arith.constant 1 : index
      %c1_189 = arith.constant 1 : index
      %c0_190 = arith.constant 0 : index
      %266 = vector.load %arg11[%c1_188, %c1_189, %c0_190] : memref<18x18x64xf32, #tpu.memory_space<vmem>>, vector<16x16x64xf32>
      tpu.vector_store %arg11[%c1_188, %c1_189, %c0_190], %265 {strides = array<i32>} : memref<18x18x64xf32, #tpu.memory_space<vmem>>, vector<16x16x64xf32>,
      %c2_i32_191 = arith.constant 2 : i32
      %267 = arith.muli %c2_i32_191, %153 : i32
      %c1_i32_192 = arith.constant 1 : i32
      %268 = arith.addi %267, %c1_i32_192 : i32
      %cst_193 = arith.constant 0.000000e+00 : f32
      %269 = vector.broadcast %cst_193 : f32 to vector<256x64xf32>
      %c0_194 = arith.constant 0 : index
      %c0_195 = arith.constant 0 : index
      %c0_196 = arith.constant 0 : index
      %270 = vector.load %arg11[%c0_194, %c0_195, %c0_196] : memref<18x18x64xf32, #tpu.memory_space<vmem>>, vector<16x16x64xf32>
      %271 = vector.shape_cast %270 : vector<16x16x64xf32> to vector<256x64xf32>
      %c9_i32_197 = arith.constant 9 : i32
      %272 = arith.muli %268, %c9_i32_197 : i32
      %c0_i32_198 = arith.constant 0 : i32
      %273 = arith.addi %272, %c0_i32_198 : i32
      %c0_i32_199 = arith.constant 0 : i32
      %274 = arith.addi %273, %c0_i32_199 : i32
      %275 = arith.index_cast %274 : i32 to index
      %c0_200 = arith.constant 0 : index
      %c0_201 = arith.constant 0 : index
      %276 = vector.load %arg4[%275, %c0_200, %c0_201] : memref<108x64x64xbf16, #tpu.memory_space<vmem>>, vector<1x64x64xbf16>
      %277 = vector.shape_cast %276 : vector<1x64x64xbf16> to vector<64x64xbf16>
      %278 = arith.truncf %271 : vector<256x64xf32> to vector<256x64xbf16>
      %cst_202 = arith.constant dense<0.000000e+00> : vector<256x64xf32>
      %279 = tpu.matmul %278, %277, %cst_202 {dimension_numbers = #tpu.dot_dimension_numbers<[1], [0], [0], [1], [0, 0, 1, 1], [], []>} : vector<256x64xbf16>, vector<64x64xbf16>, vector<256x64xf32> -> vector<256x64xf32>
      %280 = arith.addf %269, %279 : vector<256x64xf32>
      %c0_203 = arith.constant 0 : index
      %c1_204 = arith.constant 1 : index
      %c0_205 = arith.constant 0 : index
      %281 = vector.load %arg11[%c0_203, %c1_204, %c0_205] : memref<18x18x64xf32, #tpu.memory_space<vmem>>, vector<16x16x64xf32>
      %282 = vector.shape_cast %281 : vector<16x16x64xf32> to vector<256x64xf32>
      %c9_i32_206 = arith.constant 9 : i32
      %283 = arith.muli %268, %c9_i32_206 : i32
      %c0_i32_207 = arith.constant 0 : i32
      %284 = arith.addi %283, %c0_i32_207 : i32
      %c1_i32_208 = arith.constant 1 : i32
      %285 = arith.addi %284, %c1_i32_208 : i32
      %286 = arith.index_cast %285 : i32 to index
      %c0_209 = arith.constant 0 : index
      %c0_210 = arith.constant 0 : index
      %287 = vector.load %arg4[%286, %c0_209, %c0_210] : memref<108x64x64xbf16, #tpu.memory_space<vmem>>, vector<1x64x64xbf16>
      %288 = vector.shape_cast %287 : vector<1x64x64xbf16> to vector<64x64xbf16>
      %289 = arith.truncf %282 : vector<256x64xf32> to vector<256x64xbf16>
      %cst_211 = arith.constant dense<0.000000e+00> : vector<256x64xf32>
      %290 = tpu.matmul %289, %288, %cst_211 {dimension_numbers = #tpu.dot_dimension_numbers<[1], [0], [0], [1], [0, 0, 1, 1], [], []>} : vector<256x64xbf16>, vector<64x64xbf16>, vector<256x64xf32> -> vector<256x64xf32>
      %291 = arith.addf %280, %290 : vector<256x64xf32>
      %c0_212 = arith.constant 0 : index
      %c2_213 = arith.constant 2 : index
      %c0_214 = arith.constant 0 : index
      %292 = vector.load %arg11[%c0_212, %c2_213, %c0_214] : memref<18x18x64xf32, #tpu.memory_space<vmem>>, vector<16x16x64xf32>
      %293 = vector.shape_cast %292 : vector<16x16x64xf32> to vector<256x64xf32>
      %c9_i32_215 = arith.constant 9 : i32
      %294 = arith.muli %268, %c9_i32_215 : i32
      %c0_i32_216 = arith.constant 0 : i32
      %295 = arith.addi %294, %c0_i32_216 : i32
      %c2_i32_217 = arith.constant 2 : i32
      %296 = arith.addi %295, %c2_i32_217 : i32
      %297 = arith.index_cast %296 : i32 to index
      %c0_218 = arith.constant 0 : index
      %c0_219 = arith.constant 0 : index
      %298 = vector.load %arg4[%297, %c0_218, %c0_219] : memref<108x64x64xbf16, #tpu.memory_space<vmem>>, vector<1x64x64xbf16>
      %299 = vector.shape_cast %298 : vector<1x64x64xbf16> to vector<64x64xbf16>
      %300 = arith.truncf %293 : vector<256x64xf32> to vector<256x64xbf16>
      %cst_220 = arith.constant dense<0.000000e+00> : vector<256x64xf32>
      %301 = tpu.matmul %300, %299, %cst_220 {dimension_numbers = #tpu.dot_dimension_numbers<[1], [0], [0], [1], [0, 0, 1, 1], [], []>} : vector<256x64xbf16>, vector<64x64xbf16>, vector<256x64xf32> -> vector<256x64xf32>
      %302 = arith.addf %291, %301 : vector<256x64xf32>
      %c1_221 = arith.constant 1 : index
      %c0_222 = arith.constant 0 : index
      %c0_223 = arith.constant 0 : index
      %303 = vector.load %arg11[%c1_221, %c0_222, %c0_223] : memref<18x18x64xf32, #tpu.memory_space<vmem>>, vector<16x16x64xf32>
      %304 = vector.shape_cast %303 : vector<16x16x64xf32> to vector<256x64xf32>
      %c9_i32_224 = arith.constant 9 : i32
      %305 = arith.muli %268, %c9_i32_224 : i32
      %c3_i32_225 = arith.constant 3 : i32
      %306 = arith.addi %305, %c3_i32_225 : i32
      %c0_i32_226 = arith.constant 0 : i32
      %307 = arith.addi %306, %c0_i32_226 : i32
      %308 = arith.index_cast %307 : i32 to index
      %c0_227 = arith.constant 0 : index
      %c0_228 = arith.constant 0 : index
      %309 = vector.load %arg4[%308, %c0_227, %c0_228] : memref<108x64x64xbf16, #tpu.memory_space<vmem>>, vector<1x64x64xbf16>
      %310 = vector.shape_cast %309 : vector<1x64x64xbf16> to vector<64x64xbf16>
      %311 = arith.truncf %304 : vector<256x64xf32> to vector<256x64xbf16>
      %cst_229 = arith.constant dense<0.000000e+00> : vector<256x64xf32>
      %312 = tpu.matmul %311, %310, %cst_229 {dimension_numbers = #tpu.dot_dimension_numbers<[1], [0], [0], [1], [0, 0, 1, 1], [], []>} : vector<256x64xbf16>, vector<64x64xbf16>, vector<256x64xf32> -> vector<256x64xf32>
      %313 = arith.addf %302, %312 : vector<256x64xf32>
      %c1_230 = arith.constant 1 : index
      %c1_231 = arith.constant 1 : index
      %c0_232 = arith.constant 0 : index
      %314 = vector.load %arg11[%c1_230, %c1_231, %c0_232] : memref<18x18x64xf32, #tpu.memory_space<vmem>>, vector<16x16x64xf32>
      %315 = vector.shape_cast %314 : vector<16x16x64xf32> to vector<256x64xf32>
      %c9_i32_233 = arith.constant 9 : i32
      %316 = arith.muli %268, %c9_i32_233 : i32
      %c3_i32_234 = arith.constant 3 : i32
      %317 = arith.addi %316, %c3_i32_234 : i32
      %c1_i32_235 = arith.constant 1 : i32
      %318 = arith.addi %317, %c1_i32_235 : i32
      %319 = arith.index_cast %318 : i32 to index
      %c0_236 = arith.constant 0 : index
      %c0_237 = arith.constant 0 : index
      %320 = vector.load %arg4[%319, %c0_236, %c0_237] : memref<108x64x64xbf16, #tpu.memory_space<vmem>>, vector<1x64x64xbf16>
      %321 = vector.shape_cast %320 : vector<1x64x64xbf16> to vector<64x64xbf16>
      %322 = arith.truncf %315 : vector<256x64xf32> to vector<256x64xbf16>
      %cst_238 = arith.constant dense<0.000000e+00> : vector<256x64xf32>
      %323 = tpu.matmul %322, %321, %cst_238 {dimension_numbers = #tpu.dot_dimension_numbers<[1], [0], [0], [1], [0, 0, 1, 1], [], []>} : vector<256x64xbf16>, vector<64x64xbf16>, vector<256x64xf32> -> vector<256x64xf32>
      %324 = arith.addf %313, %323 : vector<256x64xf32>
      %c1_239 = arith.constant 1 : index
      %c2_240 = arith.constant 2 : index
      %c0_241 = arith.constant 0 : index
      %325 = vector.load %arg11[%c1_239, %c2_240, %c0_241] : memref<18x18x64xf32, #tpu.memory_space<vmem>>, vector<16x16x64xf32>
      %326 = vector.shape_cast %325 : vector<16x16x64xf32> to vector<256x64xf32>
      %c9_i32_242 = arith.constant 9 : i32
      %327 = arith.muli %268, %c9_i32_242 : i32
      %c3_i32_243 = arith.constant 3 : i32
      %328 = arith.addi %327, %c3_i32_243 : i32
      %c2_i32_244 = arith.constant 2 : i32
      %329 = arith.addi %328, %c2_i32_244 : i32
      %330 = arith.index_cast %329 : i32 to index
      %c0_245 = arith.constant 0 : index
      %c0_246 = arith.constant 0 : index
      %331 = vector.load %arg4[%330, %c0_245, %c0_246] : memref<108x64x64xbf16, #tpu.memory_space<vmem>>, vector<1x64x64xbf16>
      %332 = vector.shape_cast %331 : vector<1x64x64xbf16> to vector<64x64xbf16>
      %333 = arith.truncf %326 : vector<256x64xf32> to vector<256x64xbf16>
      %cst_247 = arith.constant dense<0.000000e+00> : vector<256x64xf32>
      %334 = tpu.matmul %333, %332, %cst_247 {dimension_numbers = #tpu.dot_dimension_numbers<[1], [0], [0], [1], [0, 0, 1, 1], [], []>} : vector<256x64xbf16>, vector<64x64xbf16>, vector<256x64xf32> -> vector<256x64xf32>
      %335 = arith.addf %324, %334 : vector<256x64xf32>
      %c2_248 = arith.constant 2 : index
      %c0_249 = arith.constant 0 : index
      %c0_250 = arith.constant 0 : index
      %336 = vector.load %arg11[%c2_248, %c0_249, %c0_250] : memref<18x18x64xf32, #tpu.memory_space<vmem>>, vector<16x16x64xf32>
      %337 = vector.shape_cast %336 : vector<16x16x64xf32> to vector<256x64xf32>
      %c9_i32_251 = arith.constant 9 : i32
      %338 = arith.muli %268, %c9_i32_251 : i32
      %c6_i32_252 = arith.constant 6 : i32
      %339 = arith.addi %338, %c6_i32_252 : i32
      %c0_i32_253 = arith.constant 0 : i32
      %340 = arith.addi %339, %c0_i32_253 : i32
      %341 = arith.index_cast %340 : i32 to index
      %c0_254 = arith.constant 0 : index
      %c0_255 = arith.constant 0 : index
      %342 = vector.load %arg4[%341, %c0_254, %c0_255] : memref<108x64x64xbf16, #tpu.memory_space<vmem>>, vector<1x64x64xbf16>
      %343 = vector.shape_cast %342 : vector<1x64x64xbf16> to vector<64x64xbf16>
      %344 = arith.truncf %337 : vector<256x64xf32> to vector<256x64xbf16>
      %cst_256 = arith.constant dense<0.000000e+00> : vector<256x64xf32>
      %345 = tpu.matmul %344, %343, %cst_256 {dimension_numbers = #tpu.dot_dimension_numbers<[1], [0], [0], [1], [0, 0, 1, 1], [], []>} : vector<256x64xbf16>, vector<64x64xbf16>, vector<256x64xf32> -> vector<256x64xf32>
      %346 = arith.addf %335, %345 : vector<256x64xf32>
      %c2_257 = arith.constant 2 : index
      %c1_258 = arith.constant 1 : index
      %c0_259 = arith.constant 0 : index
      %347 = vector.load %arg11[%c2_257, %c1_258, %c0_259] : memref<18x18x64xf32, #tpu.memory_space<vmem>>, vector<16x16x64xf32>
      %348 = vector.shape_cast %347 : vector<16x16x64xf32> to vector<256x64xf32>
      %c9_i32_260 = arith.constant 9 : i32
      %349 = arith.muli %268, %c9_i32_260 : i32
      %c6_i32_261 = arith.constant 6 : i32
      %350 = arith.addi %349, %c6_i32_261 : i32
      %c1_i32_262 = arith.constant 1 : i32
      %351 = arith.addi %350, %c1_i32_262 : i32
      %352 = arith.index_cast %351 : i32 to index
      %c0_263 = arith.constant 0 : index
      %c0_264 = arith.constant 0 : index
      %353 = vector.load %arg4[%352, %c0_263, %c0_264] : memref<108x64x64xbf16, #tpu.memory_space<vmem>>, vector<1x64x64xbf16>
      %354 = vector.shape_cast %353 : vector<1x64x64xbf16> to vector<64x64xbf16>
      %355 = arith.truncf %348 : vector<256x64xf32> to vector<256x64xbf16>
      %cst_265 = arith.constant dense<0.000000e+00> : vector<256x64xf32>
      %356 = tpu.matmul %355, %354, %cst_265 {dimension_numbers = #tpu.dot_dimension_numbers<[1], [0], [0], [1], [0, 0, 1, 1], [], []>} : vector<256x64xbf16>, vector<64x64xbf16>, vector<256x64xf32> -> vector<256x64xf32>
      %357 = arith.addf %346, %356 : vector<256x64xf32>
      %c2_266 = arith.constant 2 : index
      %c2_267 = arith.constant 2 : index
      %c0_268 = arith.constant 0 : index
      %358 = vector.load %arg11[%c2_266, %c2_267, %c0_268] : memref<18x18x64xf32, #tpu.memory_space<vmem>>, vector<16x16x64xf32>
      %359 = vector.shape_cast %358 : vector<16x16x64xf32> to vector<256x64xf32>
      %c9_i32_269 = arith.constant 9 : i32
      %360 = arith.muli %268, %c9_i32_269 : i32
      %c6_i32_270 = arith.constant 6 : i32
      %361 = arith.addi %360, %c6_i32_270 : i32
      %c2_i32_271 = arith.constant 2 : i32
      %362 = arith.addi %361, %c2_i32_271 : i32
      %363 = arith.index_cast %362 : i32 to index
      %c0_272 = arith.constant 0 : index
      %c0_273 = arith.constant 0 : index
      %364 = vector.load %arg4[%363, %c0_272, %c0_273] : memref<108x64x64xbf16, #tpu.memory_space<vmem>>, vector<1x64x64xbf16>
      %365 = vector.shape_cast %364 : vector<1x64x64xbf16> to vector<64x64xbf16>
      %366 = arith.truncf %359 : vector<256x64xf32> to vector<256x64xbf16>
      %cst_274 = arith.constant dense<0.000000e+00> : vector<256x64xf32>
      %367 = tpu.matmul %366, %365, %cst_274 {dimension_numbers = #tpu.dot_dimension_numbers<[1], [0], [0], [1], [0, 0, 1, 1], [], []>} : vector<256x64xbf16>, vector<64x64xbf16>, vector<256x64xf32> -> vector<256x64xf32>
      %368 = arith.addf %357, %367 : vector<256x64xf32>
      %369 = arith.index_cast %268 : i32 to index
      %c0_275 = arith.constant 0 : index
      %370 = vector.load %arg5[%369, %c0_275] : memref<12x64xf32, #tpu.memory_space<vmem>>, vector<1x64xf32>
      %371 = arith.index_cast %268 : i32 to index
      %c0_276 = arith.constant 0 : index
      %372 = vector.load %arg6[%371, %c0_276] : memref<12x64xf32, #tpu.memory_space<vmem>>, vector<1x64xf32>
      %373 = vector.broadcast %370 : vector<1x64xf32> to vector<256x64xf32>
      %374 = arith.mulf %368, %373 : vector<256x64xf32>
      %375 = vector.broadcast %372 : vector<1x64xf32> to vector<256x64xf32>
      %376 = arith.addf %374, %375 : vector<256x64xf32>
      %cst_277 = arith.constant 0.000000e+00 : f32
      %377 = vector.broadcast %cst_277 : f32 to vector<256x64xf32>
      %378 = arith.maximumf %376, %377 : vector<256x64xf32>
      %379 = vector.shape_cast %378 : vector<256x64xf32> to vector<16x16x64xf32>
      %c1_278 = arith.constant 1 : index
      %c1_279 = arith.constant 1 : index
      %c0_280 = arith.constant 0 : index
      %380 = vector.load %arg10[%c1_278, %c1_279, %c0_280] : memref<18x18x64xf32, #tpu.memory_space<vmem>>, vector<16x16x64xf32>
      tpu.vector_store %arg10[%c1_278, %c1_279, %c0_280], %379 {strides = array<i32>} : memref<18x18x64xf32, #tpu.memory_space<vmem>>, vector<16x16x64xf32>,
    }
    %c6_i32_49 = arith.constant 6 : i32
    %cst_50 = arith.constant 0.000000e+00 : f32
    %90 = vector.broadcast %cst_50 : f32 to vector<16x16x64xf32>
    %c0_51 = arith.constant 0 : index
    %c0_52 = arith.constant 0 : index
    %91 = vector.load %arg7[%c0_51, %c0_52] : memref<9x64xf32, #tpu.memory_space<vmem>>, vector<1x64xf32>
    %92 = vector.shape_cast %91 : vector<1x64xf32> to vector<1x1x64xf32>
    %c0_53 = arith.constant 0 : index
    %c0_54 = arith.constant 0 : index
    %c0_55 = arith.constant 0 : index
    %93 = vector.load %arg10[%c0_53, %c0_54, %c0_55] : memref<18x18x64xf32, #tpu.memory_space<vmem>>, vector<16x16x64xf32>
    %94 = vector.broadcast %92 : vector<1x1x64xf32> to vector<16x16x64xf32>
    %95 = arith.mulf %93, %94 : vector<16x16x64xf32>
    %96 = arith.addf %90, %95 : vector<16x16x64xf32>
    %c1_56 = arith.constant 1 : index
    %c0_57 = arith.constant 0 : index
    %97 = vector.load %arg7[%c1_56, %c0_57] : memref<9x64xf32, #tpu.memory_space<vmem>>, vector<1x64xf32>
    %98 = vector.shape_cast %97 : vector<1x64xf32> to vector<1x1x64xf32>
    %c0_58 = arith.constant 0 : index
    %c1_59 = arith.constant 1 : index
    %c0_60 = arith.constant 0 : index
    %99 = vector.load %arg10[%c0_58, %c1_59, %c0_60] : memref<18x18x64xf32, #tpu.memory_space<vmem>>, vector<16x16x64xf32>
    %100 = vector.broadcast %98 : vector<1x1x64xf32> to vector<16x16x64xf32>
    %101 = arith.mulf %99, %100 : vector<16x16x64xf32>
    %102 = arith.addf %96, %101 : vector<16x16x64xf32>
    %c2_61 = arith.constant 2 : index
    %c0_62 = arith.constant 0 : index
    %103 = vector.load %arg7[%c2_61, %c0_62] : memref<9x64xf32, #tpu.memory_space<vmem>>, vector<1x64xf32>
    %104 = vector.shape_cast %103 : vector<1x64xf32> to vector<1x1x64xf32>
    %c0_63 = arith.constant 0 : index
    %c2_64 = arith.constant 2 : index
    %c0_65 = arith.constant 0 : index
    %105 = vector.load %arg10[%c0_63, %c2_64, %c0_65] : memref<18x18x64xf32, #tpu.memory_space<vmem>>, vector<16x16x64xf32>
    %106 = vector.broadcast %104 : vector<1x1x64xf32> to vector<16x16x64xf32>
    %107 = arith.mulf %105, %106 : vector<16x16x64xf32>
    %108 = arith.addf %102, %107 : vector<16x16x64xf32>
    %c3_66 = arith.constant 3 : index
    %c0_67 = arith.constant 0 : index
    %109 = vector.load %arg7[%c3_66, %c0_67] : memref<9x64xf32, #tpu.memory_space<vmem>>, vector<1x64xf32>
    %110 = vector.shape_cast %109 : vector<1x64xf32> to vector<1x1x64xf32>
    %c1_68 = arith.constant 1 : index
    %c0_69 = arith.constant 0 : index
    %c0_70 = arith.constant 0 : index
    %111 = vector.load %arg10[%c1_68, %c0_69, %c0_70] : memref<18x18x64xf32, #tpu.memory_space<vmem>>, vector<16x16x64xf32>
    %112 = vector.broadcast %110 : vector<1x1x64xf32> to vector<16x16x64xf32>
    %113 = arith.mulf %111, %112 : vector<16x16x64xf32>
    %114 = arith.addf %108, %113 : vector<16x16x64xf32>
    %c4_71 = arith.constant 4 : index
    %c0_72 = arith.constant 0 : index
    %115 = vector.load %arg7[%c4_71, %c0_72] : memref<9x64xf32, #tpu.memory_space<vmem>>, vector<1x64xf32>
    %116 = vector.shape_cast %115 : vector<1x64xf32> to vector<1x1x64xf32>
    %c1_73 = arith.constant 1 : index
    %c1_74 = arith.constant 1 : index
    %c0_75 = arith.constant 0 : index
    %117 = vector.load %arg10[%c1_73, %c1_74, %c0_75] : memref<18x18x64xf32, #tpu.memory_space<vmem>>, vector<16x16x64xf32>
    %118 = vector.broadcast %116 : vector<1x1x64xf32> to vector<16x16x64xf32>
    %119 = arith.mulf %117, %118 : vector<16x16x64xf32>
    %120 = arith.addf %114, %119 : vector<16x16x64xf32>
    %c5_76 = arith.constant 5 : index
    %c0_77 = arith.constant 0 : index
    %121 = vector.load %arg7[%c5_76, %c0_77] : memref<9x64xf32, #tpu.memory_space<vmem>>, vector<1x64xf32>
    %122 = vector.shape_cast %121 : vector<1x64xf32> to vector<1x1x64xf32>
    %c1_78 = arith.constant 1 : index
    %c2_79 = arith.constant 2 : index
    %c0_80 = arith.constant 0 : index
    %123 = vector.load %arg10[%c1_78, %c2_79, %c0_80] : memref<18x18x64xf32, #tpu.memory_space<vmem>>, vector<16x16x64xf32>
    %124 = vector.broadcast %122 : vector<1x1x64xf32> to vector<16x16x64xf32>
    %125 = arith.mulf %123, %124 : vector<16x16x64xf32>
    %126 = arith.addf %120, %125 : vector<16x16x64xf32>
    %c6_81 = arith.constant 6 : index
    %c0_82 = arith.constant 0 : index
    %127 = vector.load %arg7[%c6_81, %c0_82] : memref<9x64xf32, #tpu.memory_space<vmem>>, vector<1x64xf32>
    %128 = vector.shape_cast %127 : vector<1x64xf32> to vector<1x1x64xf32>
    %c2_83 = arith.constant 2 : index
    %c0_84 = arith.constant 0 : index
    %c0_85 = arith.constant 0 : index
    %129 = vector.load %arg10[%c2_83, %c0_84, %c0_85] : memref<18x18x64xf32, #tpu.memory_space<vmem>>, vector<16x16x64xf32>
    %130 = vector.broadcast %128 : vector<1x1x64xf32> to vector<16x16x64xf32>
    %131 = arith.mulf %129, %130 : vector<16x16x64xf32>
    %132 = arith.addf %126, %131 : vector<16x16x64xf32>
    %c7_86 = arith.constant 7 : index
    %c0_87 = arith.constant 0 : index
    %133 = vector.load %arg7[%c7_86, %c0_87] : memref<9x64xf32, #tpu.memory_space<vmem>>, vector<1x64xf32>
    %134 = vector.shape_cast %133 : vector<1x64xf32> to vector<1x1x64xf32>
    %c2_88 = arith.constant 2 : index
    %c1_89 = arith.constant 1 : index
    %c0_90 = arith.constant 0 : index
    %135 = vector.load %arg10[%c2_88, %c1_89, %c0_90] : memref<18x18x64xf32, #tpu.memory_space<vmem>>, vector<16x16x64xf32>
    %136 = vector.broadcast %134 : vector<1x1x64xf32> to vector<16x16x64xf32>
    %137 = arith.mulf %135, %136 : vector<16x16x64xf32>
    %138 = arith.addf %132, %137 : vector<16x16x64xf32>
    %c8_91 = arith.constant 8 : index
    %c0_92 = arith.constant 0 : index
    %139 = vector.load %arg7[%c8_91, %c0_92] : memref<9x64xf32, #tpu.memory_space<vmem>>, vector<1x64xf32>
    %140 = vector.shape_cast %139 : vector<1x64xf32> to vector<1x1x64xf32>
    %c2_93 = arith.constant 2 : index
    %c2_94 = arith.constant 2 : index
    %c0_95 = arith.constant 0 : index
    %141 = vector.load %arg10[%c2_93, %c2_94, %c0_95] : memref<18x18x64xf32, #tpu.memory_space<vmem>>, vector<16x16x64xf32>
    %142 = vector.broadcast %140 : vector<1x1x64xf32> to vector<16x16x64xf32>
    %143 = arith.mulf %141, %142 : vector<16x16x64xf32>
    %144 = arith.addf %138, %143 : vector<16x16x64xf32>
    %cst_96 = arith.constant dense<0.000000e+00> : vector<16x16xf32>
    %145 = vector.multi_reduction <add>, %144, %cst_96 [2] : vector<16x16x64xf32> to vector<16x16xf32>
    %c0_97 = arith.constant 0 : index
    %c0_98 = arith.constant 0 : index
    %c0_99 = arith.constant 0 : index
    %146 = vector.load %arg1[%c0_97, %c0_98, %c0_99] : memref<1x16x16xf32, #tpu.memory_space<vmem>>, vector<1x16x16xf32>
    %147 = vector.shape_cast %146 : vector<1x16x16xf32> to vector<16x16xf32>
    %148 = arith.subf %147, %145 : vector<16x16xf32>
    %c0_100 = arith.constant 0 : index
    %c0_101 = arith.constant 0 : index
    %c0_102 = arith.constant 0 : index
    %149 = vector.load %arg8[%c0_100, %c0_101, %c0_102] : memref<1x16x16xf32, #tpu.memory_space<vmem>>, vector<1x16x16xf32>
    %150 = vector.shape_cast %149 : vector<1x16x16xf32> to vector<16x16xf32>
    %151 = vector.shape_cast %148 : vector<16x16xf32> to vector<1x16x16xf32>
    tpu.vector_store %arg8[%c0_100, %c0_101, %c0_102], %151 {strides = array<i32>} : memref<1x16x16xf32, #tpu.memory_space<vmem>>, vector<1x16x16xf32>,
    return
  }
  func.func @transform_0(%arg0: i32) -> (i32, i32, i32) {
    %c0_i32 = arith.constant 0 : i32
    %c0_i32_0 = arith.constant 0 : i32
    %c0_i32_1 = arith.constant 0 : i32
    return %arg0, %c0_i32, %c0_i32_0 : i32, i32, i32
  }
  func.func @transform_1(%arg0: i32) -> (i32, i32) {
    %c0_i32 = arith.constant 0 : i32
    %c0_i32_0 = arith.constant 0 : i32
    %c0_i32_1 = arith.constant 0 : i32
    return %c0_i32, %c0_i32_0 : i32, i32
  }
  func.func @transform_2(%arg0: i32) -> (i32, i32) {
    %c0_i32 = arith.constant 0 : i32
    %c0_i32_0 = arith.constant 0 : i32
    %c0_i32_1 = arith.constant 0 : i32
    return %c0_i32, %c0_i32_0 : i32, i32
  }
  func.func @transform_3(%arg0: i32) -> (i32, i32, i32) {
    %c0_i32 = arith.constant 0 : i32
    %c0_i32_0 = arith.constant 0 : i32
    %c0_i32_1 = arith.constant 0 : i32
    %c0_i32_2 = arith.constant 0 : i32
    return %c0_i32, %c0_i32_0, %c0_i32_1 : i32, i32, i32
  }
  func.func @transform_4(%arg0: i32) -> (i32, i32) {
    %c0_i32 = arith.constant 0 : i32
    %c0_i32_0 = arith.constant 0 : i32
    %c0_i32_1 = arith.constant 0 : i32
    return %c0_i32, %c0_i32_0 : i32, i32
  }
  func.func @transform_5(%arg0: i32) -> (i32, i32) {
    %c0_i32 = arith.constant 0 : i32
    %c0_i32_0 = arith.constant 0 : i32
    %c0_i32_1 = arith.constant 0 : i32
    return %c0_i32, %c0_i32_0 : i32, i32
  }
  func.func @transform_6(%arg0: i32) -> (i32, i32) {
    %c0_i32 = arith.constant 0 : i32
    %c0_i32_0 = arith.constant 0 : i32
    %c0_i32_1 = arith.constant 0 : i32
    return %c0_i32, %c0_i32_0 : i32, i32
  }
  func.func @transform_7(%arg0: i32) -> (i32, i32, i32) {
    %c0_i32 = arith.constant 0 : i32
    %c0_i32_0 = arith.constant 0 : i32
    %c0_i32_1 = arith.constant 0 : i32
    return %arg0, %c0_i32, %c0_i32_0 : i32, i32, i32
  }
}

</mosaic_0001>

<bundles_post_ra>
// kernel: dncnn_forward.1
= control target key start
LH: loop header
LB: loop body
LE: loop exit
PB: predicated region body
PF: predicated region fallthrough
CT: control target
= control target key end

     0   :  { %12 = vsyncpa [#allocation6], 0  ;;  %s16684_s0 = inlined_call_operand.vmem [shape: f32[2,16,16], index: 0, kind: input, shape index: {}]   ;;  %s16685_s1 = inlined_call_operand.vmem [shape: f32[9,64], index: 1, kind: input, shape index: {}]   ;;  %s16686_s2 = inlined_call_operand.vmem [shape: f32[1,64], index: 2, kind: input, shape index: {}]   ;;  %s16687_s3 = inlined_call_operand.vmem [shape: bf16[108,64,64], index: 3, kind: input, shape index: {}]   ;;  %s16688_s4 = inlined_call_operand.vmem [shape: f32[12,64], index: 4, kind: input, shape index: {}]   ;;  %s16689_s5 = inlined_call_operand.vmem [shape: f32[12,64], index: 5, kind: input, shape index: {}]   ;;  %s16690_s6 = inlined_call_operand.vmem [shape: f32[9,64], index: 6, kind: input, shape index: {}]   ;;  %s16691_s7 = inlined_call_operand.hbm [shape: f32[2,16,16], index: 7, kind: output, shape index: {}]  }
   0x1   :  { %14 = vsyncpa [#allocation6 + $0x1], 0  ;;  %s12249_s24 = smov 0   ;;  %s12251_s25 = smov 0  }
   0x2   :  { %s12253_s26 = smov 0   ;;  %s12255_s27 = smov 0  }
   0x3 LB: > { %s12270_s28 = sadd.s32 4294967295, %s12198_s27   ;;  %s9831_s29 = sadd.s32 4294967294, %s12198_s27   ;;  %s12198_s27 = sphi %s12255_s27, %s17120_s27   ;;  %s12194_s26 = sphi %s12253_s26, %s17119_s26   ;;  %s12190_s25 = sphi %s12251_s25, %s17118_s25   ;;  %s12186_s24 = sphi %s12249_s24, %s17117_s24  }
   0x4   : > { %s12274_s30 = sadd.s32 1, %s12198_s27   ;;  %s179_s8 = sadd.s32 1, %s12194_s26 }
   0x5   : > { %s176_s9 = ssub.s32 %s12198_s27, %s12274_s30  ;;  %p189_p0 = scmp.ne.s32.totalorder %s12194_s26, %s12190_s25 }
   0x6   : > { %p177_p1 = scmp.eq.s32.totalorder %s176_s9, 0  ;;  %p190_p2 = scmp.eq.s32.totalorder %s12270_s28, 1 }
   0x7   : > { %p195_p3 = scmp.ne.s32.totalorder %s12190_s25, %s12186_s24  ;;  %p196_p4 = scmp.eq.s32.totalorder %s9831_s29, 1 }
   0x8   : > { %s12285_s10 = scalar_select %p177_p1, %s12194_s26, %s179_s8  }
   0x9   : > { %p12287_p5 = por %p190_p2, %p189_p0  ;;  %p12291_p6 = por %p196_p4, %p195_p3 }
   0xa   : > { %p9834_p7 = scmp.ge.s32.totalorder %s12198_s27, 1  ;;  %p240_p8 = scmp.lt.s32.totalorder %s12198_s27, 3 }
   0xc   : > { %p241_p9 = pnand %p9834_p7, %p240_p8 }
   0xe   : > { %244 = sbr.rel (%p241_p9) target bundleno = 2741 (0xab5), region = 48 }
  0x15   : > { %p272_p10 = scmp.lt.s32.totalorder %s12270_s28, 1  ;;  %vm278_vm0 = vcmask 146432   ;;  %vm281_vm1 = vcmask 140288   ;;  %v16693_v0 = vmov 0.0   ;;  %s12205_s18 = smov 1   ;;  %v16692_v3 = vlaneseq }
  0x16   : > { %279 = vst.msk [vmem:[#allocation2] sm:$0xff] %vm278_vm0, %v16693_v0  ;;  %280 = vst.msk [vmem:[#allocation2 + $0x8] sm:$0xff] %vm278_vm0, %v16693_v0  ;;  %vm403_vm2 = vcmask 138248   ;;  %vm283_vm3 = vcmask 523264   ;;  %vm286_vm4 = vcmask 517120   ;;  %s269_s20 = sand.u32 1, %s12190_s25  }
  0x17   : > { %282 = vst.msk [vmem:[#allocation2 + $0x10] sm:$0x3] %vm281_vm1, %v16693_v0  ;;  %s273_s13 = scalar_select %p272_p10, %s12270_s28, 1  ;;  %v12310_v5 = vshrl.u32 %v16692_v3, 7 }
  0x18   : > { %s13822_s21 = sshll.u32 %s269_s20, 4  ;;  %s14658_s22 = smov 0  }
  0x19   : > { %s10403_s14 = sshll.u32 %s273_s13, 4  ;;  %16701 = vst [vmem:[#allocation8_spill] sm:$0xff] %v12310_v5  ;;  %v12313_v7 = vsub.s32 1, %v12310_v5  ;;  %v12316_v8 = vsub.s32 0, %v12310_v5  ;;  %v12325_v12 = vsub.s32 2, %v12310_v5  ;;  %v12333_v14 = vsub.s32 3, %v12310_v5 }
  0x1a   : > { %s12305_s17 = scalar_lea.vmem %s16684_s0, %s10403_s14  ;;  %v12341_v16 = vsub.s32 4, %v12310_v5  ;;  %v12349_v18 = vsub.s32 5, %v12310_v5  ;;  %v12357_v20 = vsub.s32 6, %v12310_v5  ;;  %v12365_v22 = vsub.s32 7, %v12310_v5  ;;  %s14656_s19 = scalar_lea.vmem [#allocation5], %s13822_s21 }
  0x1b   : > { %v393_v1 = vld [vmem:[%s12305_s17] sm:$0xff]  ;;  %v394_v2 = vld [vmem:[%s12305_s17 + $0x8] sm:$0xff] }
  0x1c   : > { %397 = vrot.lane.b32.xlu0 %v393_v1, %s12205_s18 }
  0x20   : > { %399 = vrot.lane.b32.xlu0 %v394_v2, %s12205_s18 }
  0x8e   : > { %v398_v4 = vpop.permute.xlu0 %397 }
  0x8f   : > { %404 = vst.msk [vmem:[#allocation2 + $0x1] sm:$0xff] %vm403_vm2, %v398_v4 }
  0x92   : > { %v400_v6 = vpop.permute.xlu0 %399 }
  0x93   : > { %405 = vst.msk [vmem:[#allocation2 + $0x9] sm:$0xff] %vm403_vm2, %v400_v6 }
  0x96   : > { %v406_v9 = vld [vmem:[#allocation2] sm:$0xff] }
  0x97   : > { %v12319_v10 = vrot.slane %v406_v9, %v12313_v7  ;;  %v12322_v11 = vrot.slane %v406_v9, %v12316_v8  ;;  %v12330_v13 = vrot.slane %v406_v9, %v12325_v12  ;;  %v12338_v15 = vrot.slane %v406_v9, %v12333_v14 }
  0x98   : > { %v12346_v17 = vrot.slane %v406_v9, %v12341_v16  ;;  %v12354_v19 = vrot.slane %v406_v9, %v12349_v18  ;;  %v12362_v21 = vrot.slane %v406_v9, %v12357_v20  ;;  %v12370_v23 = vrot.slane %v406_v9, %v12365_v22 }
  0x99   : > { %425 = vbcast.lane.b32.xlu0 %v12319_v10, 256  ;;  %414 = vbcast.lane.b32.xlu1 %v12322_v11, 256 }
  0x9a   : > { %v407_v24 = vld [vmem:[#allocation2 + $0x8] sm:$0xff] }
  0x9b   : > { %v12375_v25 = vrot.slane %v407_v24, %v12316_v8  ;;  %v12380_v26 = vrot.slane %v407_v24, %v12313_v7  ;;  %v12385_v27 = vrot.slane %v407_v24, %v12325_v12  ;;  %v12390_v28 = vrot.slane %v407_v24, %v12333_v14 }
  0x9c   : > { %v12395_v29 = vrot.slane %v407_v24, %v12341_v16  ;;  %v12400_v30 = vrot.slane %v407_v24, %v12349_v18  ;;  %v12405_v31 = vrot.slane %v407_v24, %v12357_v20  ;;  %v12410_v32 = vrot.slane %v407_v24, %v12365_v22 }
  0x9d   : > { %436 = vbcast.lane.b32.xlu0 %v12330_v13, 256  ;;  %418 = vbcast.lane.b32.xlu1 %v12322_v11, 264 }
  0xa1   : > { %447 = vbcast.lane.b32.xlu0 %v12338_v15, 256  ;;  %429 = vbcast.lane.b32.xlu1 %v12319_v10, 264 }
  0xa5   : > { %458 = vbcast.lane.b32.xlu0 %v12346_v17, 256  ;;  %440 = vbcast.lane.b32.xlu1 %v12330_v13, 264 }
  0xa9   : > { %469 = vbcast.lane.b32.xlu0 %v12354_v19, 256  ;;  %451 = vbcast.lane.b32.xlu1 %v12338_v15, 264 }
  0xad   : > { %480 = vbcast.lane.b32.xlu0 %v12362_v21, 256  ;;  %462 = vbcast.lane.b32.xlu1 %v12346_v17, 264 }
  0xb1   : > { %491 = vbcast.lane.b32.xlu0 %v12370_v23, 256  ;;  %473 = vbcast.lane.b32.xlu1 %v12354_v19, 264 }
  0xb5   : > { %484 = vbcast.lane.b32.xlu1 %v12362_v21, 264  ;;  %502 = vbcast.lane.b32.xlu0 %v12375_v25, 256 }
  0xb9   : > { %495 = vbcast.lane.b32.xlu1 %v12370_v23, 264  ;;  %513 = vbcast.lane.b32.xlu0 %v12380_v26, 256 }
  0xbd   : > { %506 = vbcast.lane.b32.xlu1 %v12375_v25, 264  ;;  %524 = vbcast.lane.b32.xlu0 %v12385_v27, 256 }
  0xc1   : > { %517 = vbcast.lane.b32.xlu1 %v12380_v26, 264  ;;  %535 = vbcast.lane.b32.xlu0 %v12390_v28, 256 }
  0xc5   : > { %528 = vbcast.lane.b32.xlu1 %v12385_v27, 264  ;;  %546 = vbcast.lane.b32.xlu0 %v12395_v29, 256 }
  0xc9   : > { %539 = vbcast.lane.b32.xlu1 %v12390_v28, 264  ;;  %557 = vbcast.lane.b32.xlu0 %v12400_v30, 256 }
  0xcd   : > { %550 = vbcast.lane.b32.xlu1 %v12395_v29, 264  ;;  %568 = vbcast.lane.b32.xlu0 %v12405_v31, 256 }
  0xd1   : > { %561 = vbcast.lane.b32.xlu1 %v12400_v30, 264  ;;  %579 = vbcast.lane.b32.xlu0 %v12410_v32, 256 }
  0xd5   : > { %572 = vbcast.lane.b32.xlu1 %v12405_v31, 264  ;;  %656 = vbcast.lane.b32.xlu0 %v12322_v11, 257 }
  0xd9   : > { %583 = vbcast.lane.b32.xlu1 %v12410_v32, 264  ;;  %664 = vbcast.lane.b32.xlu0 %v12319_v10, 257 }
  0xdd   : > { %660 = vbcast.lane.b32.xlu1 %v12322_v11, 265  ;;  %672 = vbcast.lane.b32.xlu0 %v12330_v13, 257 }
  0xe1   : > { %668 = vbcast.lane.b32.xlu1 %v12319_v10, 265  ;;  %680 = vbcast.lane.b32.xlu0 %v12338_v15, 257 }
  0xe5   : > { %676 = vbcast.lane.b32.xlu1 %v12330_v13, 265  ;;  %688 = vbcast.lane.b32.xlu0 %v12346_v17, 257 }
  0xe9   : > { %684 = vbcast.lane.b32.xlu1 %v12338_v15, 265  ;;  %696 = vbcast.lane.b32.xlu0 %v12354_v19, 257 }
  0xed   : > { %692 = vbcast.lane.b32.xlu1 %v12346_v17, 265  ;;  %704 = vbcast.lane.b32.xlu0 %v12362_v21, 257 }
  0xf1   : > { %700 = vbcast.lane.b32.xlu1 %v12354_v19, 265  ;;  %712 = vbcast.lane.b32.xlu0 %v12370_v23, 257 }
  0xf5   : > { %708 = vbcast.lane.b32.xlu1 %v12362_v21, 265  ;;  %720 = vbcast.lane.b32.xlu0 %v12375_v25, 257 }
  0xf9   : > { %716 = vbcast.lane.b32.xlu1 %v12370_v23, 265  ;;  %728 = vbcast.lane.b32.xlu0 %v12380_v26, 257 }
  0xfd   : > { %724 = vbcast.lane.b32.xlu1 %v12375_v25, 265  ;;  %736 = vbcast.lane.b32.xlu0 %v12385_v27, 257 }
 0x101   : > { %732 = vbcast.lane.b32.xlu1 %v12380_v26, 265  ;;  %744 = vbcast.lane.b32.xlu0 %v12390_v28, 257 }
 0x105   : > { %740 = vbcast.lane.b32.xlu1 %v12385_v27, 265  ;;  %752 = vbcast.lane.b32.xlu0 %v12395_v29, 257 }
 0x109   : > { %748 = vbcast.lane.b32.xlu1 %v12390_v28, 265  ;;  %760 = vbcast.lane.b32.xlu0 %v12400_v30, 257 }
 0x10b   : > { %v12442_v33 = vpop.permute.xlu1 %414  ;;  %v12444_v34 = vpop.permute.xlu0 %425 }
 0x10d   : > { %756 = vbcast.lane.b32.xlu1 %v12395_v29, 265  ;;  %768 = vbcast.lane.b32.xlu0 %v12405_v31, 257 }
 0x10f   : > { %v12448_v35 = vpop.permute.xlu1 %418  ;;  %v12450_v36 = vpop.permute.xlu0 %436 }
 0x111   : > { %764 = vbcast.lane.b32.xlu1 %v12400_v30, 265  ;;  %776 = vbcast.lane.b32.xlu0 %v12410_v32, 257 }
 0x113   : > { %v12454_v37 = vpop.permute.xlu1 %429  ;;  %v12456_v38 = vpop.permute.xlu0 %447 }
 0x115   : > { %772 = vbcast.lane.b32.xlu1 %v12405_v31, 265  ;;  %853 = vbcast.lane.b32.xlu0 %v12322_v11, 258 }
 0x117   : > { %v12460_v39 = vpop.permute.xlu1 %440  ;;  %v12462_v40 = vpop.permute.xlu0 %458 }
 0x119   : > { %780 = vbcast.lane.b32.xlu1 %v12410_v32, 265  ;;  %861 = vbcast.lane.b32.xlu0 %v12319_v10, 258 }
 0x11b   : > { %v12466_v41 = vpop.permute.xlu1 %451  ;;  %v12468_v42 = vpop.permute.xlu0 %469 }
 0x11d   : > { %857 = vbcast.lane.b32.xlu1 %v12322_v11, 266  ;;  %869 = vbcast.lane.b32.xlu0 %v12330_v13, 258 }
 0x11f   : > { %v12472_v43 = vpop.permute.xlu1 %462  ;;  %v12474_v44 = vpop.permute.xlu0 %480 }
 0x121   : > { %865 = vbcast.lane.b32.xlu1 %v12319_v10, 266  ;;  %877 = vbcast.lane.b32.xlu0 %v12338_v15, 258  ;;  %v1047_v10 = vld [vmem:[#allocation2 + $0x1] sm:$0xff] }
 0x122   : > { %v12600_v0 = vrot.slane %v1047_v10, %v12349_v18 }
 0x123   : > { %v12478_v45 = vpop.permute.xlu1 %473  ;;  %v12480_v46 = vpop.permute.xlu0 %491 }
 0x125   : > { %873 = vbcast.lane.b32.xlu1 %v12330_v13, 266  ;;  %885 = vbcast.lane.b32.xlu0 %v12346_v17, 258 }
 0x127   : > { %v12484_v47 = vpop.permute.xlu1 %484  ;;  %v12486_v48 = vpop.permute.xlu0 %502 }
 0x129   : > { %881 = vbcast.lane.b32.xlu1 %v12338_v15, 266  ;;  %893 = vbcast.lane.b32.xlu0 %v12354_v19, 258  ;;  %v12555_v15 = vrot.slane %v1047_v10, %v12316_v8 }
 0x12b   : > { %v12490_v49 = vpop.permute.xlu1 %495  ;;  %v12492_v50 = vpop.permute.xlu0 %513 }
 0x12d   : > { %889 = vbcast.lane.b32.xlu1 %v12346_v17, 266  ;;  %901 = vbcast.lane.b32.xlu0 %v12362_v21, 258 }
 0x12f   : > { %v12496_v51 = vpop.permute.xlu1 %506  ;;  %v12498_v52 = vpop.permute.xlu0 %524 }
 0x131   : > { %897 = vbcast.lane.b32.xlu1 %v12354_v19, 266  ;;  %909 = vbcast.lane.b32.xlu0 %v12370_v23, 258 }
 0x133   : > { %v12502_v53 = vpop.permute.xlu1 %517  ;;  %v12504_v54 = vpop.permute.xlu0 %535 }
 0x135   : > { %905 = vbcast.lane.b32.xlu1 %v12362_v21, 266  ;;  %917 = vbcast.lane.b32.xlu0 %v12375_v25, 258  ;;  %v12564_v21 = vrot.slane %v1047_v10, %v12313_v7 }
 0x137   : > { %v12508_v55 = vpop.permute.xlu1 %528  ;;  %v12510_v56 = vpop.permute.xlu0 %546 }
 0x139   : > { %913 = vbcast.lane.b32.xlu1 %v12370_v23, 266  ;;  %925 = vbcast.lane.b32.xlu0 %v12380_v26, 258 }
 0x13b   : > { %v12514_v57 = vpop.permute.xlu1 %539  ;;  %v12516_v58 = vpop.permute.xlu0 %557 }
 0x13d   : > { %921 = vbcast.lane.b32.xlu1 %v12375_v25, 266  ;;  %933 = vbcast.lane.b32.xlu0 %v12385_v27, 258  ;;  %v12573_v25 = vrot.slane %v1047_v10, %v12325_v12 }
 0x13f   : > { %v12520_v59 = vpop.permute.xlu1 %550  ;;  %v12522_v60 = vpop.permute.xlu0 %568 }
 0x141   : > { %929 = vbcast.lane.b32.xlu1 %v12380_v26, 266  ;;  %941 = vbcast.lane.b32.xlu0 %v12390_v28, 258 }
 0x143   : > { %v12526_v61 = vpop.permute.xlu1 %561  ;;  %v12528_v62 = vpop.permute.xlu0 %579 }
 0x144   : > { %16702 = vst [vmem:[#allocation9_spill] sm:$0xff] %v12526_v61  ;;  %16703 = vst [vmem:[#allocation10_spill] sm:$0xff] %v12528_v62 }
 0x145   : > { %937 = vbcast.lane.b32.xlu1 %v12385_v27, 266  ;;  %949 = vbcast.lane.b32.xlu0 %v12395_v29, 258 }
 0x147   : > { %v12532_v63 = vpop.permute.xlu1 %572  ;;  %v12534_v1 = vpop.permute.xlu0 %656 }
 0x148   : > { %16704 = vst [vmem:[#allocation11_spill] sm:$0xff] %v12532_v63 }
 0x149   : > { %945 = vbcast.lane.b32.xlu1 %v12390_v28, 266  ;;  %957 = vbcast.lane.b32.xlu0 %v12400_v30, 258  ;;  %v12582_v28 = vrot.slane %v1047_v10, %v12333_v14 }
 0x14b   : > { %v12538_v2 = vpop.permute.xlu1 %583  ;;  %v12540_v4 = vpop.permute.xlu0 %664 }
 0x14d   : > { %953 = vbcast.lane.b32.xlu1 %v12395_v29, 266  ;;  %965 = vbcast.lane.b32.xlu0 %v12405_v31, 258 }
 0x14f   : > { %v12544_v6 = vpop.permute.xlu1 %660  ;;  %v12546_v9 = vpop.permute.xlu0 %672 }
 0x150   : > { %16705 = vst [vmem:[#allocation12_spill] sm:$0xff] %v12544_v6  ;;  %16706 = vst [vmem:[#allocation13_spill] sm:$0xff] %v12546_v9 }
 0x151   : > { %961 = vbcast.lane.b32.xlu1 %v12400_v30, 266  ;;  %973 = vbcast.lane.b32.xlu0 %v12410_v32, 258 }
 0x153   : > { %v12550_v11 = vpop.permute.xlu1 %668  ;;  %v12552_v13 = vpop.permute.xlu0 %680 }
 0x154   : > { %16707 = vst [vmem:[#allocation14_spill] sm:$0xff] %v12550_v11  ;;  %16708 = vst [vmem:[#allocation15_spill] sm:$0xff] %v12552_v13 }
 0x155   : > { %969 = vbcast.lane.b32.xlu1 %v12405_v31, 266  ;;  %1055 = vbcast.lane.b32.xlu0 %v12555_v15, 256  ;;  %v12591_v31 = vrot.slane %v1047_v10, %v12341_v16 }
 0x157   : > { %v12559_v17 = vpop.permute.xlu1 %676  ;;  %v12561_v19 = vpop.permute.xlu0 %688 }
 0x158   : > { %16709 = vst [vmem:[#allocation16_spill] sm:$0xff] %v12559_v17  ;;  %16710 = vst [vmem:[#allocation17_spill] sm:$0xff] %v12561_v19 }
 0x159   : > { %977 = vbcast.lane.b32.xlu1 %v12410_v32, 266  ;;  %1066 = vbcast.lane.b32.xlu0 %v12564_v21, 256 }
 0x15b   : > { %v12568_v23 = vpop.permute.xlu1 %684  ;;  %v12570_v24 = vpop.permute.xlu0 %696 }
 0x15c   : > { %16711 = vst [vmem:[#allocation18_spill] sm:$0xff] %v12568_v23  ;;  %16712 = vst [vmem:[#allocation19_spill] sm:$0xff] %v12570_v24 }
 0x15d   : > { %1059 = vbcast.lane.b32.xlu1 %v12555_v15, 264  ;;  %1077 = vbcast.lane.b32.xlu0 %v12573_v25, 256 }
 0x15f   : > { %v12577_v26 = vpop.permute.xlu1 %692  ;;  %v12579_v27 = vpop.permute.xlu0 %704 }
 0x160   : > { %16713 = vst [vmem:[#allocation20_spill] sm:$0xff] %v12577_v26  ;;  %16714 = vst [vmem:[#allocation21_spill] sm:$0xff] %v12579_v27  ;;  %v12618_v27 = vrot.slane %v1047_v10, %v12365_v22  ;;  %v1048_v26 = vld [vmem:[#allocation2 + $0x9] sm:$0xff] }
 0x161   : > { %1070 = vbcast.lane.b32.xlu1 %v12564_v21, 264  ;;  %1088 = vbcast.lane.b32.xlu0 %v12582_v28, 256  ;;  %v12627_v24 = vrot.slane %v1048_v26, %v12316_v8  ;;  %v12645_v23 = vrot.slane %v1048_v26, %v12325_v12  ;;  %v12654_v19 = vrot.slane %v1048_v26, %v12333_v14 }
 0x162   : > { %v12663_v17 = vrot.slane %v1048_v26, %v12341_v16  ;;  %v12672_v13 = vrot.slane %v1048_v26, %v12349_v18  ;;  %v12681_v63 = vrot.slane %v1048_v26, %v12357_v20  ;;  %v12690_v9 = vrot.slane %v1048_v26, %v12365_v22 }
 0x163   : > { %v12586_v29 = vpop.permute.xlu1 %700  ;;  %v12588_v30 = vpop.permute.xlu0 %712 }
 0x164   : > { %16715 = vst [vmem:[#allocation22_spill] sm:$0xff] %v12586_v29  ;;  %16716 = vst [vmem:[#allocation23_spill] sm:$0xff] %v12588_v30  ;;  %v12609_v29 = vrot.slane %v1047_v10, %v12357_v20 }
 0x165   : > { %1081 = vbcast.lane.b32.xlu1 %v12573_v25, 264  ;;  %1099 = vbcast.lane.b32.xlu0 %v12591_v31, 256 }
 0x167   : > { %v12595_v32 = vpop.permute.xlu1 %708  ;;  %v12597_v3 = vpop.permute.xlu0 %720 }
 0x168   : > { %16717 = vst [vmem:[#allocation24_spill] sm:$0xff] %v12595_v32  ;;  %16718 = vst [vmem:[#allocation25_spill] sm:$0xff] %v12597_v3 }
 0x169   : > { %1092 = vbcast.lane.b32.xlu1 %v12582_v28, 264  ;;  %1110 = vbcast.lane.b32.xlu0 %v12600_v0, 256 }
 0x16b   : > { %v12604_v5 = vpop.permute.xlu1 %716  ;;  %v12606_v30 = vpop.permute.xlu0 %728 }
 0x16c   : > { %16719 = vst [vmem:[#allocation26_spill] sm:$0xff] %v12604_v5  ;;  %16720 = vst [vmem:[#allocation27_spill] sm:$0xff] %v12606_v30 }
 0x16d   : > { %1103 = vbcast.lane.b32.xlu1 %v12591_v31, 264  ;;  %1121 = vbcast.lane.b32.xlu0 %v12609_v29, 256 }
 0x16f   : > { %v12613_v32 = vpop.permute.xlu1 %724  ;;  %v12615_v3 = vpop.permute.xlu0 %736 }
 0x170   : > { %16721 = vst [vmem:[#allocation28_spill] sm:$0xff] %v12613_v32  ;;  %16722 = vst [vmem:[#allocation29_spill] sm:$0xff] %v12615_v3  ;;  %v12636_v32 = vrot.slane %v1048_v26, %v12313_v7 }
 0x171   : > { %1114 = vbcast.lane.b32.xlu1 %v12600_v0, 264  ;;  %1132 = vbcast.lane.b32.xlu0 %v12618_v27, 256 }
 0x173   : > { %v12622_v30 = vpop.permute.xlu1 %732  ;;  %v12624_v5 = vpop.permute.xlu0 %744 }
 0x174   : > { %16723 = vst [vmem:[#allocation30_spill] sm:$0xff] %v12622_v30  ;;  %16724 = vst [vmem:[#allocation31_spill] sm:$0xff] %v12624_v5 }
 0x175   : > { %1125 = vbcast.lane.b32.xlu1 %v12609_v29, 264  ;;  %1143 = vbcast.lane.b32.xlu0 %v12627_v24, 256 }
 0x177   : > { %v12631_v3 = vpop.permute.xlu1 %740  ;;  %v12633_v10 = vpop.permute.xlu0 %752 }
 0x178   : > { %16725 = vst [vmem:[#allocation32_spill] sm:$0xff] %v12631_v3  ;;  %16726 = vst [vmem:[#allocation33_spill] sm:$0xff] %v12633_v10 }
 0x179   : > { %1136 = vbcast.lane.b32.xlu1 %v12618_v27, 264  ;;  %1154 = vbcast.lane.b32.xlu0 %v12636_v32, 256 }
 0x17b   : > { %v12640_v30 = vpop.permute.xlu1 %748  ;;  %v12642_v5 = vpop.permute.xlu0 %760 }
 0x17c   : > { %16727 = vst [vmem:[#allocation34_spill] sm:$0xff] %v12640_v30  ;;  %16728 = vst [vmem:[#allocation35_spill] sm:$0xff] %v12642_v5 }
 0x17d   : > { %1147 = vbcast.lane.b32.xlu1 %v12627_v24, 264  ;;  %1165 = vbcast.lane.b32.xlu0 %v12645_v23, 256 }
 0x17f   : > { %v12649_v3 = vpop.permute.xlu1 %756  ;;  %v12651_v10 = vpop.permute.xlu0 %768 }
 0x180   : > { %16729 = vst [vmem:[#allocation36_spill] sm:$0xff] %v12649_v3  ;;  %16730 = vst [vmem:[#allocation37_spill] sm:$0xff] %v12651_v10 }
 0x181   : > { %1158 = vbcast.lane.b32.xlu1 %v12636_v32, 264  ;;  %1176 = vbcast.lane.b32.xlu0 %v12654_v19, 256 }
 0x183   : > { %v12658_v30 = vpop.permute.xlu1 %764  ;;  %v12660_v5 = vpop.permute.xlu0 %776 }
 0x184   : > { %16731 = vst [vmem:[#allocation38_spill] sm:$0xff] %v12658_v30 }
 0x185   : > { %1169 = vbcast.lane.b32.xlu1 %v12645_v23, 264  ;;  %1187 = vbcast.lane.b32.xlu0 %v12663_v17, 256 }
 0x187   : > { %v12667_v3 = vpop.permute.xlu1 %772  ;;  %v12669_v10 = vpop.permute.xlu0 %853 }
 0x188   : > { %16732 = vst [vmem:[#allocation39_spill] sm:$0xff] %v12667_v3  ;;  %16733 = vst [vmem:[#allocation40_spill] sm:$0xff] %v12669_v10 }
 0x189   : > { %1180 = vbcast.lane.b32.xlu1 %v12654_v19, 264  ;;  %1198 = vbcast.lane.b32.xlu0 %v12672_v13, 256 }
 0x18b   : > { %v12676_v30 = vpop.permute.xlu1 %780  ;;  %v12678_v11 = vpop.permute.xlu0 %861 }
 0x18c   : > { %16734 = vst [vmem:[#allocation41_spill] sm:$0xff] %v12678_v11 }
 0x18d   : > { %1191 = vbcast.lane.b32.xlu1 %v12663_v17, 264  ;;  %1209 = vbcast.lane.b32.xlu0 %v12681_v63, 256 }
 0x18f   : > { %v12685_v3 = vpop.permute.xlu1 %857  ;;  %v12687_v10 = vpop.permute.xlu0 %869 }
 0x190   : > { %16735 = vst [vmem:[#allocation42_spill] sm:$0xff] %v12685_v3  ;;  %16736 = vst [vmem:[#allocation43_spill] sm:$0xff] %v12687_v10 }
 0x191   : > { %1202 = vbcast.lane.b32.xlu1 %v12672_v13, 264  ;;  %1220 = vbcast.lane.b32.xlu0 %v12690_v9, 256 }
 0x193   : > { %v12694_v62 = vpop.permute.xlu1 %865  ;;  %v12696_v11 = vpop.permute.xlu0 %877 }
 0x194   : > { %16737 = vst [vmem:[#allocation44_spill] sm:$0xff] %v12694_v62  ;;  %16738 = vst [vmem:[#allocation45_spill] sm:$0xff] %v12696_v11 }
 0x195   : > { %1213 = vbcast.lane.b32.xlu1 %v12681_v63, 264  ;;  %1297 = vbcast.lane.b32.xlu0 %v12555_v15, 257 }
 0x197   : > { %v12700_v61 = vpop.permute.xlu1 %873  ;;  %v12702_v3 = vpop.permute.xlu0 %885 }
 0x198   : > { %16739 = vst [vmem:[#allocation46_spill] sm:$0xff] %v12700_v61  ;;  %16740 = vst [vmem:[#allocation47_spill] sm:$0xff] %v12702_v3 }
 0x199   : > { %1224 = vbcast.lane.b32.xlu1 %v12690_v9, 264  ;;  %1305 = vbcast.lane.b32.xlu0 %v12564_v21, 257 }
 0x19b   : > { %v12706_v26 = vpop.permute.xlu1 %881  ;;  %v12708_v10 = vpop.permute.xlu0 %893 }
 0x19c   : > { %16741 = vst [vmem:[#allocation48_spill] sm:$0xff] %v12706_v26  ;;  %16742 = vst [vmem:[#allocation49_spill] sm:$0xff] %v12708_v10 }
 0x19d   : > { %1301 = vbcast.lane.b32.xlu1 %v12555_v15, 265  ;;  %1313 = vbcast.lane.b32.xlu0 %v12573_v25, 257 }
 0x19f   : > { %v12712_v11 = vpop.permute.xlu1 %889  ;;  %v12714_v62 = vpop.permute.xlu0 %901 }
 0x1a0   : > { %16743 = vst [vmem:[#allocation50_spill] sm:$0xff] %v12712_v11  ;;  %16744 = vst [vmem:[#allocation51_spill] sm:$0xff] %v12714_v62 }
 0x1a1   : > { %1309 = vbcast.lane.b32.xlu1 %v12564_v21, 265  ;;  %1321 = vbcast.lane.b32.xlu0 %v12582_v28, 257 }
 0x1a3   : > { %v12718_v3 = vpop.permute.xlu1 %897  ;;  %v12720_v61 = vpop.permute.xlu0 %909 }
 0x1a4   : > { %16745 = vst [vmem:[#allocation52_spill] sm:$0xff] %v12718_v3  ;;  %16746 = vst [vmem:[#allocation53_spill] sm:$0xff] %v12720_v61 }
 0x1a5   : > { %1317 = vbcast.lane.b32.xlu1 %v12573_v25, 265  ;;  %1329 = vbcast.lane.b32.xlu0 %v12591_v31, 257 }
 0x1a7   : > { %v12724_v10 = vpop.permute.xlu1 %905  ;;  %v12726_v26 = vpop.permute.xlu0 %917 }
 0x1a8   : > { %16747 = vst [vmem:[#allocation54_spill] sm:$0xff] %v12724_v10  ;;  %16748 = vst [vmem:[#allocation55_spill] sm:$0xff] %v12726_v26 }
 0x1a9   : > { %1325 = vbcast.lane.b32.xlu1 %v12582_v28, 265  ;;  %1337 = vbcast.lane.b32.xlu0 %v12600_v0, 257 }
 0x1ab   : > { %v12730_v62 = vpop.permute.xlu1 %913  ;;  %v12732_v11 = vpop.permute.xlu0 %925 }
 0x1ac   : > { %16749 = vst [vmem:[#allocation56_spill] sm:$0xff] %v12730_v62  ;;  %16750 = vst [vmem:[#allocation57_spill] sm:$0xff] %v12732_v11 }
 0x1ad   : > { %1333 = vbcast.lane.b32.xlu1 %v12591_v31, 265  ;;  %1345 = vbcast.lane.b32.xlu0 %v12609_v29, 257 }
 0x1af   : > { %v12736_v61 = vpop.permute.xlu1 %921  ;;  %v12738_v3 = vpop.permute.xlu0 %933 }
 0x1b0   : > { %16751 = vst [vmem:[#allocation58_spill] sm:$0xff] %v12736_v61  ;;  %16752 = vst [vmem:[#allocation59_spill] sm:$0xff] %v12738_v3 }
 0x1b1   : > { %1341 = vbcast.lane.b32.xlu1 %v12600_v0, 265  ;;  %1353 = vbcast.lane.b32.xlu0 %v12618_v27, 257 }
 0x1b3   : > { %v12742_v26 = vpop.permute.xlu1 %929  ;;  %v12744_v10 = vpop.permute.xlu0 %941 }
 0x1b4   : > { %16753 = vst [vmem:[#allocation60_spill] sm:$0xff] %v12742_v26  ;;  %16754 = vst [vmem:[#allocation61_spill] sm:$0xff] %v12744_v10 }
 0x1b5   : > { %1349 = vbcast.lane.b32.xlu1 %v12609_v29, 265  ;;  %1361 = vbcast.lane.b32.xlu0 %v12627_v24, 257 }
 0x1b7   : > { %v12748_v11 = vpop.permute.xlu1 %937  ;;  %v12750_v62 = vpop.permute.xlu0 %949 }
 0x1b8   : > { %16755 = vst [vmem:[#allocation62_spill] sm:$0xff] %v12748_v11  ;;  %16756 = vst [vmem:[#allocation63_spill] sm:$0xff] %v12750_v62 }
 0x1b9   : > { %1357 = vbcast.lane.b32.xlu1 %v12618_v27, 265  ;;  %1369 = vbcast.lane.b32.xlu0 %v12636_v32, 257 }
 0x1bb   : > { %v12754_v3 = vpop.permute.xlu1 %945  ;;  %v12756_v61 = vpop.permute.xlu0 %957 }
 0x1bc   : > { %16757 = vst [vmem:[#allocation64_spill] sm:$0xff] %v12754_v3  ;;  %16758 = vst [vmem:[#allocation65_spill] sm:$0xff] %v12756_v61 }
 0x1bd   : > { %1365 = vbcast.lane.b32.xlu1 %v12627_v24, 265  ;;  %1377 = vbcast.lane.b32.xlu0 %v12645_v23, 257 }
 0x1bf   : > { %v12760_v10 = vpop.permute.xlu1 %953  ;;  %v12762_v26 = vpop.permute.xlu0 %965 }
 0x1c0   : > { %16759 = vst [vmem:[#allocation66_spill] sm:$0xff] %v12760_v10  ;;  %16760 = vst [vmem:[#allocation67_spill] sm:$0xff] %v12762_v26 }
 0x1c1   : > { %1373 = vbcast.lane.b32.xlu1 %v12636_v32, 265  ;;  %1385 = vbcast.lane.b32.xlu0 %v12654_v19, 257 }
 0x1c3   : > { %v12766_v62 = vpop.permute.xlu1 %961  ;;  %v12768_v11 = vpop.permute.xlu0 %973 }
 0x1c4   : > { %16761 = vst [vmem:[#allocation68_spill] sm:$0xff] %v12766_v62  ;;  %16762 = vst [vmem:[#allocation69_spill] sm:$0xff] %v12768_v11 }
 0x1c5   : > { %1381 = vbcast.lane.b32.xlu1 %v12645_v23, 265  ;;  %1393 = vbcast.lane.b32.xlu0 %v12663_v17, 257 }
 0x1c7   : > { %v12772_v61 = vpop.permute.xlu1 %969  ;;  %v12774_v3 = vpop.permute.xlu0 %1055 }
 0x1c8   : > { %16763 = vst [vmem:[#allocation70_spill] sm:$0xff] %v12772_v61  ;;  %16764 = vst [vmem:[#allocation71_spill] sm:$0xff] %v12774_v3 }
 0x1c9   : > { %1389 = vbcast.lane.b32.xlu1 %v12654_v19, 265  ;;  %1401 = vbcast.lane.b32.xlu0 %v12672_v13, 257 }
 0x1cb   : > { %v12778_v26 = vpop.permute.xlu1 %977  ;;  %v12780_v10 = vpop.permute.xlu0 %1066 }
 0x1cc   : > { %16765 = vst [vmem:[#allocation72_spill] sm:$0xff] %v12780_v10 }
 0x1cd   : > { %1397 = vbcast.lane.b32.xlu1 %v12663_v17, 265  ;;  %1409 = vbcast.lane.b32.xlu0 %v12681_v63, 257 }
 0x1cf   : > { %v12784_v62 = vpop.permute.xlu1 %1059  ;;  %v12786_v11 = vpop.permute.xlu0 %1077 }
 0x1d0   : > { %16766 = vst [vmem:[#allocation73_spill] sm:$0xff] %v12784_v62  ;;  %16767 = vst [vmem:[#allocation74_spill] sm:$0xff] %v12786_v11 }
 0x1d1   : > { %1405 = vbcast.lane.b32.xlu1 %v12672_v13, 265  ;;  %1417 = vbcast.lane.b32.xlu0 %v12690_v9, 257 }
 0x1d3   : > { %v12790_v3 = vpop.permute.xlu1 %1070  ;;  %v12792_v61 = vpop.permute.xlu0 %1088 }
 0x1d4   : > { %16768 = vst [vmem:[#allocation75_spill] sm:$0xff] %v12790_v3  ;;  %16769 = vst [vmem:[#allocation76_spill] sm:$0xff] %v12792_v61 }
 0x1d5   : > { %1413 = vbcast.lane.b32.xlu1 %v12681_v63, 265  ;;  %1494 = vbcast.lane.b32.xlu0 %v12555_v15, 258 }
 0x1d7   : > { %v12796_v10 = vpop.permute.xlu1 %1081  ;;  %v12798_v6 = vpop.permute.xlu0 %1099 }
 0x1d8   : > { %16770 = vst [vmem:[#allocation77_spill] sm:$0xff] %v12796_v10  ;;  %16771 = vst [vmem:[#allocation78_spill] sm:$0xff] %v12798_v6 }
 0x1d9   : > { %1421 = vbcast.lane.b32.xlu1 %v12690_v9, 265  ;;  %1502 = vbcast.lane.b32.xlu0 %v12564_v21, 258 }
 0x1db   : > { %v12802_v11 = vpop.permute.xlu1 %1092  ;;  %v12804_v62 = vpop.permute.xlu0 %1110 }
 0x1dc   : > { %16772 = vst [vmem:[#allocation79_spill] sm:$0xff] %v12802_v11  ;;  %16773 = vst [vmem:[#allocation80_spill] sm:$0xff] %v12804_v62  ;;  %v13130_v11 = vld [vmem:[%s16685_s1 + $0x3] ss:$0 sm:$0xff] }
 0x1dd   : > { %1498 = vbcast.lane.b32.xlu1 %v12555_v15, 266  ;;  %1510 = vbcast.lane.b32.xlu0 %v12573_v25, 258 }
 0x1df   : > { %v12808_v61 = vpop.permute.xlu1 %1103  ;;  %v12810_v3 = vpop.permute.xlu0 %1121 }
 0x1e0   : > { %16774 = vst [vmem:[#allocation81_spill] sm:$0xff] %v12808_v61  ;;  %16775 = vst [vmem:[#allocation82_spill] sm:$0xff] %v12810_v3 }
 0x1e1   : > { %1506 = vbcast.lane.b32.xlu1 %v12564_v21, 266  ;;  %1518 = vbcast.lane.b32.xlu0 %v12582_v28, 258 }
 0x1e3   : > { %v12814_v6 = vpop.permute.xlu1 %1114  ;;  %v12816_v10 = vpop.permute.xlu0 %1132 }
 0x1e4   : > { %16776 = vst [vmem:[#allocation83_spill] sm:$0xff] %v12814_v6  ;;  %16777 = vst [vmem:[#allocation84_spill] sm:$0xff] %v12816_v10 }
 0x1e5   : > { %1514 = vbcast.lane.b32.xlu1 %v12573_v25, 266  ;;  %1526 = vbcast.lane.b32.xlu0 %v12591_v31, 258 }
 0x1e7   : > { %v12820_v62 = vpop.permute.xlu1 %1125  ;;  %v12822_v15 = vpop.permute.xlu0 %1143 }
 0x1e8   : > { %16778 = vst [vmem:[#allocation85_spill] sm:$0xff] %v12820_v62  ;;  %16779 = vst [vmem:[#allocation86_spill] sm:$0xff] %v12822_v15 }
 0x1e9   : > { %1522 = vbcast.lane.b32.xlu1 %v12582_v28, 266  ;;  %1534 = vbcast.lane.b32.xlu0 %v12600_v0, 258 }
 0x1eb   : > { %v12826_v3 = vpop.permute.xlu1 %1136  ;;  %v12828_v21 = vpop.permute.xlu0 %1154 }
 0x1ec   : > { %16780 = vst [vmem:[#allocation87_spill] sm:$0xff] %v12826_v3  ;;  %16781 = vst [vmem:[#allocation88_spill] sm:$0xff] %v12828_v21 }
 0x1ed   : > { %1530 = vbcast.lane.b32.xlu1 %v12591_v31, 266  ;;  %1542 = vbcast.lane.b32.xlu0 %v12609_v29, 258 }
 0x1ef   : > { %v12832_v10 = vpop.permute.xlu1 %1147  ;;  %v12834_v25 = vpop.permute.xlu0 %1165 }
 0x1f0   : > { %16782 = vst [vmem:[#allocation89_spill] sm:$0xff] %v12832_v10  ;;  %16783 = vst [vmem:[#allocation90_spill] sm:$0xff] %v12834_v25  ;;  %v1689_v10 = vld [vmem:[#allocation2 + $0xa] sm:$0xff] }
 0x1f1   : > { %1538 = vbcast.lane.b32.xlu1 %v12600_v0, 266  ;;  %1550 = vbcast.lane.b32.xlu0 %v12618_v27, 258  ;;  %v12963_v3 = vrot.slane %v1689_v10, %v12316_v8 }
 0x1f3   : > { %v12838_v15 = vpop.permute.xlu1 %1158  ;;  %v12840_v28 = vpop.permute.xlu0 %1176 }
 0x1f4   : > { %16784 = vst [vmem:[#allocation91_spill] sm:$0xff] %v12838_v15  ;;  %16785 = vst [vmem:[#allocation92_spill] sm:$0xff] %v12840_v28 }
 0x1f5   : > { %1546 = vbcast.lane.b32.xlu1 %v12609_v29, 266  ;;  %1558 = vbcast.lane.b32.xlu0 %v12627_v24, 258 }
 0x1f7   : > { %v12844_v21 = vpop.permute.xlu1 %1169  ;;  %v12846_v31 = vpop.permute.xlu0 %1187 }
 0x1f8   : > { %16786 = vst [vmem:[#allocation93_spill] sm:$0xff] %v12844_v21  ;;  %16787 = vst [vmem:[#allocation94_spill] sm:$0xff] %v12846_v31 }
 0x1f9   : > { %1554 = vbcast.lane.b32.xlu1 %v12618_v27, 266  ;;  %1566 = vbcast.lane.b32.xlu0 %v12636_v32, 258 }
 0x1fb   : > { %v12850_v25 = vpop.permute.xlu1 %1180  ;;  %v12852_v0 = vpop.permute.xlu0 %1198 }
 0x1fc   : > { %16788 = vst [vmem:[#allocation95_spill] sm:$0xff] %v12850_v25  ;;  %16789 = vst [vmem:[#allocation96_spill] sm:$0xff] %v12852_v0 }
 0x1fd   : > { %1562 = vbcast.lane.b32.xlu1 %v12627_v24, 266  ;;  %1574 = vbcast.lane.b32.xlu0 %v12645_v23, 258 }
 0x1ff   : > { %v12856_v28 = vpop.permute.xlu1 %1191  ;;  %v12858_v29 = vpop.permute.xlu0 %1209 }
 0x200   : > { %16790 = vst [vmem:[#allocation97_spill] sm:$0xff] %v12856_v28  ;;  %16791 = vst [vmem:[#allocation98_spill] sm:$0xff] %v12858_v29  ;;  %v1688_v28 = vld [vmem:[#allocation2 + $0x2] sm:$0xff] }
 0x201   : > { %1570 = vbcast.lane.b32.xlu1 %v12636_v32, 266  ;;  %1582 = vbcast.lane.b32.xlu0 %v12654_v19, 258  ;;  %v12891_v25 = vrot.slane %v1688_v28, %v12316_v8  ;;  %v12945_v21 = vrot.slane %v1688_v28, %v12357_v20  ;;  %v12954_v15 = vrot.slane %v1688_v28, %v12365_v22 }
 0x202   : > { %v12981_v8 = vrot.slane %v1689_v10, %v12325_v12 }
 0x203   : > { %v12862_v31 = vpop.permute.xlu1 %1202  ;;  %v12864_v27 = vpop.permute.xlu0 %1220 }
 0x204   : > { %16792 = vst [vmem:[#allocation99_spill] sm:$0xff] %v12862_v31 }
 0x205   : > { %1578 = vbcast.lane.b32.xlu1 %v12645_v23, 266  ;;  %1590 = vbcast.lane.b32.xlu0 %v12663_v17, 258 }
 0x207   : > { %v12868_v0 = vpop.permute.xlu1 %1213  ;;  %v12870_v24 = vpop.permute.xlu0 %1297 }
 0x208   : > { %16793 = vst [vmem:[#allocation100_spill] sm:$0xff] %v12868_v0  ;;  %16794 = vst [vmem:[#allocation101_spill] sm:$0xff] %v12870_v24 }
 0x209   : > { %1586 = vbcast.lane.b32.xlu1 %v12654_v19, 266  ;;  %1598 = vbcast.lane.b32.xlu0 %v12672_v13, 258 }
 0x20b   : > { %v12874_v29 = vpop.permute.xlu1 %1224  ;;  %v12876_v32 = vpop.permute.xlu0 %1305 }
 0x20c   : > { %16795 = vst [vmem:[#allocation102_spill] sm:$0xff] %v12876_v32  ;;  %v12936_v32 = vrot.slane %v1688_v28, %v12349_v18 }
 0x20d   : > { %1594 = vbcast.lane.b32.xlu1 %v12663_v17, 266  ;;  %1606 = vbcast.lane.b32.xlu0 %v12681_v63, 258 }
 0x20f   : > { %v12880_v31 = vpop.permute.xlu1 %1301  ;;  %v12882_v23 = vpop.permute.xlu0 %1313 }
 0x210   : > { %16796 = vst [vmem:[#allocation103_spill] sm:$0xff] %v12880_v31  ;;  %16797 = vst [vmem:[#allocation104_spill] sm:$0xff] %v12882_v23  ;;  %v12900_v23 = vrot.slane %v1688_v28, %v12313_v7 }
 0x211   : > { %1602 = vbcast.lane.b32.xlu1 %v12672_v13, 266  ;;  %1614 = vbcast.lane.b32.xlu0 %v12690_v9, 258 }
 0x213   : > { %v12886_v19 = vpop.permute.xlu1 %1309  ;;  %v12888_v24 = vpop.permute.xlu0 %1321 }
 0x214   : > { %16798 = vst [vmem:[#allocation105_spill] sm:$0xff] %v12886_v19  ;;  %16799 = vst [vmem:[#allocation106_spill] sm:$0xff] %v12888_v24  ;;  %v12909_v19 = vrot.slane %v1688_v28, %v12325_v12  ;;  %v12999_v12 = vrot.slane %v1689_v10, %v12341_v16 }
 0x215   : > { %1610 = vbcast.lane.b32.xlu1 %v12681_v63, 266  ;;  %1696 = vbcast.lane.b32.xlu0 %v12891_v25, 256 }
 0x217   : > { %v12895_v17 = vpop.permute.xlu1 %1317  ;;  %v12897_v31 = vpop.permute.xlu0 %1329 }
 0x218   : > { %16800 = vst [vmem:[#allocation107_spill] sm:$0xff] %v12895_v17  ;;  %16801 = vst [vmem:[#allocation108_spill] sm:$0xff] %v12897_v31  ;;  %v12918_v17 = vrot.slane %v1688_v28, %v12333_v14 }
 0x219   : > { %1618 = vbcast.lane.b32.xlu1 %v12690_v9, 266  ;;  %1707 = vbcast.lane.b32.xlu0 %v12900_v23, 256 }
 0x21b   : > { %v12904_v13 = vpop.permute.xlu1 %1325  ;;  %v12906_v24 = vpop.permute.xlu0 %1337 }
 0x21c   : > { %16802 = vst [vmem:[#allocation109_spill] sm:$0xff] %v12904_v13  ;;  %16803 = vst [vmem:[#allocation110_spill] sm:$0xff] %v12906_v24  ;;  %v12927_v13 = vrot.slane %v1688_v28, %v12341_v16  ;;  %v13017_v16 = vrot.slane %v1689_v10, %v12357_v20 }
 0x21d   : > { %1700 = vbcast.lane.b32.xlu1 %v12891_v25, 264  ;;  %1718 = vbcast.lane.b32.xlu0 %v12909_v19, 256 }
 0x21f   : > { %v12913_v63 = vpop.permute.xlu1 %1333  ;;  %v12915_v31 = vpop.permute.xlu0 %1345 }
 0x220   : > { %16804 = vst [vmem:[#allocation111_spill] sm:$0xff] %v12913_v63  ;;  %16805 = vst [vmem:[#allocation112_spill] sm:$0xff] %v12915_v31 }
 0x221   : > { %1711 = vbcast.lane.b32.xlu1 %v12900_v23, 264  ;;  %1729 = vbcast.lane.b32.xlu0 %v12918_v17, 256 }
 0x223   : > { %v12922_v9 = vpop.permute.xlu1 %1341  ;;  %v12924_v24 = vpop.permute.xlu0 %1353 }
 0x224   : > { %16806 = vst [vmem:[#allocation113_spill] sm:$0xff] %v12922_v9  ;;  %16807 = vst [vmem:[#allocation114_spill] sm:$0xff] %v12924_v24 }
 0x225   : > { %1722 = vbcast.lane.b32.xlu1 %v12909_v19, 264  ;;  %1740 = vbcast.lane.b32.xlu0 %v12927_v13, 256 }
 0x227   : > { %v12931_v63 = vpop.permute.xlu1 %1349  ;;  %v12933_v31 = vpop.permute.xlu0 %1361 }
 0x228   : > { %16808 = vst [vmem:[#allocation115_spill] sm:$0xff] %v12931_v63  ;;  %16809 = vst [vmem:[#allocation116_spill] sm:$0xff] %v12933_v31 }
 0x229   : > { %1733 = vbcast.lane.b32.xlu1 %v12918_v17, 264  ;;  %1751 = vbcast.lane.b32.xlu0 %v12936_v32, 256 }
 0x22b   : > { %v12940_v9 = vpop.permute.xlu1 %1357  ;;  %v12942_v24 = vpop.permute.xlu0 %1369 }
 0x22c   : > { %16810 = vst [vmem:[#allocation117_spill] sm:$0xff] %v12940_v9  ;;  %16811 = vst [vmem:[#allocation118_spill] sm:$0xff] %v12942_v24 }
 0x22d   : > { %1744 = vbcast.lane.b32.xlu1 %v12927_v13, 264  ;;  %1762 = vbcast.lane.b32.xlu0 %v12945_v21, 256 }
 0x22f   : > { %v12949_v63 = vpop.permute.xlu1 %1365  ;;  %v12951_v31 = vpop.permute.xlu0 %1377 }
 0x230   : > { %16812 = vst [vmem:[#allocation119_spill] sm:$0xff] %v12949_v63  ;;  %16813 = vst [vmem:[#allocation120_spill] sm:$0xff] %v12951_v31  ;;  %v12972_v63 = vrot.slane %v1689_v10, %v12313_v7  ;;  %v12990_v7 = vrot.slane %v1689_v10, %v12333_v14  ;;  %v13008_v14 = vrot.slane %v1689_v10, %v12349_v18 }
 0x231   : > { %1755 = vbcast.lane.b32.xlu1 %v12936_v32, 264  ;;  %1773 = vbcast.lane.b32.xlu0 %v12954_v15, 256  ;;  %v13026_v18 = vrot.slane %v1689_v10, %v12365_v22 }
 0x233   : > { %v12958_v24 = vpop.permute.xlu1 %1373  ;;  %v12960_v9 = vpop.permute.xlu0 %1385  ;;  %16829 = vst [vmem:[#allocation136_spill] sm:$0xff] %v13026_v18 }
 0x234   : > { %16814 = vst [vmem:[#allocation121_spill] sm:$0xff] %v12958_v24  ;;  %16815 = vst [vmem:[#allocation122_spill] sm:$0xff] %v12960_v9 }
 0x235   : > { %1766 = vbcast.lane.b32.xlu1 %v12945_v21, 264  ;;  %1784 = vbcast.lane.b32.xlu0 %v12963_v3, 256 }
 0x237   : > { %v12967_v31 = vpop.permute.xlu1 %1381  ;;  %v12969_v28 = vpop.permute.xlu0 %1393 }
 0x238   : > { %16816 = vst [vmem:[#allocation123_spill] sm:$0xff] %v12967_v31  ;;  %16817 = vst [vmem:[#allocation124_spill] sm:$0xff] %v12969_v28 }
 0x239   : > { %1777 = vbcast.lane.b32.xlu1 %v12954_v15, 264  ;;  %1795 = vbcast.lane.b32.xlu0 %v12972_v63, 256 }
 0x23b   : > { %v12976_v24 = vpop.permute.xlu1 %1389  ;;  %v12978_v9 = vpop.permute.xlu0 %1401 }
 0x23c   : > { %16818 = vst [vmem:[#allocation125_spill] sm:$0xff] %v12976_v24  ;;  %16819 = vst [vmem:[#allocation126_spill] sm:$0xff] %v12978_v9 }
 0x23d   : > { %1788 = vbcast.lane.b32.xlu1 %v12963_v3, 264  ;;  %1806 = vbcast.lane.b32.xlu0 %v12981_v8, 256 }
 0x23f   : > { %v12985_v31 = vpop.permute.xlu1 %1397  ;;  %v12987_v28 = vpop.permute.xlu0 %1409 }
 0x240   : > { %16820 = vst [vmem:[#allocation127_spill] sm:$0xff] %v12985_v31  ;;  %16821 = vst [vmem:[#allocation128_spill] sm:$0xff] %v12987_v28 }
 0x241   : > { %1799 = vbcast.lane.b32.xlu1 %v12972_v63, 264  ;;  %1817 = vbcast.lane.b32.xlu0 %v12990_v7, 256 }
 0x243   : > { %v12994_v24 = vpop.permute.xlu1 %1405  ;;  %v12996_v9 = vpop.permute.xlu0 %1417 }
 0x244   : > { %16822 = vst [vmem:[#allocation129_spill] sm:$0xff] %v12994_v24  ;;  %16823 = vst [vmem:[#allocation130_spill] sm:$0xff] %v12996_v9 }
 0x245   : > { %1810 = vbcast.lane.b32.xlu1 %v12981_v8, 264  ;;  %1828 = vbcast.lane.b32.xlu0 %v12999_v12, 256 }
 0x247   : > { %v13003_v31 = vpop.permute.xlu1 %1413  ;;  %v13005_v28 = vpop.permute.xlu0 %1494 }
 0x248   : > { %16824 = vst [vmem:[#allocation131_spill] sm:$0xff] %v13003_v31  ;;  %16825 = vst [vmem:[#allocation132_spill] sm:$0xff] %v13005_v28 }
 0x249   : > { %1821 = vbcast.lane.b32.xlu1 %v12990_v7, 264  ;;  %1839 = vbcast.lane.b32.xlu0 %v13008_v14, 256 }
 0x24b   : > { %v13012_v24 = vpop.permute.xlu1 %1421  ;;  %v13014_v62 = vpop.permute.xlu0 %1502 }
 0x24c   : > { %16826 = vst [vmem:[#allocation133_spill] sm:$0xff] %v13014_v62 }
 0x24d   : > { %1832 = vbcast.lane.b32.xlu1 %v12999_v12, 264  ;;  %1850 = vbcast.lane.b32.xlu0 %v13017_v16, 256 }
 0x24f   : > { %v13021_v6 = vpop.permute.xlu1 %1498  ;;  %v13023_v28 = vpop.permute.xlu0 %1510 }
 0x250   : > { %16827 = vst [vmem:[#allocation134_spill] sm:$0xff] %v13021_v6  ;;  %16828 = vst [vmem:[#allocation135_spill] sm:$0xff] %v13023_v28 }
 0x251   : > { %1843 = vbcast.lane.b32.xlu1 %v13008_v14, 264  ;;  %1861 = vbcast.lane.b32.xlu0 %v13026_v18, 256 }
 0x253   : > { %v13030_v61 = vpop.permute.xlu1 %1506  ;;  %v13032_v62 = vpop.permute.xlu0 %1518 }
 0x254   : > { %16830 = vst [vmem:[#allocation137_spill] sm:$0xff] %v13030_v61  ;;  %16831 = vst [vmem:[#allocation138_spill] sm:$0xff] %v13032_v62 }
 0x255   : > { %1854 = vbcast.lane.b32.xlu1 %v13017_v16, 264  ;;  %1938 = vbcast.lane.b32.xlu0 %v12891_v25, 257 }
 0x257   : > { %v13036_v20 = vpop.permute.xlu1 %1514  ;;  %v13038_v6 = vpop.permute.xlu0 %1526 }
 0x258   : > { %16832 = vst [vmem:[#allocation139_spill] sm:$0xff] %v13036_v20  ;;  %16833 = vst [vmem:[#allocation140_spill] sm:$0xff] %v13038_v6 }
 0x259   : > { %1865 = vbcast.lane.b32.xlu1 %v13026_v18, 264  ;;  %1946 = vbcast.lane.b32.xlu0 %v12900_v23, 257 }
 0x25b   : > { %v13042_v22 = vpop.permute.xlu1 %1522  ;;  %v13044_v10 = vpop.permute.xlu0 %1534 }
 0x25c   : > { %16834 = vst [vmem:[#allocation141_spill] sm:$0xff] %v13042_v22  ;;  %16835 = vst [vmem:[#allocation142_spill] sm:$0xff] %v13044_v10 }
 0x25d   : > { %1942 = vbcast.lane.b32.xlu1 %v12891_v25, 265  ;;  %1954 = vbcast.lane.b32.xlu0 %v12909_v19, 257 }
 0x25f   : > { %v13048_v62 = vpop.permute.xlu1 %1530  ;;  %v13050_v61 = vpop.permute.xlu0 %1542 }
 0x260   : > { %16836 = vst [vmem:[#allocation143_spill] sm:$0xff] %v13048_v62  ;;  %16837 = vst [vmem:[#allocation144_spill] sm:$0xff] %v13050_v61 }
 0x261   : > { %1950 = vbcast.lane.b32.xlu1 %v12900_v23, 265  ;;  %1962 = vbcast.lane.b32.xlu0 %v12918_v17, 257 }
 0x263   : > { %v13054_v6 = vpop.permute.xlu1 %1538  ;;  %v13056_v20 = vpop.permute.xlu0 %1550 }
 0x264   : > { %16838 = vst [vmem:[#allocation145_spill] sm:$0xff] %v13054_v6  ;;  %16839 = vst [vmem:[#allocation146_spill] sm:$0xff] %v13056_v20 }
 0x265   : > { %1958 = vbcast.lane.b32.xlu1 %v12909_v19, 265  ;;  %1970 = vbcast.lane.b32.xlu0 %v12927_v13, 257 }
 0x267   : > { %v13060_v10 = vpop.permute.xlu1 %1546  ;;  %v13062_v22 = vpop.permute.xlu0 %1558 }
 0x268   : > { %16840 = vst [vmem:[#allocation147_spill] sm:$0xff] %v13060_v10  ;;  %16841 = vst [vmem:[#allocation148_spill] sm:$0xff] %v13062_v22 }
 0x269   : > { %1966 = vbcast.lane.b32.xlu1 %v12918_v17, 265  ;;  %1978 = vbcast.lane.b32.xlu0 %v12936_v32, 257 }
 0x26b   : > { %v13066_v61 = vpop.permute.xlu1 %1554  ;;  %v13068_v62 = vpop.permute.xlu0 %1566 }
 0x26c   : > { %16842 = vst [vmem:[#allocation149_spill] sm:$0xff] %v13066_v61  ;;  %16843 = vst [vmem:[#allocation150_spill] sm:$0xff] %v13068_v62 }
 0x26d   : > { %1974 = vbcast.lane.b32.xlu1 %v12927_v13, 265  ;;  %1986 = vbcast.lane.b32.xlu0 %v12945_v21, 257 }
 0x26f   : > { %v13072_v20 = vpop.permute.xlu1 %1562  ;;  %v13074_v6 = vpop.permute.xlu0 %1574 }
 0x270   : > { %16844 = vst [vmem:[#allocation151_spill] sm:$0xff] %v13072_v20  ;;  %16845 = vst [vmem:[#allocation152_spill] sm:$0xff] %v13074_v6 }
 0x271   : > { %1982 = vbcast.lane.b32.xlu1 %v12936_v32, 265  ;;  %1994 = vbcast.lane.b32.xlu0 %v12954_v15, 257 }
 0x273   : > { %v13078_v22 = vpop.permute.xlu1 %1570  ;;  %v13080_v10 = vpop.permute.xlu0 %1582 }
 0x274   : > { %16846 = vst [vmem:[#allocation153_spill] sm:$0xff] %v13078_v22  ;;  %16847 = vst [vmem:[#allocation154_spill] sm:$0xff] %v13080_v10 }
 0x275   : > { %1990 = vbcast.lane.b32.xlu1 %v12945_v21, 265  ;;  %2002 = vbcast.lane.b32.xlu0 %v12963_v3, 257 }
 0x277   : > { %v13084_v62 = vpop.permute.xlu1 %1578  ;;  %v13086_v61 = vpop.permute.xlu0 %1590 }
 0x278   : > { %16848 = vst [vmem:[#allocation155_spill] sm:$0xff] %v13084_v62  ;;  %16849 = vst [vmem:[#allocation156_spill] sm:$0xff] %v13086_v61  ;;  %v13103_v61 = vld [vmem:[%s16685_s1 + $0x1] ss:$0 sm:$0xff] }
 0x279   : > { %1998 = vbcast.lane.b32.xlu1 %v12954_v15, 265  ;;  %2010 = vbcast.lane.b32.xlu0 %v12972_v63, 257 }
 0x27b   : > { %v13090_v6 = vpop.permute.xlu1 %1586  ;;  %v13092_v20 = vpop.permute.xlu0 %1598 }
 0x27c   : > { %16850 = vst [vmem:[#allocation157_spill] sm:$0xff] %v13090_v6  ;;  %16851 = vst [vmem:[#allocation158_spill] sm:$0xff] %v13092_v20  ;;  %v817_v20 = vmul.f32 %v13103_v61, %v12676_v30  ;;  %v13112_v6 = vld [vmem:[%s16685_s1] ss:$0 sm:$0xff] }
 0x27d   : > { %2006 = vbcast.lane.b32.xlu1 %v12963_v3, 265  ;;  %2018 = vbcast.lane.b32.xlu0 %v12981_v8, 257  ;;  %v620_v28 = vmul.f32 %v13112_v6, %v12538_v2  ;;  %v13139_v2 = vld [vmem:[%s16685_s1 + $0x4] ss:$0 sm:$0xff] }
 0x27e   : > { %v13147_v9 = vmul.f32 %v13139_v2, %v13012_v24 }
 0x27f   : > { %v13096_v10 = vpop.permute.xlu1 %1594  ;;  %v13098_v22 = vpop.permute.xlu0 %1606  ;;  %v849_v31 = vadd.f32 %v817_v20, %v620_v28 }
 0x280   : > { %16852 = vst [vmem:[#allocation159_spill] sm:$0xff] %v13096_v10  ;;  %16853 = vst [vmem:[#allocation160_spill] sm:$0xff] %v13098_v22  ;;  %v13117_v22 = vld [vmem:[%s16685_s1 + $0x2] ss:$0 sm:$0xff] }
 0x281   : > { %2014 = vbcast.lane.b32.xlu1 %v12972_v63, 265  ;;  %2026 = vbcast.lane.b32.xlu0 %v12990_v7, 257  ;;  %v1014_v30 = vmul.f32 %v13117_v22, %v12778_v26 }
 0x283   : > { %v13119_v10 = vpop.permute.xlu1 %1602  ;;  %v13121_v62 = vpop.permute.xlu0 %1614  ;;  %v1046_v0 = vadd.f32 %v1014_v30, %v849_v31  ;;  %v16859_v31 = vmov 0.0  }
 0x284   : > { %16854 = vst [vmem:[#allocation161_spill] sm:$0xff] %v13119_v10  ;;  %16855 = vst [vmem:[#allocation162_spill] sm:$0xff] %v13121_v62  ;;  %v1261_v10 = vmul.f32 %v13130_v11, %v12874_v29  ;;  %v13156_v29 = vld [vmem:[%s16685_s1 + $0x5] ss:$0 sm:$0xff] }
 0x285   : > { %2022 = vbcast.lane.b32.xlu1 %v12981_v8, 265  ;;  %2034 = vbcast.lane.b32.xlu0 %v12999_v12, 257  ;;  %288 = vst.msk [vmem:[#allocation3 + $0x18] sm:$0xff] %vm283_vm3, %v16859_v31  ;;  %289 = vst.msk [vmem:[#allocation3 + $0x20] sm:$0xff] %vm283_vm3, %v16859_v31 }
 0x286   : > { %v13151_v28 = vadd.f32 %v1261_v10, %v1046_v0  ;;  %284 = vst.msk [vmem:[#allocation3] sm:$0xff] %vm283_vm3, %v16859_v31  ;;  %285 = vst.msk [vmem:[#allocation3 + $0x8] sm:$0xff] %vm283_vm3, %v16859_v31 }
 0x287   : > { %v13141_v62 = vpop.permute.xlu1 %1610  ;;  %v13143_v26 = vpop.permute.xlu0 %1696  ;;  %291 = vst.msk [vmem:[#allocation3 + $0x30] sm:$0xff] %vm283_vm3, %v16859_v31  ;;  %292 = vst.msk [vmem:[#allocation3 + $0x38] sm:$0xff] %vm283_vm3, %v16859_v31 }
 0x288   : > { %16856 = vst [vmem:[#allocation163_spill] sm:$0xff] %v13141_v62  ;;  %16857 = vst [vmem:[#allocation164_spill] sm:$0xff] %v13143_v26  ;;  %v1490_v0 = vadd.f32 %v13147_v9, %v13151_v28 }
 0x289   : > { %2030 = vbcast.lane.b32.xlu1 %v12990_v7, 265  ;;  %2042 = vbcast.lane.b32.xlu0 %v13008_v14, 257  ;;  %294 = vst.msk [vmem:[#allocation3 + $0x48] sm:$0xff] %vm283_vm3, %v16859_v31  ;;  %295 = vst.msk [vmem:[#allocation3 + $0x50] sm:$0xff] %vm283_vm3, %v16859_v31 }
 0x28a   : > { %297 = vst.msk [vmem:[#allocation3 + $0x60] sm:$0xff] %vm283_vm3, %v16859_v31  ;;  %298 = vst.msk [vmem:[#allocation3 + $0x68] sm:$0xff] %vm283_vm3, %v16859_v31 }
 0x28b   : > { %v13158_v20 = vpop.permute.xlu1 %1618  ;;  %v13160_v26 = vpop.permute.xlu0 %1707  ;;  %300 = vst.msk [vmem:[#allocation3 + $0x78] sm:$0xff] %vm283_vm3, %v16859_v31  ;;  %301 = vst.msk [vmem:[#allocation3 + $0x80] sm:$0xff] %vm283_vm3, %v16859_v31 }
 0x28c   : > { %16858 = vst [vmem:[#allocation165_spill] sm:$0xff] %v13160_v26  ;;  %303 = vst.msk [vmem:[#allocation3 + $0x90] sm:$0xff] %vm283_vm3, %v16859_v31  ;;  %v1655_v24 = vmul.f32 %v13156_v29, %v13158_v20 }
 0x28d   : > { %304 = vst.msk [vmem:[#allocation3 + $0x98] sm:$0xff] %vm283_vm3, %v16859_v31  ;;  %306 = vst.msk [vmem:[#allocation3 + $0xa8] sm:$0xff] %vm283_vm3, %v16859_v31  ;;  %2038 = vbcast.lane.b32.xlu1 %v12999_v12, 265  ;;  %2050 = vbcast.lane.b32.xlu0 %v13017_v16, 257 }
 0x28e   : > { %307 = vst.msk [vmem:[#allocation3 + $0xb0] sm:$0xff] %vm283_vm3, %v16859_v31  ;;  %309 = vst.msk [vmem:[#allocation3 + $0xc0] sm:$0xff] %vm283_vm3, %v16859_v31  ;;  %v13312_v10 = vadd.f32 %v1655_v24, %v1490_v0 }
 0x28f   : > { %310 = vst.msk [vmem:[#allocation3 + $0xc8] sm:$0xff] %vm283_vm3, %v16859_v31  ;;  %312 = vst.msk [vmem:[#allocation3 + $0xd8] sm:$0xff] %vm283_vm3, %v16859_v31  ;;  %v13314_v30 = vpop.permute.xlu1 %1700  ;;  %v13316_v26 = vpop.permute.xlu0 %1718 }
 0x290   : > { %313 = vst.msk [vmem:[#allocation3 + $0xe0] sm:$0xff] %vm283_vm3, %v16859_v31  ;;  %315 = vst.msk [vmem:[#allocation3 + $0xf0] sm:$0xff] %vm283_vm3, %v16859_v31 }
 0x291   : > { %316 = vst.msk [vmem:[#allocation3 + $0xf8] sm:$0xff] %vm283_vm3, %v16859_v31  ;;  %318 = vst.msk [vmem:[#allocation3 + $0x108] sm:$0xff] %vm283_vm3, %v16859_v31  ;;  %2046 = vbcast.lane.b32.xlu1 %v13008_v14, 265  ;;  %2058 = vbcast.lane.b32.xlu0 %v13026_v18, 257 }
 0x292   : > { %319 = vst.msk [vmem:[#allocation3 + $0x110] sm:$0xff] %vm283_vm3, %v16859_v31  ;;  %321 = vst.msk [vmem:[#allocation3 + $0x120] sm:$0xff] %vm283_vm3, %v16859_v31 }
 0x293   : > { %322 = vst.msk [vmem:[#allocation3 + $0x128] sm:$0xff] %vm283_vm3, %v16859_v31  ;;  %324 = vst.msk [vmem:[#allocation3 + $0x138] sm:$0xff] %vm283_vm3, %v16859_v31  ;;  %v13320_v62 = vpop.permute.xlu1 %1711  ;;  %v13322_v9 = vpop.permute.xlu0 %1729 }
 0x294   : > { %325 = vst.msk [vmem:[#allocation3 + $0x140] sm:$0xff] %vm283_vm3, %v16859_v31  ;;  %327 = vst.msk [vmem:[#allocation3 + $0x150] sm:$0xff] %vm283_vm3, %v16859_v31 }
 0x295   : > { %328 = vst.msk [vmem:[#allocation3 + $0x158] sm:$0xff] %vm283_vm3, %v16859_v31  ;;  %330 = vst.msk [vmem:[#allocation3 + $0x168] sm:$0xff] %vm283_vm3, %v16859_v31  ;;  %2054 = vbcast.lane.b32.xlu1 %v13017_v16, 265  ;;  %2135 = vbcast.lane.b32.xlu0 %v12891_v25, 258 }
 0x296   : > { %331 = vst.msk [vmem:[#allocation3 + $0x170] sm:$0xff] %vm283_vm3, %v16859_v31  ;;  %333 = vst.msk [vmem:[#allocation3 + $0x180] sm:$0xff] %vm283_vm3, %v16859_v31 }
 0x297   : > { %334 = vst.msk [vmem:[#allocation3 + $0x188] sm:$0xff] %vm283_vm3, %v16859_v31  ;;  %336 = vst.msk [vmem:[#allocation3 + $0x198] sm:$0xff] %vm283_vm3, %v16859_v31  ;;  %v13398_v28 = vpop.permute.xlu1 %1722  ;;  %v13400_v20 = vpop.permute.xlu0 %1740 }
 0x298   : > { %337 = vst.msk [vmem:[#allocation3 + $0x1a0] sm:$0xff] %vm283_vm3, %v16859_v31  ;;  %339 = vst.msk [vmem:[#allocation4] sm:$0xff] %vm283_vm3, %v16859_v31 }
 0x299   : > { %340 = vst.msk [vmem:[#allocation4 + $0x8] sm:$0xff] %vm283_vm3, %v16859_v31  ;;  %342 = vst.msk [vmem:[#allocation4 + $0x18] sm:$0xff] %vm283_vm3, %v16859_v31  ;;  %2062 = vbcast.lane.b32.xlu1 %v13026_v18, 265  ;;  %2143 = vbcast.lane.b32.xlu0 %v12900_v23, 258 }
 0x29a   : > { %343 = vst.msk [vmem:[#allocation4 + $0x20] sm:$0xff] %vm283_vm3, %v16859_v31  ;;  %345 = vst.msk [vmem:[#allocation4 + $0x30] sm:$0xff] %vm283_vm3, %v16859_v31 }
 0x29b   : > { %346 = vst.msk [vmem:[#allocation4 + $0x38] sm:$0xff] %vm283_vm3, %v16859_v31  ;;  %348 = vst.msk [vmem:[#allocation4 + $0x48] sm:$0xff] %vm283_vm3, %v16859_v31  ;;  %v13404_v0 = vpop.permute.xlu1 %1733  ;;  %v13406_v24 = vpop.permute.xlu0 %1751 }
 0x29c   : > { %349 = vst.msk [vmem:[#allocation4 + $0x50] sm:$0xff] %vm283_vm3, %v16859_v31  ;;  %351 = vst.msk [vmem:[#allocation4 + $0x60] sm:$0xff] %vm283_vm3, %v16859_v31 }
 0x29d   : > { %352 = vst.msk [vmem:[#allocation4 + $0x68] sm:$0xff] %vm283_vm3, %v16859_v31  ;;  %354 = vst.msk [vmem:[#allocation4 + $0x78] sm:$0xff] %vm283_vm3, %v16859_v31  ;;  %2139 = vbcast.lane.b32.xlu1 %v12891_v25, 266  ;;  %2151 = vbcast.lane.b32.xlu0 %v12909_v19, 258 }
 0x29e   : > { %355 = vst.msk [vmem:[#allocation4 + $0x80] sm:$0xff] %vm283_vm3, %v16859_v31  ;;  %357 = vst.msk [vmem:[#allocation4 + $0x90] sm:$0xff] %vm283_vm3, %v16859_v31 }
 0x29f   : > { %358 = vst.msk [vmem:[#allocation4 + $0x98] sm:$0xff] %vm283_vm3, %v16859_v31  ;;  %360 = vst.msk [vmem:[#allocation4 + $0xa8] sm:$0xff] %vm283_vm3, %v16859_v31 }
 0x2a0   : > { %361 = vst.msk [vmem:[#allocation4 + $0xb0] sm:$0xff] %vm283_vm3, %v16859_v31  ;;  %363 = vst.msk [vmem:[#allocation4 + $0xc0] sm:$0xff] %vm283_vm3, %v16859_v31 }
 0x2a1   : > { %364 = vst.msk [vmem:[#allocation4 + $0xc8] sm:$0xff] %vm283_vm3, %v16859_v31  ;;  %366 = vst.msk [vmem:[#allocation4 + $0xd8] sm:$0xff] %vm283_vm3, %v16859_v31  ;;  %2147 = vbcast.lane.b32.xlu1 %v12900_v23, 266  ;;  %2159 = vbcast.lane.b32.xlu0 %v12918_v17, 258 }
 0x2a2   : > { %367 = vst.msk [vmem:[#allocation4 + $0xe0] sm:$0xff] %vm283_vm3, %v16859_v31  ;;  %369 = vst.msk [vmem:[#allocation4 + $0xf0] sm:$0xff] %vm283_vm3, %v16859_v31 }
 0x2a3   : > { %370 = vst.msk [vmem:[#allocation4 + $0xf8] sm:$0xff] %vm283_vm3, %v16859_v31  ;;  %372 = vst.msk [vmem:[#allocation4 + $0x108] sm:$0xff] %vm283_vm3, %v16859_v31 }
 0x2a4   : > { %373 = vst.msk [vmem:[#allocation4 + $0x110] sm:$0xff] %vm283_vm3, %v16859_v31  ;;  %375 = vst.msk [vmem:[#allocation4 + $0x120] sm:$0xff] %vm283_vm3, %v16859_v31 }
 0x2a5   : > { %376 = vst.msk [vmem:[#allocation4 + $0x128] sm:$0xff] %vm283_vm3, %v16859_v31  ;;  %378 = vst.msk [vmem:[#allocation4 + $0x138] sm:$0xff] %vm283_vm3, %v16859_v31  ;;  %2155 = vbcast.lane.b32.xlu1 %v12909_v19, 266  ;;  %2167 = vbcast.lane.b32.xlu0 %v12927_v13, 258 }
 0x2a6   : > { %379 = vst.msk [vmem:[#allocation4 + $0x140] sm:$0xff] %vm283_vm3, %v16859_v31  ;;  %381 = vst.msk [vmem:[#allocation4 + $0x150] sm:$0xff] %vm283_vm3, %v16859_v31 }
 0x2a7   : > { %382 = vst.msk [vmem:[#allocation4 + $0x158] sm:$0xff] %vm283_vm3, %v16859_v31  ;;  %384 = vst.msk [vmem:[#allocation4 + $0x168] sm:$0xff] %vm283_vm3, %v16859_v31 }
 0x2a8   : > { %385 = vst.msk [vmem:[#allocation4 + $0x170] sm:$0xff] %vm283_vm3, %v16859_v31  ;;  %387 = vst.msk [vmem:[#allocation4 + $0x180] sm:$0xff] %vm283_vm3, %v16859_v31 }
 0x2a9   : > { %388 = vst.msk [vmem:[#allocation4 + $0x188] sm:$0xff] %vm283_vm3, %v16859_v31  ;;  %390 = vst.msk [vmem:[#allocation4 + $0x198] sm:$0xff] %vm283_vm3, %v16859_v31  ;;  %2163 = vbcast.lane.b32.xlu1 %v12918_v17, 266  ;;  %2175 = vbcast.lane.b32.xlu0 %v12936_v32, 258  ;;  %v591_v17 = vmul.f32 %v13112_v6, %v12444_v34  ;;  %v13456_v34 = vmul.f32 %v13112_v6, %v12462_v40 }
 0x2aa   : > { %391 = vst.msk [vmem:[#allocation4 + $0x1a0] sm:$0xff] %vm283_vm3, %v16859_v31  ;;  %16860 = vst [vmem:[#allocation166_spill] sm:$0xff] %v13314_v30  ;;  %v13480_v40 = vmul.f32 %v13112_v6, %v12478_v45  ;;  %v13502_v45 = vmul.f32 %v13112_v6, %v12492_v50  ;;  %v13522_v50 = vmul.f32 %v13112_v6, %v12508_v55 }
 0x2ab   : > { %16861 = vst [vmem:[#allocation167_spill] sm:$0xff] %v13316_v26  ;;  %16862 = vst [vmem:[#allocation168_spill] sm:$0xff] %v13320_v62  ;;  %v13412_v62 = vpop.permute.xlu0 %1762  ;;  %v13542_v55 = vmul.f32 %v13112_v6, %v12520_v59  ;;  %v16883_v59 = vld [vmem:[#allocation9_spill] sm:$0xff] }
 0x2ac   : > { %16863 = vst [vmem:[#allocation169_spill] sm:$0xff] %v13322_v9  ;;  %287 = vst.msk [vmem:[#allocation3 + $0x10] sm:$0x3] %vm286_vm4, %v16859_v31  ;;  %v13410_v9 = vpop.permute.xlu1 %1744 }
 0x2ad   : > { %290 = vst.msk [vmem:[#allocation3 + $0x28] sm:$0x3] %vm286_vm4, %v16859_v31  ;;  %338 = vst.msk [vmem:[#allocation3 + $0x1a8] sm:$0x3] %vm286_vm4, %v16859_v31  ;;  %2171 = vbcast.lane.b32.xlu1 %v12927_v13, 266  ;;  %2183 = vbcast.lane.b32.xlu0 %v12945_v21, 258  ;;  %v593_v13 = vmul.f32 %v13112_v6, %v12450_v36 }
 0x2ae   : > { %341 = vst.msk [vmem:[#allocation4 + $0x10] sm:$0x3] %vm286_vm4, %v16859_v31  ;;  %344 = vst.msk [vmem:[#allocation4 + $0x28] sm:$0x3] %vm286_vm4, %v16859_v31 }
 0x2af   : > { %347 = vst.msk [vmem:[#allocation4 + $0x40] sm:$0x3] %vm286_vm4, %v16859_v31  ;;  %350 = vst.msk [vmem:[#allocation4 + $0x58] sm:$0x3] %vm286_vm4, %v16859_v31 }
 0x2b0   : > { %353 = vst.msk [vmem:[#allocation4 + $0x70] sm:$0x3] %vm286_vm4, %v16859_v31  ;;  %356 = vst.msk [vmem:[#allocation4 + $0x88] sm:$0x3] %vm286_vm4, %v16859_v31 }
 0x2b1   : > { %359 = vst.msk [vmem:[#allocation4 + $0xa0] sm:$0x3] %vm286_vm4, %v16859_v31  ;;  %362 = vst.msk [vmem:[#allocation4 + $0xb8] sm:$0x3] %vm286_vm4, %v16859_v31  ;;  %2179 = vbcast.lane.b32.xlu1 %v12936_v32, 266  ;;  %2191 = vbcast.lane.b32.xlu0 %v12954_v15, 258  ;;  %v13460_v32 = vmul.f32 %v13112_v6, %v12466_v41  ;;  %v13484_v41 = vmul.f32 %v13112_v6, %v12480_v46 }
 0x2b2   : > { %365 = vst.msk [vmem:[#allocation4 + $0xd0] sm:$0x3] %vm286_vm4, %v16859_v31  ;;  %368 = vst.msk [vmem:[#allocation4 + $0xe8] sm:$0x3] %vm286_vm4, %v16859_v31  ;;  %v13506_v46 = vmul.f32 %v13112_v6, %v12496_v51  ;;  %v13526_v51 = vmul.f32 %v13112_v6, %v12510_v56  ;;  %v786_v56 = vmul.f32 %v13103_v61, %v12534_v1 }
 0x2b3   : > { %371 = vst.msk [vmem:[#allocation4 + $0x100] sm:$0x3] %vm286_vm4, %v16859_v31  ;;  %374 = vst.msk [vmem:[#allocation4 + $0x118] sm:$0x3] %vm286_vm4, %v16859_v31  ;;  %v13560_v1 = vmul.f32 %v13112_v6, %v16883_v59  ;;  %v16891_v59 = vld [vmem:[#allocation16_spill] sm:$0xff] }
 0x2b4   : > { %377 = vst.msk [vmem:[#allocation4 + $0x130] sm:$0x3] %vm286_vm4, %v16859_v31  ;;  %380 = vst.msk [vmem:[#allocation4 + $0x148] sm:$0x3] %vm286_vm4, %v16859_v31  ;;  %v791_v26 = vmul.f32 %v13103_v61, %v16891_v59 }
 0x2b5   : > { %383 = vst.msk [vmem:[#allocation4 + $0x160] sm:$0x3] %vm286_vm4, %v16859_v31  ;;  %386 = vst.msk [vmem:[#allocation4 + $0x178] sm:$0x3] %vm286_vm4, %v16859_v31  ;;  %2187 = vbcast.lane.b32.xlu1 %v12945_v21, 266  ;;  %2199 = vbcast.lane.b32.xlu0 %v12963_v3, 258 }
 0x2b6   : > { %389 = vst.msk [vmem:[#allocation4 + $0x190] sm:$0x3] %vm286_vm4, %v16859_v31  ;;  %392 = vst.msk [vmem:[#allocation4 + $0x1a8] sm:$0x3] %vm286_vm4, %v16859_v31 }
 0x2b7   : > { %293 = vst.msk [vmem:[#allocation3 + $0x40] sm:$0x3] %vm286_vm4, %v16859_v31  ;;  %296 = vst.msk [vmem:[#allocation3 + $0x58] sm:$0x3] %vm286_vm4, %v16859_v31 }
 0x2b8   : > { %299 = vst.msk [vmem:[#allocation3 + $0x70] sm:$0x3] %vm286_vm4, %v16859_v31  ;;  %302 = vst.msk [vmem:[#allocation3 + $0x88] sm:$0x3] %vm286_vm4, %v16859_v31 }
 0x2b9   : > { %305 = vst.msk [vmem:[#allocation3 + $0xa0] sm:$0x3] %vm286_vm4, %v16859_v31  ;;  %308 = vst.msk [vmem:[#allocation3 + $0xb8] sm:$0x3] %vm286_vm4, %v16859_v31  ;;  %2195 = vbcast.lane.b32.xlu1 %v12954_v15, 266  ;;  %2207 = vbcast.lane.b32.xlu0 %v12972_v63, 258 }
 0x2ba   : > { %311 = vst.msk [vmem:[#allocation3 + $0xd0] sm:$0x3] %vm286_vm4, %v16859_v31  ;;  %314 = vst.msk [vmem:[#allocation3 + $0xe8] sm:$0x3] %vm286_vm4, %v16859_v31 }
 0x2bb   : > { %317 = vst.msk [vmem:[#allocation3 + $0x100] sm:$0x3] %vm286_vm4, %v16859_v31  ;;  %320 = vst.msk [vmem:[#allocation3 + $0x118] sm:$0x3] %vm286_vm4, %v16859_v31 }
 0x2bc   : > { %323 = vst.msk [vmem:[#allocation3 + $0x130] sm:$0x3] %vm286_vm4, %v16859_v31  ;;  %326 = vst.msk [vmem:[#allocation3 + $0x148] sm:$0x3] %vm286_vm4, %v16859_v31 }
 0x2bd   : > { %329 = vst.msk [vmem:[#allocation3 + $0x160] sm:$0x3] %vm286_vm4, %v16859_v31  ;;  %332 = vst.msk [vmem:[#allocation3 + $0x178] sm:$0x3] %vm286_vm4, %v16859_v31  ;;  %2203 = vbcast.lane.b32.xlu1 %v12963_v3, 266  ;;  %2215 = vbcast.lane.b32.xlu0 %v12981_v8, 258 }
 0x2be   : > { %335 = vst.msk [vmem:[#allocation3 + $0x190] sm:$0x3] %vm286_vm4, %v16859_v31  ;;  %16864 = vst [vmem:[#allocation170_spill] sm:$0xff] %v13398_v28  ;;  %v13416_v31 = vpop.permute.xlu1 %1755 }
 0x2bf   : > { %16865 = vst [vmem:[#allocation171_spill] sm:$0xff] %v13400_v20  ;;  %16866 = vst [vmem:[#allocation172_spill] sm:$0xff] %v13404_v0  ;;  %v13418_v20 = vpop.permute.xlu0 %1773  ;;  %v16890_v0 = vld [vmem:[#allocation15_spill] sm:$0xff] }
 0x2c0   : > { %16867 = vst [vmem:[#allocation173_spill] sm:$0xff] %v13406_v24  ;;  %16868 = vst [vmem:[#allocation174_spill] sm:$0xff] %v13410_v9  ;;  %v16889_v9 = vld [vmem:[#allocation14_spill] sm:$0xff]  ;;  %v792_v28 = vmul.f32 %v13103_v61, %v16890_v0  ;;  %v16895_v0 = vld [vmem:[#allocation17_spill] sm:$0xff] }
 0x2c1   : > { %16869 = vst [vmem:[#allocation175_spill] sm:$0xff] %v13412_v62  ;;  %16870 = vst [vmem:[#allocation176_spill] sm:$0xff] %v13416_v31  ;;  %v16888_v31 = vld [vmem:[#allocation11_spill] sm:$0xff]  ;;  %v789_v15 = vmul.f32 %v13103_v61, %v16889_v9  ;;  %v794_v59 = vmul.f32 %v13103_v61, %v16895_v0  ;;  %2211 = vbcast.lane.b32.xlu1 %v12972_v63, 266  ;;  %2223 = vbcast.lane.b32.xlu0 %v12990_v7, 258  ;;  %v16909_v63 = vld [vmem:[#allocation24_spill] sm:$0xff] }
 0x2c2   : > { %16871 = vst [vmem:[#allocation177_spill] sm:$0xff] %v13418_v20  ;;  %v13422_v24 = vpop.permute.xlu1 %1766 }
 0x2c3   : > { %16872 = vst [vmem:[#allocation178_spill] sm:$0xff] %v13422_v24  ;;  %v13424_v25 = vpop.permute.xlu0 %1784  ;;  %v589_v24 = vmul.f32 %v13112_v6, %v12442_v33  ;;  %v594_v33 = vmul.f32 %v13112_v6, %v12460_v39  ;;  %v13476_v39 = vmul.f32 %v13112_v6, %v12474_v44  ;;  %v13496_v44 = vmul.f32 %v13112_v6, %v12490_v49 }
 0x2c4   : > { %16873 = vst [vmem:[#allocation179_spill] sm:$0xff] %v13424_v25  ;;  %v13518_v49 = vmul.f32 %v13112_v6, %v12504_v54  ;;  %v13538_v54 = vmul.f32 %v13112_v6, %v12516_v58  ;;  %v16887_v25 = vld [vmem:[#allocation69_spill] sm:$0xff] }
 0x2c5   : > { %2219 = vbcast.lane.b32.xlu1 %v12981_v8, 266  ;;  %2231 = vbcast.lane.b32.xlu0 %v12999_v12, 258 }
 0x2c6   : > { %v13428_v62 = vpop.permute.xlu1 %1777 }
 0x2c7   : > { %16874 = vst [vmem:[#allocation180_spill] sm:$0xff] %v13428_v62  ;;  %v13430_v23 = vpop.permute.xlu0 %1795  ;;  %v16886_v62 = vld [vmem:[#allocation13_spill] sm:$0xff] }
 0x2c8   : > { %16875 = vst [vmem:[#allocation181_spill] sm:$0xff] %v13430_v23  ;;  %v590_v23 = vmul.f32 %v13112_v6, %v12448_v35  ;;  %v13464_v35 = vmul.f32 %v13112_v6, %v12468_v42  ;;  %v13488_v42 = vmul.f32 %v13112_v6, %v12484_v47  ;;  %v13510_v47 = vmul.f32 %v13112_v6, %v12498_v52 }
 0x2c9   : > { %v13530_v52 = vmul.f32 %v13112_v6, %v12514_v57  ;;  %v13550_v57 = vmul.f32 %v13112_v6, %v12522_v60  ;;  %v790_v60 = vmul.f32 %v13103_v61, %v16886_v62  ;;  %v13580_v62 = vadd.f32 %v786_v56, %v589_v24  ;;  %v16896_v56 = vld [vmem:[#allocation70_spill] sm:$0xff]  ;;  %2227 = vbcast.lane.b32.xlu1 %v12990_v7, 266 }
 0x2ca   : > { %v13434_v20 = vpop.permute.xlu1 %1788  ;;  %2239 = vbcast.lane.b32.xlu0 %v13008_v14, 258  ;;  %v16923_v7 = vld [vmem:[#allocation34_spill] sm:$0xff] }
 0x2cb   : > { %16876 = vst [vmem:[#allocation182_spill] sm:$0xff] %v13434_v20  ;;  %v13436_v19 = vpop.permute.xlu0 %1806  ;;  %v592_v20 = vmul.f32 %v13112_v6, %v12454_v37  ;;  %v13594_v24 = vadd.f32 %v790_v60, %v593_v13 }
 0x2cc   : > { %16877 = vst [vmem:[#allocation183_spill] sm:$0xff] %v13436_v19  ;;  %v595_v19 = vmul.f32 %v13112_v6, %v12456_v38  ;;  %v13472_v38 = vmul.f32 %v13112_v6, %v12472_v43  ;;  %v13492_v43 = vmul.f32 %v13112_v6, %v12486_v48  ;;  %v13514_v48 = vmul.f32 %v13112_v6, %v12502_v53 }
 0x2cd   : > { %2235 = vbcast.lane.b32.xlu1 %v12999_v12, 266  ;;  %v16930_v12 = vld [vmem:[#allocation41_spill] sm:$0xff] }
 0x2ce   : > { %v13466_v36 = vpop.permute.xlu1 %1799  ;;  %2247 = vbcast.lane.b32.xlu0 %v13017_v16, 258 }
 0x2cf   : > { %16878 = vst [vmem:[#allocation184_spill] sm:$0xff] %v13466_v36  ;;  %v13468_v37 = vpop.permute.xlu0 %1817  ;;  %v16885_v36 = vld [vmem:[#allocation10_spill] sm:$0xff] }
 0x2d0   : > { %16879 = vst [vmem:[#allocation185_spill] sm:$0xff] %v13468_v37  ;;  %v816_v37 = vmul.f32 %v13103_v61, %v12660_v5  ;;  %v619_v5 = vmul.f32 %v13112_v6, %v16885_v36 }
 0x2d1   : > { %2243 = vbcast.lane.b32.xlu1 %v13008_v14, 266 }
 0x2d2   : > { %v13532_v21 = vpop.permute.xlu1 %1810  ;;  %v848_v18 = vadd.f32 %v816_v37, %v619_v5  ;;  %v1012_v5 = vmul.f32 %v13117_v22, %v16896_v56 }
 0x2d3   : > { %16880 = vst [vmem:[#allocation186_spill] sm:$0xff] %v13532_v21  ;;  %v13534_v53 = vpop.permute.xlu0 %1828  ;;  %v16882_v21 = vld [vmem:[#allocation12_spill] sm:$0xff] }
 0x2d4   : > { %16881 = vst [vmem:[#allocation187_spill] sm:$0xff] %v13534_v53  ;;  %v788_v53 = vmul.f32 %v13103_v61, %v12540_v4  ;;  %v787_v58 = vmul.f32 %v13103_v61, %v16882_v21  ;;  %16884 = vst [vmem:[#allocation12_spill] sm:$0xff] %v13560_v1  ;;  %v1013_v4 = vmul.f32 %v13117_v22, %v16887_v25  ;;  %v16894_v25 = vld [vmem:[#allocation39_spill] sm:$0xff] }
 0x2d5   : > { %v618_v21 = vmul.f32 %v13112_v6, %v16888_v31  ;;  %v815_v1 = vmul.f32 %v13103_v61, %v16894_v25  ;;  %v1260_v6 = vmul.f32 %v13130_v11, %v12864_v27  ;;  %v16897_v25 = vld [vmem:[#allocation130_spill] sm:$0xff]  ;;  %2251 = vbcast.lane.b32.xlu1 %v13017_v16, 266 }
 0x2d6   : > { %v13576_v30 = vpop.permute.xlu1 %1821  ;;  %v13586_v9 = vadd.f32 %v788_v53, %v591_v17  ;;  %v13588_v31 = vadd.f32 %v787_v58, %v590_v23  ;;  %v1045_v37 = vadd.f32 %v1013_v4, %v848_v18  ;;  %v1457_v27 = vmul.f32 %v13139_v2, %v16897_v25  ;;  %v16898_v58 = vld [vmem:[#allocation18_spill] sm:$0xff]  ;;  %v16901_v4 = vld [vmem:[#allocation100_spill] sm:$0xff]  ;;  %v16906_v25 = vld [vmem:[#allocation131_spill] sm:$0xff] }
 0x2d7   : > { %16892 = vst [vmem:[#allocation9_spill] sm:$0xff] %v13576_v30  ;;  %v13578_v36 = vpop.permute.xlu0 %1839  ;;  %v13600_v17 = vadd.f32 %v789_v15, %v592_v20  ;;  %v13602_v23 = vadd.f32 %v792_v28, %v595_v19  ;;  %v13604_v53 = vadd.f32 %v791_v26, %v594_v33  ;;  %v793_v3 = vmul.f32 %v13103_v61, %v16898_v58  ;;  %v16903_v26 = vld [vmem:[#allocation19_spill] sm:$0xff]  ;;  %v16904_v33 = vld [vmem:[#allocation20_spill] sm:$0xff]  ;;  %v16962_v30 = vld [vmem:[#allocation73_spill] sm:$0xff] }
 0x2d8   : > { %16893 = vst [vmem:[#allocation10_spill] sm:$0xff] %v13578_v36  ;;  %v847_v18 = vadd.f32 %v815_v1, %v618_v21  ;;  %v1292_v60 = vadd.f32 %v1260_v6, %v1045_v37  ;;  %v1259_v56 = vmul.f32 %v13130_v11, %v16901_v4  ;;  %v16902_v36 = vld [vmem:[#allocation162_spill] sm:$0xff]  ;;  %v13617_v28 = vadd.f32 %v794_v59, %v13456_v34  ;;  %v16905_v1 = vld [vmem:[#allocation21_spill] sm:$0xff]  ;;  %v16908_v4 = vld [vmem:[#allocation23_spill] sm:$0xff] }
 0x2d9   : > { %v1654_v20 = vmul.f32 %v13156_v29, %v16902_v36  ;;  %v796_v19 = vmul.f32 %v13103_v61, %v16903_v26  ;;  %v795_v15 = vmul.f32 %v13103_v61, %v16904_v33  ;;  %v798_v21 = vmul.f32 %v13103_v61, %v16905_v1  ;;  %v16907_v59 = vld [vmem:[#allocation22_spill] sm:$0xff] }
 0x2da   : > { %v13608_v0 = vpop.permute.xlu1 %1832  ;;  %v1044_v6 = vadd.f32 %v1012_v5, %v847_v18  ;;  %v1489_v37 = vadd.f32 %v1457_v27, %v1292_v60  ;;  %v1456_v36 = vmul.f32 %v13139_v2, %v16906_v25  ;;  %v13630_v34 = vadd.f32 %v793_v3, %v13460_v32  ;;  %v13641_v5 = vld [vmem:[%s16685_s1 + $0x6] ss:$0 sm:$0xff]  ;;  %v16911_v3 = vld [vmem:[#allocation163_spill] sm:$0xff] }
 0x2db   : > { %16899 = vst [vmem:[#allocation13_spill] sm:$0xff] %v13608_v0  ;;  %v13610_v13 = vpop.permute.xlu0 %1850  ;;  %v797_v58 = vmul.f32 %v13103_v61, %v16907_v59  ;;  %v800_v26 = vmul.f32 %v13103_v61, %v16908_v4  ;;  %v799_v33 = vmul.f32 %v13103_v61, %v16909_v63  ;;  %v1653_v1 = vmul.f32 %v13156_v29, %v16911_v3  ;;  %v16912_v63 = vld [vmem:[#allocation25_spill] sm:$0xff] }
 0x2dc   : > { %16900 = vst [vmem:[#allocation69_spill] sm:$0xff] %v13610_v13  ;;  %v1291_v60 = vadd.f32 %v1259_v56, %v1044_v6  ;;  %v1686_v32 = vadd.f32 %v1654_v20, %v1489_v37  ;;  %v13649_v59 = vadd.f32 %v796_v19, %v13464_v35  ;;  %v13652_v4 = vadd.f32 %v795_v15, %v13472_v38  ;;  %v16913_v20 = vld [vmem:[#allocation26_spill] sm:$0xff]  ;;  %v16915_v19 = vld [vmem:[#allocation27_spill] sm:$0xff]  ;;  %v16916_v15 = vld [vmem:[#allocation28_spill] sm:$0xff] }
 0x2dd   : > { %v802_v13 = vmul.f32 %v13103_v61, %v16912_v63  ;;  %v13659_v56 = vadd.f32 %v798_v21, %v13476_v39  ;;  %v801_v6 = vmul.f32 %v13103_v61, %v16913_v20  ;;  %v13666_v35 = vadd.f32 %v797_v58, %v13480_v40 }
 0x2de   : > { %v13643_v27 = vpop.permute.xlu1 %1843  ;;  %v1488_v37 = vadd.f32 %v1456_v36, %v1291_v60  ;;  %v13669_v38 = vadd.f32 %v800_v26, %v13484_v41  ;;  %v804_v8 = vmul.f32 %v13103_v61, %v16915_v19  ;;  %v803_v3 = vmul.f32 %v13103_v61, %v16916_v15  ;;  %v16917_v36 = vld [vmem:[#allocation29_spill] sm:$0xff]  ;;  %v16918_v26 = vld [vmem:[#allocation30_spill] sm:$0xff] }
 0x2df   : > { %16910 = vst [vmem:[#allocation11_spill] sm:$0xff] %v13643_v27  ;;  %v1862_v18 = vpop.permute.xlu0 %1861  ;;  %v13678_v63 = vadd.f32 %v799_v33, %v13488_v42  ;;  %v806_v60 = vmul.f32 %v13103_v61, %v16917_v36  ;;  %v13684_v41 = vadd.f32 %v802_v13, %v13492_v43  ;;  %v13693_v42 = vadd.f32 %v801_v6, %v13496_v44  ;;  %v16920_v33 = vld [vmem:[#allocation32_spill] sm:$0xff]  ;;  %v16924_v36 = vld [vmem:[#allocation35_spill] sm:$0xff] }
 0x2e0   : > { %v1901_v25 = vmul.f32 %v13641_v5, %v1862_v18  ;;  %v1685_v40 = vadd.f32 %v1653_v1, %v1488_v37  ;;  %v807_v1 = vmul.f32 %v13103_v61, %v16920_v33  ;;  %v16921_v37 = vld [vmem:[#allocation33_spill] sm:$0xff]  ;;  %v13702_v19 = vadd.f32 %v804_v8, %v13502_v45  ;;  %v16961_v27 = vld [vmem:[#allocation72_spill] sm:$0xff] }
 0x2e1   : > { %v810_v43 = vmul.f32 %v13103_v61, %v16921_v37  ;;  %v13705_v15 = vadd.f32 %v803_v3, %v13506_v46  ;;  %v812_v44 = vmul.f32 %v13103_v61, %v16924_v36  ;;  %v16926_v45 = vld [vmem:[#allocation37_spill] sm:$0xff]  ;;  %v16927_v37 = vld [vmem:[#allocation38_spill] sm:$0xff]  ;;  %v16928_v36 = vld [vmem:[#allocation40_spill] sm:$0xff]  ;;  %v1232_v0 = vmul.f32 %v13130_v11, %v16961_v27 }
 0x2e2   : > { %v13663_v18 = vadd.f32 %v1901_v25, %v1686_v32  ;;  %v1855_v39 = vpop.permute.xlu1 %1854  ;;  %v805_v32 = vmul.f32 %v13103_v61, %v16918_v26  ;;  %v16919_v25 = vld [vmem:[#allocation31_spill] sm:$0xff]  ;;  %v814_v8 = vmul.f32 %v13103_v61, %v16926_v45 }
 0x2e3   : > { %v13675_v21 = vpop.permute.xlu0 %1938  ;;  %v1900_v58 = vmul.f32 %v13641_v5, %v1855_v39  ;;  %v808_v20 = vmul.f32 %v13103_v61, %v16919_v25  ;;  %v809_v39 = vmul.f32 %v13103_v61, %v16923_v7  ;;  %v13714_v25 = vadd.f32 %v806_v60, %v13510_v47 }
 0x2e4   : > { %16914 = vst [vmem:[#allocation14_spill] sm:$0xff] %v13663_v18  ;;  %v13722_v3 = vadd.f32 %v805_v32, %v13514_v48  ;;  %v813_v7 = vmul.f32 %v13103_v61, %v16927_v37  ;;  %v13732_v47 = vadd.f32 %v807_v1, %v13522_v50  ;;  %v13735_v60 = vadd.f32 %v810_v43, %v13526_v51  ;;  %v16931_v50 = vld [vmem:[#allocation42_spill] sm:$0xff] }
 0x2e5   : > { %v13699_v13 = vadd.f32 %v1900_v58, %v1685_v40  ;;  %v16925_v40 = vld [vmem:[#allocation36_spill] sm:$0xff]  ;;  %v13725_v33 = vadd.f32 %v808_v20, %v13518_v49  ;;  %v983_v48 = vmul.f32 %v13117_v22, %v16928_v36  ;;  %v13743_v49 = vadd.f32 %v809_v39, %v13530_v52  ;;  %v16932_v52 = vld [vmem:[#allocation43_spill] sm:$0xff]  ;;  %v16936_v36 = vld [vmem:[#allocation46_spill] sm:$0xff] }
 0x2e6   : > { %v1866_v6 = vpop.permute.xlu1 %1865  ;;  %v811_v58 = vmul.f32 %v13103_v61, %v16925_v40  ;;  %v13746_v61 = vadd.f32 %v812_v44, %v13538_v54  ;;  %v985_v20 = vmul.f32 %v13117_v22, %v16930_v12  ;;  %v984_v1 = vmul.f32 %v13117_v22, %v16931_v50  ;;  %v16933_v39 = vld [vmem:[#allocation44_spill] sm:$0xff] }
 0x2e7   : > { %16922 = vst [vmem:[#allocation15_spill] sm:$0xff] %v13699_v13  ;;  %v13711_v26 = vpop.permute.xlu0 %1946  ;;  %v1902_v46 = vmul.f32 %v13641_v5, %v1866_v6  ;;  %v987_v54 = vmul.f32 %v13117_v22, %v16932_v52  ;;  %v986_v44 = vmul.f32 %v13117_v22, %v16933_v39  ;;  %v16934_v40 = vld [vmem:[#allocation12_spill] sm:$0xff]  ;;  %v988_v12 = vmul.f32 %v13117_v22, %v16936_v36  ;;  %v16940_v52 = vld [vmem:[#allocation49_spill] sm:$0xff]  ;;  %v16945_v13 = vld [vmem:[#allocation54_spill] sm:$0xff] }
 0x2e8   : > { %v13757_v6 = vadd.f32 %v811_v58, %v13542_v55  ;;  %v13767_v45 = vadd.f32 %v813_v7, %v16934_v40  ;;  %v16937_v55 = vld [vmem:[#allocation136_spill] sm:$0xff]  ;;  %v16938_v58 = vld [vmem:[#allocation47_spill] sm:$0xff]  ;;  %v993_v39 = vmul.f32 %v13117_v22, %v16940_v52  ;;  %v13785_v40 = vadd.f32 %v985_v20, %v13586_v9 }
 0x2e9   : > { %v13740_v32 = vadd.f32 %v1902_v46, %v13312_v10  ;;  %v13760_v10 = vadd.f32 %v814_v8, %v13550_v57  ;;  %v16935_v46 = vld [vmem:[#allocation45_spill] sm:$0xff]  ;;  %2255 = vbcast.lane.b32.xlu0 %v16937_v55, 258  ;;  %v13776_v57 = vadd.f32 %v983_v48, %v13580_v62  ;;  %v991_v8 = vmul.f32 %v13117_v22, %v16938_v58  ;;  %v16939_v50 = vld [vmem:[#allocation48_spill] sm:$0xff]  ;;  %v16942_v48 = vld [vmem:[#allocation51_spill] sm:$0xff] }
 0x2ea   : > { %v13752_v51 = vpop.permute.xlu1 %1942  ;;  %v989_v37 = vmul.f32 %v13117_v22, %v16935_v46  ;;  %v990_v7 = vmul.f32 %v13117_v22, %v16939_v50  ;;  %v13788_v14 = vadd.f32 %v984_v1, %v13588_v31  ;;  %v16941_v46 = vld [vmem:[#allocation50_spill] sm:$0xff]  ;;  %v995_v36 = vmul.f32 %v13117_v22, %v16942_v48  ;;  %v16943_v20 = vld [vmem:[#allocation52_spill] sm:$0xff]  ;;  %v16944_v1 = vld [vmem:[#allocation53_spill] sm:$0xff]  ;;  %2259 = vbcast.lane.b32.xlu1 %v16937_v55, 266 }
 0x2eb   : > { %16929 = vst [vmem:[#allocation16_spill] sm:$0xff] %v13740_v32  ;;  %v13754_v43 = vpop.permute.xlu0 %1954  ;;  %v992_v62 = vmul.f32 %v13117_v22, %v16941_v46  ;;  %v13799_v50 = vadd.f32 %v987_v54, %v13594_v24  ;;  %v13802_v9 = vadd.f32 %v986_v44, %v13600_v17  ;;  %v994_v31 = vmul.f32 %v13117_v22, %v16943_v20  ;;  %v16946_v54 = vld [vmem:[#allocation55_spill] sm:$0xff]  ;;  %v16948_v20 = vld [vmem:[#allocation57_spill] sm:$0xff] }
 0x2ec   : > { %v997_v52 = vmul.f32 %v13117_v22, %v16944_v1  ;;  %v13810_v46 = vadd.f32 %v989_v37, %v13602_v23  ;;  %v13813_v48 = vadd.f32 %v988_v12, %v13604_v53  ;;  %v996_v24 = vmul.f32 %v13117_v22, %v16945_v13  ;;  %v16947_v37 = vld [vmem:[#allocation56_spill] sm:$0xff] }
 0x2ed   : > { %v999_v17 = vmul.f32 %v13117_v22, %v16946_v54  ;;  %v13825_v44 = vadd.f32 %v991_v8, %v13617_v28  ;;  %v13828_v23 = vadd.f32 %v990_v7, %v13630_v34  ;;  %v13831_v53 = vadd.f32 %v993_v39, %v13649_v59  ;;  %v16949_v28 = vld [vmem:[#allocation58_spill] sm:$0xff] }
 0x2ee   : > { %v13794_v58 = vpop.permute.xlu1 %1950  ;;  %v998_v13 = vmul.f32 %v13117_v22, %v16947_v37  ;;  %v13836_v12 = vadd.f32 %v992_v62, %v13652_v4  ;;  %v13839_v16 = vadd.f32 %v995_v36, %v13659_v56  ;;  %v1001_v1 = vmul.f32 %v13117_v22, %v16948_v20  ;;  %v16950_v4 = vld [vmem:[#allocation59_spill] sm:$0xff]  ;;  %v16951_v62 = vld [vmem:[#allocation60_spill] sm:$0xff]  ;;  %v16952_v20 = vld [vmem:[#allocation61_spill] sm:$0xff] }
 0x2ef   : > { %v13796_v32 = vpop.permute.xlu0 %1962  ;;  %v1000_v8 = vmul.f32 %v13117_v22, %v16949_v28  ;;  %v13850_v59 = vadd.f32 %v994_v31, %v13666_v35  ;;  %v13853_v39 = vadd.f32 %v997_v52, %v13669_v38  ;;  %v1003_v56 = vmul.f32 %v13117_v22, %v16950_v4  ;;  %v16953_v35 = vld [vmem:[#allocation62_spill] sm:$0xff]  ;;  %v16954_v52 = vld [vmem:[#allocation63_spill] sm:$0xff] }
 0x2f0   : > { %v1002_v36 = vmul.f32 %v13117_v22, %v16951_v62  ;;  %v13860_v54 = vadd.f32 %v996_v24, %v13678_v63  ;;  %v13863_v37 = vadd.f32 %v999_v17, %v13684_v41  ;;  %v1005_v28 = vmul.f32 %v13117_v22, %v16952_v20  ;;  %v16955_v62 = vld [vmem:[#allocation64_spill] sm:$0xff]  ;;  %v16956_v24 = vld [vmem:[#allocation65_spill] sm:$0xff] }
 0x2f1   : > { %v1004_v31 = vmul.f32 %v13117_v22, %v16953_v35  ;;  %v13871_v38 = vadd.f32 %v998_v13, %v13693_v42  ;;  %v1007_v4 = vmul.f32 %v13117_v22, %v16954_v52  ;;  %v1006_v63 = vmul.f32 %v13117_v22, %v16955_v62  ;;  %v16957_v35 = vld [vmem:[#allocation66_spill] sm:$0xff]  ;;  %v16958_v42 = vld [vmem:[#allocation67_spill] sm:$0xff] }
 0x2f2   : > { %v13845_v34 = vpop.permute.xlu1 %1958  ;;  %v1009_v41 = vmul.f32 %v13117_v22, %v16956_v24  ;;  %v13880_v17 = vadd.f32 %v1001_v1, %v13702_v19  ;;  %v13883_v20 = vadd.f32 %v1000_v8, %v13705_v15  ;;  %v1008_v55 = vmul.f32 %v13117_v22, %v16957_v35  ;;  %v16959_v19 = vld [vmem:[#allocation68_spill] sm:$0xff]  ;;  %v16960_v15 = vld [vmem:[#allocation71_spill] sm:$0xff] }
 0x2f3   : > { %v13847_v7 = vpop.permute.xlu0 %1970  ;;  %v1011_v13 = vmul.f32 %v13117_v22, %v16958_v42  ;;  %v1035_v62 = vadd.f32 %v1003_v56, %v13714_v25  ;;  %v13895_v24 = vadd.f32 %v1002_v36, %v13722_v3  ;;  %v1010_v1 = vmul.f32 %v13117_v22, %v16959_v19 }
 0x2f4   : > { %v1230_v8 = vmul.f32 %v13130_v11, %v16960_v15  ;;  %v13902_v35 = vadd.f32 %v1005_v28, %v13725_v33  ;;  %v13905_v42 = vadd.f32 %v1004_v31, %v13732_v47  ;;  %v1231_v25 = vmul.f32 %v13130_v11, %v16962_v30  ;;  %v16963_v33 = vld [vmem:[#allocation74_spill] sm:$0xff]  ;;  %v16964_v28 = vld [vmem:[#allocation75_spill] sm:$0xff] }
 0x2f5   : > { %v13912_v3 = vadd.f32 %v1007_v4, %v13735_v60  ;;  %v13915_v22 = vadd.f32 %v1006_v63, %v13743_v49  ;;  %v13918_v56 = vadd.f32 %v1009_v41, %v13746_v61  ;;  %v1234_v36 = vmul.f32 %v13130_v11, %v16963_v33  ;;  %v16965_v60 = vld [vmem:[#allocation76_spill] sm:$0xff]  ;;  %v16968_v41 = vld [vmem:[#allocation78_spill] sm:$0xff]  ;;  %v16969_v15 = vld [vmem:[#allocation79_spill] sm:$0xff] }
 0x2f6   : > { %v13889_v18 = vpop.permute.xlu1 %1966  ;;  %v13923_v47 = vadd.f32 %v1008_v55, %v13757_v6  ;;  %v13926_v27 = vadd.f32 %v1011_v13, %v13760_v10  ;;  %v1233_v30 = vmul.f32 %v13130_v11, %v16964_v28  ;;  %v1236_v31 = vmul.f32 %v13130_v11, %v16965_v60  ;;  %v16967_v6 = vld [vmem:[#allocation77_spill] sm:$0xff]  ;;  %v16972_v60 = vld [vmem:[#allocation82_spill] sm:$0xff] }
 0x2f7   : > { %v13891_v52 = vpop.permute.xlu0 %1978  ;;  %v13937_v61 = vadd.f32 %v1010_v1, %v13767_v45  ;;  %v13940_v63 = vadd.f32 %v1230_v8, %v13776_v57  ;;  %v1235_v10 = vmul.f32 %v13130_v11, %v16967_v6  ;;  %v1238_v55 = vmul.f32 %v13130_v11, %v16968_v41  ;;  %v16970_v45 = vld [vmem:[#allocation80_spill] sm:$0xff]  ;;  %v16971_v8 = vld [vmem:[#allocation81_spill] sm:$0xff] }
 0x2f8   : > { %v13947_v13 = vadd.f32 %v1232_v0, %v13785_v40  ;;  %v13950_v19 = vadd.f32 %v1231_v25, %v13788_v14  ;;  %v1237_v33 = vmul.f32 %v13130_v11, %v16969_v15  ;;  %v1240_v1 = vmul.f32 %v13130_v11, %v16970_v45  ;;  %v16973_v0 = vld [vmem:[#allocation83_spill] sm:$0xff]  ;;  %v16974_v41 = vld [vmem:[#allocation84_spill] sm:$0xff] }
 0x2f9   : > { %v13957_v57 = vadd.f32 %v1234_v36, %v13799_v50  ;;  %v1239_v28 = vmul.f32 %v13130_v11, %v16971_v8  ;;  %v1242_v6 = vmul.f32 %v13130_v11, %v16972_v60  ;;  %v1241_v40 = vmul.f32 %v13130_v11, %v16973_v0  ;;  %v16975_v50 = vld [vmem:[#allocation85_spill] sm:$0xff] }
 0x2fa   : > { %v13932_v49 = vpop.permute.xlu1 %1974  ;;  %v13966_v14 = vadd.f32 %v1233_v30, %v13802_v9  ;;  %v13969_v25 = vadd.f32 %v1236_v31, %v13810_v46  ;;  %v1244_v15 = vmul.f32 %v13130_v11, %v16974_v41  ;;  %v1243_v36 = vmul.f32 %v13130_v11, %v16975_v50  ;;  %v16978_v9 = vld [vmem:[#allocation86_spill] sm:$0xff]  ;;  %v16979_v46 = vld [vmem:[#allocation87_spill] sm:$0xff] }
 0x2fb   : > { %v13934_v4 = vpop.permute.xlu0 %1986  ;;  %v1267_v60 = vadd.f32 %v1235_v10, %v13813_v48  ;;  %v13981_v0 = vadd.f32 %v1238_v55, %v13825_v44  ;;  %v1246_v30 = vmul.f32 %v13130_v11, %v16978_v9  ;;  %v1245_v31 = vmul.f32 %v13130_v11, %v16979_v46 }
 0x2fc   : > { %16966 = vst [vmem:[#allocation39_spill] sm:$0xff] %v13934_v4  ;;  %v13988_v41 = vadd.f32 %v1237_v33, %v13828_v23  ;;  %v13991_v50 = vadd.f32 %v1240_v1, %v13831_v53  ;;  %v16981_v4 = vld [vmem:[#allocation89_spill] sm:$0xff]  ;;  %v13998_v44 = vadd.f32 %v1239_v28, %v13836_v12  ;;  %v14001_v10 = vadd.f32 %v1242_v6, %v13839_v16  ;;  %v16982_v23 = vld [vmem:[#allocation90_spill] sm:$0xff]  ;;  %v16984_v12 = vld [vmem:[#allocation92_spill] sm:$0xff] }
 0x2fd   : > { %v1247_v48 = vmul.f32 %v13130_v11, %v16981_v4  ;;  %v14004_v55 = vadd.f32 %v1241_v40, %v13850_v59  ;;  %v1250_v33 = vmul.f32 %v13130_v11, %v16982_v23  ;;  %v14009_v53 = vadd.f32 %v1244_v15, %v13853_v39  ;;  %v16986_v39 = vld [vmem:[#allocation93_spill] sm:$0xff]  ;;  %v16987_v15 = vld [vmem:[#allocation94_spill] sm:$0xff]  ;;  %v16988_v23 = vld [vmem:[#allocation95_spill] sm:$0xff] }
 0x2fe   : > { %v13975_v45 = vpop.permute.xlu1 %1982  ;;  %v14012_v1 = vadd.f32 %v1243_v36, %v13860_v54  ;;  %v1252_v28 = vmul.f32 %v13130_v11, %v16984_v12  ;;  %v14023_v59 = vadd.f32 %v1246_v30, %v13863_v37  ;;  %v14026_v40 = vadd.f32 %v1245_v31, %v13871_v38  ;;  %v16989_v37 = vld [vmem:[#allocation96_spill] sm:$0xff]  ;;  %v16990_v31 = vld [vmem:[#allocation97_spill] sm:$0xff] }
 0x2ff   : > { %16976 = vst [vmem:[#allocation17_spill] sm:$0xff] %v13975_v45  ;;  %v13977_v8 = vpop.permute.xlu0 %1994  ;;  %v16980_v45 = vld [vmem:[#allocation88_spill] sm:$0xff]  ;;  %v1251_v54 = vmul.f32 %v13130_v11, %v16986_v39  ;;  %v1254_v36 = vmul.f32 %v13130_v11, %v16987_v15  ;;  %v14036_v46 = vadd.f32 %v1247_v48, %v13883_v20  ;;  %v1256_v30 = vmul.f32 %v13130_v11, %v16989_v37  ;;  %v16991_v39 = vld [vmem:[#allocation98_spill] sm:$0xff]  ;;  %v16993_v48 = vld [vmem:[#allocation101_spill] sm:$0xff] }
 0x300   : > { %16977 = vst [vmem:[#allocation70_spill] sm:$0xff] %v13977_v8  ;;  %v1248_v8 = vmul.f32 %v13130_v11, %v16980_v45  ;;  %v16983_v45 = vld [vmem:[#allocation91_spill] sm:$0xff]  ;;  %v14042_v38 = vadd.f32 %v1250_v33, %v1035_v62  ;;  %v1255_v12 = vmul.f32 %v13130_v11, %v16990_v31  ;;  %v1258_v15 = vmul.f32 %v13130_v11, %v16991_v39  ;;  %v16994_v62 = vld [vmem:[#allocation102_spill] sm:$0xff] }
 0x301   : > { %v1249_v4 = vmul.f32 %v13130_v11, %v16983_v45  ;;  %v1253_v45 = vmul.f32 %v13130_v11, %v16988_v23  ;;  %v1427_v23 = vmul.f32 %v13139_v2, %v16993_v48  ;;  %v1429_v33 = vmul.f32 %v13139_v2, %v16994_v62  ;;  %v16999_v62 = vld [vmem:[#allocation105_spill] sm:$0xff] }
 0x302   : > { %v14018_v16 = vpop.permute.xlu1 %1990  ;;  %v14033_v9 = vadd.f32 %v1248_v8, %v13880_v17  ;;  %v14054_v8 = vadd.f32 %v1252_v28, %v13902_v35  ;;  %v1283_v39 = vadd.f32 %v1251_v54, %v13905_v42  ;;  %v16998_v35 = vld [vmem:[#allocation104_spill] sm:$0xff]  ;;  %v14076_v48 = vadd.f32 %v1256_v30, %v13918_v56 }
 0x303   : > { %v14020_v6 = vpop.permute.xlu0 %2002  ;;  %v14051_v20 = vadd.f32 %v1249_v4, %v13895_v24  ;;  %v16997_v24 = vld [vmem:[#allocation103_spill] sm:$0xff]  ;;  %v1431_v28 = vmul.f32 %v13139_v2, %v16998_v35  ;;  %v14086_v54 = vadd.f32 %v1258_v15, %v13926_v27  ;;  %v14094_v56 = vadd.f32 %v1427_v23, %v13940_v63  ;;  %v17005_v63 = vld [vmem:[#allocation110_spill] sm:$0xff] }
 0x304   : > { %16985 = vst [vmem:[#allocation130_spill] sm:$0xff] %v14020_v6  ;;  %v16992_v6 = vld [vmem:[#allocation99_spill] sm:$0xff]  ;;  %v1428_v4 = vmul.f32 %v13139_v2, %v16997_v24  ;;  %v14097_v30 = vadd.f32 %v1429_v33, %v13947_v13  ;;  %v17002_v24 = vld [vmem:[#allocation108_spill] sm:$0xff]  ;;  %v1437_v13 = vmul.f32 %v13139_v2, %v17005_v63 }
 0x305   : > { %v1257_v17 = vmul.f32 %v13130_v11, %v16992_v6  ;;  %v14066_v11 = vadd.f32 %v1254_v36, %v13912_v3  ;;  %v14073_v6 = vadd.f32 %v1253_v45, %v13915_v22  ;;  %v14083_v3 = vadd.f32 %v1255_v12, %v13923_v47  ;;  %v17001_v22 = vld [vmem:[#allocation107_spill] sm:$0xff]  ;;  %v17003_v47 = vld [vmem:[#allocation109_spill] sm:$0xff] }
 0x306   : > { %v14060_v37 = vpop.permute.xlu1 %1998  ;;  %v1432_v45 = vmul.f32 %v13139_v2, %v17001_v22  ;;  %v1434_v12 = vmul.f32 %v13139_v2, %v17003_v47  ;;  %v17006_v23 = vld [vmem:[#allocation111_spill] sm:$0xff]  ;;  %v17007_v22 = vld [vmem:[#allocation112_spill] sm:$0xff] }
 0x307   : > { %16995 = vst [vmem:[#allocation18_spill] sm:$0xff] %v14060_v37  ;;  %v14062_v31 = vpop.permute.xlu0 %2010  ;;  %v17000_v37 = vld [vmem:[#allocation106_spill] sm:$0xff]  ;;  %v14089_v36 = vadd.f32 %v1257_v17, %v13937_v61  ;;  %v14108_v61 = vadd.f32 %v1428_v4, %v13950_v19  ;;  %v14111_v17 = vadd.f32 %v1431_v28, %v13957_v57  ;;  %v1436_v33 = vmul.f32 %v13139_v2, %v17006_v23  ;;  %v17008_v19 = vld [vmem:[#allocation113_spill] sm:$0xff]  ;;  %v17010_v63 = vld [vmem:[#allocation115_spill] sm:$0xff] }
 0x308   : > { %16996 = vst [vmem:[#allocation100_spill] sm:$0xff] %v14062_v31  ;;  %v1430_v31 = vmul.f32 %v13139_v2, %v16999_v62  ;;  %v1433_v42 = vmul.f32 %v13139_v2, %v17000_v37  ;;  %v1435_v37 = vmul.f32 %v13139_v2, %v17002_v24  ;;  %v1439_v24 = vmul.f32 %v13139_v2, %v17007_v22  ;;  %v17009_v28 = vld [vmem:[#allocation114_spill] sm:$0xff] }
 0x309   : > { %v1438_v4 = vmul.f32 %v13139_v2, %v17008_v19  ;;  %v14127_v57 = vadd.f32 %v1432_v45, %v1267_v60  ;;  %v1441_v47 = vmul.f32 %v13139_v2, %v17009_v28  ;;  %v1440_v23 = vmul.f32 %v13139_v2, %v17010_v63  ;;  %v17013_v60 = vld [vmem:[#allocation118_spill] sm:$0xff] }
 0x30a   : > { %v14103_v27 = vpop.permute.xlu1 %2006  ;;  %v14118_v35 = vadd.f32 %v1430_v31, %v13966_v14  ;;  %v14121_v62 = vadd.f32 %v1433_v42, %v13969_v25  ;;  %v14136_v25 = vadd.f32 %v1435_v37, %v13981_v0  ;;  %v14139_v31 = vadd.f32 %v1434_v12, %v13988_v41  ;;  %v17012_v42 = vld [vmem:[#allocation117_spill] sm:$0xff]  ;;  %v17016_v0 = vld [vmem:[#allocation119_spill] sm:$0xff]  ;;  %v17017_v37 = vld [vmem:[#allocation120_spill] sm:$0xff] }
 0x30b   : > { %v14105_v15 = vpop.permute.xlu0 %2018  ;;  %v1442_v22 = vmul.f32 %v13139_v2, %v17012_v42  ;;  %v1445_v45 = vmul.f32 %v13139_v2, %v17013_v60  ;;  %v14150_v63 = vadd.f32 %v1437_v13, %v13991_v50  ;;  %v1444_v41 = vmul.f32 %v13139_v2, %v17016_v0  ;;  %v17019_v50 = vld [vmem:[#allocation122_spill] sm:$0xff] }
 0x30c   : > { %17004 = vst [vmem:[#allocation162_spill] sm:$0xff] %v14105_v15  ;;  %v17011_v15 = vld [vmem:[#allocation116_spill] sm:$0xff]  ;;  %v1447_v12 = vmul.f32 %v13139_v2, %v17017_v37  ;;  %v14160_v42 = vadd.f32 %v1439_v24, %v14001_v10  ;;  %v14163_v60 = vadd.f32 %v1438_v4, %v14004_v55  ;;  %v1449_v13 = vmul.f32 %v13139_v2, %v17019_v50  ;;  %v17020_v10 = vld [vmem:[#allocation123_spill] sm:$0xff] }
 0x30d   : > { %v1443_v14 = vmul.f32 %v13139_v2, %v17011_v15  ;;  %v14153_v15 = vadd.f32 %v1436_v33, %v13998_v44  ;;  %v14170_v44 = vadd.f32 %v1441_v47, %v14009_v53  ;;  %v14173_v33 = vadd.f32 %v1440_v23, %v14012_v1  ;;  %v17022_v53 = vld [vmem:[#allocation125_spill] sm:$0xff] }
 0x30e   : > { %v14145_v19 = vpop.permute.xlu1 %2014  ;;  %v1448_v24 = vmul.f32 %v13139_v2, %v17020_v10  ;;  %v14181_v55 = vadd.f32 %v1442_v22, %v14026_v40  ;;  %v14184_v4 = vadd.f32 %v1445_v45, %v14033_v9  ;;  %v1450_v47 = vmul.f32 %v13139_v2, %v17022_v53  ;;  %v17025_v40 = vld [vmem:[#allocation126_spill] sm:$0xff]  ;;  %v17026_v22 = vld [vmem:[#allocation127_spill] sm:$0xff] }
 0x30f   : > { %17014 = vst [vmem:[#allocation19_spill] sm:$0xff] %v14145_v19  ;;  %v14147_v28 = vpop.permute.xlu0 %2026  ;;  %v17018_v19 = vld [vmem:[#allocation121_spill] sm:$0xff]  ;;  %v14176_v0 = vadd.f32 %v1443_v14, %v14023_v59  ;;  %v14195_v59 = vadd.f32 %v1444_v41, %v14036_v46  ;;  %v14198_v14 = vadd.f32 %v1447_v12, %v14042_v38  ;;  %v1453_v9 = vmul.f32 %v13139_v2, %v17025_v40  ;;  %v17029_v12 = vld [vmem:[#allocation132_spill] sm:$0xff] }
 0x310   : > { %17015 = vst [vmem:[#allocation20_spill] sm:$0xff] %v14147_v28  ;;  %v1446_v28 = vmul.f32 %v13139_v2, %v17018_v19  ;;  %v17021_v19 = vld [vmem:[#allocation124_spill] sm:$0xff]  ;;  %v1452_v45 = vmul.f32 %v13139_v2, %v17026_v22  ;;  %v14208_v10 = vadd.f32 %v1449_v13, %v14054_v8  ;;  %v17028_v46 = vld [vmem:[#allocation129_spill] sm:$0xff]  ;;  %v14214_v38 = vadd.f32 %v1448_v24, %v1283_v39  ;;  %v17032_v13 = vld [vmem:[#allocation135_spill] sm:$0xff] }
 0x311   : > { %v1451_v37 = vmul.f32 %v13139_v2, %v17021_v19  ;;  %v17027_v19 = vld [vmem:[#allocation128_spill] sm:$0xff]  ;;  %v1454_v41 = vmul.f32 %v13139_v2, %v17028_v46  ;;  %v1624_v40 = vmul.f32 %v13156_v29, %v17029_v12  ;;  %v17033_v39 = vld [vmem:[#allocation137_spill] sm:$0xff] }
 0x312   : > { %v14190_v1 = vpop.permute.xlu1 %2022  ;;  %v14205_v50 = vadd.f32 %v1446_v28, %v14051_v20  ;;  %v1455_v53 = vmul.f32 %v13139_v2, %v17027_v19  ;;  %v14226_v28 = vadd.f32 %v1450_v47, %v14073_v6  ;;  %v1628_v2 = vmul.f32 %v13156_v29, %v17032_v13 }
 0x313   : > { %17023 = vst [vmem:[#allocation21_spill] sm:$0xff] %v14190_v1  ;;  %v14192_v23 = vpop.permute.xlu0 %2034  ;;  %v17031_v1 = vld [vmem:[#allocation134_spill] sm:$0xff]  ;;  %v14223_v8 = vadd.f32 %v1451_v37, %v14066_v11  ;;  %v1627_v24 = vmul.f32 %v13156_v29, %v17033_v39  ;;  %v17036_v37 = vld [vmem:[#allocation139_spill] sm:$0xff]  ;;  %v14250_v13 = vadd.f32 %v1454_v41, %v14089_v36  ;;  %v17038_v39 = vld [vmem:[#allocation140_spill] sm:$0xff] }
 0x314   : > { %17024 = vst [vmem:[#allocation131_spill] sm:$0xff] %v14192_v23  ;;  %v17030_v23 = vld [vmem:[#allocation133_spill] sm:$0xff]  ;;  %v1625_v20 = vmul.f32 %v13156_v29, %v17031_v1  ;;  %v14240_v1 = vadd.f32 %v1452_v45, %v14083_v3  ;;  %v17035_v11 = vld [vmem:[#allocation138_spill] sm:$0xff]  ;;  %v1629_v47 = vmul.f32 %v13156_v29, %v17036_v37  ;;  %v14247_v12 = vadd.f32 %v1455_v53, %v14086_v54 }
 0x315   : > { %v1626_v22 = vmul.f32 %v13156_v29, %v17030_v23  ;;  %v14237_v23 = vadd.f32 %v1453_v9, %v14076_v48  ;;  %v1630_v6 = vmul.f32 %v13156_v29, %v17035_v11  ;;  %17037 = vst [vmem:[#allocation23_spill] sm:$0xff] %v14250_v13  ;;  %v17039_v48 = vld [vmem:[#allocation141_spill] sm:$0xff]  ;;  %v1656_v3 = vadd.f32 %v1624_v40, %v14094_v56  ;;  %v17040_v36 = vld [vmem:[#allocation142_spill] sm:$0xff]  ;;  %v17041_v56 = vld [vmem:[#allocation143_spill] sm:$0xff] }
 0x316   : > { %v14232_v19 = vpop.permute.xlu1 %2030  ;;  %v1631_v9 = vmul.f32 %v13156_v29, %v17039_v48  ;;  %v14259_v11 = vadd.f32 %v1625_v20, %v14108_v61  ;;  %v14264_v54 = vld [vmem:[%s16685_s1 + $0x5] ss:$0 sm:$0xff]  ;;  %v14269_v41 = vadd.f32 %v1628_v2, %v14111_v17  ;;  %v17042_v40 = vld [vmem:[#allocation144_spill] sm:$0xff]  ;;  %v17046_v2 = vld [vmem:[#allocation146_spill] sm:$0xff] }
 0x317   : > { %v14234_v46 = vpop.permute.xlu0 %2042  ;;  %v1658_v45 = vadd.f32 %v1626_v22, %v14097_v30  ;;  %v1634_v53 = vmul.f32 %v14264_v54, %v17040_v36  ;;  %v1633_v30 = vmul.f32 %v14264_v54, %v17041_v56  ;;  %v1636_v61 = vmul.f32 %v14264_v54, %v17042_v40  ;;  %v17045_v17 = vld [vmem:[#allocation145_spill] sm:$0xff]  ;;  %v17047_v56 = vld [vmem:[#allocation147_spill] sm:$0xff] }
 0x318   : > { %17034 = vst [vmem:[#allocation22_spill] sm:$0xff] %v14234_v46  ;;  %v1632_v46 = vmul.f32 %v13156_v29, %v17038_v39  ;;  %v14272_v29 = vadd.f32 %v1627_v24, %v14118_v35  ;;  %v14283_v37 = vadd.f32 %v1630_v6, %v14121_v62  ;;  %v14286_v39 = vadd.f32 %v1629_v47, %v14127_v57  ;;  %v17048_v62 = vld [vmem:[#allocation148_spill] sm:$0xff]  ;;  %v14305_v57 = vld [vmem:[%s16685_s1 + $0x7] ss:$0 sm:$0xff]  ;;  %v17052_v13 = vld [vmem:[#allocation151_spill] sm:$0xff] }
 0x319   : > { %v1635_v35 = vmul.f32 %v14264_v54, %v17045_v17  ;;  %v1638_v24 = vmul.f32 %v14264_v54, %v17046_v2  ;;  %v14296_v36 = vadd.f32 %v1631_v9, %v14139_v31  ;;  %v1637_v40 = vmul.f32 %v14264_v54, %v17047_v56  ;;  %v17049_v17 = vld [vmem:[#allocation149_spill] sm:$0xff]  ;;  %v17051_v9 = vld [vmem:[#allocation164_spill] sm:$0xff] }
 0x31a   : > { %v14278_v22 = vpop.permute.xlu1 %2038  ;;  %v14293_v48 = vadd.f32 %v1632_v46, %v14136_v25  ;;  %v1640_v6 = vmul.f32 %v14264_v54, %v17048_v62  ;;  %v14308_v47 = vadd.f32 %v1634_v53, %v14150_v63  ;;  %v1639_v25 = vmul.f32 %v14264_v54, %v17049_v17  ;;  %v17050_v46 = vld [vmem:[#allocation150_spill] sm:$0xff]  ;;  %v17053_v63 = vld [vmem:[#allocation152_spill] sm:$0xff] }
 0x31b   : > { %17043 = vst [vmem:[#allocation24_spill] sm:$0xff] %v14278_v22  ;;  %v14280_v20 = vpop.permute.xlu0 %2050  ;;  %v1642_v31 = vmul.f32 %v14264_v54, %v17050_v46  ;;  %v1871_v2 = vmul.f32 %v13641_v5, %v17051_v9  ;;  %v14317_v56 = vadd.f32 %v1633_v30, %v14153_v15  ;;  %v14320_v62 = vadd.f32 %v1636_v61, %v14160_v42  ;;  %v17056_v15 = vld [vmem:[#allocation153_spill] sm:$0xff] }
 0x31c   : > { %17044 = vst [vmem:[#allocation163_spill] sm:$0xff] %v14280_v20  ;;  %v1641_v20 = vmul.f32 %v14264_v54, %v17052_v13  ;;  %v1644_v53 = vmul.f32 %v14264_v54, %v17053_v63  ;;  %v14331_v46 = vadd.f32 %v1635_v35, %v14163_v60  ;;  %v14334_v9 = vadd.f32 %v1638_v24, %v14170_v44  ;;  %v17057_v63 = vld [vmem:[#allocation154_spill] sm:$0xff]  ;;  %v17058_v60 = vld [vmem:[#allocation155_spill] sm:$0xff] }
 0x31d   : > { %v1643_v42 = vmul.f32 %v14264_v54, %v17056_v15  ;;  %v2068_v30 = vmul.f32 %v14305_v57, %v13675_v21  ;;  %v14341_v13 = vadd.f32 %v1637_v40, %v14173_v33  ;;  %v14344_v61 = vadd.f32 %v1640_v6, %v14176_v0  ;;  %v14353_v44 = vld [vmem:[%s16685_s1 + $0x8] ss:$0 sm:$0xff]  ;;  %v17059_v0 = vld [vmem:[#allocation165_spill] sm:$0xff] }
 0x31e   : > { %v14326_v22 = vpop.permute.xlu1 %2046  ;;  %v1645_v35 = vmul.f32 %v14264_v54, %v17058_v60  ;;  %v14356_v24 = vadd.f32 %v1639_v25, %v14181_v55  ;;  %v14359_v21 = vadd.f32 %v1642_v31, %v14184_v4  ;;  %v1903_v33 = vadd.f32 %v1871_v2, %v1656_v3 }
 0x31f   : > { %17054 = vst [vmem:[#allocation25_spill] sm:$0xff] %v14326_v22  ;;  %v14328_v17 = vpop.permute.xlu0 %2058  ;;  %v1873_v40 = vmul.f32 %v13641_v5, %v17059_v0  ;;  %v14364_v6 = vadd.f32 %v1641_v20, %v14195_v59  ;;  %v14367_v15 = vadd.f32 %v1644_v53, %v14198_v14  ;;  %v17061_v22 = vld [vmem:[#allocation157_spill] sm:$0xff]  ;;  %v14376_v3 = vadd.f32 %v1643_v42, %v14205_v50  ;;  %v17063_v53 = vld [vmem:[#allocation158_spill] sm:$0xff] }
 0x320   : > { %17055 = vst [vmem:[#allocation26_spill] sm:$0xff] %v14328_v17  ;;  %v1646_v17 = vmul.f32 %v14264_v54, %v17057_v63  ;;  %v17060_v63 = vld [vmem:[#allocation156_spill] sm:$0xff]  ;;  %v1647_v55 = vmul.f32 %v14264_v54, %v17061_v22  ;;  %v2100_v31 = vadd.f32 %v2068_v30, %v1903_v33  ;;  %v2070_v59 = vmul.f32 %v14305_v57, %v13711_v26  ;;  %v17064_v0 = vld [vmem:[#allocation166_spill] sm:$0xff]  ;;  %v14394_v50 = vld [vmem:[%s16686_s2] ss:$0 sm:$0xff] }
 0x321   : > { %v1648_v60 = vmul.f32 %v14264_v54, %v17060_v63  ;;  %v14385_v2 = vadd.f32 %v1645_v35, %v14214_v38  ;;  %v1650_v22 = vmul.f32 %v14264_v54, %v17063_v53  ;;  %v1872_v63 = vmul.f32 %v13641_v5, %v17064_v0  ;;  %v17065_v26 = vld [vmem:[#allocation159_spill] sm:$0xff] }
 0x322   : > { %v14373_v25 = vpop.permute.xlu1 %2054  ;;  %v14382_v14 = vadd.f32 %v1646_v17, %v14208_v10  ;;  %v1649_v42 = vmul.f32 %v14264_v54, %v17065_v26  ;;  %v1905_v30 = vadd.f32 %v1873_v40, %v1658_v45  ;;  %v17066_v10 = vld [vmem:[#allocation167_spill] sm:$0xff]  ;;  %v14404_v33 = vadd.f32 %v1647_v55, %v14226_v28  ;;  %v17068_v55 = vld [vmem:[#allocation168_spill] sm:$0xff] }
 0x323   : > { %17062 = vst [vmem:[#allocation27_spill] sm:$0xff] %v14373_v25  ;;  %v2136_v4 = vpop.permute.xlu0 %2135  ;;  %v1875_v17 = vmul.f32 %v13641_v5, %v17066_v10  ;;  %v14401_v35 = vadd.f32 %v1648_v60, %v14223_v8  ;;  %v2069_v0 = vmul.f32 %v14305_v57, %v13752_v51  ;;  %v2072_v40 = vmul.f32 %v14305_v57, %v13754_v43  ;;  %v17069_v51 = vld [vmem:[#allocation169_spill] sm:$0xff] }
 0x324   : > { %v2265_v20 = vmul.f32 %v14353_v44, %v2136_v4  ;;  %v17067_v4 = vld [vmem:[#allocation160_spill] sm:$0xff]  ;;  %v2102_v45 = vadd.f32 %v2070_v59, %v1905_v30  ;;  %v14417_v28 = vadd.f32 %v1650_v22, %v14237_v23  ;;  %v1904_v60 = vadd.f32 %v1872_v63, %v14259_v11 }
 0x325   : > { %v1652_v53 = vmul.f32 %v14264_v54, %v17067_v4  ;;  %v1877_v10 = vmul.f32 %v13641_v5, %v17069_v51  ;;  %v14425_v59 = vadd.f32 %v1649_v42, %v14240_v1  ;;  %v1907_v43 = vadd.f32 %v1875_v17, %v14269_v41 }
 0x326   : > { %v2297_v38 = vadd.f32 %v2265_v20, %v2100_v31  ;;  %v14410_v25 = vpop.permute.xlu1 %2062  ;;  %v1874_v20 = vmul.f32 %v13641_v5, %v17068_v55  ;;  %v2101_v23 = vadd.f32 %v2069_v0, %v1904_v60  ;;  %v2071_v11 = vmul.f32 %v14305_v57, %v13794_v58  ;;  %v17071_v0 = vld [vmem:[#allocation171_spill] sm:$0xff] }
 0x327   : > { %v2144_v26 = vpop.permute.xlu0 %2143  ;;  %v14429_v4 = vadd.f32 %v1652_v53, %v14247_v12  ;;  %v2074_v22 = vmul.f32 %v14305_v57, %v13796_v32  ;;  %v2104_v55 = vadd.f32 %v2072_v40, %v1907_v43  ;;  %v1909_v17 = vadd.f32 %v1877_v10, %v14283_v37  ;;  %v17070_v53 = vld [vmem:[#allocation170_spill] sm:$0xff] }
 0x328   : > { %v2336_v31 = vadd.f32 %v14394_v50, %v2297_v38  ;;  %v2267_v8 = vmul.f32 %v14353_v44, %v2144_v26  ;;  %v1906_v12 = vadd.f32 %v1874_v20, %v14272_v29  ;;  %v1876_v58 = vmul.f32 %v13641_v5, %v17070_v53 }
 0x329   : > { %v1879_v32 = vmul.f32 %v13641_v5, %v17071_v0  ;;  %v2106_v43 = vadd.f32 %v2074_v22, %v1909_v17  ;;  %v2073_v29 = vmul.f32 %v14305_v57, %v13845_v34  ;;  %v2076_v37 = vmul.f32 %v14305_v57, %v13847_v7  ;;  %v17073_v34 = vld [vmem:[#allocation172_spill] sm:$0xff]  ;;  %v17074_v7 = vld [vmem:[#allocation173_spill] sm:$0xff] }
 0x32a   : > { %v2368_v30 = vmax.f32 %v2336_v31, 0.0  ;;  %v2299_v38 = vadd.f32 %v2267_v8, %v2102_v45  ;;  %v2140_v63 = vpop.permute.xlu1 %2139  ;;  %v17072_v45 = vld [vmem:[#allocation161_spill] sm:$0xff]  ;;  %v2103_v51 = vadd.f32 %v2071_v11, %v1906_v12  ;;  %v1908_v11 = vadd.f32 %v1876_v58, %v14286_v39 }
 0x32b   : > { %v2152_v26 = vpop.permute.xlu0 %2151  ;;  %v2266_v41 = vmul.f32 %v14353_v44, %v2140_v63  ;;  %v14447_v40 = vmul.f32 %v14264_v54, %v17072_v45  ;;  %v1911_v22 = vadd.f32 %v1879_v32, %v14293_v48  ;;  %v1878_v63 = vmul.f32 %v13641_v5, %v17073_v34 }
 0x32c   : > { %2401 = vst.msk [vmem:[#allocation3 + $0x19] sm:$0xff] %vm283_vm3, %v2368_v30  ;;  %v2338_v1 = vadd.f32 %v14394_v50, %v2299_v38  ;;  %v2269_v42 = vmul.f32 %v14353_v44, %v2152_v26  ;;  %v1881_v26 = vmul.f32 %v13641_v5, %v17074_v7  ;;  %v2105_v12 = vadd.f32 %v2073_v29, %v1908_v11 }
 0x32d   : > { %v2298_v8 = vadd.f32 %v2266_v41, %v2101_v23  ;;  %v2108_v17 = vadd.f32 %v2076_v37, %v1911_v22  ;;  %v2075_v53 = vmul.f32 %v14305_v57, %v13889_v18  ;;  %v2078_v39 = vmul.f32 %v14305_v57, %v13891_v52 }
 0x32e   : > { %v2370_v31 = vmax.f32 %v2338_v1, 0.0  ;;  %v2301_v60 = vadd.f32 %v2269_v42, %v2104_v55  ;;  %v2148_v20 = vpop.permute.xlu1 %2147  ;;  %v1913_v18 = vadd.f32 %v1881_v26, %v14308_v47 }
 0x32f   : > { %v2160_v10 = vpop.permute.xlu0 %2159  ;;  %v2337_v30 = vadd.f32 %v14394_v50, %v2298_v8  ;;  %v2268_v38 = vmul.f32 %v14353_v44, %v2148_v20  ;;  %v1910_v8 = vadd.f32 %v1878_v63, %v14296_v36 }
 0x330   : > { %2403 = vst.msk [vmem:[#allocation3 + $0x31] sm:$0xff] %vm283_vm3, %v2370_v31  ;;  %v2340_v54 = vadd.f32 %v14394_v50, %v2301_v60  ;;  %v2271_v23 = vmul.f32 %v14353_v44, %v2160_v10  ;;  %v17075_v60 = vld [vmem:[#allocation174_spill] sm:$0xff] }
 0x331   : > { %v2369_v55 = vmax.f32 %v2337_v30, 0.0  ;;  %v2300_v41 = vadd.f32 %v2268_v38, %v2103_v51  ;;  %v1880_v52 = vmul.f32 %v13641_v5, %v17075_v60  ;;  %v17076_v51 = vld [vmem:[#allocation175_spill] sm:$0xff]  ;;  %v2107_v30 = vadd.f32 %v2075_v53, %v1910_v8 }
 0x332   : > { %v2372_v1 = vmax.f32 %v2340_v54, 0.0  ;;  %v2303_v42 = vadd.f32 %v2271_v23, %v2106_v43  ;;  %v2156_v58 = vpop.permute.xlu1 %2155  ;;  %v1883_v43 = vmul.f32 %v13641_v5, %v17076_v51  ;;  %v2110_v54 = vadd.f32 %v2078_v39, %v1913_v18  ;;  %v17077_v23 = vld [vmem:[#allocation39_spill] sm:$0xff] }
 0x333   : > { %v2168_v48 = vpop.permute.xlu0 %2167  ;;  %2402 = vst.msk [vmem:[#allocation3 + $0x21] sm:$0xff] %vm283_vm3, %v2369_v55  ;;  %v2339_v0 = vadd.f32 %v14394_v50, %v2300_v41  ;;  %v2270_v45 = vmul.f32 %v14353_v44, %v2156_v58  ;;  %v2077_v38 = vmul.f32 %v14305_v57, %v13932_v49  ;;  %v2080_v36 = vmul.f32 %v14305_v57, %v17077_v23  ;;  %v17078_v55 = vld [vmem:[#allocation176_spill] sm:$0xff]  ;;  %v17079_v41 = vld [vmem:[#allocation177_spill] sm:$0xff] }
 0x334   : > { %2405 = vst.msk [vmem:[#allocation3 + $0x49] sm:$0xff] %vm283_vm3, %v2372_v1  ;;  %v2342_v32 = vadd.f32 %v14394_v50, %v2303_v42  ;;  %v2273_v31 = vmul.f32 %v14353_v44, %v2168_v48  ;;  %v1912_v26 = vadd.f32 %v1880_v52, %v14317_v56  ;;  %v1915_v49 = vadd.f32 %v1883_v43, %v14320_v62 }
 0x335   : > { %v2371_v29 = vmax.f32 %v2339_v0, 0.0  ;;  %v2302_v20 = vadd.f32 %v2270_v45, %v2105_v12  ;;  %v1882_v1 = vmul.f32 %v13641_v5, %v17078_v55  ;;  %v1885_v42 = vmul.f32 %v13641_v5, %v17079_v41  ;;  %v17080_v0 = vld [vmem:[#allocation17_spill] sm:$0xff]  ;;  %v17081_v45 = vld [vmem:[#allocation70_spill] sm:$0xff] }
 0x336   : > { %v2374_v37 = vmax.f32 %v2342_v32, 0.0  ;;  %v2305_v10 = vadd.f32 %v2273_v31, %v2108_v17  ;;  %v2164_v11 = vpop.permute.xlu1 %2163  ;;  %v2109_v58 = vadd.f32 %v2077_v38, %v1912_v26  ;;  %v2112_v48 = vadd.f32 %v2080_v36, %v1915_v49 }
 0x337   : > { %v2176_v47 = vpop.permute.xlu0 %2175  ;;  %2404 = vst.msk [vmem:[#allocation3 + $0x39] sm:$0xff] %vm283_vm3, %v2371_v29  ;;  %v2341_v22 = vadd.f32 %v14394_v50, %v2302_v20  ;;  %v2272_v63 = vmul.f32 %v14353_v44, %v2164_v11  ;;  %v2079_v32 = vmul.f32 %v14305_v57, %v17080_v0  ;;  %v2082_v56 = vmul.f32 %v14305_v57, %v17081_v45  ;;  %v17082_v29 = vld [vmem:[#allocation178_spill] sm:$0xff]  ;;  %v17083_v20 = vld [vmem:[#allocation179_spill] sm:$0xff] }
 0x338   : > { %2407 = vst.msk [vmem:[#allocation3 + $0x61] sm:$0xff] %vm283_vm3, %v2374_v37  ;;  %v2344_v34 = vadd.f32 %v14394_v50, %v2305_v10  ;;  %v2275_v7 = vmul.f32 %v14353_v44, %v2176_v47  ;;  %v1914_v51 = vadd.f32 %v1882_v1, %v14331_v46  ;;  %v1917_v43 = vadd.f32 %v1885_v42, %v14334_v9  ;;  %v17085_v1 = vld [vmem:[#allocation180_spill] sm:$0xff]  ;;  %v17086_v42 = vld [vmem:[#allocation181_spill] sm:$0xff] }
 0x339   : > { %v2373_v12 = vmax.f32 %v2341_v22, 0.0  ;;  %v2304_v53 = vadd.f32 %v2272_v63, %v2107_v30  ;;  %v1884_v37 = vmul.f32 %v13641_v5, %v17082_v29  ;;  %v1887_v10 = vmul.f32 %v13641_v5, %v17083_v20  ;;  %v17084_v22 = vld [vmem:[#allocation130_spill] sm:$0xff] }
 0x33a   : > { %v2376_v17 = vmax.f32 %v2344_v34, 0.0  ;;  %v2307_v39 = vadd.f32 %v2275_v7, %v2110_v54  ;;  %v2172_v31 = vpop.permute.xlu1 %2171  ;;  %v2111_v36 = vadd.f32 %v2079_v32, %v1914_v51  ;;  %v2114_v11 = vadd.f32 %v2082_v56, %v1917_v43  ;;  %v17087_v32 = vld [vmem:[#allocation18_spill] sm:$0xff]  ;;  %v17088_v56 = vld [vmem:[#allocation100_spill] sm:$0xff] }
 0x33b   : > { %v2184_v62 = vpop.permute.xlu0 %2183  ;;  %2406 = vst.msk [vmem:[#allocation3 + $0x51] sm:$0xff] %vm283_vm3, %v2373_v12  ;;  %v2343_v8 = vadd.f32 %v14394_v50, %v2304_v53  ;;  %v2274_v60 = vmul.f32 %v14353_v44, %v2172_v31  ;;  %v2081_v47 = vmul.f32 %v14305_v57, %v14018_v16  ;;  %v2084_v46 = vmul.f32 %v14305_v57, %v17084_v22  ;;  %v17089_v43 = vld [vmem:[#allocation182_spill] sm:$0xff] }
 0x33c   : > { %2409 = vst.msk [vmem:[#allocation3 + $0x79] sm:$0xff] %vm283_vm3, %v2376_v17  ;;  %v2346_v18 = vadd.f32 %v14394_v50, %v2307_v39  ;;  %v2277_v52 = vmul.f32 %v14353_v44, %v2184_v62  ;;  %v1916_v55 = vadd.f32 %v1884_v37, %v14341_v13  ;;  %v1919_v16 = vadd.f32 %v1887_v10, %v14344_v61  ;;  %v17090_v37 = vld [vmem:[#allocation183_spill] sm:$0xff] }
 0x33d   : > { %v2375_v30 = vmax.f32 %v2343_v8, 0.0  ;;  %v2306_v38 = vadd.f32 %v2274_v60, %v2109_v58  ;;  %v1886_v41 = vmul.f32 %v13641_v5, %v17085_v1  ;;  %v1889_v12 = vmul.f32 %v13641_v5, %v17086_v42 }
 0x33e   : > { %v2378_v54 = vmax.f32 %v2346_v18, 0.0  ;;  %v2309_v23 = vadd.f32 %v2277_v52, %v2112_v48  ;;  %v2180_v34 = vpop.permute.xlu1 %2179  ;;  %v2113_v48 = vadd.f32 %v2081_v47, %v1916_v55  ;;  %v2116_v0 = vadd.f32 %v2084_v46, %v1919_v16  ;;  %v17091_v47 = vld [vmem:[#allocation162_spill] sm:$0xff]  ;;  %v17093_v55 = vld [vmem:[#allocation185_spill] sm:$0xff] }
 0x33f   : > { %v2192_v9 = vpop.permute.xlu0 %2191  ;;  %2408 = vst.msk [vmem:[#allocation3 + $0x69] sm:$0xff] %vm283_vm3, %v2375_v30  ;;  %v2345_v63 = vadd.f32 %v14394_v50, %v2306_v38  ;;  %v2276_v26 = vmul.f32 %v14353_v44, %v2180_v34  ;;  %v2083_v45 = vmul.f32 %v14305_v57, %v17087_v32  ;;  %v2086_v13 = vmul.f32 %v14305_v57, %v17088_v56 }
 0x340   : > { %2411 = vst.msk [vmem:[#allocation3 + $0x91] sm:$0xff] %vm283_vm3, %v2378_v54  ;;  %v2348_v7 = vadd.f32 %v14394_v50, %v2309_v23  ;;  %v2279_v49 = vmul.f32 %v14353_v44, %v2192_v9  ;;  %v1918_v52 = vadd.f32 %v1886_v41, %v14356_v24  ;;  %v1921_v51 = vadd.f32 %v1889_v12, %v14359_v21 }
 0x341   : > { %v2377_v17 = vmax.f32 %v2345_v63, 0.0  ;;  %v2308_v39 = vadd.f32 %v2276_v26, %v2111_v36  ;;  %v1888_v29 = vmul.f32 %v13641_v5, %v17089_v43  ;;  %v1891_v20 = vmul.f32 %v13641_v5, %v17090_v37  ;;  %v17092_v26 = vld [vmem:[#allocation184_spill] sm:$0xff] }
 0x342   : > { %v2380_v53 = vmax.f32 %v2348_v7, 0.0  ;;  %v2311_v58 = vadd.f32 %v2279_v49, %v2114_v11  ;;  %v2188_v31 = vpop.permute.xlu1 %2187  ;;  %v2115_v23 = vadd.f32 %v2083_v45, %v1918_v52  ;;  %v2118_v36 = vadd.f32 %v2086_v13, %v1921_v51 }
 0x343   : > { %v2200_v61 = vpop.permute.xlu0 %2199  ;;  %2410 = vst.msk [vmem:[#allocation3 + $0x81] sm:$0xff] %vm283_vm3, %v2377_v17  ;;  %v2347_v62 = vadd.f32 %v14394_v50, %v2308_v39  ;;  %v2278_v18 = vmul.f32 %v14353_v44, %v2188_v31  ;;  %v2085_v11 = vmul.f32 %v14305_v57, %v14103_v27  ;;  %v2088_v24 = vmul.f32 %v14305_v57, %v17091_v47  ;;  %v17094_v39 = vld [vmem:[#allocation19_spill] sm:$0xff] }
 0x344   : > { %2413 = vst.msk [vmem:[#allocation3 + $0xa9] sm:$0xff] %vm283_vm3, %v2380_v53  ;;  %v2350_v8 = vadd.f32 %v14394_v50, %v2311_v58  ;;  %v2281_v60 = vmul.f32 %v14353_v44, %v2200_v61  ;;  %v1920_v7 = vadd.f32 %v1888_v29, %v14364_v6  ;;  %v1923_v27 = vadd.f32 %v1891_v20, %v14367_v15  ;;  %v12050_v61 = vld [vmem:[%s16685_s1 + $0x6] ss:$0 sm:$0xff] }
 0x345   : > { %v2379_v10 = vmax.f32 %v2347_v62, 0.0  ;;  %v2310_v54 = vadd.f32 %v2278_v18, %v2113_v48  ;;  %v1890_v49 = vmul.f32 %v13641_v5, %v17092_v26  ;;  %v1893_v16 = vmul.f32 %v13641_v5, %v17093_v55  ;;  %v17095_v48 = vld [vmem:[#allocation20_spill] sm:$0xff]  ;;  %v17096_v62 = vld [vmem:[#allocation186_spill] sm:$0xff]  ;;  %v17097_v18 = vld [vmem:[#allocation187_spill] sm:$0xff] }
 0x346   : > { %v2382_v30 = vmax.f32 %v2350_v8, 0.0  ;;  %v2313_v38 = vadd.f32 %v2281_v60, %v2116_v0  ;;  %v2196_v22 = vpop.permute.xlu1 %2195  ;;  %v2117_v17 = vadd.f32 %v2085_v11, %v1920_v7  ;;  %v2120_v53 = vadd.f32 %v2088_v24, %v1923_v27 }
 0x347   : > { %v2208_v21 = vpop.permute.xlu0 %2207  ;;  %2412 = vst.msk [vmem:[#allocation3 + $0x99] sm:$0xff] %vm283_vm3, %v2379_v10  ;;  %v2349_v46 = vadd.f32 %v14394_v50, %v2310_v54  ;;  %v2280_v9 = vmul.f32 %v14353_v44, %v2196_v22  ;;  %v2087_v58 = vmul.f32 %v14305_v57, %v17094_v39  ;;  %v2090_v6 = vmul.f32 %v14305_v57, %v17095_v48  ;;  %v17098_v10 = vld [vmem:[#allocation21_spill] sm:$0xff] }
 0x348   : > { %2415 = vst.msk [vmem:[#allocation3 + $0xc1] sm:$0xff] %vm283_vm3, %v2382_v30  ;;  %v2352_v34 = vadd.f32 %v14394_v50, %v2313_v38  ;;  %v2283_v63 = vmul.f32 %v14353_v44, %v2208_v21  ;;  %v1922_v13 = vadd.f32 %v1890_v49, %v14376_v3  ;;  %v1925_v31 = vadd.f32 %v1893_v16, %v14382_v14  ;;  %v17099_v3 = vld [vmem:[#allocation131_spill] sm:$0xff]  ;;  %v17100_v21 = vld [vmem:[#allocation9_spill] sm:$0xff] }
 0x349   : > { %v2381_v1 = vmax.f32 %v2349_v46, 0.0  ;;  %v2312_v42 = vadd.f32 %v2280_v9, %v2115_v23  ;;  %v1892_v8 = vmul.f32 %v12050_v61, %v17096_v62  ;;  %v1895_v60 = vmul.f32 %v12050_v61, %v17097_v18 }
 0x34a   : > { %v2384_v41 = vmax.f32 %v2352_v34, 0.0  ;;  %v2315_v12 = vadd.f32 %v2283_v63, %v2118_v36  ;;  %v2204_v0 = vpop.permute.xlu1 %2203  ;;  %v2119_v37 = vadd.f32 %v2087_v58, %v1922_v13  ;;  %v2122_v20 = vadd.f32 %v2090_v6, %v1925_v31  ;;  %v17101_v34 = vld [vmem:[#allocation10_spill] sm:$0xff]  ;;  %v17103_v58 = vld [vmem:[#allocation13_spill] sm:$0xff]  ;;  %v17105_v31 = vld [vmem:[#allocation24_spill] sm:$0xff] }
 0x34b   : > { %v2216_v15 = vpop.permute.xlu0 %2215  ;;  %2414 = vst.msk [vmem:[#allocation3 + $0xb1] sm:$0xff] %vm283_vm3, %v2381_v1  ;;  %v2351_v5 = vadd.f32 %v14394_v50, %v2312_v42  ;;  %v2282_v45 = vmul.f32 %v14353_v44, %v2204_v0  ;;  %v2089_v30 = vmul.f32 %v14305_v57, %v17098_v10  ;;  %v2092_v14 = vmul.f32 %v14305_v57, %v17099_v3  ;;  %v17102_v1 = vld [vmem:[#allocation22_spill] sm:$0xff]  ;;  %v17104_v6 = vld [vmem:[#allocation69_spill] sm:$0xff] }
 0x34c   : > { %2417 = vst.msk [vmem:[#allocation3 + $0xd9] sm:$0xff] %vm283_vm3, %v2384_v41  ;;  %v2354_v32 = vadd.f32 %v14394_v50, %v2315_v12  ;;  %v2285_v56 = vmul.f32 %v14353_v44, %v2216_v15  ;;  %v1924_v24 = vadd.f32 %v1892_v8, %v14385_v2  ;;  %v1927_v22 = vadd.f32 %v1895_v60, %v14401_v35  ;;  %v17106_v8 = vld [vmem:[#allocation163_spill] sm:$0xff] }
 0x34d   : > { %v2383_v52 = vmax.f32 %v2351_v5, 0.0  ;;  %v2314_v43 = vadd.f32 %v2282_v45, %v2117_v17  ;;  %v1894_v46 = vmul.f32 %v12050_v61, %v17100_v21  ;;  %v1897_v9 = vmul.f32 %v12050_v61, %v17101_v34 }
 0x34e   : > { %v2386_v51 = vmax.f32 %v2354_v32, 0.0  ;;  %v2317_v29 = vadd.f32 %v2285_v56, %v2120_v53  ;;  %v2212_v54 = vpop.permute.xlu1 %2211  ;;  %v2121_v49 = vadd.f32 %v2089_v30, %v1924_v24  ;;  %v2124_v55 = vadd.f32 %v2092_v14, %v1927_v22  ;;  %v17108_v30 = vld [vmem:[#allocation11_spill] sm:$0xff]  ;;  %v17110_v22 = vld [vmem:[#allocation26_spill] sm:$0xff] }
 0x34f   : > { %v2224_v38 = vpop.permute.xlu0 %2223  ;;  %2416 = vst.msk [vmem:[#allocation3 + $0xc9] sm:$0xff] %vm283_vm3, %v2383_v52  ;;  %v2353_v23 = vadd.f32 %v14394_v50, %v2314_v43  ;;  %v2284_v11 = vmul.f32 %v14353_v44, %v2212_v54  ;;  %v2091_v16 = vmul.f32 %v14305_v57, %v14232_v19  ;;  %v2094_v41 = vmul.f32 %v14305_v57, %v17102_v1  ;;  %v17112_v1 = vld [vmem:[#allocation27_spill] sm:$0xff] }
 0x350   : > { %2419 = vst.msk [vmem:[#allocation3 + $0xf1] sm:$0xff] %vm283_vm3, %v2386_v51  ;;  %v2356_v36 = vadd.f32 %v14394_v50, %v2317_v29  ;;  %v2287_v47 = vmul.f32 %v14353_v44, %v2224_v38  ;;  %v1926_v39 = vadd.f32 %v1894_v46, %v14404_v33  ;;  %v1929_v19 = vadd.f32 %v1897_v9, %v14417_v28  ;;  %v17107_v29 = vld [vmem:[#allocation23_spill] sm:$0xff] }
 0x351   : > { %v2385_v63 = vmax.f32 %v2353_v23, 0.0  ;;  %v2316_v27 = vadd.f32 %v2284_v11, %v2119_v37  ;;  %v1896_v48 = vmul.f32 %v12050_v61, %v17103_v58  ;;  %v1899_v0 = vmul.f32 %v12050_v61, %v17104_v6  ;;  %v17113_v6 = vld [vmem:[#allocation15_spill] sm:$0xff] }
 0x352   : > { %v2388_v7 = vmax.f32 %v2356_v36, 0.0  ;;  %v2319_v26 = vadd.f32 %v2287_v47, %v2122_v20  ;;  %v2220_v42 = vpop.permute.xlu1 %2219  ;;  %v2123_v56 = vadd.f32 %v2091_v16, %v1926_v39  ;;  %v2126_v13 = vadd.f32 %v2094_v41, %v1929_v19  ;;  %v17109_v47 = vld [vmem:[#allocation25_spill] sm:$0xff] }
 0x353   : > { %v2232_v2 = vpop.permute.xlu0 %2231  ;;  %2418 = vst.msk [vmem:[#allocation3 + $0xe1] sm:$0xff] %vm283_vm3, %v2385_v63  ;;  %v2355_v35 = vadd.f32 %v14394_v50, %v2316_v27  ;;  %v2286_v17 = vmul.f32 %v14353_v44, %v2220_v42  ;;  %v2093_v62 = vmul.f32 %v14305_v57, %v17105_v31  ;;  %v2096_v18 = vmul.f32 %v14305_v57, %v17106_v8 }
 0x354   : > { %2421 = vst.msk [vmem:[#allocation3 + $0x109] sm:$0xff] %vm283_vm3, %v2388_v7  ;;  %v2358_v12 = vadd.f32 %v14394_v50, %v2319_v26  ;;  %v2289_v53 = vmul.f32 %v14353_v44, %v2232_v2  ;;  %v1683_v37 = vadd.f32 %v14447_v40, %v17107_v29  ;;  %v1928_v20 = vadd.f32 %v1896_v48, %v14425_v59 }
 0x355   : > { %v2387_v15 = vmax.f32 %v2355_v35, 0.0  ;;  %v2318_v32 = vadd.f32 %v2286_v17, %v2121_v49  ;;  %v1931_v10 = vadd.f32 %v1899_v0, %v14429_v4  ;;  %v1898_v3 = vmul.f32 %v12050_v61, %v17108_v30 }
 0x356   : > { %v2390_v5 = vmax.f32 %v2358_v12, 0.0  ;;  %v2321_v45 = vadd.f32 %v2289_v53, %v2124_v55  ;;  %v2228_v60 = vpop.permute.xlu1 %2227  ;;  %v2125_v36 = vadd.f32 %v2093_v62, %v1928_v20  ;;  %v2095_v24 = vmul.f32 %v14305_v57, %v17109_v47  ;;  %v17111_v55 = vld [vmem:[#allocation14_spill] sm:$0xff] }
 0x357   : > { %v2240_v33 = vpop.permute.xlu0 %2239  ;;  %2420 = vst.msk [vmem:[#allocation3 + $0xf9] sm:$0xff] %vm283_vm3, %v2387_v15  ;;  %v2357_v28 = vadd.f32 %v14394_v50, %v2318_v32  ;;  %v2288_v51 = vmul.f32 %v14353_v44, %v2228_v60  ;;  %v2128_v11 = vadd.f32 %v2096_v18, %v1931_v10  ;;  %v2098_v21 = vmul.f32 %v14305_v57, %v17110_v22  ;;  %v17114_v18 = vld [vmem:[#allocation16_spill] sm:$0xff] }
 0x358   : > { %2423 = vst.msk [vmem:[#allocation3 + $0x121] sm:$0xff] %vm283_vm3, %v2390_v5  ;;  %v2360_v52 = vadd.f32 %v14394_v50, %v2321_v45  ;;  %v2291_v43 = vmul.f32 %v14353_v44, %v2240_v33  ;;  %v1930_v9 = vadd.f32 %v1898_v3, %v1683_v37  ;;  %v2097_v41 = vmul.f32 %v14305_v57, %v17112_v1 }
 0x359   : > { %v2389_v14 = vmax.f32 %v2357_v28, 0.0  ;;  %v2320_v38 = vadd.f32 %v2288_v51, %v2123_v56  ;;  %v2130_v16 = vadd.f32 %v2098_v21, %v17111_v55  ;;  %v2099_v5 = vmul.f32 %v14305_v57, %v14410_v25 }
 0x35a   : > { %v2392_v54 = vmax.f32 %v2360_v52, 0.0  ;;  %v2323_v23 = vadd.f32 %v2291_v43, %v2126_v13  ;;  %v2236_v46 = vpop.permute.xlu1 %2235  ;;  %v2127_v49 = vadd.f32 %v2095_v24, %v1930_v9  ;;  %v2129_v0 = vadd.f32 %v2097_v41, %v17113_v6 }
 0x35b   : > { %v2248_v40 = vpop.permute.xlu0 %2247  ;;  %2422 = vst.msk [vmem:[#allocation3 + $0x111] sm:$0xff] %vm283_vm3, %v2389_v14  ;;  %v2359_v59 = vadd.f32 %v14394_v50, %v2320_v38  ;;  %v2290_v61 = vmul.f32 %v14353_v44, %v2236_v46  ;;  %v2131_v60 = vadd.f32 %v2099_v5, %v17114_v18 }
 0x35c   : > { %2425 = vst.msk [vmem:[#allocation3 + $0x139] sm:$0xff] %vm283_vm3, %v2392_v54  ;;  %v2362_v4 = vadd.f32 %v14394_v50, %v2323_v23  ;;  %v2293_v34 = vmul.f32 %v14353_v44, %v2248_v40 }
 0x35d   : > { %v2391_v63 = vmax.f32 %v2359_v59, 0.0  ;;  %v2322_v27 = vadd.f32 %v2290_v61, %v2125_v36 }
 0x35e   : > { %v2394_v7 = vmax.f32 %v2362_v4, 0.0  ;;  %v2325_v26 = vadd.f32 %v2293_v34, %v2128_v11  ;;  %v2244_v42 = vpop.permute.xlu1 %2243 }
 0x35f   : > { %v2256_v2 = vpop.permute.xlu0 %2255  ;;  %2424 = vst.msk [vmem:[#allocation3 + $0x129] sm:$0xff] %vm283_vm3, %v2391_v63  ;;  %v2361_v35 = vadd.f32 %v14394_v50, %v2322_v27  ;;  %v2292_v17 = vmul.f32 %v14353_v44, %v2244_v42 }
 0x360   : > { %2427 = vst.msk [vmem:[#allocation3 + $0x151] sm:$0xff] %vm283_vm3, %v2394_v7  ;;  %v2364_v12 = vadd.f32 %v14394_v50, %v2325_v26  ;;  %v2295_v53 = vmul.f32 %v14353_v44, %v2256_v2 }
 0x361   : > { %v2393_v39 = vmax.f32 %v2361_v35, 0.0  ;;  %v2324_v58 = vadd.f32 %v2292_v17, %v2127_v49 }
 0x362   : > { %v2396_v19 = vmax.f32 %v2364_v12, 0.0  ;;  %v2327_v48 = vadd.f32 %v2295_v53, %v2130_v16  ;;  %v2252_v15 = vpop.permute.xlu1 %2251 }
 0x363   : > { %2426 = vst.msk [vmem:[#allocation3 + $0x141] sm:$0xff] %vm283_vm3, %v2393_v39  ;;  %v2363_v32 = vadd.f32 %v14394_v50, %v2324_v58  ;;  %v2294_v56 = vmul.f32 %v14353_v44, %v2252_v15 }
 0x364   : > { %2429 = vst.msk [vmem:[#allocation3 + $0x169] sm:$0xff] %vm283_vm3, %v2396_v19  ;;  %v2366_v45 = vadd.f32 %v14394_v50, %v2327_v48 }
 0x365   : > { %v2395_v13 = vmax.f32 %v2363_v32, 0.0  ;;  %v2326_v62 = vadd.f32 %v2294_v56, %v2129_v0 }
 0x366   : > { %v2398_v31 = vmax.f32 %v2366_v45, 0.0  ;;  %v2260_v8 = vpop.permute.xlu1 %2259 }
 0x367   : > { %2428 = vst.msk [vmem:[#allocation3 + $0x159] sm:$0xff] %vm283_vm3, %v2395_v13  ;;  %v2365_v57 = vadd.f32 %v14394_v50, %v2326_v62  ;;  %v2296_v25 = vmul.f32 %v14353_v44, %v2260_v8 }
 0x368   : > { %2431 = vst.msk [vmem:[#allocation3 + $0x181] sm:$0xff] %vm283_vm3, %v2398_v31 }
 0x369   : > { %v2397_v33 = vmax.f32 %v2365_v57, 0.0  ;;  %v2328_v28 = vadd.f32 %v2296_v25, %v2131_v60 }
 0x36b   : > { %2430 = vst.msk [vmem:[#allocation3 + $0x171] sm:$0xff] %vm283_vm3, %v2397_v33  ;;  %v2367_v52 = vadd.f32 %v14394_v50, %v2328_v28 }
 0x36d   : > { %v2399_v51 = vmax.f32 %v2367_v52, 0.0 }
 0x36f   : > { %2432 = vst.msk [vmem:[#allocation3 + $0x189] sm:$0xff] %vm283_vm3, %v2399_v51 }
 0x370 LB: >> { %v2500_v44 = vld [vmem:[#allocation3 + $0x1] sm:$0xff]  ;;  %v2501_v43 = vld [vmem:[#allocation3 + $0x9] sm:$0xff]  ;;  %s10404_s23 = smul.u32 576, %s12202_s22  ;;  %v2502_v30 = vld [vmem:[#allocation3 + $0x19] sm:$0xff]  ;;  %s9848_s21 = sshll.u32 %s12202_s22, 1  ;;  %s12202_s22 = sphi %s14658_s22, %s2438_s22  }
 0x371   : >> { %v2544_v29 = vpack.c.bf16 %v2501_v43, %v2500_v44  ;;  %v2503_v3 = vld [vmem:[#allocation3 + $0x21] sm:$0xff]  ;;  %v2504_v54 = vld [vmem:[#allocation3 + $0x31] sm:$0xff]  ;;  %v2505_v38 = vld [vmem:[#allocation3 + $0x39] sm:$0xff]  ;;  %s15082_s15 = scalar_lea.vmem %s16688_s4, %s9848_s21  ;;  %s2438_s22 = sadd.s32 1, %s12202_s22  }
 0x372   : >> { %s14668_s9 = scalar_lea.vmem %s16687_s3, %s10404_s23  ;;  %v14675_v23 = vpack.c.bf16 %v2503_v3, %v2502_v30  ;;  %v14677_v36 = vpack.c.bf16 %v2505_v38, %v2504_v54  ;;  %v2506_v47 = vld [vmem:[#allocation3 + $0x49] sm:$0xff]  ;;  %v2507_v24 = vld [vmem:[#allocation3 + $0x51] sm:$0xff]  ;;  %v2508_v22 = vld [vmem:[#allocation3 + $0x61] sm:$0xff]  ;;  %s15087_s23 = scalar_lea.vmem %s16689_s5, %s9848_s21 }
 0x373   : >> { %10774 = vmatprep.mubr.msk.bf16.mxu0 %vm283_vm3, %v2544_v29  ;;  %v12051_v50 = vld [vmem:[%s14668_s9 + $0x20] sm:$0xff]   ;;  %v12052_v37 = vld [vmem:[%s14668_s9 + $0x28] sm:$0xff]   ;;  %v12053_v20 = vld [vmem:[%s14668_s9 + $0x30] sm:$0xff]   ;;  %v14685_v40 = vpack.c.bf16 %v2507_v24, %v2506_v47  ;;  %p2435_p11 = scmp.ge.s32.totalorder %s2438_s22, 6  }
 0x374   : >> { %10766 = vmatprep.subr.bf16.mxu0 %v12051_v50  ;;  %v12054_v10 = vld [vmem:[%s14668_s9 + $0x38] sm:$0xff]   ;;  %v12055_v14 = vld [vmem:[%s14668_s9] sm:$0xff]   ;;  %v12056_v11 = vld [vmem:[%s14668_s9 + $0x8] sm:$0xff]   ;;  %vm9497_vm5 = vcmask (%p2435_p11), 130112   ;;  %vm9634_vm6 = vcmask (%p2435_p11), 1041409   ;;  %vm9636_vm7 = vcmask (%p2435_p11), 1042434  }
 0x375   : >> { %10767 = vmatpush3.bf16.msra.mxu0 %v12051_v50  ;;  %v2509_v21 = vld [vmem:[#allocation3 + $0x69] sm:$0xff]  ;;  %v12057_v46 = vld [vmem:[%s14668_s9 + $0x10] sm:$0xff]   ;;  %v12058_v4 = vld [vmem:[%s14668_s9 + $0x18] sm:$0xff]   ;;  %vm9638_vm8 = vcmask (%p2435_p11), 1043459   ;;  %vm9640_vm9 = vcmask (%p2435_p11), 1044484   ;;  %vm9642_vm10 = vcmask (%p2435_p11), 1045509  }
 0x376   : >> { %10768 = vmatprep.subr.bf16.mxu0 %v12052_v37  ;;  %v14687_v59 = vpack.c.bf16 %v2509_v21, %v2508_v22  ;;  %v2510_v61 = vld [vmem:[#allocation3 + $0x79] sm:$0xff]  ;;  %v2511_v34 = vld [vmem:[#allocation3 + $0x81] sm:$0xff]  ;;  %v2512_v9 = vld [vmem:[#allocation3 + $0x91] sm:$0xff]  ;;  %vm9644_vm11 = vcmask (%p2435_p11), 1046534   ;;  %vm9646_vm12 = vcmask (%p2435_p11), 1047559   ;;  %vm9659_vm13 = vcmask (%p2435_p11), 130048  }
 0x377   : >> { %v2513_v63 = vld [vmem:[#allocation3 + $0x99] sm:$0xff]  ;;  %v12059_v7 = vld [vmem:[%s14668_s9 + $0x40] sm:$0xff]   ;;  %v14695_v27 = vpack.c.bf16 %v2511_v34, %v2510_v61  ;;  %v2515_v55 = vld [vmem:[#allocation3 + $0xb1] sm:$0xff]  ;;  %s10405_s21 = sshll.u32 (%p2435_p11), %s12270_s28, 8  ;;  %s9676_s13 = sshll.u32 (%p2435_p11), %s14656_s19, 4  ;;  %s16637_s13 = int_to_ptr.vmem [resolvable:$true] %s9676_s13 }
 0x378   : >> { %v14697_v26 = vpack.c.bf16 %v2513_v63, %v2512_v9  ;;  %v2514_v49 = vld [vmem:[#allocation3 + $0xa9] sm:$0xff]  ;;  %v2516_v16 = vld [vmem:[#allocation3 + $0xc1] sm:$0xff]  ;;  %v2518_v2 = vld [vmem:[#allocation3 + $0xd9] sm:$0xff]  ;;  %s16643_s28 = scalar_lea.sflag (%p2435_p11), [#allocation6], %s269_s20  ;;  %s12206_s16 = smov (%p2435_p11), [#allocation5]  }
 0x379   : >> { %10769 = vmatpush3.bf16.msra.mxu0 %v12052_v37  ;;  %v2517_v1 = vld [vmem:[#allocation3 + $0xc9] sm:$0xff]  ;;  %v14703_v41 = vpack.c.bf16 %v2515_v55, %v2514_v49  ;;  %v2519_v35 = vld [vmem:[#allocation3 + $0xe1] sm:$0xff]  ;;  %v2520_v12 = vld [vmem:[#allocation3 + $0xf1] sm:$0xff]  ;;  %s12136_s18 = sshll.u32 (%p2435_p11), %s12206_s16, 4  ;;  %s12137_s18 = int_to_ptr.vmem [resolvable:$false] %s12136_s18 }
 0x37a   : >> { %10770 = vmatprep.subr.bf16.mxu0 %v12053_v20  ;;  %v14705_v42 = vpack.c.bf16 %v2517_v1, %v2516_v16  ;;  %v2521_v17 = vld [vmem:[#allocation3 + $0xf9] sm:$0xff]  ;;  %v14711_v53 = vpack.c.bf16 %v2519_v35, %v2518_v2  ;;  %v2522_v19 = vld [vmem:[#allocation3 + $0x109] sm:$0xff]  ;;  %v2523_v58 = vld [vmem:[#allocation3 + $0x111] sm:$0xff]  ;;  %p12139_p1 = scmp.lt.s32.totalorder (%p2435_p11), %s16637_s13, %s12137_s18 }
 0x37b   : >> { %v14713_v39 = vpack.c.bf16 %v2521_v17, %v2520_v12  ;;  %v2524_v48 = vld [vmem:[#allocation3 + $0x121] sm:$0xff]  ;;  %v2525_v6 = vld [vmem:[#allocation3 + $0x129] sm:$0xff]  ;;  %v14719_v0 = vpack.c.bf16 %v2523_v58, %v2522_v19  ;;  %v2526_v5 = vld [vmem:[#allocation3 + $0x139] sm:$0xff] }
 0x37c   : >> { %v14721_v15 = vpack.c.bf16 %v2525_v6, %v2524_v48  ;;  %v2527_v32 = vld [vmem:[#allocation3 + $0x141] sm:$0xff]  ;;  %v2528_v45 = vld [vmem:[#allocation3 + $0x151] sm:$0xff]  ;;  %v2529_v56 = vld [vmem:[#allocation3 + $0x159] sm:$0xff] }
 0x37d   : >> { %10771 = vmatpush3.bf16.msra.mxu0 %v12053_v20  ;;  %v14727_v13 = vpack.c.bf16 %v2527_v32, %v2526_v5  ;;  %v14729_v31 = vpack.c.bf16 %v2529_v56, %v2528_v45  ;;  %v2530_v62 = vld [vmem:[#allocation3 + $0x169] sm:$0xff]  ;;  %v2531_v8 = vld [vmem:[#allocation3 + $0x171] sm:$0xff]  ;;  %v2440_v18 = vld [vmem:[#allocation3] sm:$0xff] }
 0x37e   : >> { %10772 = vmatprep.subr.bf16.mxu0 %v12054_v10  ;;  %v2441_v60 = vld [vmem:[#allocation3 + $0x8] sm:$0xff]  ;;  %v14735_v57 = vpack.c.bf16 %v2531_v8, %v2530_v62  ;;  %v2442_v33 = vld [vmem:[#allocation3 + $0x18] sm:$0xff]  ;;  %v2443_v28 = vld [vmem:[#allocation3 + $0x20] sm:$0xff] }
 0x37f   : >> { %v2484_v25 = vpack.c.bf16 %v2441_v60, %v2440_v18  ;;  %v2444_v52 = vld [vmem:[#allocation3 + $0x30] sm:$0xff]  ;;  %v2445_v51 = vld [vmem:[#allocation3 + $0x38] sm:$0xff]  ;;  %v14740_v44 = vpack.c.bf16 %v2443_v28, %v2442_v33  ;;  %v2446_v50 = vld [vmem:[#allocation3 + $0x48] sm:$0xff] }
 0x380   : >> { %v14742_v43 = vpack.c.bf16 %v2445_v51, %v2444_v52  ;;  %v12060_v29 = vld [vmem:[%s14668_s9 + $0x48] sm:$0xff]   ;;  %v2448_v20 = vld [vmem:[#allocation3 + $0x60] sm:$0xff]  ;;  %v12061_v30 = vld [vmem:[%s14668_s9 + $0x50] sm:$0xff]  }
 0x381   : >> { %10773 = vmatpush3.bf16.msra.mxu0 %v12054_v10  ;;  %v2447_v37 = vld [vmem:[#allocation3 + $0x50] sm:$0xff]  ;;  %v2449_v10 = vld [vmem:[#allocation3 + $0x68] sm:$0xff]  ;;  %v12062_v54 = vld [vmem:[%s14668_s9 + $0x58] sm:$0xff]  }
 0x382   : >> { %10806 = vmatprep.subr.bf16.mxu0 %v12055_v14  ;;  %v14750_v3 = vpack.c.bf16 %v2447_v37, %v2446_v50  ;;  %v2450_v38 = vld [vmem:[#allocation3 + $0x78] sm:$0xff]  ;;  %v2452_v47 = vld [vmem:[#allocation3 + $0x90] sm:$0xff]  ;;  %v12063_v22 = vld [vmem:[%s14668_s9 + $0x60] sm:$0xff]  }
 0x383   : >> { %v2453_v24 = vld [vmem:[#allocation3 + $0x98] sm:$0xff]  ;;  %v2455_v61 = vld [vmem:[#allocation3 + $0xb0] sm:$0xff]  ;;  %v2456_v34 = vld [vmem:[#allocation3 + $0xc0] sm:$0xff] }
 0x384   : >> { %10775 = vmatmul.mubr.msk.bf16.vlgmr.msra.gmra.mrb[0].mxu0 %vm283_vm3, %v14675_v23  ;;  %v2457_v9 = vld [vmem:[#allocation3 + $0xc8] sm:$0xff]  ;;  %v2458_v49 = vld [vmem:[#allocation3 + $0xd8] sm:$0xff]  ;;  %v2459_v55 = vld [vmem:[#allocation3 + $0xe0] sm:$0xff] }
 0x385   : >> { %10807 = vmatpush3.bf16.msra.mxu0 %v12055_v14  ;;  %10778 = vmatprep.mubr.msk.bf16.mxu0 %vm283_vm3, %v14677_v36  ;;  %v14752_v14 = vpack.c.bf16 %v2449_v10, %v2448_v20  ;;  %v2460_v16 = vld [vmem:[#allocation3 + $0xf0] sm:$0xff]  ;;  %v2461_v1 = vld [vmem:[#allocation3 + $0xf8] sm:$0xff]  ;;  %v14776_v2 = vpack.c.bf16 %v2459_v55, %v2458_v49  ;;  %v2462_v12 = vld [vmem:[#allocation3 + $0x108] sm:$0xff] }
 0x386   : >> { %10808 = vmatprep.subr.bf16.mxu0 %v12056_v11  ;;  %v14778_v35 = vpack.c.bf16 %v2461_v1, %v2460_v16  ;;  %v2463_v17 = vld [vmem:[#allocation3 + $0x110] sm:$0xff]  ;;  %v2464_v19 = vld [vmem:[#allocation3 + $0x120] sm:$0xff]  ;;  %v2465_v58 = vld [vmem:[#allocation3 + $0x128] sm:$0xff] }
 0x387   : >> { %v14784_v48 = vpack.c.bf16 %v2463_v17, %v2462_v12  ;;  %v14786_v6 = vpack.c.bf16 %v2465_v58, %v2464_v19  ;;  %v2466_v5 = vld [vmem:[#allocation3 + $0x138] sm:$0xff]  ;;  %v2467_v32 = vld [vmem:[#allocation3 + $0x140] sm:$0xff]  ;;  %v2468_v45 = vld [vmem:[#allocation3 + $0x150] sm:$0xff] }
 0x388   : >> { %v2469_v56 = vld [vmem:[#allocation3 + $0x158] sm:$0xff]  ;;  %v14792_v62 = vpack.c.bf16 %v2467_v32, %v2466_v5  ;;  %v2470_v18 = vld [vmem:[#allocation3 + $0x168] sm:$0xff]  ;;  %v2471_v60 = vld [vmem:[#allocation3 + $0x170] sm:$0xff] }
 0x389   : >> { %10809 = vmatpush3.bf16.msra.mxu0 %v12056_v11  ;;  %v2451_v11 = vld [vmem:[#allocation3 + $0x80] sm:$0xff]  ;;  %v14794_v8 = vpack.c.bf16 %v2469_v56, %v2468_v45  ;;  %v3027_v33 = vld [vmem:[#allocation3 + $0xa] sm:$0xff]  ;;  %v14800_v28 = vpack.c.bf16 %v2471_v60, %v2470_v18  ;;  %v3030_v50 = vld [vmem:[#allocation3 + $0x32] sm:$0xff] }
 0x38a   : >> { %10810 = vmatprep.subr.bf16.mxu0 %v12057_v46  ;;  %v14760_v21 = vpack.c.bf16 %v2451_v11, %v2450_v38  ;;  %v3028_v51 = vld [vmem:[#allocation3 + $0x1a] sm:$0xff]  ;;  %v3033_v38 = vld [vmem:[#allocation3 + $0x52] sm:$0xff]  ;;  %v3034_v11 = vld [vmem:[#allocation3 + $0x62] sm:$0xff] }
 0x38b   : >> { %v3031_v37 = vld [vmem:[#allocation3 + $0x3a] sm:$0xff]  ;;  %v3038_v49 = vld [vmem:[#allocation3 + $0x92] sm:$0xff]  ;;  %v12067_v16 = vld [vmem:[%s14668_s9 + $0x80] sm:$0xff]  }
 0x38c   : >> { %10779 = vmatmul.mubr.msk.bf16.gmra.mrb[4].mxu0 %vm283_vm3, %v14685_v40  ;;  %v14807_v10 = vpack.c.bf16 %v3031_v37, %v3030_v50  ;;  %v3039_v55 = vld [vmem:[#allocation3 + $0x9a] sm:$0xff]  ;;  %v3040_v17 = vld [vmem:[#allocation3 + $0xaa] sm:$0xff]  ;;  %v3041_v19 = vld [vmem:[#allocation3 + $0xb2] sm:$0xff] }
 0x38d   : >> { %10782 = vmatprep.mubr.msk.bf16.mxu0 %vm283_vm3, %v14687_v59  ;;  %10811 = vmatpush3.bf16.msra.mxu0 %v12057_v46  ;;  %v14762_v46 = vpack.c.bf16 %v2453_v24, %v2452_v47  ;;  %v3035_v47 = vld [vmem:[#allocation3 + $0x6a] sm:$0xff]  ;;  %v12065_v24 = vld [vmem:[%s14668_s9 + $0x70] sm:$0xff]   ;;  %v14827_v12 = vpack.c.bf16 %v3039_v55, %v3038_v49  ;;  %v3042_v58 = vld [vmem:[#allocation3 + $0xc2] sm:$0xff]  ;;  %v14833_v32 = vpack.c.bf16 %v3041_v19, %v3040_v17 }
 0x38e   : >> { %10812 = vmatprep.subr.bf16.mxu0 %v12058_v4  ;;  %v3043_v5 = vld [vmem:[#allocation3 + $0xca] sm:$0xff]  ;;  %v3044_v56 = vld [vmem:[#allocation3 + $0xda] sm:$0xff]  ;;  %v3045_v18 = vld [vmem:[#allocation3 + $0xe2] sm:$0xff] }
 0x38f   : >> { %v14835_v45 = vpack.c.bf16 %v3043_v5, %v3042_v58  ;;  %v3046_v60 = vld [vmem:[#allocation3 + $0xf2] sm:$0xff]  ;;  %v3050_v50 = vld [vmem:[#allocation3 + $0x122] sm:$0xff]  ;;  %v3051_v37 = vld [vmem:[#allocation3 + $0x12a] sm:$0xff] }
 0x390   : >> { %v3057_v49 = vld [vmem:[#allocation3 + $0x172] sm:$0xff]  ;;  %v12070_v58 = vld [vmem:[%s14668_s9 + $0x98] sm:$0xff]   ;;  %v3382_v5 = vld [vmem:[#allocation3 + $0x188] sm:$0xff] }
 0x391   : >> { %10813 = vmatpush3.bf16.msra.mxu0 %v12058_v4  ;;  %v2454_v4 = vld [vmem:[#allocation3 + $0xa8] sm:$0xff]  ;;  %v12068_v17 = vld [vmem:[%s14668_s9 + $0x88] sm:$0xff]   ;;  %v12069_v19 = vld [vmem:[%s14668_s9 + $0x90] sm:$0xff]  }
 0x392   : >> { %10846 = vmatprep.subr.bf16.mxu0 %v12059_v7  ;;  %v14768_v63 = vpack.c.bf16 %v2455_v61, %v2454_v4  ;;  %v14817_v61 = vpack.c.bf16 %v3035_v47, %v3034_v11  ;;  %v3053_v11 = vld [vmem:[#allocation3 + $0x142] sm:$0xff]  ;;  %v3054_v47 = vld [vmem:[#allocation3 + $0x152] sm:$0xff] }
 0x394   : >> { %10783 = vmatmul.mubr.msk.bf16.gmra.mrb[8].mxu0 %vm283_vm3, %v14695_v27 }
 0x395   : >> { %10786 = vmatprep.mubr.msk.bf16.mxu0 %vm283_vm3, %v14697_v26 }
 0x39c   : >> { %10787 = vmatmul.mubr.msk.bf16.gmra.mrb[12].mxu0 %vm283_vm3, %v14703_v41 }
 0x39d   : >> { %10790 = vmatprep.mubr.msk.bf16.mxu0 %vm283_vm3, %v14705_v42 }
 0x3a4   : >> { %10791 = vmatmul.mubr.msk.bf16.gmra.mrb[16].mxu0 %vm283_vm3, %v14711_v53 }
 0x3a5   : >> { %10794 = vmatprep.mubr.msk.bf16.mxu0 %vm283_vm3, %v14713_v39 }
 0x3ac   : >> { %10795 = vmatmul.mubr.msk.bf16.gmra.mrb[20].mxu0 %vm283_vm3, %v14719_v0 }
 0x3ad   : >> { %10798 = vmatprep.mubr.msk.bf16.mxu0 %vm283_vm3, %v14721_v15 }
 0x3b4   : >> { %10799 = vmatmul.mubr.msk.bf16.gmra.mrb[24].mxu0 %vm283_vm3, %v14727_v13 }
 0x3b5   : >> { %10802 = vmatprep.mubr.msk.bf16.mxu0 %vm283_vm3, %v14729_v31 }
 0x3bc   : >> { %10803 = vmatmul.mubr.msk.bf16.gmra.mrb[28].mxu0 %vm283_vm3, %v14735_v57 }
 0x3bd   : >> { %10814 = vmatprep.mubr.msk.bf16.mxu0 %vm283_vm3, %v2484_v25  ;;  %v3026_v25 = vld [vmem:[#allocation3 + $0x2] sm:$0xff] }
 0x3be   : >> { %v3070_v52 = vpack.c.bf16 %v3027_v33, %v3026_v25  ;;  %v3047_v25 = vld [vmem:[#allocation3 + $0xfa] sm:$0xff]  ;;  %v14841_v33 = vpack.c.bf16 %v3045_v18, %v3044_v56  ;;  %v12072_v18 = vld [vmem:[%s14668_s9 + $0xa8] sm:$0xff]  }
 0x3c4   : >> { %10815 = vmatmul.mubr.msk.bf16.vlgmr.msra.gmra.mrb[0].mxu0 %vm283_vm3, %v14740_v44 }
 0x3c5   : >> { %10847 = vmatpush3.bf16.msra.mxu0 %v12059_v7  ;;  %10818 = vmatprep.mubr.msk.bf16.mxu0 %vm283_vm3, %v14742_v43  ;;  %v14770_v7 = vpack.c.bf16 %v2457_v9, %v2456_v34  ;;  %v12066_v34 = vld [vmem:[%s14668_s9 + $0x78] sm:$0xff]  }
 0x3c6   : >> { %10848 = vmatprep.subr.bf16.mxu0 %v12060_v29  ;;  %v3037_v9 = vld [vmem:[#allocation3 + $0x82] sm:$0xff] }
 0x3c9   : >> { %10849 = vmatpush3.bf16.msra.mxu0 %v12060_v29  ;;  %v3029_v29 = vld [vmem:[#allocation3 + $0x22] sm:$0xff] }
 0x3ca   : >> { %10850 = vmatprep.subr.bf16.mxu0 %v12061_v30  ;;  %v14805_v20 = vpack.c.bf16 %v3029_v29, %v3028_v51  ;;  %v3048_v51 = vld [vmem:[#allocation3 + $0x10a] sm:$0xff]  ;;  %v3049_v29 = vld [vmem:[#allocation3 + $0x112] sm:$0xff] }
 0x3cc   : >> { %10819 = vmatmul.mubr.msk.bf16.gmra.mrb[4].mxu0 %vm283_vm3, %v14750_v3 }
 0x3cd   : >> { %10822 = vmatprep.mubr.msk.bf16.mxu0 %vm283_vm3, %v14752_v14  ;;  %10851 = vmatpush3.bf16.msra.mxu0 %v12061_v30  ;;  %v12064_v30 = vld [vmem:[%s14668_s9 + $0x68] sm:$0xff]  }
 0x3ce   : >> { %10852 = vmatprep.subr.bf16.mxu0 %v12062_v54 }
 0x3d1   : >> { %10853 = vmatpush3.bf16.msra.mxu0 %v12062_v54  ;;  %v3032_v54 = vld [vmem:[#allocation3 + $0x4a] sm:$0xff] }
 0x3d2   : >> { %10886 = vmatprep.subr.bf16.mxu0 %v12063_v22  ;;  %v14815_v4 = vpack.c.bf16 %v3033_v38, %v3032_v54  ;;  %v14851_v54 = vpack.c.bf16 %v3051_v37, %v3050_v50  ;;  %v3052_v38 = vld [vmem:[#allocation3 + $0x13a] sm:$0xff] }
 0x3d3   : >> { %v12085_v50 = vld [vmem:[%s14668_s9 + $0x110] sm:$0xff]  }
 0x3d4   : >> { %10823 = vmatmul.mubr.msk.bf16.gmra.mrb[8].mxu0 %vm283_vm3, %v14760_v21 }
 0x3d5   : >> { %10826 = vmatprep.mubr.msk.bf16.mxu0 %vm283_vm3, %v14762_v46 }
 0x3dc   : >> { %10827 = vmatmul.mubr.msk.bf16.gmra.mrb[12].mxu0 %vm283_vm3, %v14768_v63 }
 0x3dd   : >> { %10830 = vmatprep.mubr.msk.bf16.mxu0 %vm283_vm3, %v14770_v7 }
 0x3e4   : >> { %10831 = vmatmul.mubr.msk.bf16.gmra.mrb[16].mxu0 %vm283_vm3, %v14776_v2 }
 0x3e5   : >> { %10834 = vmatprep.mubr.msk.bf16.mxu0 %vm283_vm3, %v14778_v35 }
 0x3ec   : >> { %10835 = vmatmul.mubr.msk.bf16.gmra.mrb[20].mxu0 %vm283_vm3, %v14784_v48 }
 0x3ed   : >> { %10838 = vmatprep.mubr.msk.bf16.mxu0 %vm283_vm3, %v14786_v6 }
 0x3f4   : >> { %10839 = vmatmul.mubr.msk.bf16.gmra.mrb[24].mxu0 %vm283_vm3, %v14792_v62 }
 0x3f5   : >> { %10842 = vmatprep.mubr.msk.bf16.mxu0 %vm283_vm3, %v14794_v8 }
 0x3fc   : >> { %10843 = vmatmul.mubr.msk.bf16.gmra.mrb[28].mxu0 %vm283_vm3, %v14800_v28 }
 0x3fd   : >> { %10854 = vmatprep.mubr.msk.bf16.mxu0 %vm283_vm3, %v3070_v52  ;;  %v14843_v52 = vpack.c.bf16 %v3047_v25, %v3046_v60  ;;  %v12073_v60 = vld [vmem:[%s14668_s9 + $0xb0] sm:$0xff]   ;;  %v12074_v25 = vld [vmem:[%s14668_s9 + $0xb8] sm:$0xff]  }
 0x404   : >> { %10855 = vmatmul.mubr.msk.bf16.vlgmr.msra.gmra.mrb[0].mxu0 %vm283_vm3, %v14805_v20 }
 0x405   : >> { %10887 = vmatpush3.bf16.msra.mxu0 %v12063_v22  ;;  %10858 = vmatprep.mubr.msk.bf16.mxu0 %vm283_vm3, %v14807_v10  ;;  %v3036_v22 = vld [vmem:[#allocation3 + $0x7a] sm:$0xff] }
 0x406   : >> { %10888 = vmatprep.subr.bf16.mxu0 %v12064_v30  ;;  %v14825_v1 = vpack.c.bf16 %v3037_v9, %v3036_v22  ;;  %v3056_v9 = vld [vmem:[#allocation3 + $0x16a] sm:$0xff] }
 0x407   : >> { %v14865_v55 = vpack.c.bf16 %v3057_v49, %v3056_v9  ;;  %v4664_v9 = vld [vmem:[#allocation3 + $0xc1] sm:$0xff]  ;;  %v4665_v49 = vld [vmem:[#allocation3 + $0xc9] sm:$0xff] }
 0x409   : >> { %10889 = vmatpush3.bf16.msra.mxu0 %v12064_v30  ;;  %v14849_v30 = vpack.c.bf16 %v3049_v29, %v3048_v51  ;;  %v4660_v51 = vld [vmem:[#allocation3 + $0x91] sm:$0xff]  ;;  %v4661_v29 = vld [vmem:[#allocation3 + $0x99] sm:$0xff] }
 0x40a   : >> { %10890 = vmatprep.subr.bf16.mxu0 %v12065_v24 }
 0x40c   : >> { %10859 = vmatmul.mubr.msk.bf16.gmra.mrb[4].mxu0 %vm283_vm3, %v14815_v4 }
 0x40d   : >> { %10862 = vmatprep.mubr.msk.bf16.mxu0 %vm283_vm3, %v14817_v61  ;;  %10891 = vmatpush3.bf16.msra.mxu0 %v12065_v24  ;;  %v3055_v24 = vld [vmem:[#allocation3 + $0x15a] sm:$0xff] }
 0x40e   : >> { %10892 = vmatprep.subr.bf16.mxu0 %v12066_v34  ;;  %v14859_v22 = vpack.c.bf16 %v3055_v24, %v3054_v47  ;;  %v4662_v47 = vld [vmem:[#allocation3 + $0xa9] sm:$0xff]  ;;  %v4663_v24 = vld [vmem:[#allocation3 + $0xb1] sm:$0xff] }
 0x411   : >> { %10893 = vmatpush3.bf16.msra.mxu0 %v12066_v34  ;;  %v14857_v34 = vpack.c.bf16 %v3053_v11, %v3052_v38  ;;  %v4700_v38 = vpack.c.bf16 %v4661_v29, %v4660_v51  ;;  %v12086_v11 = vld [vmem:[%s14668_s9 + $0x118] sm:$0xff]  }
 0x412   : >> { %10926 = vmatprep.subr.bf16.mxu0 %v12067_v16 }
 0x414   : >> { %10863 = vmatmul.mubr.msk.bf16.gmra.mrb[8].mxu0 %vm283_vm3, %v14825_v1 }
 0x415   : >> { %10866 = vmatprep.mubr.msk.bf16.mxu0 %vm283_vm3, %v14827_v12 }
 0x41c   : >> { %10867 = vmatmul.mubr.msk.bf16.gmra.mrb[12].mxu0 %vm283_vm3, %v14833_v32 }
 0x41d   : >> { %10870 = vmatprep.mubr.msk.bf16.mxu0 %vm283_vm3, %v14835_v45 }
 0x424   : >> { %10871 = vmatmul.mubr.msk.bf16.gmra.mrb[16].mxu0 %vm283_vm3, %v14841_v33 }
 0x425   : >> { %10874 = vmatprep.mubr.msk.bf16.mxu0 %vm283_vm3, %v14843_v52 }
 0x42c   : >> { %10875 = vmatmul.mubr.msk.bf16.gmra.mrb[20].mxu0 %vm283_vm3, %v14849_v30 }
 0x42d   : >> { %10878 = vmatprep.mubr.msk.bf16.mxu0 %vm283_vm3, %v14851_v54 }
 0x434   : >> { %10879 = vmatmul.mubr.msk.bf16.gmra.mrb[24].mxu0 %vm283_vm3, %v14857_v34 }
 0x435   : >> { %10882 = vmatprep.mubr.msk.bf16.mxu0 %vm283_vm3, %v14859_v22 }
 0x43c   : >> { %10883 = vmatmul.mubr.msk.bf16.gmra.mrb[28].mxu0 %vm283_vm3, %v14865_v55 }
 0x43d   : >> { %10894 = vmatprep.mubr.msk.bf16.mxu0 %vm283_vm3, %v14740_v44  ;;  %v12071_v44 = vld [vmem:[%s14668_s9 + $0xa0] sm:$0xff]  }
 0x444   : >> { %10895 = vmatmul.mubr.msk.bf16.vlgmr.msra.gmra.mrb[0].mxu0 %vm283_vm3, %v14742_v43 }
 0x445   : >> { %10927 = vmatpush3.bf16.msra.mxu0 %v12067_v16  ;;  %10898 = vmatprep.mubr.msk.bf16.mxu0 %vm283_vm3, %v14750_v3  ;;  %v3381_v16 = vld [vmem:[#allocation3 + $0x180] sm:$0xff] }
 0x446   : >> { %10928 = vmatprep.subr.bf16.mxu0 %v12068_v17  ;;  %v14903_v56 = vpack.c.bf16 %v3382_v5, %v3381_v16  ;;  %v4668_v16 = vld [vmem:[#allocation3 + $0xf1] sm:$0xff]  ;;  %v4669_v5 = vld [vmem:[#allocation3 + $0xf9] sm:$0xff] }
 0x449   : >> { %10929 = vmatpush3.bf16.msra.mxu0 %v12068_v17  ;;  %v4701_v17 = vpack.c.bf16 %v4663_v24, %v4662_v47 }
 0x44a   : >> { %10930 = vmatprep.subr.bf16.mxu0 %v12069_v19 }
 0x44c   : >> { %10899 = vmatmul.mubr.msk.bf16.gmra.mrb[4].mxu0 %vm283_vm3, %v14752_v14 }
 0x44d   : >> { %10902 = vmatprep.mubr.msk.bf16.mxu0 %vm283_vm3, %v14760_v21  ;;  %10931 = vmatpush3.bf16.msra.mxu0 %v12069_v19  ;;  %v4702_v19 = vpack.c.bf16 %v4665_v49, %v4664_v9 }
 0x44e   : >> { %10932 = vmatprep.subr.bf16.mxu0 %v12070_v58 }
 0x451   : >> { %10933 = vmatpush3.bf16.msra.mxu0 %v12070_v58  ;;  %v4666_v58 = vld [vmem:[#allocation3 + $0xd9] sm:$0xff] }
 0x452   : >> { %10966 = vmatprep.subr.bf16.mxu0 %v12071_v44 }
 0x454   : >> { %10903 = vmatmul.mubr.msk.bf16.gmra.mrb[8].mxu0 %vm283_vm3, %v14762_v46 }
 0x455   : >> { %10906 = vmatprep.mubr.msk.bf16.mxu0 %vm283_vm3, %v14768_v63 }
 0x45c   : >> { %10907 = vmatmul.mubr.msk.bf16.gmra.mrb[12].mxu0 %vm283_vm3, %v14770_v7 }
 0x45d   : >> { %10910 = vmatprep.mubr.msk.bf16.mxu0 %vm283_vm3, %v14776_v2 }
 0x464   : >> { %10911 = vmatmul.mubr.msk.bf16.gmra.mrb[16].mxu0 %vm283_vm3, %v14778_v35 }
 0x465   : >> { %10914 = vmatprep.mubr.msk.bf16.mxu0 %vm283_vm3, %v14784_v48 }
 0x46c   : >> { %10915 = vmatmul.mubr.msk.bf16.gmra.mrb[20].mxu0 %vm283_vm3, %v14786_v6 }
 0x46d   : >> { %10918 = vmatprep.mubr.msk.bf16.mxu0 %vm283_vm3, %v14792_v62 }
 0x474   : >> { %10919 = vmatmul.mubr.msk.bf16.gmra.mrb[24].mxu0 %vm283_vm3, %v14794_v8 }
 0x475   : >> { %10922 = vmatprep.mubr.msk.bf16.mxu0 %vm283_vm3, %v14800_v28 }
 0x47c   : >> { %10923 = vmatmul.mubr.msk.bf16.gmra.mrb[28].mxu0 %vm283_vm3, %v14903_v56 }
 0x47d   : >> { %10934 = vmatprep.mubr.msk.bf16.mxu0 %vm283_vm3, %v14675_v23  ;;  %v12075_v23 = vld [vmem:[%s14668_s9 + $0xc0] sm:$0xff]  }
 0x484   : >> { %10935 = vmatmul.mubr.msk.bf16.vlgmr.msra.gmra.mrb[0].mxu0 %vm283_vm3, %v14677_v36  ;;  %v3706_v36 = vld [vmem:[#allocation3 + $0x181] sm:$0xff] }
 0x485   : >> { %10967 = vmatpush3.bf16.msra.mxu0 %v12071_v44  ;;  %10938 = vmatprep.mubr.msk.bf16.mxu0 %vm283_vm3, %v14685_v40  ;;  %v3707_v40 = vld [vmem:[#allocation3 + $0x189] sm:$0xff]  ;;  %v4667_v44 = vld [vmem:[#allocation3 + $0xe1] sm:$0xff] }
 0x486   : >> { %10968 = vmatprep.subr.bf16.mxu0 %v12072_v18 }
 0x489   : >> { %10969 = vmatpush3.bf16.msra.mxu0 %v12072_v18  ;;  %v4704_v18 = vpack.c.bf16 %v4669_v5, %v4668_v16 }
 0x48a   : >> { %10970 = vmatprep.subr.bf16.mxu0 %v12073_v60 }
 0x48c   : >> { %10939 = vmatmul.mubr.msk.bf16.gmra.mrb[4].mxu0 %vm283_vm3, %v14687_v59  ;;  %v14941_v59 = vpack.c.bf16 %v3707_v40, %v3706_v36  ;;  %v4673_v36 = vld [vmem:[#allocation3 + $0x129] sm:$0xff] }
 0x48d   : >> { %10942 = vmatprep.mubr.msk.bf16.mxu0 %vm283_vm3, %v14695_v27  ;;  %10971 = vmatpush3.bf16.msra.mxu0 %v12073_v60  ;;  %v12076_v27 = vld [vmem:[%s14668_s9 + $0xc8] sm:$0xff]  }
 0x48e   : >> { %10972 = vmatprep.subr.bf16.mxu0 %v12074_v25  ;;  %v4670_v60 = vld [vmem:[#allocation3 + $0x109] sm:$0xff] }
 0x491   : >> { %10973 = vmatpush3.bf16.msra.mxu0 %v12074_v25  ;;  %v4671_v25 = vld [vmem:[#allocation3 + $0x111] sm:$0xff] }
 0x492   : >> { %11006 = vmatprep.subr.bf16.mxu0 %v12075_v23  ;;  %v4705_v40 = vpack.c.bf16 %v4671_v25, %v4670_v60 }
 0x494   : >> { %10943 = vmatmul.mubr.msk.bf16.gmra.mrb[8].mxu0 %vm283_vm3, %v14697_v26  ;;  %v12077_v26 = vld [vmem:[%s14668_s9 + $0xd0] sm:$0xff]  }
 0x495   : >> { %10946 = vmatprep.mubr.msk.bf16.mxu0 %vm283_vm3, %v14703_v41  ;;  %v12078_v41 = vld [vmem:[%s14668_s9 + $0xd8] sm:$0xff]  }
 0x49c   : >> { %10947 = vmatmul.mubr.msk.bf16.gmra.mrb[12].mxu0 %vm283_vm3, %v14705_v42  ;;  %v12079_v42 = vld [vmem:[%s14668_s9 + $0xe0] sm:$0xff]  }
 0x49d   : >> { %10950 = vmatprep.mubr.msk.bf16.mxu0 %vm283_vm3, %v14711_v53  ;;  %v4031_v53 = vld [vmem:[#allocation3 + $0x182] sm:$0xff] }
 0x4a4   : >> { %10951 = vmatmul.mubr.msk.bf16.gmra.mrb[16].mxu0 %vm283_vm3, %v14713_v39  ;;  %v4032_v39 = vld [vmem:[#allocation3 + $0x18a] sm:$0xff] }
 0x4a5   : >> { %10954 = vmatprep.mubr.msk.bf16.mxu0 %vm283_vm3, %v14719_v0  ;;  %v14979_v0 = vpack.c.bf16 %v4032_v39, %v4031_v53  ;;  %v4677_v53 = vld [vmem:[#allocation3 + $0x159] sm:$0xff] }
 0x4ac   : >> { %10955 = vmatmul.mubr.msk.bf16.gmra.mrb[20].mxu0 %vm283_vm3, %v14721_v15  ;;  %v12080_v15 = vld [vmem:[%s14668_s9 + $0xe8] sm:$0xff]  }
 0x4ad   : >> { %10958 = vmatprep.mubr.msk.bf16.mxu0 %vm283_vm3, %v14727_v13  ;;  %v12081_v13 = vld [vmem:[%s14668_s9 + $0xf0] sm:$0xff]  }
 0x4b4   : >> { %10959 = vmatmul.mubr.msk.bf16.gmra.mrb[24].mxu0 %vm283_vm3, %v14729_v31  ;;  %v12082_v31 = vld [vmem:[%s14668_s9 + $0xf8] sm:$0xff]  }
 0x4b5   : >> { %10962 = vmatprep.mubr.msk.bf16.mxu0 %vm283_vm3, %v14735_v57  ;;  %v12083_v57 = vld [vmem:[%s14668_s9 + $0x100] sm:$0xff]  }
 0x4bc   : >> { %10963 = vmatmul.mubr.msk.bf16.gmra.mrb[28].mxu0 %vm283_vm3, %v14941_v59 }
 0x4bd   : >> { %10974 = vmatprep.mubr.msk.bf16.mxu0 %vm283_vm3, %v14805_v20  ;;  %v4659_v20 = vld [vmem:[#allocation3 + $0x81] sm:$0xff] }
 0x4c4   : >> { %10975 = vmatmul.mubr.msk.bf16.vlgmr.msra.gmra.mrb[0].mxu0 %vm283_vm3, %v14807_v10 }
 0x4c5   : >> { %11007 = vmatpush3.bf16.msra.mxu0 %v12075_v23  ;;  %10978 = vmatprep.mubr.msk.bf16.mxu0 %vm283_vm3, %v14815_v4  ;;  %v4672_v23 = vld [vmem:[#allocation3 + $0x121] sm:$0xff] }
 0x4c6   : >> { %11008 = vmatprep.subr.bf16.mxu0 %v12076_v27 }
 0x4c9   : >> { %11009 = vmatpush3.bf16.msra.mxu0 %v12076_v27  ;;  %v4706_v27 = vpack.c.bf16 %v4673_v36, %v4672_v23 }
 0x4ca   : >> { %11010 = vmatprep.subr.bf16.mxu0 %v12077_v26 }
 0x4cc   : >> { %10979 = vmatmul.mubr.msk.bf16.gmra.mrb[4].mxu0 %vm283_vm3, %v14817_v61 }
 0x4cd   : >> { %10982 = vmatprep.mubr.msk.bf16.mxu0 %vm283_vm3, %v14825_v1  ;;  %11011 = vmatpush3.bf16.msra.mxu0 %v12077_v26  ;;  %v4674_v26 = vld [vmem:[#allocation3 + $0x139] sm:$0xff] }
 0x4ce   : >> { %11012 = vmatprep.subr.bf16.mxu0 %v12078_v41 }
 0x4d1   : >> { %11013 = vmatpush3.bf16.msra.mxu0 %v12078_v41  ;;  %v4675_v41 = vld [vmem:[#allocation3 + $0x141] sm:$0xff] }
 0x4d2   : >> { %11046 = vmatprep.subr.bf16.mxu0 %v12079_v42  ;;  %v4707_v39 = vpack.c.bf16 %v4675_v41, %v4674_v26 }
 0x4d4   : >> { %10983 = vmatmul.mubr.msk.bf16.gmra.mrb[8].mxu0 %vm283_vm3, %v14827_v12 }
 0x4d5   : >> { %10986 = vmatprep.mubr.msk.bf16.mxu0 %vm283_vm3, %v14833_v32 }
 0x4dc   : >> { %10987 = vmatmul.mubr.msk.bf16.gmra.mrb[12].mxu0 %vm283_vm3, %v14835_v45 }
 0x4dd   : >> { %10990 = vmatprep.mubr.msk.bf16.mxu0 %vm283_vm3, %v14841_v33 }
 0x4e4   : >> { %10991 = vmatmul.mubr.msk.bf16.gmra.mrb[16].mxu0 %vm283_vm3, %v14843_v52 }
 0x4e5   : >> { %10994 = vmatprep.mubr.msk.bf16.mxu0 %vm283_vm3, %v14849_v30 }
 0x4ec   : >> { %10995 = vmatmul.mubr.msk.bf16.gmra.mrb[20].mxu0 %vm283_vm3, %v14851_v54 }
 0x4ed   : >> { %10998 = vmatprep.mubr.msk.bf16.mxu0 %vm283_vm3, %v14857_v34 }
 0x4f4   : >> { %10999 = vmatmul.mubr.msk.bf16.gmra.mrb[24].mxu0 %vm283_vm3, %v14859_v22 }
 0x4f5   : >> { %11002 = vmatprep.mubr.msk.bf16.mxu0 %vm283_vm3, %v14865_v55 }
 0x4fc   : >> { %11003 = vmatmul.mubr.msk.bf16.gmra.mrb[28].mxu0 %vm283_vm3, %v14979_v0 }
 0x4fd   : >> { %11014 = vmatprep.mubr.msk.bf16.mxu0 %vm283_vm3, %v14742_v43  ;;  %v4357_v43 = vld [vmem:[#allocation3 + $0x198] sm:$0xff] }
 0x504   : >> { %11015 = vmatmul.mubr.msk.bf16.vlgmr.msra.gmra.mrb[0].mxu0 %vm283_vm3, %v14750_v3  ;;  %v4358_v3 = vld [vmem:[#allocation3 + $0x1a0] sm:$0xff] }
 0x505   : >> { %11047 = vmatpush3.bf16.msra.mxu0 %v12079_v42  ;;  %11018 = vmatprep.mubr.msk.bf16.mxu0 %vm283_vm3, %v14752_v14  ;;  %v4652_v14 = vld [vmem:[#allocation3 + $0x31] sm:$0xff] }
 0x506   : >> { %11048 = vmatprep.subr.bf16.mxu0 %v12080_v15  ;;  %v4676_v42 = vld [vmem:[#allocation3 + $0x151] sm:$0xff] }
 0x509   : >> { %11049 = vmatpush3.bf16.msra.mxu0 %v12080_v15  ;;  %v4708_v15 = vpack.c.bf16 %v4677_v53, %v4676_v42  ;;  %v12092_v53 = vld [vmem:[%s14668_s9 + $0x128] sm:$0xff]  }
 0x50a   : >> { %11050 = vmatprep.subr.bf16.mxu0 %v12081_v13 }
 0x50c   : >> { %11019 = vmatmul.mubr.msk.bf16.gmra.mrb[4].mxu0 %vm283_vm3, %v14760_v21  ;;  %v4653_v21 = vld [vmem:[#allocation3 + $0x39] sm:$0xff] }
 0x50d   : >> { %11022 = vmatprep.mubr.msk.bf16.mxu0 %vm283_vm3, %v14762_v46  ;;  %11051 = vmatpush3.bf16.msra.mxu0 %v12081_v13  ;;  %v4386_v46 = vpack.c.bf16 %v4358_v3, %v4357_v43  ;;  %v4678_v13 = vld [vmem:[#allocation3 + $0x169] sm:$0xff]  ;;  %v4682_v43 = vld [vmem:[#allocation3 + $0x199] sm:$0xff]  ;;  %v4683_v3 = vld [vmem:[#allocation3 + $0x1a1] sm:$0xff] }
 0x50e   : >> { %11052 = vmatprep.subr.bf16.mxu0 %v12082_v31 }
 0x511   : >> { %11053 = vmatpush3.bf16.msra.mxu0 %v12082_v31  ;;  %v4679_v31 = vld [vmem:[#allocation3 + $0x171] sm:$0xff] }
 0x512   : >> { %11086 = vmatprep.subr.bf16.mxu0 %v12083_v57 }
 0x514   : >> { %11023 = vmatmul.mubr.msk.bf16.gmra.mrb[8].mxu0 %vm283_vm3, %v14768_v63  ;;  %v4696_v63 = vpack.c.bf16 %v4653_v21, %v4652_v14  ;;  %v4711_v14 = vpack.c.bf16 %v4683_v3, %v4682_v43 }
 0x515   : >> { %11026 = vmatprep.mubr.msk.bf16.mxu0 %vm283_vm3, %v14770_v7  ;;  %v4654_v7 = vld [vmem:[#allocation3 + $0x49] sm:$0xff] }
 0x51c   : >> { %11027 = vmatmul.mubr.msk.bf16.gmra.mrb[12].mxu0 %vm283_vm3, %v14776_v2  ;;  %v4655_v2 = vld [vmem:[#allocation3 + $0x51] sm:$0xff] }
 0x51d   : >> { %11030 = vmatprep.mubr.msk.bf16.mxu0 %vm283_vm3, %v14778_v35  ;;  %v4656_v35 = vld [vmem:[#allocation3 + $0x61] sm:$0xff] }
 0x524   : >> { %11031 = vmatmul.mubr.msk.bf16.gmra.mrb[16].mxu0 %vm283_vm3, %v14784_v48  ;;  %v4657_v48 = vld [vmem:[#allocation3 + $0x69] sm:$0xff] }
 0x525   : >> { %11034 = vmatprep.mubr.msk.bf16.mxu0 %vm283_vm3, %v14786_v6  ;;  %v4697_v6 = vpack.c.bf16 %v4655_v2, %v4654_v7 }
 0x52c   : >> { %11035 = vmatmul.mubr.msk.bf16.gmra.mrb[20].mxu0 %vm283_vm3, %v14792_v62  ;;  %v4698_v62 = vpack.c.bf16 %v4657_v48, %v4656_v35 }
 0x52d   : >> { %11038 = vmatprep.mubr.msk.bf16.mxu0 %vm283_vm3, %v14794_v8  ;;  %v12084_v8 = vld [vmem:[%s14668_s9 + $0x108] sm:$0xff]  }
 0x534   : >> { %11039 = vmatmul.mubr.msk.bf16.gmra.mrb[24].mxu0 %vm283_vm3, %v14800_v28  ;;  %v4658_v28 = vld [vmem:[#allocation3 + $0x79] sm:$0xff] }
 0x535   : >> { %11042 = vmatprep.mubr.msk.bf16.mxu0 %vm283_vm3, %v14903_v56  ;;  %v4699_v37 = vpack.c.bf16 %v4659_v20, %v4658_v28  ;;  %v4703_v56 = vpack.c.bf16 %v4667_v44, %v4666_v58 }
 0x53c   : >> { %11043 = vmatmul.mubr.msk.bf16.gmra.mrb[28].mxu0 %vm283_vm3, %v4386_v46 }
 0x53d   : >> { %11054 = vmatprep.mubr.msk.bf16.mxu0 %vm283_vm3, %v4696_v63 }
 0x544   : >> { %11055 = vmatmul.mubr.msk.bf16.vlgmr.msra.gmra.mrb[0].mxu0 %vm283_vm3, %v4697_v6 }
 0x545   : >> { %11087 = vmatpush3.bf16.msra.mxu0 %v12083_v57  ;;  %11058 = vmatprep.mubr.msk.bf16.mxu0 %vm283_vm3, %v4698_v62  ;;  %v4709_v57 = vpack.c.bf16 %v4679_v31, %v4678_v13 }
 0x546   : >> { %11088 = vmatprep.subr.bf16.mxu0 %v12084_v8 }
 0x549   : >> { %11089 = vmatpush3.bf16.msra.mxu0 %v12084_v8 }
 0x54a   : >> { %11090 = vmatprep.subr.bf16.mxu0 %v12085_v50 }
 0x54c   : >> { %11059 = vmatmul.mubr.msk.bf16.gmra.mrb[4].mxu0 %vm283_vm3, %v4699_v37 }
 0x54d   : >> { %11062 = vmatprep.mubr.msk.bf16.mxu0 %vm283_vm3, %v4700_v38  ;;  %11091 = vmatpush3.bf16.msra.mxu0 %v12085_v50 }
 0x54e   : >> { %11092 = vmatprep.subr.bf16.mxu0 %v12086_v11 }
 0x551   : >> { %11093 = vmatpush3.bf16.msra.mxu0 %v12086_v11 }
 0x554   : >> { %11063 = vmatmul.mubr.msk.bf16.gmra.mrb[8].mxu0 %vm283_vm3, %v4701_v17 }
 0x555   : >> { %11066 = vmatprep.mubr.msk.bf16.mxu0 %vm283_vm3, %v4702_v19 }
 0x55c   : >> { %11067 = vmatmul.mubr.msk.bf16.gmra.mrb[12].mxu0 %vm283_vm3, %v4703_v56 }
 0x55d   : >> { %11070 = vmatprep.mubr.msk.bf16.mxu0 %vm283_vm3, %v4704_v18 }
 0x564   : >> { %11071 = vmatmul.mubr.msk.bf16.gmra.mrb[16].mxu0 %vm283_vm3, %v4705_v40 }
 0x565   : >> { %11074 = vmatprep.mubr.msk.bf16.mxu0 %vm283_vm3, %v4706_v27 }
 0x56c   : >> { %11075 = vmatmul.mubr.msk.bf16.gmra.mrb[20].mxu0 %vm283_vm3, %v4707_v39 }
 0x56d   : >> { %11078 = vmatprep.mubr.msk.bf16.mxu0 %vm283_vm3, %v4708_v15 }
 0x574   : >> { %11079 = vmatmul.mubr.msk.bf16.gmra.mrb[24].mxu0 %vm283_vm3, %v4709_v57 }
 0x575   : >> { %11082 = vmatprep.mubr.msk.bf16.mxu0 %vm283_vm3, %v14941_v59 }
 0x57c   : >> { %11083 = vmatmul.mubr.msk.bf16.gmra.mrb[28].mxu0 %vm283_vm3, %v4711_v14 }
 0x57d   : >> { %11094 = vmatprep.mubr.msk.bf16.mxu0 %vm283_vm3, %v14807_v10  ;;  %v5007_v10 = vld [vmem:[#allocation3 + $0x19a] sm:$0xff] }
 0x584   : >> { %11095 = vmatmul.mubr.msk.bf16.vlgmr.msra.gmra.mrb[0].mxu0 %vm283_vm3, %v14815_v4  ;;  %v5008_v4 = vld [vmem:[#allocation3 + $0x1a2] sm:$0xff] }
 0x585   : >> { %11098 = vmatprep.mubr.msk.bf16.mxu0 %vm283_vm3, %v14817_v61  ;;  %v5036_v61 = vpack.c.bf16 %v5008_v4, %v5007_v10 }
 0x58c   : >> { %11099 = vmatmul.mubr.msk.bf16.gmra.mrb[4].mxu0 %vm283_vm3, %v14825_v1  ;;  %v12087_v1 = vld [vmem:[%s14668_s9 + $0x140] sm:$0xff]  }
 0x58d   : >> { %11102 = vmatprep.mubr.msk.bf16.mxu0 %vm283_vm3, %v14827_v12  ;;  %11126 = vmatprep.subr.bf16.mxu1 %v12087_v1  ;;  %v12088_v12 = vld [vmem:[%s14668_s9 + $0x148] sm:$0xff]  }
 0x58e   : >> { %11127 = vmatpush3.bf16.msra.mxu1 %v12087_v1 }
 0x58f   : >> { %11128 = vmatprep.subr.bf16.mxu1 %v12088_v12 }
 0x592   : >> { %11129 = vmatpush3.bf16.msra.mxu1 %v12088_v12 }
 0x594   : >> { %11103 = vmatmul.mubr.msk.bf16.gmra.mrb[8].mxu0 %vm283_vm3, %v14833_v32  ;;  %v12089_v32 = vld [vmem:[%s14668_s9 + $0x150] sm:$0xff]  }
 0x595   : >> { %11106 = vmatprep.mubr.msk.bf16.mxu0 %vm283_vm3, %v14835_v45  ;;  %11130 = vmatprep.subr.bf16.mxu1 %v12089_v32  ;;  %v12090_v45 = vld [vmem:[%s14668_s9 + $0x158] sm:$0xff]  }
 0x596   : >> { %11131 = vmatpush3.bf16.msra.mxu1 %v12089_v32 }
 0x597   : >> { %11132 = vmatprep.subr.bf16.mxu1 %v12090_v45 }
 0x59a   : >> { %11133 = vmatpush3.bf16.msra.mxu1 %v12090_v45 }
 0x59c   : >> { %11107 = vmatmul.mubr.msk.bf16.gmra.mrb[12].mxu0 %vm283_vm3, %v14841_v33  ;;  %v5504_v33 = vld [vmem:[#allocation4 + $0x1] sm:$0xff] }
 0x59d   : >> { %11110 = vmatprep.mubr.msk.bf16.mxu0 %vm283_vm3, %v14843_v52  ;;  %v5505_v52 = vld [vmem:[#allocation4 + $0x9] sm:$0xff] }
 0x5a4   : >> { %11111 = vmatmul.mubr.msk.bf16.gmra.mrb[16].mxu0 %vm283_vm3, %v14849_v30  ;;  %v5548_v30 = vpack.c.bf16 %v5505_v52, %v5504_v33 }
 0x5a5   : >> { %11114 = vmatprep.mubr.msk.bf16.mxu0 %vm283_vm3, %v14851_v54  ;;  %v15075_v54 = vld [vmem:[%s14668_s9 + $0x120] sm:$0xff]  }
 0x5a6   : >> { %11134 = vmatprep.mubr.msk.bf16.mxu1 %vm283_vm3, %v5548_v30  ;;  %11166 = vmatprep.subr.bf16.mxu1 %v15075_v54 }
 0x5ac   : >> { %11115 = vmatmul.mubr.msk.bf16.gmra.mrb[20].mxu0 %vm283_vm3, %v14857_v34  ;;  %v15090_v34 = vld [vmem:[%s15082_s15] ss:$0 sm:$0xff] }
 0x5ad   : >> { %11118 = vmatprep.mubr.msk.bf16.mxu0 %vm283_vm3, %v14859_v22 }
 0x5b4   : >> { %11119 = vmatmul.mubr.msk.bf16.gmra.mrb[24].mxu0 %vm283_vm3, %v14865_v55  ;;  %v15093_v55 = vld [vmem:[%s15087_s23] ss:$0 sm:$0xff] }
 0x5b5   : >> { %11122 = vmatprep.mubr.msk.bf16.mxu0 %vm283_vm3, %v14979_v0 }
 0x5bc   : >> { %11123 = vmatmul.mubr.msk.bf16.gmra.mrb[28].mxu0 %vm283_vm3, %v5036_v61  ;;  %v12093_v61 = vld [vmem:[%s14668_s9 + $0x130] sm:$0xff]  }
 0x657   : >> { %v11096_v22 = vpop.f32.mrb[0].mxu0 }
 0x658   : >> { %v5312_v59 = vmul.f32 %v11096_v22, %v15090_v34  ;;  %v5143_v0 = vpop.f32.mrb[1].mxu0 }
 0x659   : >> { %v5310_v21 = vmul.f32 %v15090_v34, %v5143_v0  ;;  %v11097_v46 = vpop.f32.mrb[2].mxu0 }
 0x65a   : >> { %v5348_v63 = vadd.f32 %v15093_v55, %v5312_v59  ;;  %v5313_v7 = vmul.f32 %v11097_v46, %v15090_v34  ;;  %v5146_v2 = vpop.f32.mrb[3].mxu0  ;;  %v12094_v46 = vld [vmem:[%s14668_s9 + $0x138] sm:$0xff]  }
 0x65b   : >> { %v5346_v35 = vadd.f32 %v15093_v55, %v5310_v21  ;;  %v5311_v48 = vmul.f32 %v15090_v34, %v5146_v2 }
 0x65c   : >> { %v5380_v6 = vmax.f32 %v5348_v63, 0.0  ;;  %v5349_v62 = vadd.f32 %v15093_v55, %v5313_v7 }
 0x65d   : >> { %v5378_v8 = vmax.f32 %v5346_v35, 0.0  ;;  %v5347_v28 = vadd.f32 %v15093_v55, %v5311_v48 }
 0x65e   : >> { %5413 = vst.msk [vmem:[#allocation4 + $0x31] sm:$0xff] %vm283_vm3, %v5380_v6  ;;  %v5381_v20 = vmax.f32 %v5349_v62, 0.0 }
 0x65f   : >> { %5411 = vst.msk [vmem:[#allocation4 + $0x19] sm:$0xff] %vm283_vm3, %v5378_v8  ;;  %v5379_v51 = vmax.f32 %v5347_v28, 0.0  ;;  %v11100_v29 = vpop.f32.mrb[4].mxu0 }
 0x660   : >> { %5414 = vst.msk [vmem:[#allocation4 + $0x39] sm:$0xff] %vm283_vm3, %v5381_v20  ;;  %v5316_v50 = vmul.f32 %v11100_v29, %v15090_v34  ;;  %v5159_v37 = vpop.f32.mrb[5].mxu0 }
 0x661   : >> { %5412 = vst.msk [vmem:[#allocation4 + $0x21] sm:$0xff] %vm283_vm3, %v5379_v51  ;;  %v5314_v38 = vmul.f32 %v15090_v34, %v5159_v37  ;;  %v11101_v11 = vpop.f32.mrb[6].mxu0  ;;  %v15160_v51 = vld [vmem:[%s14668_s9 + $0x160] sm:$0xff]  }
 0x662   : >> { %v5352_v47 = vadd.f32 %v15093_v55, %v5316_v50  ;;  %v5317_v24 = vmul.f32 %v11101_v11, %v15090_v34  ;;  %v5162_v9 = vpop.f32.mrb[7].mxu0 }
 0x663   : >> { %v5350_v49 = vadd.f32 %v15093_v55, %v5314_v38  ;;  %v5315_v17 = vmul.f32 %v15090_v34, %v5162_v9 }
 0x664   : >> { %v5384_v19 = vmax.f32 %v5352_v47, 0.0  ;;  %v5353_v58 = vadd.f32 %v15093_v55, %v5317_v24 }
 0x665   : >> { %v5382_v44 = vmax.f32 %v5350_v49, 0.0  ;;  %v5351_v16 = vadd.f32 %v15093_v55, %v5315_v17  ;;  %v5508_v42 = vld [vmem:[#allocation4 + $0x31] sm:$0xff] }
 0x666   : >> { %5417 = vst.msk [vmem:[#allocation4 + $0x61] sm:$0xff] %vm283_vm3, %v5384_v19  ;;  %v5385_v5 = vmax.f32 %v5353_v58, 0.0  ;;  %v5506_v36 = vld [vmem:[#allocation4 + $0x19] sm:$0xff] }
 0x667   : >> { %5415 = vst.msk [vmem:[#allocation4 + $0x49] sm:$0xff] %vm283_vm3, %v5382_v44  ;;  %v5383_v56 = vmax.f32 %v5351_v16, 0.0  ;;  %v11104_v18 = vpop.f32.mrb[8].mxu0  ;;  %v5509_v60 = vld [vmem:[#allocation4 + $0x39] sm:$0xff] }
 0x668   : >> { %5418 = vst.msk [vmem:[#allocation4 + $0x69] sm:$0xff] %vm283_vm3, %v5385_v5  ;;  %v5320_v25 = vmul.f32 %v11104_v18, %v15090_v34  ;;  %v5175_v23 = vpop.f32.mrb[9].mxu0  ;;  %v5507_v40 = vld [vmem:[#allocation4 + $0x21] sm:$0xff]  ;;  %v15126_v31 = vpack.c.bf16 %v5509_v60, %v5508_v42 }
 0x669   : >> { %5416 = vst.msk [vmem:[#allocation4 + $0x51] sm:$0xff] %vm283_vm3, %v5383_v56  ;;  %v5318_v27 = vmul.f32 %v15090_v34, %v5175_v23  ;;  %v11105_v26 = vpop.f32.mrb[10].mxu0  ;;  %v15121_v41 = vpack.c.bf16 %v5507_v40, %v5506_v36 }
 0x66a   : >> { %v5356_v39 = vadd.f32 %v15093_v55, %v5320_v25  ;;  %v5321_v15 = vmul.f32 %v11105_v26, %v15090_v34  ;;  %v5178_v13 = vpop.f32.mrb[11].mxu0 }
 0x66b   : >> { %v5354_v57 = vadd.f32 %v15093_v55, %v5318_v27  ;;  %v5319_v43 = vmul.f32 %v15090_v34, %v5178_v13  ;;  %11135 = vmatmul.mubr.msk.bf16.vlgmr.msra.gmra.mrb[0].mxu1 %vm283_vm3, %v15121_v41 }
 0x66c   : >> { %v5388_v3 = vmax.f32 %v5356_v39, 0.0  ;;  %v5357_v14 = vadd.f32 %v15093_v55, %v5321_v15  ;;  %11138 = vmatprep.mubr.msk.bf16.mxu1 %vm283_vm3, %v15126_v31  ;;  %11167 = vmatpush3.bf16.msra.mxu1 %v15075_v54 }
 0x66d   : >> { %v5386_v10 = vmax.f32 %v5354_v57, 0.0  ;;  %v5355_v4 = vadd.f32 %v15093_v55, %v5319_v43  ;;  %11168 = vmatprep.subr.bf16.mxu1 %v12092_v53  ;;  %v5512_v21 = vld [vmem:[#allocation4 + $0x61] sm:$0xff] }
 0x66e   : >> { %5421 = vst.msk [vmem:[#allocation4 + $0x91] sm:$0xff] %vm283_vm3, %v5388_v3  ;;  %v5389_v1 = vmax.f32 %v5357_v14, 0.0  ;;  %v5510_v30 = vld [vmem:[#allocation4 + $0x49] sm:$0xff] }
 0x66f   : >> { %5419 = vst.msk [vmem:[#allocation4 + $0x79] sm:$0xff] %vm283_vm3, %v5386_v10  ;;  %v5387_v12 = vmax.f32 %v5355_v4, 0.0  ;;  %v11108_v32 = vpop.f32.mrb[12].mxu0  ;;  %v5513_v45 = vld [vmem:[#allocation4 + $0x69] sm:$0xff] }
 0x670   : >> { %5422 = vst.msk [vmem:[#allocation4 + $0x99] sm:$0xff] %vm283_vm3, %v5389_v1  ;;  %v5324_v33 = vmul.f32 %v11108_v32, %v15090_v34  ;;  %v5191_v52 = vpop.f32.mrb[13].mxu0  ;;  %v5511_v54 = vld [vmem:[#allocation4 + $0x51] sm:$0xff]  ;;  %11169 = vmatpush3.bf16.msra.mxu1 %v12092_v53  ;;  %v15149_v35 = vpack.c.bf16 %v5513_v45, %v5512_v21 }
 0x671   : >> { %5420 = vst.msk [vmem:[#allocation4 + $0x81] sm:$0xff] %vm283_vm3, %v5387_v12  ;;  %v5322_v22 = vmul.f32 %v15090_v34, %v5191_v52  ;;  %v11109_v59 = vpop.f32.mrb[14].mxu0  ;;  %v15144_v0 = vpack.c.bf16 %v5511_v54, %v5510_v30  ;;  %11170 = vmatprep.subr.bf16.mxu1 %v12093_v61 }
 0x672   : >> { %v5360_v63 = vadd.f32 %v15093_v55, %v5324_v33  ;;  %v5325_v7 = vmul.f32 %v11109_v59, %v15090_v34  ;;  %v5194_v2 = vpop.f32.mrb[15].mxu0 }
 0x673   : >> { %v5358_v48 = vadd.f32 %v15093_v55, %v5322_v22  ;;  %v5323_v6 = vmul.f32 %v15090_v34, %v5194_v2  ;;  %11139 = vmatmul.mubr.msk.bf16.gmra.mrb[4].mxu1 %vm283_vm3, %v15144_v0 }
 0x674   : >> { %v5392_v62 = vmax.f32 %v5360_v63, 0.0  ;;  %v5361_v8 = vadd.f32 %v15093_v55, %v5325_v7  ;;  %11142 = vmatprep.mubr.msk.bf16.mxu1 %vm283_vm3, %v15149_v35  ;;  %11171 = vmatpush3.bf16.msra.mxu1 %v12093_v61 }
 0x675   : >> { %v5390_v28 = vmax.f32 %v5358_v48, 0.0  ;;  %v5359_v20 = vadd.f32 %v15093_v55, %v5323_v6  ;;  %11172 = vmatprep.subr.bf16.mxu1 %v12094_v46  ;;  %v5516_v58 = vld [vmem:[#allocation4 + $0x91] sm:$0xff] }
 0x676   : >> { %5425 = vst.msk [vmem:[#allocation4 + $0xc1] sm:$0xff] %vm283_vm3, %v5392_v62  ;;  %v5393_v29 = vmax.f32 %v5361_v8, 0.0  ;;  %v5514_v24 = vld [vmem:[#allocation4 + $0x79] sm:$0xff] }
 0x677   : >> { %5423 = vst.msk [vmem:[#allocation4 + $0xa9] sm:$0xff] %vm283_vm3, %v5390_v28  ;;  %v5391_v50 = vmax.f32 %v5359_v20, 0.0  ;;  %v11112_v37 = vpop.f32.mrb[16].mxu0  ;;  %v5517_v38 = vld [vmem:[#allocation4 + $0x99] sm:$0xff] }
 0x678   : >> { %5426 = vst.msk [vmem:[#allocation4 + $0xc9] sm:$0xff] %vm283_vm3, %v5393_v29  ;;  %v5328_v11 = vmul.f32 %v11112_v37, %v15090_v34  ;;  %v5207_v47 = vpop.f32.mrb[17].mxu0  ;;  %v5515_v9 = vld [vmem:[#allocation4 + $0x81] sm:$0xff]  ;;  %11173 = vmatpush3.bf16.msra.mxu1 %v12094_v46  ;;  %v15173_v56 = vpack.c.bf16 %v5517_v38, %v5516_v58 }
 0x679   : >> { %5424 = vst.msk [vmem:[#allocation4 + $0xb1] sm:$0xff] %vm283_vm3, %v5391_v50  ;;  %v5326_v49 = vmul.f32 %v15090_v34, %v5207_v47  ;;  %v11113_v17 = vpop.f32.mrb[18].mxu0  ;;  %v15168_v19 = vpack.c.bf16 %v5515_v9, %v5514_v24  ;;  %11206 = vmatprep.subr.bf16.mxu1 %v15160_v51 }
 0x67a   : >> { %v5364_v44 = vadd.f32 %v15093_v55, %v5328_v11  ;;  %v5329_v16 = vmul.f32 %v11113_v17, %v15090_v34  ;;  %v5210_v5 = vpop.f32.mrb[19].mxu0 }
 0x67b   : >> { %v5362_v18 = vadd.f32 %v15093_v55, %v5326_v49  ;;  %v5327_v60 = vmul.f32 %v15090_v34, %v5210_v5  ;;  %11143 = vmatmul.mubr.msk.bf16.gmra.mrb[8].mxu1 %vm283_vm3, %v15168_v19 }
 0x67c   : >> { %v5396_v25 = vmax.f32 %v5364_v44, 0.0  ;;  %v5365_v23 = vadd.f32 %v15093_v55, %v5329_v16  ;;  %11146 = vmatprep.mubr.msk.bf16.mxu1 %vm283_vm3, %v15173_v56 }
 0x67d   : >> { %v5394_v36 = vmax.f32 %v5362_v18, 0.0  ;;  %v5363_v40 = vadd.f32 %v15093_v55, %v5327_v60  ;;  %v5520_v10 = vld [vmem:[#allocation4 + $0xc1] sm:$0xff] }
 0x67e   : >> { %5429 = vst.msk [vmem:[#allocation4 + $0xf1] sm:$0xff] %vm283_vm3, %v5396_v25  ;;  %v5397_v27 = vmax.f32 %v5365_v23, 0.0  ;;  %v5518_v13 = vld [vmem:[#allocation4 + $0xa9] sm:$0xff] }
 0x67f   : >> { %5427 = vst.msk [vmem:[#allocation4 + $0xd9] sm:$0xff] %vm283_vm3, %v5394_v36  ;;  %v5395_v26 = vmax.f32 %v5363_v40, 0.0  ;;  %v11116_v42 = vpop.f32.mrb[20].mxu0  ;;  %v5521_v53 = vld [vmem:[#allocation4 + $0xc9] sm:$0xff] }
 0x680   : >> { %5430 = vst.msk [vmem:[#allocation4 + $0xf9] sm:$0xff] %vm283_vm3, %v5397_v27  ;;  %v5332_v39 = vmul.f32 %v11116_v42, %v15090_v34  ;;  %v5223_v15 = vpop.f32.mrb[21].mxu0  ;;  %v5519_v57 = vld [vmem:[#allocation4 + $0xb1] sm:$0xff]  ;;  %v15193_v12 = vpack.c.bf16 %v5521_v53, %v5520_v10 }
 0x681   : >> { %5428 = vst.msk [vmem:[#allocation4 + $0xe1] sm:$0xff] %vm283_vm3, %v5395_v26  ;;  %v5330_v43 = vmul.f32 %v15090_v34, %v5223_v15  ;;  %v11117_v3 = vpop.f32.mrb[22].mxu0  ;;  %v15189_v14 = vpack.c.bf16 %v5519_v57, %v5518_v13 }
 0x682   : >> { %v5368_v4 = vadd.f32 %v15093_v55, %v5332_v39  ;;  %v5333_v61 = vmul.f32 %v11117_v3, %v15090_v34  ;;  %v5226_v1 = vpop.f32.mrb[23].mxu0 }
 0x683   : >> { %v5366_v32 = vadd.f32 %v15093_v55, %v5330_v43  ;;  %v5331_v45 = vmul.f32 %v15090_v34, %v5226_v1  ;;  %11147 = vmatmul.mubr.msk.bf16.gmra.mrb[12].mxu1 %vm283_vm3, %v15189_v14 }
 0x684   : >> { %v5400_v33 = vmax.f32 %v5368_v4, 0.0  ;;  %v5369_v52 = vadd.f32 %v15093_v55, %v5333_v61  ;;  %11150 = vmatprep.mubr.msk.bf16.mxu1 %vm283_vm3, %v15193_v12 }
 0x685   : >> { %v5398_v30 = vmax.f32 %v5366_v32, 0.0  ;;  %v5367_v54 = vadd.f32 %v15093_v55, %v5331_v45  ;;  %v5524_v28 = vld [vmem:[#allocation4 + $0xf1] sm:$0xff] }
 0x686   : >> { %5433 = vst.msk [vmem:[#allocation4 + $0x121] sm:$0xff] %vm283_vm3, %v5400_v33  ;;  %v5401_v22 = vmax.f32 %v5369_v52, 0.0  ;;  %v5522_v2 = vld [vmem:[#allocation4 + $0xd9] sm:$0xff] }
 0x687   : >> { %5431 = vst.msk [vmem:[#allocation4 + $0x109] sm:$0xff] %vm283_vm3, %v5398_v30  ;;  %v5399_v59 = vmax.f32 %v5367_v54, 0.0  ;;  %v11120_v21 = vpop.f32.mrb[24].mxu0  ;;  %v5525_v46 = vld [vmem:[#allocation4 + $0xf9] sm:$0xff]  ;;  %v5445_v30 = vld [vmem:[#allocation4 + $0x8] sm:$0xff] }
 0x688   : >> { %5434 = vst.msk [vmem:[#allocation4 + $0x129] sm:$0xff] %vm283_vm3, %v5401_v22  ;;  %v5336_v63 = vmul.f32 %v11120_v21, %v15090_v34  ;;  %v5239_v7 = vpop.f32.mrb[25].mxu0  ;;  %v5523_v48 = vld [vmem:[#allocation4 + $0xe1] sm:$0xff]  ;;  %v15213_v37 = vpack.c.bf16 %v5525_v46, %v5524_v28 }
 0x689   : >> { %5432 = vst.msk [vmem:[#allocation4 + $0x111] sm:$0xff] %vm283_vm3, %v5399_v59  ;;  %v5334_v6 = vmul.f32 %v15090_v34, %v5239_v7  ;;  %v11121_v62 = vpop.f32.mrb[26].mxu0  ;;  %v15209_v8 = vpack.c.bf16 %v5523_v48, %v5522_v2  ;;  %v5447_v46 = vld [vmem:[#allocation4 + $0x20] sm:$0xff]  ;;  %v5446_v7 = vld [vmem:[#allocation4 + $0x18] sm:$0xff]  ;;  %v5448_v48 = vld [vmem:[#allocation4 + $0x30] sm:$0xff] }
 0x68a   : >> { %v5372_v20 = vadd.f32 %v15093_v55, %v5336_v63  ;;  %v5337_v29 = vmul.f32 %v11121_v62, %v15090_v34  ;;  %v5242_v50 = vpop.f32.mrb[27].mxu0  ;;  %v5449_v63 = vld [vmem:[#allocation4 + $0x38] sm:$0xff]  ;;  %v15260_v2 = vpack.c.bf16 %v5447_v46, %v5446_v7  ;;  %v12097_v28 = vld [vmem:[%s14668_s9 + $0x170] sm:$0xff]  }
 0x68b   : >> { %v5370_v38 = vadd.f32 %v15093_v55, %v5334_v6  ;;  %v5335_v11 = vmul.f32 %v15090_v34, %v5242_v50  ;;  %11151 = vmatmul.mubr.msk.bf16.gmra.mrb[16].mxu1 %vm283_vm3, %v15209_v8  ;;  %v12096_v6 = vld [vmem:[%s14668_s9 + $0x168] sm:$0xff]   ;;  %v15263_v62 = vpack.c.bf16 %v5449_v63, %v5448_v48  ;;  %v5450_v50 = vld [vmem:[#allocation4 + $0x48] sm:$0xff] }
 0x68c   : >> { %v5404_v47 = vmax.f32 %v5372_v20, 0.0  ;;  %v5373_v24 = vadd.f32 %v15093_v55, %v5337_v29  ;;  %11154 = vmatprep.mubr.msk.bf16.mxu1 %vm283_vm3, %v15213_v37  ;;  %v5451_v20 = vld [vmem:[#allocation4 + $0x50] sm:$0xff]  ;;  %v5453_v29 = vld [vmem:[#allocation4 + $0x68] sm:$0xff]  ;;  %v6032_v48 = vld [vmem:[#allocation4 + $0x1a] sm:$0xff] }
 0x68d   : >> { %v5402_v9 = vmax.f32 %v5370_v38, 0.0  ;;  %v5371_v49 = vadd.f32 %v15093_v55, %v5335_v11  ;;  %v5528_v27 = vld [vmem:[#allocation4 + $0x121] sm:$0xff]  ;;  %v15271_v38 = vpack.c.bf16 %v5451_v20, %v5450_v50 }
 0x68e   : >> { %5437 = vst.msk [vmem:[#allocation4 + $0x151] sm:$0xff] %vm283_vm3, %v5404_v47  ;;  %v5405_v17 = vmax.f32 %v5373_v24, 0.0  ;;  %v5526_v60 = vld [vmem:[#allocation4 + $0x109] sm:$0xff]  ;;  %v5452_v11 = vld [vmem:[#allocation4 + $0x60] sm:$0xff] }
 0x68f   : >> { %5435 = vst.msk [vmem:[#allocation4 + $0x139] sm:$0xff] %vm283_vm3, %v5402_v9  ;;  %v5403_v58 = vmax.f32 %v5371_v49, 0.0  ;;  %v11124_v44 = vpop.f32.mrb[28].mxu0  ;;  %v5529_v16 = vld [vmem:[#allocation4 + $0x129] sm:$0xff]  ;;  %v15274_v24 = vpack.c.bf16 %v5453_v29, %v5452_v11  ;;  %v5455_v9 = vld [vmem:[#allocation4 + $0x80] sm:$0xff]  ;;  %v5457_v49 = vld [vmem:[#allocation4 + $0x98] sm:$0xff] }
 0x690   : >> { %5438 = vst.msk [vmem:[#allocation4 + $0x159] sm:$0xff] %vm283_vm3, %v5405_v17  ;;  %v5340_v5 = vmul.f32 %v11124_v44, %v15090_v34  ;;  %v5255_v18 = vpop.f32.mrb[29].mxu0  ;;  %v5527_v25 = vld [vmem:[#allocation4 + $0x111] sm:$0xff]  ;;  %v15233_v39 = vpack.c.bf16 %v5529_v16, %v5528_v27  ;;  %v5463_v27 = vld [vmem:[#allocation4 + $0xe0] sm:$0xff] }
 0x691   : >> { %5436 = vst.msk [vmem:[#allocation4 + $0x141] sm:$0xff] %vm283_vm3, %v5403_v58  ;;  %v5338_v23 = vmul.f32 %v15090_v34, %v5255_v18  ;;  %v11125_v36 = vpop.f32.mrb[30].mxu0  ;;  %v15229_v40 = vpack.c.bf16 %v5527_v25, %v5526_v60  ;;  %v12098_v47 = vld [vmem:[%s14668_s9 + $0x178] sm:$0xff]   ;;  %v5454_v17 = vld [vmem:[#allocation4 + $0x78] sm:$0xff]  ;;  %v5461_v18 = vld [vmem:[#allocation4 + $0xc8] sm:$0xff] }
 0x692   : >> { %v5376_v26 = vadd.f32 %v15093_v55, %v5340_v5  ;;  %v5341_v42 = vmul.f32 %v11125_v36, %v15090_v34  ;;  %v5258_v53 = vpop.f32.mrb[31].mxu0  ;;  %v15281_v58 = vpack.c.bf16 %v5455_v9, %v5454_v17  ;;  %v5456_v44 = vld [vmem:[#allocation4 + $0x90] sm:$0xff]  ;;  %v5458_v60 = vld [vmem:[#allocation4 + $0xa8] sm:$0xff]  ;;  %v6035_v20 = vld [vmem:[#allocation4 + $0x3a] sm:$0xff] }
 0x693   : >> { %v5374_v15 = vadd.f32 %v15093_v55, %v5338_v23  ;;  %v5339_v13 = vmul.f32 %v15090_v34, %v5258_v53  ;;  %11155 = vmatmul.mubr.msk.bf16.gmra.mrb[20].mxu1 %vm283_vm3, %v15229_v40  ;;  %v15283_v16 = vpack.c.bf16 %v5457_v49, %v5456_v44  ;;  %v5459_v5 = vld [vmem:[#allocation4 + $0xb0] sm:$0xff]  ;;  %v5460_v23 = vld [vmem:[#allocation4 + $0xc0] sm:$0xff] }
 0x694   : >> { %v5408_v57 = vmax.f32 %v5376_v26, 0.0  ;;  %v5377_v43 = vadd.f32 %v15093_v55, %v5341_v42  ;;  %11158 = vmatprep.mubr.msk.bf16.mxu1 %vm283_vm3, %v15233_v39  ;;  %v15289_v25 = vpack.c.bf16 %v5459_v5, %v5458_v60  ;;  %v15291_v36 = vpack.c.bf16 %v5461_v18, %v5460_v23  ;;  %v5465_v26 = vld [vmem:[#allocation4 + $0xf8] sm:$0xff]  ;;  %v12100_v50 = vld [vmem:[%s14668_s9 + $0x188] sm:$0xff]   ;;  %v6036_v9 = vld [vmem:[#allocation4 + $0x4a] sm:$0xff] }
 0x695   : >> { %v5406_v3 = vmax.f32 %v5374_v15, 0.0  ;;  %v5375_v10 = vadd.f32 %v15093_v55, %v5339_v13  ;;  %v5532_v33 = vld [vmem:[#allocation4 + $0x151] sm:$0xff]  ;;  %v5444_v55 = vld [vmem:[#allocation4] sm:$0xff] }
 0x696   : >> { %5441 = vst.msk [vmem:[#allocation4 + $0x181] sm:$0xff] %vm283_vm3, %v5408_v57  ;;  %v5409_v4 = vmax.f32 %v5377_v43, 0.0  ;;  %v5530_v34 = vld [vmem:[#allocation4 + $0x139] sm:$0xff]  ;;  %v5488_v59 = vpack.c.bf16 %v5445_v30, %v5444_v55  ;;  %v5464_v15 = vld [vmem:[#allocation4 + $0xf0] sm:$0xff]  ;;  %v5469_v43 = vld [vmem:[#allocation4 + $0x128] sm:$0xff] }
 0x697   : >> { %5439 = vst.msk [vmem:[#allocation4 + $0x169] sm:$0xff] %vm283_vm3, %v5406_v3  ;;  %v5407_v61 = vmax.f32 %v5375_v10, 0.0  ;;  %v5533_v1 = vld [vmem:[#allocation4 + $0x159] sm:$0xff]  ;;  %v15299_v13 = vpack.c.bf16 %v5465_v26, %v5464_v15  ;;  %v5467_v57 = vld [vmem:[#allocation4 + $0x110] sm:$0xff]  ;;  %v5466_v3 = vld [vmem:[#allocation4 + $0x108] sm:$0xff] }
 0x698   : >> { %5442 = vst.msk [vmem:[#allocation4 + $0x189] sm:$0xff] %vm283_vm3, %v5409_v4  ;;  %v5531_v32 = vld [vmem:[#allocation4 + $0x141] sm:$0xff]  ;;  %v15249_v52 = vpack.c.bf16 %v5533_v1, %v5532_v33  ;;  %v5462_v42 = vld [vmem:[#allocation4 + $0xd8] sm:$0xff]  ;;  %v15305_v10 = vpack.c.bf16 %v5467_v57, %v5466_v3  ;;  %v5472_v55 = vld [vmem:[#allocation4 + $0x150] sm:$0xff] }
 0x699   : >> { %5440 = vst.msk [vmem:[#allocation4 + $0x171] sm:$0xff] %vm283_vm3, %v5407_v61  ;;  %v15247_v45 = vpack.c.bf16 %v5531_v32, %v5530_v34  ;;  %v15297_v53 = vpack.c.bf16 %v5463_v27, %v5462_v42  ;;  %v5468_v4 = vld [vmem:[#allocation4 + $0x120] sm:$0xff]  ;;  %v5473_v34 = vld [vmem:[#allocation4 + $0x158] sm:$0xff]  ;;  %v6039_v44 = vld [vmem:[#allocation4 + $0x6a] sm:$0xff] }
 0x69a   : >> { %v15307_v61 = vpack.c.bf16 %v5469_v43, %v5468_v4  ;;  %v5471_v1 = vld [vmem:[#allocation4 + $0x140] sm:$0xff]  ;;  %v5470_v32 = vld [vmem:[#allocation4 + $0x138] sm:$0xff]  ;;  %v15315_v30 = vpack.c.bf16 %v5473_v34, %v5472_v55  ;;  %v12102_v18 = vld [vmem:[%s14668_s9 + $0x198] sm:$0xff]  }
 0x69b   : >> { %11159 = vmatmul.mubr.msk.bf16.gmra.mrb[24].mxu1 %vm283_vm3, %v15247_v45  ;;  %v15313_v33 = vpack.c.bf16 %v5471_v1, %v5470_v32  ;;  %v6037_v49 = vld [vmem:[#allocation4 + $0x52] sm:$0xff]  ;;  %v6038_v17 = vld [vmem:[#allocation4 + $0x62] sm:$0xff]  ;;  %v6040_v23 = vld [vmem:[#allocation4 + $0x7a] sm:$0xff] }
 0x69c   : >> { %11162 = vmatprep.mubr.msk.bf16.mxu1 %vm283_vm3, %v15249_v52  ;;  %v15336_v5 = vpack.c.bf16 %v6037_v49, %v6036_v9  ;;  %v15339_v60 = vpack.c.bf16 %v6039_v44, %v6038_v17  ;;  %v6041_v27 = vld [vmem:[#allocation4 + $0x82] sm:$0xff]  ;;  %v6042_v26 = vld [vmem:[#allocation4 + $0x92] sm:$0xff]  ;;  %v6043_v42 = vld [vmem:[#allocation4 + $0x9a] sm:$0xff] }
 0x69d   : >> { %v15346_v15 = vpack.c.bf16 %v6041_v27, %v6040_v23  ;;  %v15348_v57 = vpack.c.bf16 %v6043_v42, %v6042_v26  ;;  %v6044_v43 = vld [vmem:[#allocation4 + $0xaa] sm:$0xff]  ;;  %v6045_v3 = vld [vmem:[#allocation4 + $0xb2] sm:$0xff]  ;;  %v6046_v4 = vld [vmem:[#allocation4 + $0xc2] sm:$0xff] }
 0x69e   : >> { %v5534_v54 = vld [vmem:[#allocation4 + $0x169] sm:$0xff]  ;;  %v15354_v34 = vpack.c.bf16 %v6045_v3, %v6044_v43  ;;  %v6048_v55 = vld [vmem:[#allocation4 + $0xda] sm:$0xff]  ;;  %v6058_v17 = vld [vmem:[#allocation4 + $0x152] sm:$0xff] }
 0x69f   : >> { %v5474_v46 = vld [vmem:[#allocation4 + $0x168] sm:$0xff]  ;;  %v6056_v9 = vld [vmem:[#allocation4 + $0x13a] sm:$0xff] }
 0x6a0   : >> { %v5535_v22 = vld [vmem:[#allocation4 + $0x171] sm:$0xff]  ;;  %v6057_v49 = vld [vmem:[#allocation4 + $0x142] sm:$0xff]  ;;  %v6059_v44 = vld [vmem:[#allocation4 + $0x15a] sm:$0xff] }
 0x6a1   : >> { %v15255_v21 = vpack.c.bf16 %v5535_v22, %v5534_v54  ;;  %v6030_v54 = vld [vmem:[#allocation4 + $0x2] sm:$0xff]  ;;  %v6031_v22 = vld [vmem:[#allocation4 + $0xa] sm:$0xff]  ;;  %v15380_v23 = vpack.c.bf16 %v6059_v44, %v6058_v17  ;;  %v6061_v26 = vld [vmem:[#allocation4 + $0x172] sm:$0xff] }
 0x6a2   : >> { %v6074_v63 = vpack.c.bf16 %v6031_v22, %v6030_v54  ;;  %v6047_v1 = vld [vmem:[#allocation4 + $0xca] sm:$0xff]  ;;  %v6049_v54 = vld [vmem:[#allocation4 + $0xe2] sm:$0xff]  ;;  %v6050_v22 = vld [vmem:[#allocation4 + $0xf2] sm:$0xff] }
 0x6a3   : >> { %11163 = vmatmul.mubr.msk.bf16.gmra.mrb[28].mxu1 %vm283_vm3, %v15255_v21  ;;  %v15356_v32 = vpack.c.bf16 %v6047_v1, %v6046_v4  ;;  %v6060_v27 = vld [vmem:[#allocation4 + $0x16a] sm:$0xff]  ;;  %v12104_v43 = vld [vmem:[%s14668_s9 + $0x1a8] sm:$0xff]  }
 0x6a4   : >> { %11174 = vmatprep.mubr.msk.bf16.mxu1 %vm283_vm3, %v5488_v59  ;;  %v5475_v59 = vld [vmem:[#allocation4 + $0x170] sm:$0xff]  ;;  %v15386_v42 = vpack.c.bf16 %v6061_v26, %v6060_v27  ;;  %v12105_v3 = vld [vmem:[%s14668_s9 + $0x1b0] sm:$0xff]   ;;  %v6385_v1 = vld [vmem:[#allocation4 + $0x180] sm:$0xff] }
 0x6a5   : >> { %v15321_v7 = vpack.c.bf16 %v5475_v59, %v5474_v46  ;;  %v6051_v59 = vld [vmem:[#allocation4 + $0xfa] sm:$0xff]  ;;  %v15362_v46 = vpack.c.bf16 %v6049_v54, %v6048_v55  ;;  %v12106_v4 = vld [vmem:[%s14668_s9 + $0x1b8] sm:$0xff]  }
 0x6a6   : >> { %v12108_v54 = vld [vmem:[%s14668_s9 + $0x1c8] sm:$0xff]   ;;  %v7667_v17 = vld [vmem:[#allocation4 + $0xb1] sm:$0xff]  ;;  %v7669_v44 = vld [vmem:[#allocation4 + $0xc9] sm:$0xff] }
 0x6a7   : >> { %v7666_v27 = vld [vmem:[#allocation4 + $0xa9] sm:$0xff] }
 0x6a8   : >> { %v7705_v26 = vpack.c.bf16 %v7667_v17, %v7666_v27 }
 0x6ab   : >> { %11175 = vmatmul.mubr.msk.bf16.vlgmr.msra.gmra.mrb[0].mxu1 %vm283_vm3, %v15260_v2 }
 0x6ac   : >> { %11178 = vmatprep.mubr.msk.bf16.mxu1 %vm283_vm3, %v15263_v62  ;;  %11207 = vmatpush3.bf16.msra.mxu1 %v15160_v51  ;;  %v12099_v51 = vld [vmem:[%s14668_s9 + $0x180] sm:$0xff]  }
 0x6ad   : >> { %11208 = vmatprep.subr.bf16.mxu1 %v12096_v6 }
 0x6b0   : >> { %11209 = vmatpush3.bf16.msra.mxu1 %v12096_v6  ;;  %v6033_v6 = vld [vmem:[#allocation4 + $0x22] sm:$0xff] }
 0x6b1   : >> { %11210 = vmatprep.subr.bf16.mxu1 %v12097_v28  ;;  %v15326_v29 = vpack.c.bf16 %v6033_v6, %v6032_v48  ;;  %v6052_v48 = vld [vmem:[#allocation4 + $0x10a] sm:$0xff]  ;;  %v6053_v6 = vld [vmem:[#allocation4 + $0x112] sm:$0xff] }
 0x6b3   : >> { %11179 = vmatmul.mubr.msk.bf16.gmra.mrb[4].mxu1 %vm283_vm3, %v15271_v38 }
 0x6b4   : >> { %11182 = vmatprep.mubr.msk.bf16.mxu1 %vm283_vm3, %v15274_v24  ;;  %11211 = vmatpush3.bf16.msra.mxu1 %v12097_v28  ;;  %v6034_v28 = vld [vmem:[#allocation4 + $0x32] sm:$0xff] }
 0x6b5   : >> { %11212 = vmatprep.subr.bf16.mxu1 %v12098_v47  ;;  %v15329_v11 = vpack.c.bf16 %v6035_v20, %v6034_v28  ;;  %v6054_v28 = vld [vmem:[#allocation4 + $0x122] sm:$0xff]  ;;  %v6055_v20 = vld [vmem:[#allocation4 + $0x12a] sm:$0xff] }
 0x6b8   : >> { %11213 = vmatpush3.bf16.msra.mxu1 %v12098_v47  ;;  %v12101_v47 = vld [vmem:[%s14668_s9 + $0x190] sm:$0xff]  }
 0x6b9   : >> { %11246 = vmatprep.subr.bf16.mxu1 %v12099_v51 }
 0x6bb   : >> { %11183 = vmatmul.mubr.msk.bf16.gmra.mrb[8].mxu1 %vm283_vm3, %v15281_v58 }
 0x6bc   : >> { %11186 = vmatprep.mubr.msk.bf16.mxu1 %vm283_vm3, %v15283_v16 }
 0x6c3   : >> { %11187 = vmatmul.mubr.msk.bf16.gmra.mrb[12].mxu1 %vm283_vm3, %v15289_v25 }
 0x6c4   : >> { %11190 = vmatprep.mubr.msk.bf16.mxu1 %vm283_vm3, %v15291_v36 }
 0x6cb   : >> { %11191 = vmatmul.mubr.msk.bf16.gmra.mrb[16].mxu1 %vm283_vm3, %v15297_v53 }
 0x6cc   : >> { %11194 = vmatprep.mubr.msk.bf16.mxu1 %vm283_vm3, %v15299_v13 }
 0x6d3   : >> { %11195 = vmatmul.mubr.msk.bf16.gmra.mrb[20].mxu1 %vm283_vm3, %v15305_v10 }
 0x6d4   : >> { %11198 = vmatprep.mubr.msk.bf16.mxu1 %vm283_vm3, %v15307_v61 }
 0x6db   : >> { %11199 = vmatmul.mubr.msk.bf16.gmra.mrb[24].mxu1 %vm283_vm3, %v15313_v33 }
 0x6dc   : >> { %11202 = vmatprep.mubr.msk.bf16.mxu1 %vm283_vm3, %v15315_v30 }
 0x6e3   : >> { %11203 = vmatmul.mubr.msk.bf16.gmra.mrb[28].mxu1 %vm283_vm3, %v15321_v7 }
 0x6e4   : >> { %11214 = vmatprep.mubr.msk.bf16.mxu1 %vm283_vm3, %v6074_v63  ;;  %v15364_v63 = vpack.c.bf16 %v6051_v59, %v6050_v22  ;;  %v12109_v22 = vld [vmem:[%s14668_s9 + $0x1d0] sm:$0xff]   ;;  %v12110_v59 = vld [vmem:[%s14668_s9 + $0x1d8] sm:$0xff]  }
 0x6eb   : >> { %11215 = vmatmul.mubr.msk.bf16.vlgmr.msra.gmra.mrb[0].mxu1 %vm283_vm3, %v15326_v29 }
 0x6ec   : >> { %11218 = vmatprep.mubr.msk.bf16.mxu1 %vm283_vm3, %v15329_v11  ;;  %11247 = vmatpush3.bf16.msra.mxu1 %v12099_v51  ;;  %v12103_v51 = vld [vmem:[%s14668_s9 + $0x1a0] sm:$0xff]  }
 0x6ed   : >> { %11248 = vmatprep.subr.bf16.mxu1 %v12100_v50 }
 0x6f0   : >> { %11249 = vmatpush3.bf16.msra.mxu1 %v12100_v50  ;;  %v15370_v50 = vpack.c.bf16 %v6053_v6, %v6052_v48  ;;  %v7665_v48 = vld [vmem:[#allocation4 + $0x99] sm:$0xff] }
 0x6f1   : >> { %11250 = vmatprep.subr.bf16.mxu1 %v12101_v47  ;;  %v7662_v6 = vld [vmem:[#allocation4 + $0x79] sm:$0xff] }
 0x6f3   : >> { %11219 = vmatmul.mubr.msk.bf16.gmra.mrb[4].mxu1 %vm283_vm3, %v15336_v5 }
 0x6f4   : >> { %11222 = vmatprep.mubr.msk.bf16.mxu1 %vm283_vm3, %v15339_v60  ;;  %11251 = vmatpush3.bf16.msra.mxu1 %v12101_v47  ;;  %v15372_v47 = vpack.c.bf16 %v6055_v20, %v6054_v28  ;;  %v7664_v20 = vld [vmem:[#allocation4 + $0x91] sm:$0xff] }
 0x6f5   : >> { %11252 = vmatprep.subr.bf16.mxu1 %v12102_v18 }
 0x6f8   : >> { %11253 = vmatpush3.bf16.msra.mxu1 %v12102_v18  ;;  %v15378_v18 = vpack.c.bf16 %v6057_v49, %v6056_v9  ;;  %v12122_v9 = vld [vmem:[%s14668_s9 + $0x238] sm:$0xff]   ;;  %v7704_v49 = vpack.c.bf16 %v7665_v48, %v7664_v20 }
 0x6f9   : >> { %11286 = vmatprep.subr.bf16.mxu1 %v12103_v51 }
 0x6fb   : >> { %11223 = vmatmul.mubr.msk.bf16.gmra.mrb[8].mxu1 %vm283_vm3, %v15346_v15 }
 0x6fc   : >> { %11226 = vmatprep.mubr.msk.bf16.mxu1 %vm283_vm3, %v15348_v57 }
 0x703   : >> { %11227 = vmatmul.mubr.msk.bf16.gmra.mrb[12].mxu1 %vm283_vm3, %v15354_v34 }
 0x704   : >> { %11230 = vmatprep.mubr.msk.bf16.mxu1 %vm283_vm3, %v15356_v32 }
 0x70b   : >> { %11231 = vmatmul.mubr.msk.bf16.gmra.mrb[16].mxu1 %vm283_vm3, %v15362_v46 }
 0x70c   : >> { %11234 = vmatprep.mubr.msk.bf16.mxu1 %vm283_vm3, %v15364_v63 }
 0x713   : >> { %11235 = vmatmul.mubr.msk.bf16.gmra.mrb[20].mxu1 %vm283_vm3, %v15370_v50 }
 0x714   : >> { %11238 = vmatprep.mubr.msk.bf16.mxu1 %vm283_vm3, %v15372_v47 }
 0x71b   : >> { %11239 = vmatmul.mubr.msk.bf16.gmra.mrb[24].mxu1 %vm283_vm3, %v15378_v18 }
 0x71c   : >> { %11242 = vmatprep.mubr.msk.bf16.mxu1 %vm283_vm3, %v15380_v23 }
 0x723   : >> { %11243 = vmatmul.mubr.msk.bf16.gmra.mrb[28].mxu1 %vm283_vm3, %v15386_v42 }
 0x724   : >> { %11254 = vmatprep.mubr.msk.bf16.mxu1 %vm283_vm3, %v15260_v2  ;;  %v12107_v2 = vld [vmem:[%s14668_s9 + $0x1c0] sm:$0xff]  }
 0x72b   : >> { %11255 = vmatmul.mubr.msk.bf16.vlgmr.msra.gmra.mrb[0].mxu1 %vm283_vm3, %v15263_v62 }
 0x72c   : >> { %11258 = vmatprep.mubr.msk.bf16.mxu1 %vm283_vm3, %v15271_v38  ;;  %11287 = vmatpush3.bf16.msra.mxu1 %v12103_v51  ;;  %v6386_v51 = vld [vmem:[#allocation4 + $0x188] sm:$0xff] }
 0x72d   : >> { %11288 = vmatprep.subr.bf16.mxu1 %v12104_v43  ;;  %v15424_v55 = vpack.c.bf16 %v6386_v51, %v6385_v1  ;;  %v7670_v51 = vld [vmem:[#allocation4 + $0xd9] sm:$0xff] }
 0x730   : >> { %11289 = vmatpush3.bf16.msra.mxu1 %v12104_v43  ;;  %v7668_v43 = vld [vmem:[#allocation4 + $0xc1] sm:$0xff] }
 0x731   : >> { %11290 = vmatprep.subr.bf16.mxu1 %v12105_v3 }
 0x733   : >> { %11259 = vmatmul.mubr.msk.bf16.gmra.mrb[4].mxu1 %vm283_vm3, %v15274_v24 }
 0x734   : >> { %11262 = vmatprep.mubr.msk.bf16.mxu1 %vm283_vm3, %v15281_v58  ;;  %11291 = vmatpush3.bf16.msra.mxu1 %v12105_v3  ;;  %v7706_v3 = vpack.c.bf16 %v7669_v44, %v7668_v43 }
 0x735   : >> { %11292 = vmatprep.subr.bf16.mxu1 %v12106_v4 }
 0x738   : >> { %11293 = vmatpush3.bf16.msra.mxu1 %v12106_v4  ;;  %v7671_v4 = vld [vmem:[#allocation4 + $0xe1] sm:$0xff] }
 0x739   : >> { %11326 = vmatprep.subr.bf16.mxu1 %v12107_v2  ;;  %v7707_v1 = vpack.c.bf16 %v7671_v4, %v7670_v51 }
 0x73b   : >> { %11263 = vmatmul.mubr.msk.bf16.gmra.mrb[8].mxu1 %vm283_vm3, %v15283_v16 }
 0x73c   : >> { %11266 = vmatprep.mubr.msk.bf16.mxu1 %vm283_vm3, %v15289_v25 }
 0x743   : >> { %11267 = vmatmul.mubr.msk.bf16.gmra.mrb[12].mxu1 %vm283_vm3, %v15291_v36 }
 0x744   : >> { %11270 = vmatprep.mubr.msk.bf16.mxu1 %vm283_vm3, %v15297_v53 }
 0x74b   : >> { %11271 = vmatmul.mubr.msk.bf16.gmra.mrb[16].mxu1 %vm283_vm3, %v15299_v13 }
 0x74c   : >> { %11274 = vmatprep.mubr.msk.bf16.mxu1 %vm283_vm3, %v15305_v10 }
 0x753   : >> { %11275 = vmatmul.mubr.msk.bf16.gmra.mrb[20].mxu1 %vm283_vm3, %v15307_v61 }
 0x754   : >> { %11278 = vmatprep.mubr.msk.bf16.mxu1 %vm283_vm3, %v15313_v33 }
 0x75b   : >> { %11279 = vmatmul.mubr.msk.bf16.gmra.mrb[24].mxu1 %vm283_vm3, %v15315_v30 }
 0x75c   : >> { %11282 = vmatprep.mubr.msk.bf16.mxu1 %vm283_vm3, %v15321_v7 }
 0x763   : >> { %11283 = vmatmul.mubr.msk.bf16.gmra.mrb[28].mxu1 %vm283_vm3, %v15424_v55 }
 0x764   : >> { %11294 = vmatprep.mubr.msk.bf16.mxu1 %vm283_vm3, %v15121_v41  ;;  %v12111_v41 = vld [vmem:[%s14668_s9 + $0x1e0] sm:$0xff]  }
 0x76b   : >> { %11295 = vmatmul.mubr.msk.bf16.vlgmr.msra.gmra.mrb[0].mxu1 %vm283_vm3, %v15126_v31  ;;  %v6711_v31 = vld [vmem:[#allocation4 + $0x189] sm:$0xff] }
 0x76c   : >> { %11298 = vmatprep.mubr.msk.bf16.mxu1 %vm283_vm3, %v15144_v0  ;;  %11327 = vmatpush3.bf16.msra.mxu1 %v12107_v2  ;;  %v6710_v0 = vld [vmem:[#allocation4 + $0x181] sm:$0xff]  ;;  %v7673_v2 = vld [vmem:[#allocation4 + $0xf9] sm:$0xff] }
 0x76d   : >> { %11328 = vmatprep.subr.bf16.mxu1 %v12108_v54 }
 0x770   : >> { %11329 = vmatpush3.bf16.msra.mxu1 %v12108_v54 }
 0x771   : >> { %11330 = vmatprep.subr.bf16.mxu1 %v12109_v22 }
 0x773   : >> { %11299 = vmatmul.mubr.msk.bf16.gmra.mrb[4].mxu1 %vm283_vm3, %v15149_v35  ;;  %v15462_v35 = vpack.c.bf16 %v6711_v31, %v6710_v0  ;;  %v7676_v0 = vld [vmem:[#allocation4 + $0x121] sm:$0xff] }
 0x774   : >> { %11302 = vmatprep.mubr.msk.bf16.mxu1 %vm283_vm3, %v15168_v19  ;;  %11331 = vmatpush3.bf16.msra.mxu1 %v12109_v22  ;;  %v12112_v19 = vld [vmem:[%s14668_s9 + $0x1e8] sm:$0xff]   ;;  %v7675_v22 = vld [vmem:[#allocation4 + $0x111] sm:$0xff] }
 0x775   : >> { %11332 = vmatprep.subr.bf16.mxu1 %v12110_v59 }
 0x778   : >> { %11333 = vmatpush3.bf16.msra.mxu1 %v12110_v59  ;;  %v7677_v59 = vld [vmem:[#allocation4 + $0x129] sm:$0xff] }
 0x779   : >> { %11366 = vmatprep.subr.bf16.mxu1 %v12111_v41 }
 0x77b   : >> { %11303 = vmatmul.mubr.msk.bf16.gmra.mrb[8].mxu1 %vm283_vm3, %v15173_v56  ;;  %v12113_v56 = vld [vmem:[%s14668_s9 + $0x1f0] sm:$0xff]  }
 0x77c   : >> { %11306 = vmatprep.mubr.msk.bf16.mxu1 %vm283_vm3, %v15189_v14  ;;  %v12114_v14 = vld [vmem:[%s14668_s9 + $0x1f8] sm:$0xff]  }
 0x783   : >> { %11307 = vmatmul.mubr.msk.bf16.gmra.mrb[12].mxu1 %vm283_vm3, %v15193_v12  ;;  %v12115_v12 = vld [vmem:[%s14668_s9 + $0x200] sm:$0xff]  }
 0x784   : >> { %11310 = vmatprep.mubr.msk.bf16.mxu1 %vm283_vm3, %v15209_v8  ;;  %v7035_v8 = vld [vmem:[#allocation4 + $0x182] sm:$0xff] }
 0x78b   : >> { %11311 = vmatmul.mubr.msk.bf16.gmra.mrb[16].mxu1 %vm283_vm3, %v15213_v37  ;;  %v7036_v37 = vld [vmem:[#allocation4 + $0x18a] sm:$0xff] }
 0x78c   : >> { %11314 = vmatprep.mubr.msk.bf16.mxu1 %vm283_vm3, %v15229_v40  ;;  %v15500_v40 = vpack.c.bf16 %v7036_v37, %v7035_v8  ;;  %v7680_v37 = vld [vmem:[#allocation4 + $0x151] sm:$0xff] }
 0x793   : >> { %11315 = vmatmul.mubr.msk.bf16.gmra.mrb[20].mxu1 %vm283_vm3, %v15233_v39  ;;  %v12116_v39 = vld [vmem:[%s14668_s9 + $0x208] sm:$0xff]  }
 0x794   : >> { %11318 = vmatprep.mubr.msk.bf16.mxu1 %vm283_vm3, %v15247_v45  ;;  %v12117_v45 = vld [vmem:[%s14668_s9 + $0x210] sm:$0xff]  }
 0x79b   : >> { %11319 = vmatmul.mubr.msk.bf16.gmra.mrb[24].mxu1 %vm283_vm3, %v15249_v52  ;;  %v12118_v52 = vld [vmem:[%s14668_s9 + $0x218] sm:$0xff]  }
 0x79c   : >> { %11322 = vmatprep.mubr.msk.bf16.mxu1 %vm283_vm3, %v15255_v21  ;;  %v12119_v21 = vld [vmem:[%s14668_s9 + $0x220] sm:$0xff]  }
 0x7a3   : >> { %11323 = vmatmul.mubr.msk.bf16.gmra.mrb[28].mxu1 %vm283_vm3, %v15462_v35 }
 0x7a4   : >> { %11334 = vmatprep.mubr.msk.bf16.mxu1 %vm283_vm3, %v15326_v29  ;;  %v7663_v29 = vld [vmem:[#allocation4 + $0x81] sm:$0xff] }
 0x7a5   : >> { %v7703_v28 = vpack.c.bf16 %v7663_v29, %v7662_v6 }
 0x7ab   : >> { %11335 = vmatmul.mubr.msk.bf16.vlgmr.msra.gmra.mrb[0].mxu1 %vm283_vm3, %v15329_v11 }
 0x7ac   : >> { %11338 = vmatprep.mubr.msk.bf16.mxu1 %vm283_vm3, %v15336_v5  ;;  %11367 = vmatpush3.bf16.msra.mxu1 %v12111_v41  ;;  %v7674_v41 = vld [vmem:[#allocation4 + $0x109] sm:$0xff] }
 0x7ad   : >> { %11368 = vmatprep.subr.bf16.mxu1 %v12112_v19  ;;  %v7709_v31 = vpack.c.bf16 %v7675_v22, %v7674_v41 }
 0x7b0   : >> { %11369 = vmatpush3.bf16.msra.mxu1 %v12112_v19  ;;  %v7710_v19 = vpack.c.bf16 %v7677_v59, %v7676_v0 }
 0x7b1   : >> { %11370 = vmatprep.subr.bf16.mxu1 %v12113_v56 }
 0x7b3   : >> { %11339 = vmatmul.mubr.msk.bf16.gmra.mrb[4].mxu1 %vm283_vm3, %v15339_v60 }
 0x7b4   : >> { %11342 = vmatprep.mubr.msk.bf16.mxu1 %vm283_vm3, %v15346_v15  ;;  %11371 = vmatpush3.bf16.msra.mxu1 %v12113_v56  ;;  %v7679_v56 = vld [vmem:[#allocation4 + $0x141] sm:$0xff] }
 0x7b5   : >> { %11372 = vmatprep.subr.bf16.mxu1 %v12114_v14 }
 0x7b8   : >> { %11373 = vmatpush3.bf16.msra.mxu1 %v12114_v14  ;;  %v7681_v14 = vld [vmem:[#allocation4 + $0x159] sm:$0xff] }
 0x7b9   : >> { %11406 = vmatprep.subr.bf16.mxu1 %v12115_v12 }
 0x7bb   : >> { %11343 = vmatmul.mubr.msk.bf16.gmra.mrb[8].mxu1 %vm283_vm3, %v15348_v57 }
 0x7bc   : >> { %11346 = vmatprep.mubr.msk.bf16.mxu1 %vm283_vm3, %v15354_v34 }
 0x7c3   : >> { %11347 = vmatmul.mubr.msk.bf16.gmra.mrb[12].mxu1 %vm283_vm3, %v15356_v32 }
 0x7c4   : >> { %11350 = vmatprep.mubr.msk.bf16.mxu1 %vm283_vm3, %v15362_v46 }
 0x7cb   : >> { %11351 = vmatmul.mubr.msk.bf16.gmra.mrb[16].mxu1 %vm283_vm3, %v15364_v63 }
 0x7cc   : >> { %11354 = vmatprep.mubr.msk.bf16.mxu1 %vm283_vm3, %v15370_v50 }
 0x7d3   : >> { %11355 = vmatmul.mubr.msk.bf16.gmra.mrb[20].mxu1 %vm283_vm3, %v15372_v47 }
 0x7d4   : >> { %11358 = vmatprep.mubr.msk.bf16.mxu1 %vm283_vm3, %v15378_v18 }
 0x7db   : >> { %11359 = vmatmul.mubr.msk.bf16.gmra.mrb[24].mxu1 %vm283_vm3, %v15380_v23 }
 0x7dc   : >> { %11362 = vmatprep.mubr.msk.bf16.mxu1 %vm283_vm3, %v15386_v42 }
 0x7e3   : >> { %11363 = vmatmul.mubr.msk.bf16.gmra.mrb[28].mxu1 %vm283_vm3, %v15500_v40 }
 0x7e4   : >> { %11374 = vmatprep.mubr.msk.bf16.mxu1 %vm283_vm3, %v15263_v62  ;;  %v7361_v62 = vld [vmem:[#allocation4 + $0x198] sm:$0xff] }
 0x7eb   : >> { %11375 = vmatmul.mubr.msk.bf16.vlgmr.msra.gmra.mrb[0].mxu1 %vm283_vm3, %v15271_v38  ;;  %v7362_v38 = vld [vmem:[#allocation4 + $0x1a0] sm:$0xff] }
 0x7ec   : >> { %11378 = vmatprep.mubr.msk.bf16.mxu1 %vm283_vm3, %v15274_v24  ;;  %11407 = vmatpush3.bf16.msra.mxu1 %v12115_v12  ;;  %v7390_v24 = vpack.c.bf16 %v7362_v38, %v7361_v62  ;;  %v7678_v12 = vld [vmem:[#allocation4 + $0x139] sm:$0xff]  ;;  %v7687_v38 = vld [vmem:[#allocation4 + $0x1a1] sm:$0xff] }
 0x7ed   : >> { %11408 = vmatprep.subr.bf16.mxu1 %v12116_v39  ;;  %v7711_v8 = vpack.c.bf16 %v7679_v56, %v7678_v12  ;;  %v7686_v62 = vld [vmem:[#allocation4 + $0x199] sm:$0xff] }
 0x7f0   : >> { %11409 = vmatpush3.bf16.msra.mxu1 %v12116_v39  ;;  %v7712_v39 = vpack.c.bf16 %v7681_v14, %v7680_v37 }
 0x7f1   : >> { %11410 = vmatprep.subr.bf16.mxu1 %v12117_v45 }
 0x7f3   : >> { %11379 = vmatmul.mubr.msk.bf16.gmra.mrb[4].mxu1 %vm283_vm3, %v15281_v58  ;;  %v7657_v58 = vld [vmem:[#allocation4 + $0x39] sm:$0xff] }
 0x7f4   : >> { %11382 = vmatprep.mubr.msk.bf16.mxu1 %vm283_vm3, %v15283_v16  ;;  %11411 = vmatpush3.bf16.msra.mxu1 %v12117_v45  ;;  %v7656_v16 = vld [vmem:[#allocation4 + $0x31] sm:$0xff] }
 0x7f5   : >> { %11412 = vmatprep.subr.bf16.mxu1 %v12118_v52  ;;  %v7683_v45 = vld [vmem:[#allocation4 + $0x171] sm:$0xff] }
 0x7f8   : >> { %11413 = vmatpush3.bf16.msra.mxu1 %v12118_v52  ;;  %v7682_v52 = vld [vmem:[#allocation4 + $0x169] sm:$0xff] }
 0x7f9   : >> { %11446 = vmatprep.subr.bf16.mxu1 %v12119_v21 }
 0x7fb   : >> { %11383 = vmatmul.mubr.msk.bf16.gmra.mrb[8].mxu1 %vm283_vm3, %v15289_v25  ;;  %v7700_v25 = vpack.c.bf16 %v7657_v58, %v7656_v16 }
 0x7fc   : >> { %11386 = vmatprep.mubr.msk.bf16.mxu1 %vm283_vm3, %v15291_v36  ;;  %v7659_v36 = vld [vmem:[#allocation4 + $0x51] sm:$0xff] }
 0x803   : >> { %11387 = vmatmul.mubr.msk.bf16.gmra.mrb[12].mxu1 %vm283_vm3, %v15297_v53  ;;  %v7661_v53 = vld [vmem:[#allocation4 + $0x69] sm:$0xff] }
 0x804   : >> { %11390 = vmatprep.mubr.msk.bf16.mxu1 %vm283_vm3, %v15299_v13  ;;  %v7658_v13 = vld [vmem:[#allocation4 + $0x49] sm:$0xff] }
 0x80b   : >> { %11391 = vmatmul.mubr.msk.bf16.gmra.mrb[16].mxu1 %vm283_vm3, %v15305_v10  ;;  %v7701_v10 = vpack.c.bf16 %v7659_v36, %v7658_v13 }
 0x80c   : >> { %11394 = vmatprep.mubr.msk.bf16.mxu1 %vm283_vm3, %v15307_v61  ;;  %v7660_v61 = vld [vmem:[#allocation4 + $0x61] sm:$0xff] }
 0x813   : >> { %11395 = vmatmul.mubr.msk.bf16.gmra.mrb[20].mxu1 %vm283_vm3, %v15313_v33  ;;  %v12120_v33 = vld [vmem:[%s14668_s9 + $0x228] sm:$0xff]  }
 0x814   : >> { %11398 = vmatprep.mubr.msk.bf16.mxu1 %vm283_vm3, %v15315_v30  ;;  %v7702_v30 = vpack.c.bf16 %v7661_v53, %v7660_v61 }
 0x81b   : >> { %11399 = vmatmul.mubr.msk.bf16.gmra.mrb[24].mxu1 %vm283_vm3, %v15321_v7  ;;  %v12121_v7 = vld [vmem:[%s14668_s9 + $0x230] sm:$0xff]  }
 0x81c   : >> { %11402 = vmatprep.mubr.msk.bf16.mxu1 %vm283_vm3, %v15424_v55  ;;  %v7672_v55 = vld [vmem:[#allocation4 + $0xf1] sm:$0xff] }
 0x81d   : >> { %v7708_v54 = vpack.c.bf16 %v7673_v2, %v7672_v55 }
 0x823   : >> { %11403 = vmatmul.mubr.msk.bf16.gmra.mrb[28].mxu1 %vm283_vm3, %v7390_v24  ;;  %v7715_v24 = vpack.c.bf16 %v7687_v38, %v7686_v62 }
 0x824   : >> { %11414 = vmatprep.mubr.msk.bf16.mxu1 %vm283_vm3, %v7700_v25 }
 0x82b   : >> { %11415 = vmatmul.mubr.msk.bf16.vlgmr.msra.gmra.mrb[0].mxu1 %vm283_vm3, %v7701_v10 }
 0x82c   : >> { %11418 = vmatprep.mubr.msk.bf16.mxu1 %vm283_vm3, %v7702_v30  ;;  %11447 = vmatpush3.bf16.msra.mxu1 %v12119_v21  ;;  %v7713_v21 = vpack.c.bf16 %v7683_v45, %v7682_v52 }
 0x82d   : >> { %11448 = vmatprep.subr.bf16.mxu1 %v12120_v33 }
 0x830   : >> { %11449 = vmatpush3.bf16.msra.mxu1 %v12120_v33 }
 0x831   : >> { %11450 = vmatprep.subr.bf16.mxu1 %v12121_v7 }
 0x833   : >> { %11419 = vmatmul.mubr.msk.bf16.gmra.mrb[4].mxu1 %vm283_vm3, %v7703_v28 }
 0x834   : >> { %11422 = vmatprep.mubr.msk.bf16.mxu1 %vm283_vm3, %v7704_v49  ;;  %11451 = vmatpush3.bf16.msra.mxu1 %v12121_v7 }
 0x835   : >> { %11452 = vmatprep.subr.bf16.mxu1 %v12122_v9 }
 0x838   : >> { %11453 = vmatpush3.bf16.msra.mxu1 %v12122_v9 }
 0x83b   : >> { %11423 = vmatmul.mubr.msk.bf16.gmra.mrb[8].mxu1 %vm283_vm3, %v7705_v26 }
 0x83c   : >> { %11426 = vmatprep.mubr.msk.bf16.mxu1 %vm283_vm3, %v7706_v3 }
 0x843   : >> { %11427 = vmatmul.mubr.msk.bf16.gmra.mrb[12].mxu1 %vm283_vm3, %v7707_v1 }
 0x844   : >> { %11430 = vmatprep.mubr.msk.bf16.mxu1 %vm283_vm3, %v7708_v54 }
 0x84b   : >> { %11431 = vmatmul.mubr.msk.bf16.gmra.mrb[16].mxu1 %vm283_vm3, %v7709_v31 }
 0x84c   : >> { %11434 = vmatprep.mubr.msk.bf16.mxu1 %vm283_vm3, %v7710_v19 }
 0x853   : >> { %11435 = vmatmul.mubr.msk.bf16.gmra.mrb[20].mxu1 %vm283_vm3, %v7711_v8 }
 0x854   : >> { %11438 = vmatprep.mubr.msk.bf16.mxu1 %vm283_vm3, %v7712_v39 }
 0x85b   : >> { %11439 = vmatmul.mubr.msk.bf16.gmra.mrb[24].mxu1 %vm283_vm3, %v7713_v21 }
 0x85c   : >> { %11442 = vmatprep.mubr.msk.bf16.mxu1 %vm283_vm3, %v15462_v35 }
 0x863   : >> { %11443 = vmatmul.mubr.msk.bf16.gmra.mrb[28].mxu1 %vm283_vm3, %v7715_v24 }
 0x864   : >> { %11454 = vmatprep.mubr.msk.bf16.mxu1 %vm283_vm3, %v15329_v11  ;;  %v8011_v11 = vld [vmem:[#allocation4 + $0x19a] sm:$0xff] }
 0x86b   : >> { %11455 = vmatmul.mubr.msk.bf16.vlgmr.msra.gmra.mrb[0].mxu1 %vm283_vm3, %v15336_v5  ;;  %v8012_v5 = vld [vmem:[#allocation4 + $0x1a2] sm:$0xff] }
 0x86c   : >> { %11458 = vmatprep.mubr.msk.bf16.mxu1 %vm283_vm3, %v15339_v60  ;;  %v8040_v60 = vpack.c.bf16 %v8012_v5, %v8011_v11 }
 0x873   : >> { %11459 = vmatmul.mubr.msk.bf16.gmra.mrb[4].mxu1 %vm283_vm3, %v15346_v15  ;;  %v15591_v15 = vld [vmem:[%s15082_s15 + $0x1] ss:$0 sm:$0xff]  ;;  %s16635_s15 = scalar_lea.hbm (%p2435_p11), %s16691_s7, %s10405_s21 }
 0x874   : >> { %11462 = vmatprep.mubr.msk.bf16.mxu1 %vm283_vm3, %v15348_v57 }
 0x87b   : >> { %11463 = vmatmul.mubr.msk.bf16.gmra.mrb[8].mxu1 %vm283_vm3, %v15354_v34  ;;  %v15594_v34 = vld [vmem:[%s15087_s23 + $0x1] ss:$0 sm:$0xff]  ;;  %s12138_s23 = scalar_lea.vmem (%p2435_p11), %s12137_s18, 512 }
 0x87c   : >> { %11466 = vmatprep.mubr.msk.bf16.mxu1 %vm283_vm3, %v15356_v32 }
 0x883   : >> { %11467 = vmatmul.mubr.msk.bf16.gmra.mrb[12].mxu1 %vm283_vm3, %v15362_v46 }
 0x884   : >> { %11470 = vmatprep.mubr.msk.bf16.mxu1 %vm283_vm3, %v15364_v63 }
 0x88b   : >> { %11471 = vmatmul.mubr.msk.bf16.gmra.mrb[16].mxu1 %vm283_vm3, %v15370_v50 }
 0x88c   : >> { %11474 = vmatprep.mubr.msk.bf16.mxu1 %vm283_vm3, %v15372_v47 }
 0x893   : >> { %11475 = vmatmul.mubr.msk.bf16.gmra.mrb[20].mxu1 %vm283_vm3, %v15378_v18 }
 0x894   : >> { %11478 = vmatprep.mubr.msk.bf16.mxu1 %vm283_vm3, %v15380_v23 }
 0x89b   : >> { %11479 = vmatmul.mubr.msk.bf16.gmra.mrb[24].mxu1 %vm283_vm3, %v15386_v42 }
 0x89c   : >> { %11482 = vmatprep.mubr.msk.bf16.mxu1 %vm283_vm3, %v15500_v40 }
 0x8a3   : >> { %11483 = vmatmul.mubr.msk.bf16.gmra.mrb[28].mxu1 %vm283_vm3, %v8040_v60 }
 0x93e   : >> { %v11456_v57 = vpop.f32.mrb[0].mxu1 }
 0x93f   : >> { %v8316_v32 = vmul.f32 %v11456_v57, %v15591_v15  ;;  %v8147_v46 = vpop.f32.mrb[1].mxu1 }
 0x940   : >> { %v8314_v63 = vmul.f32 %v15591_v15, %v8147_v46  ;;  %v11457_v50 = vpop.f32.mrb[2].mxu1 }
 0x941   : >> { %v8352_v47 = vadd.f32 %v15594_v34, %v8316_v32  ;;  %v8317_v18 = vmul.f32 %v11457_v50, %v15591_v15  ;;  %v8150_v23 = vpop.f32.mrb[3].mxu1 }
 0x942   : >> { %v8350_v42 = vadd.f32 %v15594_v34, %v8314_v63  ;;  %v8315_v35 = vmul.f32 %v15591_v15, %v8150_v23 }
 0x943   : >> { %v8384_v40 = vmax.f32 %v8352_v47, 0.0  ;;  %v8353_v58 = vadd.f32 %v15594_v34, %v8317_v18 }
 0x944   : >> { %v8382_v16 = vmax.f32 %v8350_v42, 0.0  ;;  %v8351_v25 = vadd.f32 %v15594_v34, %v8315_v35 }
 0x945   : >> { %8416 = vst.msk [vmem:[#allocation3 + $0x31] sm:$0xff] %vm283_vm3, %v8384_v40  ;;  %v8385_v36 = vmax.f32 %v8353_v58, 0.0 }
 0x946   : >> { %8414 = vst.msk [vmem:[#allocation3 + $0x19] sm:$0xff] %vm283_vm3, %v8382_v16  ;;  %v8383_v53 = vmax.f32 %v8351_v25, 0.0  ;;  %v11460_v13 = vpop.f32.mrb[4].mxu1 }
 0x947   : >> { %8417 = vst.msk [vmem:[#allocation3 + $0x39] sm:$0xff] %vm283_vm3, %v8385_v36  ;;  %v8320_v10 = vmul.f32 %v11460_v13, %v15591_v15  ;;  %v8163_v61 = vpop.f32.mrb[5].mxu1 }
 0x948   : >> { %8415 = vst.msk [vmem:[#allocation3 + $0x21] sm:$0xff] %vm283_vm3, %v8383_v53  ;;  %v8318_v33 = vmul.f32 %v15591_v15, %v8163_v61  ;;  %v11461_v30 = vpop.f32.mrb[6].mxu1 }
 0x949   : >> { %v8356_v7 = vadd.f32 %v15594_v34, %v8320_v10  ;;  %v8321_v29 = vmul.f32 %v11461_v30, %v15591_v15  ;;  %v8166_v48 = vpop.f32.mrb[7].mxu1 }
 0x94a   : >> { %v8354_v6 = vadd.f32 %v15594_v34, %v8318_v33  ;;  %v8319_v28 = vmul.f32 %v15591_v15, %v8166_v48 }
 0x94b   : >> { %v8388_v20 = vmax.f32 %v8356_v7, 0.0  ;;  %v8357_v9 = vadd.f32 %v15594_v34, %v8321_v29 }
 0x94c   : >> { %v8386_v49 = vmax.f32 %v8354_v6, 0.0  ;;  %v8355_v17 = vadd.f32 %v15594_v34, %v8319_v28 }
 0x94d   : >> { %8420 = vst.msk [vmem:[#allocation3 + $0x61] sm:$0xff] %vm283_vm3, %v8388_v20  ;;  %v8389_v44 = vmax.f32 %v8357_v9, 0.0 }
 0x94e   : >> { %8418 = vst.msk [vmem:[#allocation3 + $0x49] sm:$0xff] %vm283_vm3, %v8386_v49  ;;  %v8387_v27 = vmax.f32 %v8355_v17, 0.0  ;;  %v11464_v26 = vpop.f32.mrb[8].mxu1 }
 0x94f   : >> { %8421 = vst.msk [vmem:[#allocation3 + $0x69] sm:$0xff] %vm283_vm3, %v8389_v44  ;;  %v8324_v43 = vmul.f32 %v11464_v26, %v15591_v15  ;;  %v8179_v3 = vpop.f32.mrb[9].mxu1 }
 0x950   : >> { %8419 = vst.msk [vmem:[#allocation3 + $0x51] sm:$0xff] %vm283_vm3, %v8387_v27  ;;  %v8322_v4 = vmul.f32 %v15591_v15, %v8179_v3  ;;  %v11465_v2 = vpop.f32.mrb[10].mxu1 }
 0x951   : >> { %v8360_v51 = vadd.f32 %v15594_v34, %v8324_v43  ;;  %v8325_v1 = vmul.f32 %v11465_v2, %v15591_v15  ;;  %v8182_v55 = vpop.f32.mrb[11].mxu1 }
 0x952   : >> { %v8358_v54 = vadd.f32 %v15594_v34, %v8322_v4  ;;  %v8323_v22 = vmul.f32 %v15591_v15, %v8182_v55 }
 0x953   : >> { %v8392_v59 = vmax.f32 %v8360_v51, 0.0  ;;  %v8361_v41 = vadd.f32 %v15594_v34, %v8325_v1 }
 0x954   : >> { %v8390_v31 = vmax.f32 %v8358_v54, 0.0  ;;  %v8359_v0 = vadd.f32 %v15594_v34, %v8323_v22 }
 0x955   : >> { %8424 = vst.msk [vmem:[#allocation3 + $0x91] sm:$0xff] %vm283_vm3, %v8392_v59  ;;  %v8393_v19 = vmax.f32 %v8361_v41, 0.0 }
 0x956   : >> { %8422 = vst.msk [vmem:[#allocation3 + $0x79] sm:$0xff] %vm283_vm3, %v8390_v31  ;;  %v8391_v56 = vmax.f32 %v8359_v0, 0.0  ;;  %v11468_v14 = vpop.f32.mrb[12].mxu1 }
 0x957   : >> { %8425 = vst.msk [vmem:[#allocation3 + $0x99] sm:$0xff] %vm283_vm3, %v8393_v19  ;;  %v8328_v12 = vmul.f32 %v11468_v14, %v15591_v15  ;;  %v8195_v8 = vpop.f32.mrb[13].mxu1 }
 0x958   : >> { %8423 = vst.msk [vmem:[#allocation3 + $0x81] sm:$0xff] %vm283_vm3, %v8391_v56  ;;  %v8326_v37 = vmul.f32 %v15591_v15, %v8195_v8  ;;  %v11469_v39 = vpop.f32.mrb[14].mxu1 }
 0x959   : >> { %v8364_v45 = vadd.f32 %v15594_v34, %v8328_v12  ;;  %v8329_v52 = vmul.f32 %v11469_v39, %v15591_v15  ;;  %v8198_v21 = vpop.f32.mrb[15].mxu1 }
 0x95a   : >> { %v8362_v62 = vadd.f32 %v15594_v34, %v8326_v37  ;;  %v8327_v38 = vmul.f32 %v15591_v15, %v8198_v21 }
 0x95b   : >> { %v8396_v24 = vmax.f32 %v8364_v45, 0.0  ;;  %v8365_v11 = vadd.f32 %v15594_v34, %v8329_v52 }
 0x95c   : >> { %v8394_v5 = vmax.f32 %v8362_v62, 0.0  ;;  %v8363_v60 = vadd.f32 %v15594_v34, %v8327_v38 }
 0x95d   : >> { %8428 = vst.msk [vmem:[#allocation3 + $0xc1] sm:$0xff] %vm283_vm3, %v8396_v24  ;;  %v8397_v57 = vmax.f32 %v8365_v11, 0.0 }
 0x95e   : >> { %8426 = vst.msk [vmem:[#allocation3 + $0xa9] sm:$0xff] %vm283_vm3, %v8394_v5  ;;  %v8395_v32 = vmax.f32 %v8363_v60, 0.0  ;;  %v11472_v46 = vpop.f32.mrb[16].mxu1 }
 0x95f   : >> { %8429 = vst.msk [vmem:[#allocation3 + $0xc9] sm:$0xff] %vm283_vm3, %v8397_v57  ;;  %v8332_v63 = vmul.f32 %v11472_v46, %v15591_v15  ;;  %v8211_v50 = vpop.f32.mrb[17].mxu1 }
 0x960   : >> { %8427 = vst.msk [vmem:[#allocation3 + $0xb1] sm:$0xff] %vm283_vm3, %v8395_v32  ;;  %v8330_v47 = vmul.f32 %v15591_v15, %v8211_v50  ;;  %v11473_v18 = vpop.f32.mrb[18].mxu1  ;;  %v15703_v50 = vld [vmem:[%s16690_s6 + $0x1] ss:$0 sm:$0xff] (%p2435_p11) }
 0x961   : >> { %v8368_v23 = vadd.f32 %v15594_v34, %v8332_v63  ;;  %v8333_v42 = vmul.f32 %v11473_v18, %v15591_v15  ;;  %v8214_v35 = vpop.f32.mrb[19].mxu1  ;;  %v8550_v18 = vld [vmem:[#allocation3 + $0x19] sm:$0xff] (%p2435_p11) }
 0x962   : >> { %v8366_v40 = vadd.f32 %v15594_v34, %v8330_v47  ;;  %v8331_v58 = vmul.f32 %v15591_v15, %v8214_v35  ;;  %v8586_v35 = vmul.f32 (%p2435_p11), %v15703_v50, %v8550_v18 }
 0x963   : >> { %v8400_v16 = vmax.f32 %v8368_v23, 0.0  ;;  %v8369_v25 = vadd.f32 %v15594_v34, %v8333_v42  ;;  %v15709_v23 = vld [vmem:[%s16690_s6 + $0x2] ss:$0 sm:$0xff] (%p2435_p11)  ;;  %v8651_v42 = vld [vmem:[#allocation3 + $0x1a] sm:$0xff] (%p2435_p11) }
 0x964   : >> { %v8398_v36 = vmax.f32 %v8366_v40, 0.0  ;;  %v8367_v53 = vadd.f32 %v15594_v34, %v8331_v58  ;;  %v8687_v40 = vmul.f32 (%p2435_p11), %v15709_v23, %v8651_v42  ;;  %v15716_v58 = vld [vmem:[%s16690_s6 + $0x3] ss:$0 sm:$0xff] (%p2435_p11) }
 0x965   : >> { %8432 = vst.msk [vmem:[#allocation3 + $0xf1] sm:$0xff] %vm283_vm3, %v8400_v16  ;;  %v8401_v13 = vmax.f32 %v8369_v25, 0.0  ;;  %v8752_v16 = vld [vmem:[#allocation3 + $0x30] sm:$0xff] (%p2435_p11)  ;;  %v15721_v25 = vld [vmem:[%s16690_s6 + $0x4] ss:$0 sm:$0xff] (%p2435_p11) }
 0x966   : >> { %8430 = vst.msk [vmem:[#allocation3 + $0xd9] sm:$0xff] %vm283_vm3, %v8398_v36  ;;  %v8399_v10 = vmax.f32 %v8367_v53, 0.0  ;;  %v11476_v61 = vpop.f32.mrb[20].mxu1  ;;  %v8853_v36 = vld [vmem:[#allocation3 + $0x31] sm:$0xff] (%p2435_p11)  ;;  %v15726_v53 = vld [vmem:[%s16690_s6 + $0x5] ss:$0 sm:$0xff] (%p2435_p11) }
 0x967   : >> { %8433 = vst.msk [vmem:[#allocation3 + $0xf9] sm:$0xff] %vm283_vm3, %v8401_v13  ;;  %v8336_v33 = vmul.f32 %v11476_v61, %v15591_v15  ;;  %v8227_v30 = vpop.f32.mrb[21].mxu1  ;;  %v15728_v13 = vld [vmem:[#allocation3 + $0x32] sm:$0xff] (%p2435_p11)  ;;  %v8788_v61 = vmul.f32 (%p2435_p11), %v15716_v58, %v8752_v16 }
 0x968   : >> { %8431 = vst.msk [vmem:[#allocation3 + $0xe1] sm:$0xff] %vm283_vm3, %v8399_v10  ;;  %v8334_v7 = vmul.f32 %v15591_v15, %v8227_v30  ;;  %v11477_v29 = vpop.f32.mrb[22].mxu1  ;;  %v15736_v30 = vld [vmem:[#allocation3 + $0x48] sm:$0xff] (%p2435_p11) }
 0x969   : >> { %v8372_v48 = vadd.f32 %v15594_v34, %v8336_v33  ;;  %v8337_v6 = vmul.f32 %v11477_v29, %v15591_v15  ;;  %v8230_v28 = vpop.f32.mrb[23].mxu1  ;;  %v15734_v33 = vld [vmem:[%s16690_s6 + $0x6] ss:$0 sm:$0xff] (%p2435_p11) }
 0x96a   : >> { %v8370_v20 = vadd.f32 %v15594_v34, %v8334_v7  ;;  %v8335_v9 = vmul.f32 %v15591_v15, %v8230_v28  ;;  %v15741_v7 = vld [vmem:[%s16690_s6 + $0x7] ss:$0 sm:$0xff] (%p2435_p11)  ;;  %v8990_v28 = vmul.f32 (%p2435_p11), %v15726_v53, %v15728_v13 }
 0x96b   : >> { %v8404_v49 = vmax.f32 %v8372_v48, 0.0  ;;  %v8373_v17 = vadd.f32 %v15594_v34, %v8337_v6  ;;  %v8887_v48 = vmul.f32 (%p2435_p11), %v15721_v25, %v8550_v18  ;;  %v8889_v6 = vmul.f32 (%p2435_p11), %v15721_v25, %v8853_v36 }
 0x96c   : >> { %v8402_v44 = vmax.f32 %v8370_v20, 0.0  ;;  %v8371_v27 = vadd.f32 %v15594_v34, %v8335_v9  ;;  %v15748_v20 = vld [vmem:[#allocation3 + $0x49] sm:$0xff] (%p2435_p11) }
 0x96d   : >> { %8436 = vst.msk [vmem:[#allocation3 + $0x121] sm:$0xff] %vm283_vm3, %v8404_v49  ;;  %v8405_v26 = vmax.f32 %v8373_v17, 0.0  ;;  %v15753_v9 = vld [vmem:[%s16690_s6 + $0x8] ss:$0 sm:$0xff] (%p2435_p11)  ;;  %v15758_v17 = vmul.f32 (%p2435_p11), %v15726_v53, %v8651_v42 }
 0x96e   : >> { %8434 = vst.msk [vmem:[#allocation3 + $0x109] sm:$0xff] %vm283_vm3, %v8402_v44  ;;  %v8403_v43 = vmax.f32 %v8371_v27, 0.0  ;;  %v11480_v3 = vpop.f32.mrb[24].mxu1  ;;  %v15755_v49 = vld [vmem:[#allocation3 + $0x4a] sm:$0xff] (%p2435_p11) }
 0x96f   : >> { %8437 = vst.msk [vmem:[#allocation3 + $0x129] sm:$0xff] %vm283_vm3, %v8405_v26  ;;  %v8340_v4 = vmul.f32 %v11480_v3, %v15591_v15  ;;  %v8243_v2 = vpop.f32.mrb[25].mxu1  ;;  %v9092_v26 = vmul.f32 (%p2435_p11), %v15734_v33, %v15736_v30  ;;  %v8548_v3 = vld [vmem:[#allocation3 + $0x1] sm:$0xff] (%p2435_p11) }
 0x970   : >> { %8435 = vst.msk [vmem:[#allocation3 + $0x111] sm:$0xff] %vm283_vm3, %v8403_v43  ;;  %v8338_v51 = vmul.f32 %v15591_v15, %v8243_v2  ;;  %v11481_v1 = vpop.f32.mrb[26].mxu1  ;;  %v8447_v43 = vld [vmem:[#allocation3] sm:$0xff] (%p2435_p11)  ;;  %v15764_v2 = vmul.f32 (%p2435_p11), %v15734_v33, %v8752_v16 }
 0x971   : >> { %v8376_v55 = vadd.f32 %v15594_v34, %v8340_v4  ;;  %v8341_v54 = vmul.f32 %v11481_v1, %v15591_v15  ;;  %v8246_v22 = vpop.f32.mrb[27].mxu1  ;;  %v8649_v4 = vld [vmem:[#allocation3 + $0x2] sm:$0xff] (%p2435_p11) }
 0x972   : >> { %v8374_v59 = vadd.f32 %v15594_v34, %v8338_v51  ;;  %v8339_v41 = vmul.f32 %v15591_v15, %v8246_v22  ;;  %v8588_v51 = vmul.f32 (%p2435_p11), %v15703_v50, %v8853_v36  ;;  %v15771_v22 = vmul.f32 (%p2435_p11), %v15741_v7, %v8853_v36 }
 0x973   : >> { %v8408_v31 = vmax.f32 %v8376_v55, 0.0  ;;  %v8377_v0 = vadd.f32 %v15594_v34, %v8341_v54  ;;  %v8584_v55 = vmul.f32 (%p2435_p11), %v15703_v50, %v8548_v3  ;;  %v8685_v54 = vmul.f32 (%p2435_p11), %v15709_v23, %v8649_v4  ;;  %v8666_v3 = vld [vmem:[#allocation3 + $0xca] sm:$0xff] (%p2435_p11) }
 0x974   : >> { %v8406_v19 = vmax.f32 %v8374_v59, 0.0  ;;  %v8375_v56 = vadd.f32 %v15594_v34, %v8339_v41  ;;  %v8450_v59 = vld [vmem:[#allocation3 + $0x20] sm:$0xff] (%p2435_p11) }
 0x975   : >> { %8440 = vst.msk [vmem:[#allocation3 + $0x151] sm:$0xff] %vm283_vm3, %v8408_v31  ;;  %v8409_v14 = vmax.f32 %v8377_v0, 0.0  ;;  %v8551_v41 = vld [vmem:[#allocation3 + $0x21] sm:$0xff] (%p2435_p11) }
 0x976   : >> { %8438 = vst.msk [vmem:[#allocation3 + $0x139] sm:$0xff] %vm283_vm3, %v8406_v19  ;;  %v8407_v12 = vmax.f32 %v8375_v56, 0.0  ;;  %v11484_v8 = vpop.f32.mrb[28].mxu1  ;;  %v8652_v31 = vld [vmem:[#allocation3 + $0x22] sm:$0xff] (%p2435_p11)  ;;  %v8587_v56 = vmul.f32 (%p2435_p11), %v15703_v50, %v8551_v41 }
 0x977   : >> { %8441 = vst.msk [vmem:[#allocation3 + $0x159] sm:$0xff] %vm283_vm3, %v8409_v14  ;;  %v8344_v37 = vmul.f32 %v11484_v8, %v15591_v15  ;;  %v8259_v39 = vpop.f32.mrb[29].mxu1  ;;  %v8688_v14 = vmul.f32 (%p2435_p11), %v15709_v23, %v8652_v31  ;;  %v15778_v8 = vld [vmem:[#allocation3 + $0x39] sm:$0xff] (%p2435_p11) }
 0x978   : >> { %8439 = vst.msk [vmem:[#allocation3 + $0x141] sm:$0xff] %vm283_vm3, %v8407_v12  ;;  %v8342_v45 = vmul.f32 %v15591_v15, %v8259_v39  ;;  %v11485_v52 = vpop.f32.mrb[30].mxu1  ;;  %v15776_v12 = vld [vmem:[#allocation3 + $0x38] sm:$0xff] (%p2435_p11)  ;;  %v9294_v39 = vmul.f32 (%p2435_p11), %v15753_v9, %v15755_v49 }
 0x979   : >> { %v8380_v21 = vadd.f32 %v15594_v34, %v8344_v37  ;;  %v8345_v62 = vmul.f32 %v11485_v52, %v15591_v15  ;;  %v8262_v38 = vpop.f32.mrb[31].mxu1  ;;  %v9193_v37 = vmul.f32 (%p2435_p11), %v15741_v7, %v15748_v20  ;;  %v15786_v52 = vmul.f32 (%p2435_p11), %v15753_v9, %v15728_v13 }
 0x97a   : >> { %v8378_v24 = vadd.f32 %v15594_v34, %v8342_v45  ;;  %v8343_v11 = vmul.f32 %v15591_v15, %v8262_v38  ;;  %2437 = sbr.rel (!%p2435_p11) target bundleno = 880 (0x370), region = 117  ;;  %v15698_v15 = vld [vmem:[%s16690_s6] ss:$0 sm:$0xff] (%p2435_p11) }
 0x97b   : >> { %v8412_v5 = vmax.f32 %v8380_v21, 0.0  ;;  %v8381_v60 = vadd.f32 %v15594_v34, %v8345_v62  ;;  %v8487_v44 = vmul.f32 (%p2435_p11), %v15698_v15, %v8752_v16  ;;  %v8483_v1 = vmul.f32 (%p2435_p11), %v15698_v15, %v8447_v43  ;;  %v15788_v21 = vld [vmem:[#allocation3 + $0x3a] sm:$0xff] (%p2435_p11)  ;;  %v15790_v62 = vld [vmem:[#allocation3 + $0x50] sm:$0xff] (%p2435_p11) }
 0x97c   : >> { %v8410_v57 = vmax.f32 %v8378_v24, 0.0  ;;  %v8379_v32 = vadd.f32 %v15594_v34, %v8343_v11  ;;  %v8449_v34 = vld [vmem:[#allocation3 + $0x18] sm:$0xff] (%p2435_p11)  ;;  %v8486_v19 = vmul.f32 (%p2435_p11), %v15698_v15, %v8450_v59  ;;  %v8789_v11 = vmul.f32 (%p2435_p11), %v15716_v58, %v15776_v12  ;;  %v8565_v43 = vld [vmem:[#allocation3 + $0xc9] sm:$0xff] (%p2435_p11) }
 0x97d   : >> { %8444 = vst.msk [vmem:[#allocation3 + $0x181] sm:$0xff] %vm283_vm3, %v8412_v5  ;;  %v8413_v46 = vmax.f32 %v8381_v60, 0.0  ;;  %v8485_v47 = vmul.f32 (%p2435_p11), %v15698_v15, %v8449_v34  ;;  %v8786_v29 = vmul.f32 (%p2435_p11), %v15716_v58, %v8449_v34  ;;  %v8616_v45 = vadd.f32 (%p2435_p11), %v8584_v55, %v8483_v1  ;;  %v8448_v5 = vld [vmem:[#allocation3 + $0x8] sm:$0xff] (%p2435_p11)  ;;  %v15798_v34 = vld [vmem:[#allocation3 + $0x51] sm:$0xff] (%p2435_p11) }
 0x97e   : >> { %8442 = vst.msk [vmem:[#allocation3 + $0x169] sm:$0xff] %vm283_vm3, %v8410_v57  ;;  %v8411_v63 = vmax.f32 %v8379_v32, 0.0  ;;  %v8619_v24 = vadd.f32 (%p2435_p11), %v8587_v56, %v8486_v19  ;;  %v8549_v60 = vld [vmem:[#allocation3 + $0x9] sm:$0xff] (%p2435_p11)  ;;  %v15794_v32 = vadd.f32 (%p2435_p11), %v8588_v51, %v8487_v44  ;;  %v8484_v18 = vmul.f32 (%p2435_p11), %v15698_v15, %v8448_v5  ;;  %v8767_v19 = vld [vmem:[#allocation3 + $0xe0] sm:$0xff] (%p2435_p11) }
 0x97f   : >> { %8445 = vst.msk [vmem:[#allocation3 + $0x189] sm:$0xff] %vm283_vm3, %v8413_v46  ;;  %v8618_v10 = vadd.f32 (%p2435_p11), %v8586_v35, %v8485_v47  ;;  %v8650_v57 = vld [vmem:[#allocation3 + $0xa] sm:$0xff] (%p2435_p11)  ;;  %v8717_v46 = vadd.f32 (%p2435_p11), %v8685_v54, %v8616_v45  ;;  %v15800_v47 = vld [vmem:[#allocation3 + $0x52] sm:$0xff] (%p2435_p11)  ;;  %v8585_v42 = vmul.f32 (%p2435_p11), %v15703_v50, %v8549_v60  ;;  %v8991_v16 = vmul.f32 (%p2435_p11), %v15726_v53, %v15788_v21 }
 0x980   : >> { %8443 = vst.msk [vmem:[#allocation3 + $0x171] sm:$0xff] %vm283_vm3, %v8411_v63  ;;  %v8890_v63 = vmul.f32 (%p2435_p11), %v15721_v25, %v15778_v8  ;;  %v8686_v36 = vmul.f32 (%p2435_p11), %v15709_v23, %v8650_v57  ;;  %v9295_v1 = vmul.f32 (%p2435_p11), %v15753_v9, %v15800_v47  ;;  %v8803_v60 = vmul.f32 (%p2435_p11), %v15716_v58, %v8767_v19  ;;  %v8463_v57 = vld [vmem:[#allocation3 + $0xc0] sm:$0xff] (%p2435_p11) }
 0x981   : > { %v8719_v27 = vadd.f32 %v8687_v40, %v8618_v10  ;;  %v8720_v40 = vadd.f32 %v8688_v14, %v8619_v24  ;;  %v8464_v10 = vld [vmem:[#allocation3 + $0xc8] sm:$0xff]  ;;  %v8617_v44 = vadd.f32 %v8585_v42, %v8484_v18  ;;  %v8989_v24 = vmul.f32 %v15726_v53, %v8652_v31 }
 0x982   : > { %v9192_v18 = vmul.f32 %v15741_v7, %v15778_v8  ;;  %v8868_v31 = vld [vmem:[#allocation3 + $0xe1] sm:$0xff] }
 0x983   : > { %v8820_v0 = vadd.f32 %v8788_v61, %v8719_v27  ;;  %v8818_v61 = vadd.f32 %v8786_v29, %v8717_v46  ;;  %v8787_v27 = vmul.f32 %v15716_v58, %v8450_v59  ;;  %v8821_v51 = vadd.f32 %v8789_v11, %v8720_v40  ;;  %v8665_v42 = vld [vmem:[#allocation3 + $0xc2] sm:$0xff] }
 0x984   : > { %v8718_v54 = vadd.f32 %v8686_v36, %v8617_v44  ;;  %v8888_v29 = vmul.f32 %v15721_v25, %v8551_v41  ;;  %v8601_v59 = vmul.f32 %v15703_v50, %v8565_v43  ;;  %v8766_v36 = vld [vmem:[#allocation3 + $0xd8] sm:$0xff]  ;;  %v8499_v44 = vmul.f32 %v15698_v15, %v8463_v57 }
 0x985   : > { %v8921_v38 = vadd.f32 %v8889_v6, %v8820_v0  ;;  %v9093_v6 = vmul.f32 %v15734_v33, %v15790_v62  ;;  %v8919_v55 = vadd.f32 %v8887_v48, %v8818_v61  ;;  %v8500_v0 = vmul.f32 %v15698_v15, %v8464_v10  ;;  %v8969_v61 = vld [vmem:[#allocation3 + $0xe2] sm:$0xff]  ;;  %v15850_v57 = vld [vmem:[#allocation3 + $0xfa] sm:$0xff] }
 0x986   : > { %v8922_v14 = vadd.f32 %v8890_v63, %v8821_v51  ;;  %v9091_v48 = vmul.f32 %v15734_v33, %v15776_v12  ;;  %v8701_v51 = vmul.f32 %v15709_v23, %v8665_v42  ;;  %v8704_v42 = vmul.f32 %v15709_v23, %v8969_v61 }
 0x987   : > { %v9022_v35 = vadd.f32 %v8990_v28, %v8921_v38  ;;  %v9194_v28 = vmul.f32 %v15741_v7, %v15798_v34  ;;  %v9020_v45 = vadd.f32 %v15758_v17, %v8919_v55  ;;  %v8819_v38 = vadd.f32 %v8787_v27, %v8718_v54  ;;  %v15836_v54 = vld [vmem:[#allocation3 + $0xf8] sm:$0xff] }
 0x988   : > { %v9023_v5 = vadd.f32 %v8991_v16, %v8922_v14  ;;  %v8633_v41 = vadd.f32 %v8601_v59, %v8500_v0  ;;  %v9293_v17 = vmul.f32 %v15753_v9, %v15788_v21  ;;  %v8904_v16 = vmul.f32 %v15721_v25, %v8868_v31 }
 0x989   : > { %v9124_v4 = vadd.f32 %v9092_v26, %v9022_v35  ;;  %v8702_v26 = vmul.f32 %v15709_v23, %v8666_v3  ;;  %v9122_v46 = vadd.f32 %v15764_v2, %v9020_v45  ;;  %v8920_v63 = vadd.f32 %v8888_v29, %v8819_v38  ;;  %v15838_v29 = vld [vmem:[#allocation3 + $0xf9] sm:$0xff] }
 0x98a   : > { %v8802_v0 = vmul.f32 %v15716_v58, %v8766_v36  ;;  %v9208_v59 = vmul.f32 %v15741_v7, %v15838_v29 }
 0x98b   : > { %v9225_v56 = vadd.f32 %v9193_v37, %v9124_v4  ;;  %v8564_v37 = vld [vmem:[#allocation3 + $0xc1] sm:$0xff]  ;;  %v8734_v40 = vadd.f32 %v8702_v26, %v8633_v41  ;;  %v9223_v10 = vadd.f32 %v15771_v22, %v9122_v46  ;;  %v9021_v2 = vadd.f32 %v8989_v24, %v8920_v63  ;;  %v8867_v26 = vld [vmem:[#allocation3 + $0xd9] sm:$0xff]  ;;  %v15852_v46 = vld [vmem:[#allocation3 + $0xf0] sm:$0xff] }
 0x98c   : > { %v8600_v27 = vmul.f32 %v15703_v50, %v8564_v37  ;;  %v9005_v4 = vmul.f32 %v15726_v53, %v8969_v61  ;;  %v8903_v24 = vmul.f32 %v15721_v25, %v8867_v26  ;;  %v8502_v41 = vmul.f32 %v15698_v15, %v8767_v19  ;;  %v15854_v63 = vld [vmem:[#allocation3 + $0xf1] sm:$0xff] }
 0x98d   : > { %v9326_v11 = vadd.f32 %v9294_v39, %v9225_v56  ;;  %v9125_v39 = vadd.f32 %v9093_v6, %v9023_v5  ;;  %v8835_v3 = vadd.f32 %v8803_v60, %v8734_v40  ;;  %v9324_v6 = vadd.f32 %v15786_v52, %v9223_v10  ;;  %v15865_v10 = vld [vmem:[#allocation3 + $0xf2] sm:$0xff] }
 0x98e   : > { %v9123_v55 = vadd.f32 %v9091_v48, %v9021_v2  ;;  %v8632_v22 = vadd.f32 %v8600_v27, %v8499_v44  ;;  %v8968_v48 = vld [vmem:[#allocation3 + $0xda] sm:$0xff]  ;;  %v9106_v19 = vmul.f32 %v15734_v33, %v15852_v46  ;;  %v15869_v61 = vld [vmem:[#allocation3 + $0x110] sm:$0xff] }
 0x98f   : > { %v9362_v35 = vsel %vm283_vm3, %v9326_v11, 0.0  ;;  %v9226_v43 = vadd.f32 %v9194_v28, %v9125_v39  ;;  %v8936_v14 = vadd.f32 %v8904_v16, %v8835_v3  ;;  %v9107_v28 = vmul.f32 %v15734_v33, %v15836_v54  ;;  %v15871_v44 = vld [vmem:[#allocation3 + $0x111] sm:$0xff] }
 0x990   : > { %9363 = vadd.xlane.f32.xlu1 %v9362_v35  ;;  %v9356_v45 = vsel %vm283_vm3, %v9324_v6, 0.0  ;;  %v9224_v52 = vadd.f32 %v9192_v18, %v9123_v55  ;;  %v8733_v38 = vadd.f32 %v8701_v51, %v8632_v22  ;;  %v8603_v18 = vmul.f32 %v15703_v50, %v8868_v31  ;;  %v15878_v55 = vld [vmem:[#allocation3 + $0x112] sm:$0xff] }
 0x991   : > { %v9327_v56 = vadd.f32 %v9295_v1, %v9226_v43  ;;  %9357 = vadd.xlane.f32.xlu0 %v9356_v45  ;;  %v9037_v5 = vadd.f32 %v9005_v4, %v8936_v14  ;;  %v9004_v1 = vmul.f32 %v15726_v53, %v8968_v48  ;;  %v9309_v39 = vmul.f32 %v15753_v9, %v15850_v57 }
 0x992   : > { %v9325_v60 = vadd.f32 %v9293_v17, %v9224_v52  ;;  %v8834_v37 = vadd.f32 %v8802_v0, %v8733_v38  ;;  %v9207_v17 = vmul.f32 %v15741_v7, %v15854_v63  ;;  %v8635_v2 = vadd.f32 %v8603_v18, %v8502_v41  ;;  %v15901_v18 = vld [vmem:[#allocation3 + $0x10a] sm:$0xff] }
 0x993   : > { %v9365_v11 = vsel %vm283_vm3, %v9327_v56, 0.0  ;;  %v9139_v35 = vadd.f32 %v9107_v28, %v9037_v5  ;;  %v8805_v31 = vmul.f32 %v15716_v58, %v15836_v54  ;;  %v9308_v43 = vmul.f32 %v15753_v9, %v15865_v10 }
 0x994   : > { %9366 = vadd.xlane.f32.xlu1 %v9365_v11  ;;  %v9359_v40 = vsel %vm283_vm3, %v9325_v60, 0.0  ;;  %v8935_v16 = vadd.f32 %v8903_v24, %v8834_v37  ;;  %v8906_v3 = vmul.f32 %v15721_v25, %v15838_v29  ;;  %v8501_v4 = vmul.f32 %v15698_v15, %v8766_v36  ;;  %v15890_v24 = vld [vmem:[#allocation3 + $0x108] sm:$0xff] }
 0x995   : > { %9360 = vadd.xlane.f32.xlu0 %v9359_v40  ;;  %v9240_v27 = vadd.f32 %v9208_v59, %v9139_v35  ;;  %v8736_v6 = vadd.f32 %v8704_v42, %v8635_v2  ;;  %v8602_v22 = vmul.f32 %v15703_v50, %v8867_v26  ;;  %v8703_v0 = vmul.f32 %v15709_v23, %v8968_v48  ;;  %v15899_v37 = vld [vmem:[#allocation3 + $0x109] sm:$0xff] }
 0x996   : > { %v9036_v51 = vadd.f32 %v9004_v1, %v8935_v16  ;;  %v9007_v14 = vmul.f32 %v15726_v53, %v15850_v57  ;;  %v9109_v28 = vmul.f32 %v15734_v33, %v15869_v61  ;;  %v9210_v59 = vmul.f32 %v15741_v7, %v15871_v44 }
 0x997   : > { %v9341_v56 = vadd.f32 %v9309_v39, %v9240_v27  ;;  %v8837_v36 = vadd.f32 %v8805_v31, %v8736_v6  ;;  %v8634_v52 = vadd.f32 %v8602_v22, %v8501_v4  ;;  %v8804_v38 = vmul.f32 %v15716_v58, %v15852_v46  ;;  %v15924_v22 = vld [vmem:[#allocation3 + $0x69] sm:$0xff] }
 0x998   : > { %v9138_v45 = vadd.f32 %v9106_v19, %v9036_v51  ;;  %v9311_v48 = vmul.f32 %v15753_v9, %v15878_v55  ;;  %v8905_v11 = vmul.f32 %v15721_v25, %v15854_v63  ;;  %v8488_v5 = vmul.f32 %v15698_v15, %v15776_v12 }
 0x999   : > { %v9407_v26 = vsel %vm283_vm3, %v9341_v56, 0.0  ;;  %v8938_v41 = vadd.f32 %v8906_v3, %v8837_v36  ;;  %v8735_v60 = vadd.f32 %v8703_v0, %v8634_v52  ;;  %v8589_v42 = vmul.f32 %v15703_v50, %v15778_v8  ;;  %v15919_v3 = vld [vmem:[#allocation3 + $0x68] sm:$0xff] }
 0x99a   : > { %9408 = vadd.xlane.f32.xlu1 %v9407_v26  ;;  %v9239_v1 = vadd.f32 %v9207_v17, %v9138_v45  ;;  %v9006_v35 = vmul.f32 %v15726_v53, %v15865_v10  ;;  %v9108_v39 = vmul.f32 %v15734_v33, %v15890_v24  ;;  %v8690_v12 = vmul.f32 %v15709_v23, %v15788_v21 }
 0x99b   : > { %v8791_v19 = vmul.f32 %v15716_v58, %v15790_v62  ;;  %v9039_v40 = vadd.f32 %v9007_v14, %v8938_v41  ;;  %v8836_v16 = vadd.f32 %v8804_v38, %v8735_v60  ;;  %v8621_v2 = vadd.f32 %v8589_v42, %v8488_v5  ;;  %v15935_v38 = vld [vmem:[#allocation3 + $0x60] sm:$0xff]  ;;  %v15943_v60 = vld [vmem:[#allocation3 + $0x6a] sm:$0xff] }
 0x99c   : > { %v9340_v17 = vadd.f32 %v9308_v43, %v9239_v1  ;;  %v9209_v31 = vmul.f32 %v15741_v7, %v15899_v37  ;;  %v9310_v8 = vmul.f32 %v15753_v9, %v15901_v18  ;;  %v8892_v27 = vmul.f32 %v15721_v25, %v15798_v34  ;;  %v15945_v42 = vld [vmem:[#allocation3 + $0x61] sm:$0xff] }
 0x99d   : > { %v8689_v21 = vmul.f32 %v15709_v23, %v15728_v13  ;;  %v9141_v43 = vadd.f32 %v9109_v28, %v9039_v40  ;;  %v8937_v51 = vadd.f32 %v8905_v11, %v8836_v16  ;;  %v8722_v6 = vadd.f32 %v8690_v12, %v8621_v2 }
 0x99e   : > { %v9404_v4 = vsel %vm283_vm3, %v9340_v17, 0.0  ;;  %v8993_v0 = vmul.f32 %v15726_v53, %v15800_v47  ;;  %v8790_v14 = vmul.f32 %v15716_v58, %v15736_v30  ;;  %v8891_v45 = vmul.f32 %v15721_v25, %v15748_v20 }
 0x99f   : > { %9405 = vadd.xlane.f32.xlu0 %v9404_v4  ;;  %v8721_v56 = vadd.f32 %v8689_v21, %v15794_v32  ;;  %v9242_v13 = vadd.f32 %v9210_v59, %v9141_v43  ;;  %v9038_v36 = vadd.f32 %v9006_v35, %v8937_v51  ;;  %v8823_v52 = vadd.f32 %v8791_v19, %v8722_v6  ;;  %v15947_v35 = vld [vmem:[#allocation3 + $0x62] sm:$0xff] }
 0x9a0   : > { %v9095_v28 = vmul.f32 %v15734_v33, %v15919_v3  ;;  %v9196_v26 = vmul.f32 %v15741_v7, %v15924_v22  ;;  %v8992_v32 = vmul.f32 %v15726_v53, %v15755_v49  ;;  %v8504_v5 = vmul.f32 %v15698_v15, %v15836_v54 }
 0x9a1   : > { %v8822_v11 = vadd.f32 %v8790_v14, %v8721_v56  ;;  %v9343_v1 = vadd.f32 %v9311_v48, %v9242_v13  ;;  %v9140_v41 = vadd.f32 %v9108_v39, %v9038_v36  ;;  %v8924_v59 = vadd.f32 %v8892_v27, %v8823_v52  ;;  %v15968_v56 = vld [vmem:[#allocation3 + $0x129] sm:$0xff] }
 0x9a2   : > { %v8605_v12 = vmul.f32 %v15703_v50, %v15838_v29  ;;  %v9094_v17 = vmul.f32 %v15734_v33, %v15935_v38  ;;  %v8706_v40 = vmul.f32 %v15709_v23, %v15850_v57  ;;  %v8807_v54 = vmul.f32 %v15716_v58, %v15869_v61 }
 0x9a3   : > { %v8923_v19 = vadd.f32 %v8891_v45, %v8822_v11  ;;  %v9413_v48 = vsel %vm283_vm3, %v9343_v1, 0.0  ;;  %v9241_v39 = vadd.f32 %v9209_v31, %v9140_v41  ;;  %v9025_v16 = vadd.f32 %v8993_v0, %v8924_v59  ;;  %v15966_v0 = vld [vmem:[#allocation3 + $0x128] sm:$0xff] }
 0x9a4   : > { %v8637_v2 = vadd.f32 %v8605_v12, %v8504_v5  ;;  %9414 = vadd.xlane.f32.xlu1 %v9413_v48  ;;  %v9297_v27 = vmul.f32 %v15753_v9, %v15943_v60  ;;  %v9195_v21 = vmul.f32 %v15741_v7, %v15945_v42  ;;  %v9296_v4 = vmul.f32 %v15753_v9, %v15947_v35 }
 0x9a5   : > { %v9024_v29 = vadd.f32 %v8992_v32, %v8923_v19  ;;  %v9342_v57 = vadd.f32 %v9310_v8, %v9241_v39  ;;  %v9127_v43 = vadd.f32 %v9095_v28, %v9025_v16  ;;  %v8908_v6 = vmul.f32 %v15721_v25, %v15871_v44 }
 0x9a6   : > { %v8738_v51 = vadd.f32 %v8706_v40, %v8637_v2  ;;  %v8503_v14 = vmul.f32 %v15698_v15, %v15852_v46  ;;  %v8604_v45 = vmul.f32 %v15703_v50, %v15854_v63  ;;  %v8705_v13 = vmul.f32 %v15709_v23, %v15865_v10 }
 0x9a7   : > { %v9126_v31 = vadd.f32 %v9094_v17, %v9024_v29  ;;  %v9410_v8 = vsel %vm283_vm3, %v9342_v57, 0.0  ;;  %v9228_v36 = vadd.f32 %v9196_v26, %v9127_v43  ;;  %v9009_v28 = vmul.f32 %v15726_v53, %v15878_v55  ;;  %v15985_v26 = vld [vmem:[#allocation3 + $0x12a] sm:$0xff] }
 0x9a8   : > { %v8839_v52 = vadd.f32 %v8807_v54, %v8738_v51  ;;  %9411 = vadd.xlane.f32.xlu0 %v9410_v8  ;;  %v8636_v32 = vadd.f32 %v8604_v45, %v8503_v14  ;;  %v8806_v5 = vmul.f32 %v15716_v58, %v15890_v24  ;;  %v9111_v63 = vmul.f32 %v15734_v33, %v15966_v0  ;;  %v15992_v54 = vld [vmem:[#allocation3 + $0x120] sm:$0xff] }
 0x9a9   : > { %v9227_v11 = vadd.f32 %v9195_v21, %v9126_v31  ;;  %v9329_v46 = vadd.f32 %v9297_v27, %v9228_v36  ;;  %v9212_v10 = vmul.f32 %v15741_v7, %v15968_v56  ;;  %v8907_v12 = vmul.f32 %v15721_v25, %v15899_v37  ;;  %v16003_v21 = vld [vmem:[#allocation3 + $0x121] sm:$0xff] }
 0x9aa   : > { %v8940_v1 = vadd.f32 %v8908_v6, %v8839_v52  ;;  %v8737_v59 = vadd.f32 %v8705_v13, %v8636_v32  ;;  %v8490_v19 = vmul.f32 %v15698_v15, %v15790_v62  ;;  %v8591_v48 = vmul.f32 %v15703_v50, %v15798_v34  ;;  %v16015_v45 = vld [vmem:[#allocation3 + $0x80] sm:$0xff] }
 0x9ab   : > { %v9328_v41 = vadd.f32 %v9296_v4, %v9227_v11  ;;  %v9371_v17 = vsel %vm283_vm3, %v9329_v46, 0.0  ;;  %v8692_v39 = vmul.f32 %v15709_v23, %v15800_v47  ;;  %v9008_v27 = vmul.f32 %v15726_v53, %v15901_v18  ;;  %v16005_v4 = vld [vmem:[#allocation3 + $0x122] sm:$0xff] }
 0x9ac   : > { %v9041_v40 = vadd.f32 %v9009_v28, %v8940_v1  ;;  %9372 = vadd.xlane.f32.xlu1 %v9371_v17  ;;  %v8838_v2 = vadd.f32 %v8806_v5, %v8737_v59  ;;  %v9313_v29 = vmul.f32 %v15753_v9, %v15985_v26  ;;  %v8623_v34 = vadd.f32 %v8591_v48, %v8490_v19  ;;  %v16027_v5 = vld [vmem:[#allocation3 + $0x81] sm:$0xff]  ;;  %v16040_v17 = vld [vmem:[#allocation3 + $0x78] sm:$0xff] }
 0x9ad   : > { %v9368_v16 = vsel %vm283_vm3, %v9328_v41, 0.0  ;;  %v8793_v47 = vmul.f32 %v15716_v58, %v15919_v3  ;;  %v9110_v43 = vmul.f32 %v15734_v33, %v15992_v54  ;;  %v8894_v51 = vmul.f32 %v15721_v25, %v15924_v22 }
 0x9ae   : > { %9369 = vadd.xlane.f32.xlu0 %v9368_v16  ;;  %v9143_v62 = vadd.f32 %v9111_v63, %v9041_v40  ;;  %v8939_v57 = vadd.f32 %v8907_v12, %v8838_v2  ;;  %v8489_v6 = vmul.f32 %v15698_v15, %v15736_v30  ;;  %v8724_v14 = vadd.f32 %v8692_v39, %v8623_v34  ;;  %v16038_v12 = vld [vmem:[#allocation3 + $0x82] sm:$0xff] }
 0x9af   : > { %v8590_v13 = vmul.f32 %v15703_v50, %v15748_v20  ;;  %v8691_v8 = vmul.f32 %v15709_v23, %v15755_v49  ;;  %v9211_v52 = vmul.f32 %v15741_v7, %v16003_v21  ;;  %v9312_v28 = vmul.f32 %v15753_v9, %v16005_v4 }
 0x9b0   : > { %v9244_v31 = vadd.f32 %v9212_v10, %v9143_v62  ;;  %v9040_v36 = vadd.f32 %v9008_v27, %v8939_v57  ;;  %v8995_v30 = vmul.f32 %v15726_v53, %v15943_v60  ;;  %v8825_v32 = vadd.f32 %v8793_v47, %v8724_v14  ;;  %v16050_v62 = vld [vmem:[#allocation3 + $0x79] sm:$0xff] }
 0x9b1   : > { %v8622_v46 = vadd.f32 %v8590_v13, %v8489_v6  ;;  %v8792_v20 = vmul.f32 %v15716_v58, %v15935_v38  ;;  %v9097_v49 = vmul.f32 %v15734_v33, %v16015_v45  ;;  %v8893_v63 = vmul.f32 %v15721_v25, %v15945_v42  ;;  %v16060_v6 = vld [vmem:[#allocation3 + $0x7a] sm:$0xff] }
 0x9b2   : > { %v9345_v11 = vadd.f32 %v9313_v29, %v9244_v31  ;;  %v9142_v1 = vadd.f32 %v9110_v43, %v9040_v36  ;;  %v8506_v10 = vmul.f32 %v15698_v15, %v15869_v61  ;;  %v8926_v59 = vadd.f32 %v8894_v51, %v8825_v32  ;;  %v16062_v14 = vld [vmem:[#allocation3 + $0x140] sm:$0xff] }
 0x9b3   : > { %v8723_v19 = vadd.f32 %v8691_v8, %v8622_v46  ;;  %v8607_v40 = vmul.f32 %v15703_v50, %v15871_v44  ;;  %v9198_v39 = vmul.f32 %v15741_v7, %v16027_v5  ;;  %v8994_v16 = vmul.f32 %v15726_v53, %v15947_v35 }
 0x9b4   : > { %v9419_v41 = vsel %vm283_vm3, %v9345_v11, 0.0  ;;  %v9243_v48 = vadd.f32 %v9211_v52, %v9142_v1  ;;  %v8708_v61 = vmul.f32 %v15709_v23, %v15878_v55  ;;  %v9027_v2 = vadd.f32 %v8995_v30, %v8926_v59  ;;  %v16079_v1 = vld [vmem:[#allocation3 + $0x141] sm:$0xff] }
 0x9b5   : > { %9420 = vadd.xlane.f32.xlu1 %v9419_v41  ;;  %v8824_v27 = vadd.f32 %v8792_v20, %v8723_v19  ;;  %v8639_v29 = vadd.f32 %v8607_v40, %v8506_v10  ;;  %v8809_v34 = vmul.f32 %v15716_v58, %v15966_v0  ;;  %v9299_v47 = vmul.f32 %v15753_v9, %v16038_v12  ;;  %v16085_v59 = vld [vmem:[#allocation3 + $0x142] sm:$0xff]  ;;  %v16087_v40 = vld [vmem:[#allocation3 + $0x138] sm:$0xff] }
 0x9b6   : > { %v9344_v44 = vadd.f32 %v9312_v28, %v9243_v48  ;;  %v9096_v57 = vmul.f32 %v15734_v33, %v16040_v17  ;;  %v8910_v43 = vmul.f32 %v15721_v25, %v15968_v56  ;;  %v9129_v51 = vadd.f32 %v9097_v49, %v9027_v2 }
 0x9b7   : > { %v8925_v55 = vadd.f32 %v8893_v63, %v8824_v27  ;;  %v8740_v31 = vadd.f32 %v8708_v61, %v8639_v29  ;;  %v8505_v13 = vmul.f32 %v15698_v15, %v15890_v24  ;;  %v9197_v36 = vmul.f32 %v15741_v7, %v16050_v62 }
 0x9b8   : > { %v9416_v8 = vsel %vm283_vm3, %v9344_v44, 0.0  ;;  %v8606_v52 = vmul.f32 %v15703_v50, %v15899_v37  ;;  %v8707_v28 = vmul.f32 %v15709_v23, %v15901_v18  ;;  %v9230_v30 = vadd.f32 %v9198_v39, %v9129_v51  ;;  %v16106_v51 = vld [vmem:[#allocation3 + $0x139] sm:$0xff] }
 0x9b9   : > { %9417 = vadd.xlane.f32.xlu0 %v9416_v8  ;;  %v9026_v11 = vadd.f32 %v8994_v16, %v8925_v55  ;;  %v8841_v32 = vadd.f32 %v8809_v34, %v8740_v31  ;;  %v9011_v46 = vmul.f32 %v15726_v53, %v15985_v26  ;;  %v9298_v24 = vmul.f32 %v15753_v9, %v16060_v6  ;;  %v16108_v31 = vld [vmem:[#allocation3 + $0x13a] sm:$0xff] }
 0x9ba   : > { %v9113_v20 = vmul.f32 %v15734_v33, %v16062_v14  ;;  %v8638_v49 = vadd.f32 %v8606_v52, %v8505_v13  ;;  %v8808_v37 = vmul.f32 %v15716_v58, %v15992_v54  ;;  %v9331_v18 = vadd.f32 %v9299_v47, %v9230_v30  ;;  %v16115_v30 = vld [vmem:[#allocation3 + $0x98] sm:$0xff] }
 0x9bb   : > { %v9128_v63 = vadd.f32 %v9096_v57, %v9026_v11  ;;  %v8942_v10 = vadd.f32 %v8910_v43, %v8841_v32  ;;  %v8909_v41 = vmul.f32 %v15721_v25, %v16003_v21  ;;  %v8492_v48 = vmul.f32 %v15698_v15, %v15919_v3 }
 0x9bc   : > { %v8739_v19 = vadd.f32 %v8707_v28, %v8638_v49  ;;  %v8593_v39 = vmul.f32 %v15703_v50, %v15924_v22  ;;  %v8694_v16 = vmul.f32 %v15709_v23, %v15943_v60  ;;  %v9377_v61 = vsel %vm283_vm3, %v9331_v18, 0.0  ;;  %v16127_v18 = vld [vmem:[#allocation3 + $0x99] sm:$0xff] }
 0x9bd   : > { %v9229_v2 = vadd.f32 %v9197_v36, %v9128_v63  ;;  %v9043_v27 = vadd.f32 %v9011_v46, %v8942_v10  ;;  %v9214_v29 = vmul.f32 %v15741_v7, %v16079_v1  ;;  %9378 = vadd.xlane.f32.xlu1 %v9377_v61  ;;  %v9010_v44 = vmul.f32 %v15726_v53, %v16005_v4  ;;  %v16138_v61 = vld [vmem:[#allocation3 + $0x90] sm:$0xff] }
 0x9be   : > { %v8840_v34 = vadd.f32 %v8808_v37, %v8739_v19  ;;  %v8625_v47 = vadd.f32 %v8593_v39, %v8492_v48  ;;  %v8795_v3 = vmul.f32 %v15716_v58, %v16015_v45  ;;  %v9315_v60 = vmul.f32 %v15753_v9, %v16085_v59  ;;  %v16136_v39 = vld [vmem:[#allocation3 + $0x9a] sm:$0xff] }
 0x9bf   : > { %v9330_v22 = vadd.f32 %v9298_v24, %v9229_v2  ;;  %v9145_v57 = vadd.f32 %v9113_v20, %v9043_v27  ;;  %v9112_v43 = vmul.f32 %v15734_v33, %v16087_v40  ;;  %v8896_v8 = vmul.f32 %v15721_v25, %v16027_v5 }
 0x9c0   : > { %v8941_v55 = vadd.f32 %v8909_v41, %v8840_v34  ;;  %v8726_v13 = vadd.f32 %v8694_v16, %v8625_v47  ;;  %v8491_v36 = vmul.f32 %v15698_v15, %v15935_v38  ;;  %v8592_v11 = vmul.f32 %v15703_v50, %v15945_v42 }
 0x9c1   : > { %v9374_v52 = vsel %vm283_vm3, %v9330_v22, 0.0  ;;  %v9246_v28 = vadd.f32 %v9214_v29, %v9145_v57  ;;  %v8693_v32 = vmul.f32 %v15709_v23, %v15947_v35  ;;  %v9213_v24 = vmul.f32 %v15741_v7, %v16106_v51 }
 0x9c2   : > { %9375 = vadd.xlane.f32.xlu0 %v9374_v52  ;;  %v9042_v46 = vadd.f32 %v9010_v44, %v8941_v55  ;;  %v8827_v20 = vadd.f32 %v8795_v3, %v8726_v13  ;;  %v8997_v38 = vmul.f32 %v15726_v53, %v16038_v12  ;;  %v9314_v37 = vmul.f32 %v15753_v9, %v16108_v31  ;;  %v16156_v13 = vld [vmem:[#allocation3 + $0x91] sm:$0xff] }
 0x9c3   : > { %v9347_v49 = vadd.f32 %v9315_v60, %v9246_v28  ;;  %v8624_v63 = vadd.f32 %v8592_v11, %v8491_v36  ;;  %v8794_v42 = vmul.f32 %v15716_v58, %v16040_v17  ;;  %v9099_v41 = vmul.f32 %v15734_v33, %v16115_v30 }
 0x9c4   : > { %v9144_v35 = vadd.f32 %v9112_v43, %v9042_v46  ;;  %v8928_v10 = vadd.f32 %v8896_v8, %v8827_v20  ;;  %v8895_v19 = vmul.f32 %v15721_v25, %v16050_v62  ;;  %v8508_v2 = vmul.f32 %v15698_v15, %v15966_v0  ;;  %v16165_v46 = vld [vmem:[#allocation3 + $0x158] sm:$0xff] }
 0x9c5   : > { %v9425_v48 = vsel %vm283_vm3, %v9347_v49, 0.0  ;;  %v8725_v16 = vadd.f32 %v8693_v32, %v8624_v63  ;;  %v8609_v27 = vmul.f32 %v15703_v50, %v15968_v56  ;;  %v9200_v44 = vmul.f32 %v15741_v7, %v16127_v18 }
 0x9c6   : > { %9426 = vadd.xlane.f32.xlu1 %v9425_v48  ;;  %v9245_v29 = vadd.f32 %v9213_v24, %v9144_v35  ;;  %v9029_v34 = vadd.f32 %v8997_v38, %v8928_v10  ;;  %v8710_v47 = vmul.f32 %v15709_v23, %v15985_v26  ;;  %v8996_v22 = vmul.f32 %v15726_v53, %v16060_v6  ;;  %v16158_v26 = vld [vmem:[#allocation3 + $0x92] sm:$0xff] }
 0x9c7   : > { %v8826_v3 = vadd.f32 %v8794_v42, %v8725_v16  ;;  %v8641_v57 = vadd.f32 %v8609_v27, %v8508_v2  ;;  %v8811_v0 = vmul.f32 %v15716_v58, %v16062_v14  ;;  %v9301_v56 = vmul.f32 %v15753_v9, %v16136_v39  ;;  %v16177_v35 = vld [vmem:[#allocation3 + $0x159] sm:$0xff] }
 0x9c8   : > { %v9346_v60 = vadd.f32 %v9314_v37, %v9245_v29  ;;  %v9131_v43 = vadd.f32 %v9099_v41, %v9029_v34  ;;  %v9098_v55 = vmul.f32 %v15734_v33, %v16138_v61  ;;  %v8912_v52 = vmul.f32 %v15721_v25, %v16079_v1  ;;  %v16186_v2 = vld [vmem:[#allocation3 + $0x15a] sm:$0xff]  ;;  %v16188_v29 = vld [vmem:[#allocation3 + $0x150] sm:$0xff] }
 0x9c9   : > { %v8927_v8 = vadd.f32 %v8895_v19, %v8826_v3  ;;  %v8742_v36 = vadd.f32 %v8710_v47, %v8641_v57  ;;  %v8507_v28 = vmul.f32 %v15698_v15, %v15992_v54  ;;  %v8608_v24 = vmul.f32 %v15703_v50, %v16003_v21 }
 0x9ca   : > { %v9422_v11 = vsel %vm283_vm3, %v9346_v60, 0.0  ;;  %v9232_v32 = vadd.f32 %v9200_v44, %v9131_v43  ;;  %v8709_v20 = vmul.f32 %v15709_v23, %v16005_v4  ;;  %v9199_v49 = vmul.f32 %v15741_v7, %v16156_v13 }
 0x9cb   : > { %9423 = vadd.xlane.f32.xlu0 %v9422_v11  ;;  %v9028_v38 = vadd.f32 %v8996_v22, %v8927_v8  ;;  %v8843_v37 = vadd.f32 %v8811_v0, %v8742_v36  ;;  %v9013_v54 = vmul.f32 %v15726_v53, %v16085_v59  ;;  %v9300_v42 = vmul.f32 %v15753_v9, %v16158_v26  ;;  %v16206_v36 = vld [vmem:[#allocation3 + $0x151] sm:$0xff] }
 0x9cc   : > { %v9333_v63 = vadd.f32 %v9301_v56, %v9232_v32  ;;  %v8640_v10 = vadd.f32 %v8608_v24, %v8507_v28  ;;  %v8810_v21 = vmul.f32 %v15716_v58, %v16087_v40  ;;  %v9115_v19 = vmul.f32 %v15734_v33, %v16165_v46 }
 0x9cd   : > { %v9130_v4 = vadd.f32 %v9098_v55, %v9028_v38  ;;  %v8944_v41 = vadd.f32 %v8912_v52, %v8843_v37  ;;  %v8911_v48 = vmul.f32 %v15721_v25, %v16106_v51  ;;  %v8494_v34 = vmul.f32 %v15698_v15, %v16015_v45  ;;  %v16215_v38 = vld [vmem:[#allocation3 + $0xb0] sm:$0xff] }
 0x9ce   : > { %v9383_v16 = vsel %vm283_vm3, %v9333_v63, 0.0  ;;  %v8741_v27 = vadd.f32 %v8709_v20, %v8640_v10  ;;  %v8595_v44 = vmul.f32 %v15703_v50, %v16027_v5  ;;  %v9216_v22 = vmul.f32 %v15741_v7, %v16177_v35 }
 0x9cf   : > { %9384 = vadd.xlane.f32.xlu1 %v9383_v16  ;;  %v9231_v47 = vadd.f32 %v9199_v49, %v9130_v4  ;;  %v9045_v3 = vadd.f32 %v9013_v54, %v8944_v41  ;;  %v8696_v57 = vmul.f32 %v15709_v23, %v16038_v12  ;;  %v9012_v60 = vmul.f32 %v15726_v53, %v16108_v31  ;;  %v16208_v12 = vld [vmem:[#allocation3 + $0x152] sm:$0xff] }
 0x9d0   : > { %v8842_v0 = vadd.f32 %v8810_v21, %v8741_v27  ;;  %v8627_v43 = vadd.f32 %v8595_v44, %v8494_v34  ;;  %v8797_v45 = vmul.f32 %v15716_v58, %v16115_v30  ;;  %v9317_v5 = vmul.f32 %v15753_v9, %v16186_v2  ;;  %v16227_v4 = vld [vmem:[#allocation3 + $0xb1] sm:$0xff] }
 0x9d1   : > { %v9332_v56 = vadd.f32 %v9300_v42, %v9231_v47  ;;  %v9147_v55 = vadd.f32 %v9115_v19, %v9045_v3  ;;  %v9114_v8 = vmul.f32 %v15734_v33, %v16188_v29  ;;  %v8898_v11 = vmul.f32 %v15721_v25, %v16127_v18  ;;  %v16236_v34 = vld [vmem:[#allocation3 + $0xb2] sm:$0xff]  ;;  %v16238_v47 = vld [vmem:[#allocation3 + $0xa8] sm:$0xff] }
 0x9d2   : > { %v8943_v52 = vadd.f32 %v8911_v48, %v8842_v0  ;;  %v8728_v28 = vadd.f32 %v8696_v57, %v8627_v43  ;;  %v8493_v32 = vmul.f32 %v15698_v15, %v16040_v17  ;;  %v8594_v49 = vmul.f32 %v15703_v50, %v16050_v62 }
 0x9d3   : > { %v9380_v24 = vsel %vm283_vm3, %v9332_v56, 0.0  ;;  %v9248_v20 = vadd.f32 %v9216_v22, %v9147_v55  ;;  %v8695_v37 = vmul.f32 %v15709_v23, %v16060_v6  ;;  %v9215_v63 = vmul.f32 %v15741_v7, %v16206_v36 }
 0x9d4   : > { %9381 = vadd.xlane.f32.xlu0 %v9380_v24  ;;  %v9044_v54 = vadd.f32 %v9012_v60, %v8943_v52  ;;  %v8829_v42 = vadd.f32 %v8797_v45, %v8728_v28  ;;  %v8999_v17 = vmul.f32 %v15726_v53, %v16136_v39  ;;  %v9316_v21 = vmul.f32 %v15753_v9, %v16208_v12  ;;  %v16256_v52 = vld [vmem:[#allocation3 + $0xa9] sm:$0xff] }
 0x9d5   : > { %v9349_v10 = vadd.f32 %v9317_v5, %v9248_v20  ;;  %v8626_v41 = vadd.f32 %v8594_v49, %v8493_v32  ;;  %v8796_v62 = vmul.f32 %v15716_v58, %v16138_v61  ;;  %v9101_v48 = vmul.f32 %v15734_v33, %v16215_v38  ;;  %v16265_v49 = vld [vmem:[#allocation3 + $0x170] sm:$0xff] }
 0x9d6   : > { %v9146_v6 = vadd.f32 %v9114_v8, %v9044_v54  ;;  %v8930_v19 = vadd.f32 %v8898_v11, %v8829_v42  ;;  %v8897_v16 = vmul.f32 %v15721_v25, %v16156_v13  ;;  %v8510_v3 = vmul.f32 %v15698_v15, %v16062_v14 }
 0x9d7   : > { %v9431_v27 = vsel %vm283_vm3, %v9349_v10, 0.0  ;;  %v8727_v44 = vadd.f32 %v8695_v37, %v8626_v41  ;;  %v8611_v22 = vmul.f32 %v15703_v50, %v16079_v1  ;;  %v9202_v60 = vmul.f32 %v15741_v7, %v16227_v4  ;;  %v16270_v37 = vld [vmem:[%s16690_s6 + $0x1] ss:$0 sm:$0xff] }
 0x9d8   : > { %9432 = vadd.xlane.f32.xlu1 %v9431_v27  ;;  %v9247_v57 = vadd.f32 %v9215_v63, %v9146_v6  ;;  %v9031_v0 = vadd.f32 %v8999_v17, %v8930_v19  ;;  %v8712_v43 = vmul.f32 %v15709_v23, %v16085_v59  ;;  %v8998_v56 = vmul.f32 %v15726_v53, %v16158_v26  ;;  %v16258_v59 = vld [vmem:[#allocation3 + $0xaa] sm:$0xff]  ;;  %v16301_v19 = vld [vmem:[#allocation3 + $0x172] sm:$0xff]  ;;  %v16308_v27 = vld [vmem:[%s16690_s6] ss:$0 sm:$0xff] }
 0x9d9   : > { %v8828_v45 = vadd.f32 %v8796_v62, %v8727_v44  ;;  %v8643_v55 = vadd.f32 %v8611_v22, %v8510_v3  ;;  %v8813_v14 = vmul.f32 %v15716_v58, %v16165_v46  ;;  %v9303_v50 = vmul.f32 %v15753_v9, %v16236_v34 }
 0x9da   : > { %v9348_v5 = vadd.f32 %v9316_v21, %v9247_v57  ;;  %v9133_v8 = vadd.f32 %v9101_v48, %v9031_v0  ;;  %v9100_v1 = vmul.f32 %v15734_v33, %v16238_v47  ;;  %v8914_v32 = vmul.f32 %v15721_v25, %v16177_v35  ;;  %v16282_v21 = vld [vmem:[#allocation3 + $0x171] sm:$0xff]  ;;  %v16317_v57 = vld [vmem:[%s16690_s6 + $0x7] ss:$0 sm:$0xff] }
 0x9db   : > { %v8929_v28 = vadd.f32 %v8897_v16, %v8828_v45  ;;  %v8744_v11 = vadd.f32 %v8712_v43, %v8643_v55  ;;  %v8509_v58 = vmul.f32 %v15698_v15, %v16087_v40  ;;  %v8610_v54 = vmul.f32 %v16270_v37, %v16106_v51  ;;  %v16303_v16 = vld [vmem:[#allocation3 + $0x168] sm:$0xff] }
 0x9dc   : > { %v9428_v24 = vsel %vm283_vm3, %v9348_v5, 0.0  ;;  %v9234_v20 = vadd.f32 %v9202_v60, %v9133_v8  ;;  %v8711_v63 = vmul.f32 %v15709_v23, %v16108_v31  ;;  %v9201_v15 = vmul.f32 %v15741_v7, %v16256_v52  ;;  %v16287_v23 = vld [vmem:[%s16690_s6 + $0x3] ss:$0 sm:$0xff]  ;;  %v16324_v60 = vld [vmem:[%s16690_s6 + $0x2] ss:$0 sm:$0xff] }
 0x9dd   : > { %9429 = vadd.xlane.f32.xlu0 %v9428_v24  ;;  %v9030_v25 = vadd.f32 %v8998_v56, %v8929_v28  ;;  %v8845_v40 = vadd.f32 %v8813_v14, %v8744_v11  ;;  %v9015_v42 = vmul.f32 %v15726_v53, %v16186_v2  ;;  %v9302_v10 = vmul.f32 %v15753_v9, %v16258_v59  ;;  %v16296_v9 = vld [vmem:[%s16690_s6 + $0x4] ss:$0 sm:$0xff]  ;;  %v16331_v43 = vld [vmem:[%s16690_s6 + $0x5] ss:$0 sm:$0xff]  ;;  %v16340_v8 = vld [vmem:[%s16690_s6 + $0x8] ss:$0 sm:$0xff] }
 0x9de   : > { %v9335_v17 = vadd.f32 %v9303_v50, %v9234_v20  ;;  %v8642_v41 = vadd.f32 %v8610_v54, %v8509_v58  ;;  %v8812_v51 = vmul.f32 %v16287_v23, %v16188_v29  ;;  %v9117_v53 = vmul.f32 %v15734_v33, %v16265_v49  ;;  %v16347_v50 = vld [vmem:[%s16690_s6 + $0x6] ss:$0 sm:$0xff] }
 0x9df   : > { %v9132_v7 = vadd.f32 %v9100_v1, %v9030_v25  ;;  %v8946_v31 = vadd.f32 %v8914_v32, %v8845_v40  ;;  %v8913_v62 = vmul.f32 %v16296_v9, %v16206_v36  ;;  %v8496_v33 = vmul.f32 %v16308_v27, %v16115_v30  ;;  %v16351_v28 = vld [vmem:[#allocation3 + $0x169] sm:$0xff] }
 0x9e0   : > { %v9389_v6 = vsel %vm283_vm3, %v9335_v17, 0.0  ;;  %v8743_v48 = vadd.f32 %v8711_v63, %v8642_v41  ;;  %v8597_v44 = vmul.f32 %v16270_v37, %v16127_v18  ;;  %v9218_v0 = vmul.f32 %v16317_v57, %v16282_v21  ;;  %v16353_v32 = vld [vmem:[#allocation3 + $0x16a] sm:$0xff] }
 0x9e1   : > { %9390 = vadd.xlane.f32.xlu1 %v9389_v6  ;;  %v9233_v3 = vadd.f32 %v9201_v15, %v9132_v7  ;;  %v9047_v22 = vadd.f32 %v9015_v42, %v8946_v31  ;;  %v8698_v30 = vmul.f32 %v16324_v60, %v16136_v39  ;;  %v9014_v45 = vmul.f32 %v16331_v43, %v16208_v12  ;;  %v16360_v25 = vld [vmem:[#allocation3 + $0xc8] sm:$0xff] }
 0x9e2   : > { %v8844_v18 = vadd.f32 %v8812_v51, %v8743_v48  ;;  %v8629_v56 = vadd.f32 %v8597_v44, %v8496_v33  ;;  %v8799_v55 = vmul.f32 %v16287_v23, %v16215_v38  ;;  %v9319_v39 = vmul.f32 %v16340_v8, %v16301_v19  ;;  %v16372_v7 = vld [vmem:[#allocation3 + $0xc9] sm:$0xff] }
 0x9e3   : > { %v9334_v14 = vadd.f32 %v9302_v10, %v9233_v3  ;;  %v9149_v5 = vadd.f32 %v9117_v53, %v9047_v22  ;;  %v9116_v1 = vmul.f32 %v16347_v50, %v16303_v16  ;;  %v8900_v24 = vmul.f32 %v16296_v9, %v16227_v4  ;;  %v16381_v33 = vld [vmem:[#allocation3 + $0xca] sm:$0xff]  ;;  %v16383_v3 = vld [vmem:[#allocation3 + $0xc0] sm:$0xff] }
 0x9e4   : > { %v8945_v11 = vadd.f32 %v8913_v62, %v8844_v18  ;;  %v8730_v58 = vadd.f32 %v8698_v30, %v8629_v56  ;;  %v8495_v20 = vmul.f32 %v16308_v27, %v16138_v61  ;;  %v8596_v15 = vmul.f32 %v16270_v37, %v16156_v13 }
 0x9e5   : > { %v9386_v54 = vsel %vm283_vm3, %v9334_v14, 0.0  ;;  %v9250_v63 = vadd.f32 %v9218_v0, %v9149_v5  ;;  %v8697_v40 = vmul.f32 %v16324_v60, %v16158_v26  ;;  %v9217_v17 = vmul.f32 %v16317_v57, %v16351_v28 }
 0x9e6   : > { %9387 = vadd.xlane.f32.xlu0 %v9386_v54  ;;  %v9046_v42 = vadd.f32 %v9014_v45, %v8945_v11  ;;  %v8831_v10 = vadd.f32 %v8799_v55, %v8730_v58  ;;  %v9001_v61 = vmul.f32 %v16331_v43, %v16236_v34  ;;  %v9318_v51 = vmul.f32 %v16340_v8, %v16353_v32  ;;  %v16401_v58 = vld [vmem:[#allocation3 + $0xc1] sm:$0xff] }
 0x9e7   : > { %v9351_v41 = vadd.f32 %v9319_v39, %v9250_v63  ;;  %v8628_v31 = vadd.f32 %v8596_v15, %v8495_v20  ;;  %v8798_v13 = vmul.f32 %v16287_v23, %v16238_v47  ;;  %v9103_v62 = vmul.f32 %v16347_v50, %v16360_v25 }
 0x9e8   : > { %v9148_v26 = vadd.f32 %v9116_v1, %v9046_v42  ;;  %v8932_v53 = vadd.f32 %v8900_v24, %v8831_v10  ;;  %v8899_v6 = vmul.f32 %v16296_v9, %v16256_v52  ;;  %v8512_v22 = vmul.f32 %v16308_v27, %v16165_v46  ;;  %v16410_v42 = vld [vmem:[#allocation3 + $0x188] sm:$0xff] }
 0x9e9   : > { %v9437_v48 = vsel %vm283_vm3, %v9351_v41, 0.0  ;;  %v8729_v44 = vadd.f32 %v8697_v40, %v8628_v31  ;;  %v8613_v0 = vmul.f32 %v16270_v37, %v16177_v35  ;;  %v9204_v45 = vmul.f32 %v16317_v57, %v16372_v7 }
 0x9ea   : > { %9438 = vadd.xlane.f32.xlu1 %v9437_v48  ;;  %v9249_v30 = vadd.f32 %v9217_v17, %v9148_v26  ;;  %v9033_v18 = vadd.f32 %v9001_v61, %v8932_v53  ;;  %v8714_v56 = vmul.f32 %v16324_v60, %v16186_v2  ;;  %v9000_v14 = vmul.f32 %v16331_v43, %v16258_v59  ;;  %v16403_v2 = vld [vmem:[#allocation3 + $0xc2] sm:$0xff] }
 0x9eb   : > { %v8830_v55 = vadd.f32 %v8798_v13, %v8729_v44  ;;  %v8645_v5 = vadd.f32 %v8613_v0, %v8512_v22  ;;  %v8815_v46 = vmul.f32 %v16287_v23, %v16265_v49  ;;  %v9305_v35 = vmul.f32 %v16340_v8, %v16381_v33  ;;  %v16422_v26 = vld [vmem:[#allocation3 + $0x189] sm:$0xff] }
 0x9ec   : > { %v9350_v39 = vadd.f32 %v9318_v51, %v9249_v30  ;;  %v9135_v1 = vadd.f32 %v9103_v62, %v9033_v18  ;;  %v9102_v11 = vmul.f32 %v16347_v50, %v16383_v3  ;;  %v8916_v54 = vmul.f32 %v16296_v9, %v16282_v21  ;;  %v16431_v22 = vld [vmem:[#allocation3 + $0x18a] sm:$0xff]  ;;  %v16433_v30 = vld [vmem:[#allocation3 + $0x180] sm:$0xff] }
 0x9ed   : > { %v8931_v24 = vadd.f32 %v8899_v6, %v8830_v55  ;;  %v8746_v20 = vadd.f32 %v8714_v56, %v8645_v5  ;;  %v8511_v63 = vmul.f32 %v16308_v27, %v16188_v29  ;;  %v8612_v17 = vmul.f32 %v16270_v37, %v16206_v36 }
 0x9ee   : > { %v9434_v15 = vsel %vm283_vm3, %v9350_v39, 0.0  ;;  %v9236_v40 = vadd.f32 %v9204_v45, %v9135_v1  ;;  %v8713_v10 = vmul.f32 %v16324_v60, %v16208_v12  ;;  %v9203_v41 = vmul.f32 %v16317_v57, %v16401_v58 }
 0x9ef   : > { %9435 = vadd.xlane.f32.xlu0 %v9434_v15  ;;  %v9032_v61 = vadd.f32 %v9000_v14, %v8931_v24  ;;  %v8847_v51 = vadd.f32 %v8815_v46, %v8746_v20  ;;  %v9017_v29 = vmul.f32 %v16331_v43, %v16301_v19  ;;  %v9304_v13 = vmul.f32 %v16340_v8, %v16403_v2  ;;  %v16451_v20 = vld [vmem:[#allocation3 + $0x181] sm:$0xff] }
 0x9f0   : > { %v9337_v31 = vadd.f32 %v9305_v35, %v9236_v40  ;;  %v8644_v53 = vadd.f32 %v8612_v17, %v8511_v63  ;;  %v8814_v36 = vmul.f32 %v16287_v23, %v16303_v16  ;;  %v9119_v6 = vmul.f32 %v16347_v50, %v16410_v42 }
 0x9f1   : > { %v9134_v12 = vadd.f32 %v9102_v11, %v9032_v61  ;;  %v8948_v62 = vadd.f32 %v8916_v54, %v8847_v51  ;;  %v8915_v48 = vmul.f32 %v16296_v9, %v16351_v28  ;;  %v8498_v18 = vmul.f32 %v16308_v27, %v16215_v38 }
 0x9f2   : > { %v9395_v44 = vsel %vm283_vm3, %v9337_v31, 0.0  ;;  %v8745_v0 = vadd.f32 %v8713_v10, %v8644_v53  ;;  %v8599_v45 = vmul.f32 %v16270_v37, %v16227_v4  ;;  %v9220_v14 = vmul.f32 %v16317_v57, %v16422_v26  ;;  %v9069_v10 = vld [vmem:[#allocation3 + $0xe0] sm:$0xff] }
 0x9f3   : > { %9396 = vadd.xlane.f32.xlu1 %v9395_v44  ;;  %v9235_v56 = vadd.f32 %v9203_v41, %v9134_v12  ;;  %v9049_v55 = vadd.f32 %v9017_v29, %v8948_v62  ;;  %v8700_v5 = vmul.f32 %v16324_v60, %v16236_v34  ;;  %v9016_v39 = vmul.f32 %v16331_v43, %v16353_v32  ;;  %v16453_v34 = vld [vmem:[#allocation3 + $0x182] sm:$0xff] }
 0x9f4   : > { %v8846_v46 = vadd.f32 %v8814_v36, %v8745_v0  ;;  %v8631_v1 = vadd.f32 %v8599_v45, %v8498_v18  ;;  %v8801_v38 = vmul.f32 %v16287_v23, %v16360_v25  ;;  %v9321_v4 = vmul.f32 %v16340_v8, %v16431_v22  ;;  %v9170_v53 = vld [vmem:[#allocation3 + $0xe1] sm:$0xff]  ;;  %v9068_v0 = vld [vmem:[#allocation3 + $0xd8] sm:$0xff] }
 0x9f5   : > { %v9336_v35 = vadd.f32 %v9304_v13, %v9235_v56  ;;  %v9151_v11 = vadd.f32 %v9119_v6, %v9049_v55  ;;  %v9118_v24 = vmul.f32 %v16347_v50, %v16433_v30  ;;  %v8902_v15 = vmul.f32 %v16296_v9, %v16372_v7  ;;  %v9271_v44 = vld [vmem:[#allocation3 + $0xe2] sm:$0xff] }
 0x9f6   : > { %v8947_v54 = vadd.f32 %v8915_v48, %v8846_v46  ;;  %v8732_v63 = vadd.f32 %v8700_v5, %v8631_v1  ;;  %v8497_v25 = vmul.f32 %v16308_v27, %v16238_v47  ;;  %v8598_v61 = vmul.f32 %v16270_v37, %v16256_v52 }
 0x9f7   : > { %v9392_v40 = vsel %vm283_vm3, %v9336_v35, 0.0  ;;  %v9252_v17 = vadd.f32 %v9220_v14, %v9151_v11  ;;  %v8699_v41 = vmul.f32 %v16324_v60, %v16258_v59  ;;  %v9219_v29 = vmul.f32 %v16317_v57, %v16451_v20  ;;  %v9169_v35 = vld [vmem:[#allocation3 + $0xd9] sm:$0xff] }
 0x9f8   : > { %9393 = vadd.xlane.f32.xlu0 %v9392_v40  ;;  %v9048_v51 = vadd.f32 %v9016_v39, %v8947_v54  ;;  %v8833_v31 = vadd.f32 %v8801_v38, %v8732_v63  ;;  %v9003_v7 = vmul.f32 %v16331_v43, %v16381_v33  ;;  %v9320_v13 = vmul.f32 %v16340_v8, %v16453_v34  ;;  %v9270_v63 = vld [vmem:[#allocation3 + $0xda] sm:$0xff] }
 0x9f9   : > { %v9353_v47 = vadd.f32 %v9321_v4, %v9252_v17  ;;  %v8630_v36 = vadd.f32 %v8598_v61, %v8497_v25  ;;  %v8800_v52 = vmul.f32 %v16287_v23, %v16383_v3  ;;  %v9105_v62 = vmul.f32 %v16347_v50, %v9069_v10 }
 0x9fa   : > { %v9150_v12 = vadd.f32 %v9118_v24, %v9048_v51  ;;  %v8934_v59 = vadd.f32 %v8902_v15, %v8833_v31  ;;  %v8901_v6 = vmul.f32 %v16296_v9, %v16401_v58  ;;  %v8514_v18 = vmul.f32 %v16308_v27, %v16265_v49 }
 0x9fb   : > { %v9443_v48 = vsel %vm283_vm3, %v9353_v47, 0.0  ;;  %v8731_v33 = vadd.f32 %v8699_v41, %v8630_v36  ;;  %v8615_v45 = vmul.f32 %v16270_v37, %v16282_v21  ;;  %v9206_v55 = vmul.f32 %v16317_v57, %v9170_v53  ;;  %v9084_v53 = vld [vmem:[#allocation3 + $0x198] sm:$0xff] }
 0x9fc   : > { %9444 = vadd.xlane.f32.xlu1 %v9443_v48  ;;  %v9251_v3 = vadd.f32 %v9219_v29, %v9150_v12  ;;  %v9035_v56 = vadd.f32 %v9003_v7, %v8934_v59  ;;  %v8716_v14 = vmul.f32 %v16324_v60, %v16301_v19  ;;  %v9002_v5 = vmul.f32 %v16331_v43, %v16403_v2  ;;  %v9287_v29 = vld [vmem:[#allocation3 + $0x1a2] sm:$0xff]  ;;  %v9185_v59 = vld [vmem:[#allocation3 + $0x199] sm:$0xff] }
 0x9fd   : > { %v8832_v58 = vadd.f32 %v8800_v52, %v8731_v33  ;;  %v8647_v46 = vadd.f32 %v8615_v45, %v8514_v18  ;;  %v8817_v39 = vmul.f32 %v16287_v23, %v16410_v42  ;;  %v9307_v21 = vmul.f32 %v16340_v8, %v9271_v44  ;;  %v9085_v42 = vld [vmem:[#allocation3 + $0x1a0] sm:$0xff] }
 0x9fe   : > { %v9352_v49 = vadd.f32 %v9320_v13, %v9251_v3  ;;  %v9137_v1 = vadd.f32 %v9105_v62, %v9035_v56  ;;  %v9104_v38 = vmul.f32 %v16347_v50, %v9068_v0  ;;  %v8918_v19 = vmul.f32 %v16296_v9, %v16422_v26  ;;  %v9286_v48 = vld [vmem:[#allocation3 + $0x19a] sm:$0xff] }
 0x9ff   : > { %v8933_v11 = vadd.f32 %v8901_v6, %v8832_v58  ;;  %v8748_v4 = vadd.f32 %v8716_v14, %v8647_v46  ;;  %v8513_v24 = vmul.f32 %v16308_v27, %v16303_v16  ;;  %v8614_v15 = vmul.f32 %v16270_v37, %v16351_v28  ;;  %v9186_v27 = vld [vmem:[#allocation3 + $0x1a1] sm:$0xff] }
 0xa00   : > { %v9440_v2 = vsel %vm283_vm3, %v9352_v49, 0.0  ;;  %v9238_v54 = vadd.f32 %v9206_v55, %v9137_v1  ;;  %v8715_v25 = vmul.f32 %v16324_v60, %v16353_v32  ;;  %v9205_v17 = vmul.f32 %v16317_v57, %v9169_v35 }
 0xa01   : > { %9441 = vadd.xlane.f32.xlu0 %v9440_v2  ;;  %v9034_v40 = vadd.f32 %v9002_v5, %v8933_v11  ;;  %v8849_v10 = vadd.f32 %v8817_v39, %v8748_v4  ;;  %v9019_v26 = vmul.f32 %v16331_v43, %v16431_v22  ;;  %v8646_v61 = vadd.f32 %v8614_v15, %v8513_v24 }
 0xa02   : > { %v9339_v16 = vadd.f32 %v9307_v21, %v9238_v54  ;;  %v8816_v41 = vmul.f32 %v16287_v23, %v16433_v30  ;;  %v9306_v37 = vmul.f32 %v16340_v8, %v9270_v63  ;;  %v9121_v60 = vmul.f32 %v16347_v50, %v9085_v42 }
 0xa03   : > { %v9136_v51 = vadd.f32 %v9104_v38, %v9034_v40  ;;  %v8950_v28 = vadd.f32 %v8918_v19, %v8849_v10  ;;  %v8747_v31 = vadd.f32 %v8715_v25, %v8646_v61  ;;  %v8917_v7 = vmul.f32 %v16296_v9, %v16451_v20 }
 0xa04   : > { %v9401_v32 = vsel %vm283_vm3, %v9339_v16, 0.0  ;;  %v9222_v13 = vmul.f32 %v16317_v57, %v9186_v27  ;;  %v9018_v30 = vmul.f32 %v16331_v43, %v16453_v34  ;;  %v9323_v12 = vmul.f32 %v16340_v8, %v9287_v29  ;;  %v17116_v16 = vld [vmem:[#allocation8_spill] sm:$0xff] }
 0xa05   : > { %9402 = vadd.xlane.f32.xlu1 %v9401_v32  ;;  %v9237_v22 = vadd.f32 %v9205_v17, %v9136_v51  ;;  %v9051_v47 = vadd.f32 %v9019_v26, %v8950_v28  ;;  %v8848_v23 = vadd.f32 %v8816_v41, %v8747_v31  ;;  %v9120_v6 = vmul.f32 %v16347_v50, %v9084_v53 }
 0xa06   : > { %v9221_v33 = vmul.f32 %v16317_v57, %v9185_v59  ;;  %v9322_v43 = vmul.f32 %v16340_v8, %v9286_v48  ;;  %v17115_v25 = vlaneseq }
 0xa07   : > { %v9338_v36 = vadd.f32 %v9306_v37, %v9237_v22  ;;  %v9153_v52 = vadd.f32 %v9121_v60, %v9051_v47  ;;  %v8949_v62 = vadd.f32 %v8917_v7, %v8848_v23 }
 0xa08   : > { %v9487_v40 = vand.u32 127, %v17115_v25 }
 0xa09   : > { %v9398_v9 = vsel %vm283_vm3, %v9338_v36, 0.0  ;;  %v9254_v20 = vadd.f32 %v9222_v13, %v9153_v52  ;;  %v9050_v44 = vadd.f32 %v9018_v30, %v8949_v62 }
 0xa0a   : > { %9399 = vadd.xlane.f32.xlu0 %v9398_v9  ;;  %v9492_v10 = vadd.s32 4294967288, %v9487_v40  ;;  %v16547_v41 = vsub.s32 %v9487_v40, %v17116_v16 }
 0xa0b   : > { %v9355_v0 = vadd.f32 %v9323_v12, %v9254_v20  ;;  %v9152_v18 = vadd.f32 %v9120_v6, %v9050_v44 }
 0xa0c   : > { %v16544_v27 = vsub.s32 %v9492_v10, %v17116_v16 }
 0xa0d   : > { %v9449_v34 = vsel %vm283_vm3, %v9355_v0, 0.0  ;;  %v9253_v45 = vadd.f32 %v9221_v33, %v9152_v18 }
 0xa0e   : > { %9450 = vadd.xlane.f32.xlu1 %v9449_v34 }
 0xa0f   : > { %v9354_v3 = vadd.f32 %v9322_v43, %v9253_v45 }
 0xa11   : > { %v9446_v56 = vsel %vm283_vm3, %v9354_v3, 0.0 }
 0xa12   : > { %9447 = vadd.xlane.f32.xlu0 %v9446_v56 }
 0xa1d   : > { %v9364_v50 = vpop.xlane.xlu1 %9363 }
 0xa1e   : > { %v9358_v55 = vpop.xlane.xlu0 %9357  ;;  %v9502_v29 = vrot.slane %v9364_v50, %v16547_v41 }
 0xa1f   : > { %v9491_v31 = vrot.slane %v9358_v55, %v16547_v41 }
 0xa21   : > { %v9367_v14 = vpop.xlane.xlu1 %9366 }
 0xa22   : > { %v9361_v58 = vpop.xlane.xlu0 %9360  ;;  %v9506_v37 = vrot.slane %v9367_v14, %v16544_v27 }
 0xa23   : > { %v9496_v28 = vrot.slane %v9361_v58, %v16544_v27 }
 0xa24   : > { %v9507_v23 = vsel %vm9497_vm5, %v9506_v37, %v9502_v29  ;;  %v9453_v29 = vld [vmem:[%s12305_s17 + $0x8] sm:$0xff] }
 0xa25   : > { %v9498_v30 = vsel %vm9497_vm5, %v9496_v28, %v9491_v31 }
 0xa26   : > { %v9635_v20 = vsel %vm9634_vm6, %v9507_v23, %v9498_v30 }
 0xa27   : > { %v16518_v5 = vpop.xlane.xlu1 %9408 }
 0xa28   : > { %v9569_v44 = vrot.slane %v16518_v5, %v16544_v27 }
 0xa2c   : > { %v16520_v46 = vpop.xlane.xlu0 %9405 }
 0xa2d   : > { %v9565_v5 = vrot.slane %v16520_v46, %v16547_v41 }
 0xa2f   : > { %v9570_v25 = vsel %vm9497_vm5, %v9569_v44, %v9565_v5 }
 0xa31   : > { %v16522_v57 = vpop.xlane.xlu1 %9414 }
 0xa32   : > { %v9578_v43 = vrot.slane %v16522_v57, %v16544_v27 }
 0xa35   : > { %v16524_v39 = vpop.xlane.xlu0 %9411 }
 0xa36   : > { %v9574_v34 = vrot.slane %v16524_v39, %v16547_v41 }
 0xa39   : > { %v9373_v8 = vpop.xlane.xlu1 %9372 }
 0xa3a   : > { %v9515_v60 = vrot.slane %v9373_v8, %v16544_v27 }
 0xa3b   : > { %v9370_v49 = vpop.xlane.xlu0 %9369 }
 0xa3c   : > { %v9511_v32 = vrot.slane %v9370_v49, %v16547_v41  ;;  %v9452_v49 = vld [vmem:[%s12305_s17] sm:$0xff]  ;;  %s12132_s17 = scalar_lea.vmem %s16637_s13, 256 }
 0xa3d   : > { %p12133_p12 = scmp.ne.s32.totalorder %s16637_s13, %s12132_s17  ;;  %p12140_p2 = scmp.lt.s32.totalorder %s12138_s23, %s12132_s17 }
 0xa3e   : > { %v9516_v12 = vsel %vm9497_vm5, %v9515_v60, %v9511_v32 }
 0xa3f   : > { %v9637_v33 = vsel %vm9636_vm7, %v9516_v12, %v9635_v20  ;;  %p12134_p13 = pnand %p12133_p12, %p12287_p5  ;;  %p12141_p3 = por %p12140_p2, %p12139_p1 }
 0xa41   : > { %p12135_p0 = pneg %p12134_p13 }
 0xa42   : > { %v16526_v1 = vpop.xlane.xlu1 %9420 }
 0xa43   : > { %v9587_v50 = vrot.slane %v16526_v1, %v16544_v27  ;;  %p12142_p4 = pnand %p12141_p3, %p12135_p0 }
 0xa46   : > { %v16528_v21 = vpop.xlane.xlu0 %9417 }
 0xa47   : > { %v9583_v55 = vrot.slane %v16528_v21, %v16547_v41 }
 0xa4a   : > { %v9379_v38 = vpop.xlane.xlu1 %9378 }
 0xa4b   : > { %v9524_v7 = vrot.slane %v9379_v38, %v16544_v27 }
 0xa4f   : > { %v9376_v35 = vpop.xlane.xlu0 %9375 }
 0xa50   : > { %v9520_v22 = vrot.slane %v9376_v35, %v16547_v41  ;;  %v9579_v35 = vsel %vm9497_vm5, %v9578_v43, %v9574_v34 }
 0xa51   : > { %v9648_v40 = vsel %vm9634_vm6, %v9579_v35, %v9570_v25 }
 0xa52   : > { %v9525_v9 = vsel %vm9497_vm5, %v9524_v7, %v9520_v22 }
 0xa53   : > { %v16530_v11 = vpop.xlane.xlu1 %9426  ;;  %v9639_v45 = vsel %vm9638_vm8, %v9525_v9, %v9637_v33 }
 0xa54   : > { %v9596_v57 = vrot.slane %v16530_v11, %v16544_v27 }
 0xa58   : > { %v16532_v4 = vpop.xlane.xlu0 %9423 }
 0xa59   : > { %v9592_v39 = vrot.slane %v16532_v4, %v16547_v41 }
 0xa5c   : > { %v9385_v19 = vpop.xlane.xlu1 %9384 }
 0xa5d   : > { %v9533_v47 = vrot.slane %v9385_v19, %v16544_v27 }
 0xa61   : > { %v9382_v24 = vpop.xlane.xlu0 %9381 }
 0xa62   : > { %v9529_v13 = vrot.slane %v9382_v24, %v16547_v41  ;;  %v9588_v24 = vsel %vm9497_vm5, %v9587_v50, %v9583_v55 }
 0xa63   : > { %v9649_v10 = vsel %vm9636_vm7, %v9588_v24, %v9648_v40 }
 0xa64   : > { %v9534_v48 = vsel %vm9497_vm5, %v9533_v47, %v9529_v13 }
 0xa65   : > { %v16534_v2 = vpop.xlane.xlu1 %9432  ;;  %v9641_v14 = vsel %vm9640_vm9, %v9534_v48, %v9639_v45 }
 0xa66   : > { %v9605_v1 = vrot.slane %v16534_v2, %v16544_v27 }
 0xa6a   : > { %v16536_v54 = vpop.xlane.xlu0 %9429 }
 0xa6b   : > { %v9601_v21 = vrot.slane %v16536_v54, %v16547_v41 }
 0xa6e   : > { %v9391_v63 = vpop.xlane.xlu1 %9390 }
 0xa6f   : > { %v9542_v36 = vrot.slane %v9391_v63, %v16544_v27 }
 0xa73   : > { %v9388_v42 = vpop.xlane.xlu0 %9387 }
 0xa74   : > { %v9538_v52 = vrot.slane %v9388_v42, %v16547_v41 }
 0xa76   : > { %v9543_v0 = vsel %vm9497_vm5, %v9542_v36, %v9538_v52 }
 0xa77   : > { %v16538_v15 = vpop.xlane.xlu1 %9438  ;;  %v9643_v8 = vsel %vm9642_vm10, %v9543_v0, %v9641_v14 }
 0xa78   : > { %v9614_v11 = vrot.slane %v16538_v15, %v16544_v27  ;;  %v9597_v15 = vsel %vm9497_vm5, %v9596_v57, %v9592_v39 }
 0xa7c   : > { %v16541_v17 = vpop.xlane.xlu0 %9435 }
 0xa7d   : > { %v9610_v4 = vrot.slane %v16541_v17, %v16547_v41  ;;  %v9606_v17 = vsel %vm9497_vm5, %v9605_v1, %v9601_v21 }
 0xa80   : > { %v9397_v26 = vpop.xlane.xlu1 %9396 }
 0xa81   : > { %v9551_v59 = vrot.slane %v9397_v26, %v16544_v27  ;;  %v9615_v26 = vsel %vm9497_vm5, %v9614_v11, %v9610_v4 }
 0xa85   : > { %v9394_v61 = vpop.xlane.xlu0 %9393 }
 0xa86   : > { %v9547_v62 = vrot.slane %v9394_v61, %v16547_v41  ;;  %v9650_v61 = vsel %vm9638_vm8, %v9597_v15, %v9649_v10 }
 0xa87   : > { %v9651_v28 = vsel %vm9640_vm9, %v9606_v17, %v9650_v61 }
 0xa88   : > { %v9552_v3 = vsel %vm9497_vm5, %v9551_v59, %v9547_v62  ;;  %v9652_v32 = vsel %vm9642_vm10, %v9615_v26, %v9651_v28 }
 0xa89   : > { %v16549_v51 = vpop.xlane.xlu1 %9444  ;;  %v9645_v38 = vsel %vm9644_vm11, %v9552_v3, %v9643_v8 }
 0xa8a   : > { %v9623_v2 = vrot.slane %v16549_v51, %v16544_v27 }
 0xa8e   : > { %v9442_v53 = vpop.xlane.xlu0 %9441 }
 0xa8f   : > { %v9619_v54 = vrot.slane %v9442_v53, %v16547_v41 }
 0xa91   : > { %v9624_v51 = vsel %vm9497_vm5, %v9623_v2, %v9619_v54 }
 0xa92   : > { %v9403_v6 = vpop.xlane.xlu1 %9402  ;;  %v9653_v31 = vsel %vm9644_vm11, %v9624_v51, %v9652_v32 }
 0xa93   : > { %v9560_v18 = vrot.slane %v9403_v6, %v16544_v27 }
 0xa97   : > { %v9400_v56 = vpop.xlane.xlu0 %9399 }
 0xa98   : > { %v9556_v58 = vrot.slane %v9400_v56, %v16547_v41 }
 0xa9a   : > { %v9561_v46 = vsel %vm9497_vm5, %v9560_v18, %v9556_v58 }
 0xa9b   : > { %v9647_v19 = vsel %vm9646_vm12, %v9561_v46, %v9645_v38  ;;  %v9451_v42 = vpop.xlane.xlu1 %9450 }
 0xa9c   : > { %v9657_v63 = vsub.f32 %v9452_v49, %v9647_v19  ;;  %v9632_v16 = vrot.slane %v9451_v42, %v16544_v27 }
 0xa9e   : > { %9660 = vst.msk [vmem:[%s14656_s19] sm:$0xff] %vm9659_vm13, %v9657_v63 }
 0xa9f   : > { %v9448_v37 = vpop.xlane.xlu0 %9447 }
 0xaa0   : > { %v9628_v60 = vrot.slane %v9448_v37, %v16547_v41 }
 0xaa2   : > { %v9633_v27 = vsel %vm9497_vm5, %v9632_v16, %v9628_v60 }
 0xaa3   : > { %v9654_v7 = vsel %vm9646_vm12, %v9633_v27, %v9653_v31 }
 0xaa4   : > { %v9658_v41 = vsub.f32 %v9453_v29, %v9654_v7 }
 0xaa6   : > { %9661 = vst.msk [vmem:[%s14656_s19 + $0x8] sm:$0xff] %vm9659_vm13, %v9658_v41 }
 0xaa7   : > { %12145 = shalt.err (!%p12142_p4)
}
 0xaa8   : > { %s12146_s20 = scalar_lea.hbm %s16635_s15, 256  ;;  %s12150_s8 = scalar_lea.hbm %s16691_s7, 512 }
 0xaa9   : > { %p12147_p7 = scmp.ne.s32.totalorder %s16635_s15, %s12146_s20  ;;  %p12151_p10 = scmp.lt.u32.totalorder %s16635_s15, %s16691_s7 }
 0xaaa   : > { %p12152_p11 = scmp.lt.u32.totalorder %s12150_s8, %s12146_s20  ;;  %p12154_p13 = scmp.lt.u32.totalorder %s12146_s20, %s16635_s15 }
 0xaab   : > { %p12148_p8 = pnand %p12147_p7, %p12287_p5 }
 0xaac   : > { %p12153_p12 = por %p12152_p11, %p12151_p10 }
 0xaad   : > { %p12149_p9 = pneg %p12148_p8 }
 0xaae   : > { %p12155_p0 = por %p12154_p13, %p12153_p12 }
 0xab0   : > { %p12156_p1 = pnand %p12155_p0, %p12149_p9 }
 0xab2   : > { %12159 = shalt.err (!%p12156_p1)
}
 0xab3   : > { %s12207_s14 = smov 128   ;;  %s12208_s22 = smov 8  }
 0xab4   : > { %11998 = dma.vmem_to_hbm [thread:$0]  (%p12287_p5), %s16637_s13, 256, %s16635_s15, %s16643_s28, %s12207_s14, %s12207_s14, %s12208_s22  }
 0xab5 PF: > { %p12004_p2 = scmp.ge.s32.totalorder %s12198_s27, 2  ;;  %s9691_s17 = sand.u32 1, %s12186_s24  }
 0xab6   : > { %s9692_s16 = scalar_lea.sflag [#allocation6], %s9691_s17 }
 0xab7   : > { %p12001_p3 = pnand %p12004_p2, %p12291_p6 }
 0xab9   : > { %12181 = dma.done.wait (!%p12001_p3), %s9692_s16, 256  }
 0xaba   : > { %12183 = vsyncadd (!%p12001_p3), %s9692_s16, 4294967040  ;;  %p17_p4 = scmp.ge.s32.totalorder %s12274_s30, 4   ;;  %s17117_s24 = smov %s12190_s25 }
 0xabb   : > { %s17118_s25 = smov %s12194_s26  ;;  %s17119_s26 = smov %s12285_s10 }
 0xabc   : > { %s17120_s27 = smov %s12274_s30  ;;  %19 = sbr.rel (!%p17_p4) target bundleno = 3 (0x3), region = 128 }
 0xac3   :  { %9697 = vsyncpa [#allocation6], 1 }
 0xac4   :  { %9699 = vsyncpa [#allocation6 + $0x1], 1 }

</bundles_post_ra>
